<compile_context>
chip_gen: v7x
topology: tpu7x:2x2x1
jax: 0.10.0
libtpu: 0.0.40
codegen_flags: <defaults>
</compile_context>

<pallas_src>
import functools

import jax
import jax.numpy as jnp
from jax.experimental import pallas as pl

EPS_GN = 1e-5          # torch.nn.GroupNorm default eps
EPS_NORMALIZE = 1e-12  # torch.nn.functional.normalize default eps
_PREC = jax.lax.Precision.HIGHEST

# ---------------- configuration ----------------
B = 2
N_POINTS = 16
CF = 5                       # extra point features (input_f channels)
NF_CONV_STN = [16, 32]
NF_FC_STN = [32, 16]
NF_CONV = [32, 64]
NF_FC = [32, 16]
NF_CONV_DESC = [32, 16]
K_STN = 3


# ---------------- fused Pallas kernel ----------------

def pointnet_fused_kernel(*refs, batch):
    """Whole PointNet forward for `batch` samples in one kernel invocation.

    refs = (p, f, <flattened params...>, out).  Everything is resident in VMEM;
    only `out` (B, N, C_desc) is written back to HBM by Pallas.
    """
    out_ref = refs[-1]
    it = iter(refs[:-1])
    p_ref = next(it)                                              # (B, N, 3)
    f_ref = next(it)                                              # (B, N, CF)
    stn_convs = [tuple(next(it) for _ in range(4)) for _ in NF_CONV_STN]
    stn_fcs = [tuple(next(it) for _ in range(4)) for _ in NF_FC_STN]
    proj_w, proj_b = next(it), next(it)
    c1_wp, c1_wf, c1_b, c1_g, c1_be = [next(it) for _ in range(5)]
    conv2 = tuple(next(it) for _ in range(4))
    fc1 = tuple(next(it) for _ in range(4))
    fc2_w, fc2_b = next(it), next(it)
    d1_wx, d1_wg, d1_b, d1_g, d1_be = [next(it) for _ in range(5)]
    d2 = tuple(next(it) for _ in range(4))

    # Group-membership "pair sum" matrices (GroupNorm(C//2, C) groups adjacent
    # channel pairs), built in-register -- no HBM input, cached per width so the
    # second batch sample reuses the same traced constant.
    pair_cache = {}

    def pair_matrix(c):
        if c not in pair_cache:
            ii = jax.lax.broadcasted_iota(jnp.int32, (c, c), 0)
            jj = jax.lax.broadcasted_iota(jnp.int32, (c, c), 1)
            pair_cache[c] = jnp.where((ii >> 1) == (jj >> 1), 1.0, 0.0
                                      ).astype(jnp.float32)
        return pair_cache[c]

    def dense(x, w_ref, b_ref):
        return jnp.dot(x, w_ref[...], preferred_element_type=jnp.float32,
                       precision=_PREC) + b_ref[...]

    def group_norm(y, gamma_ref, beta_ref, relu):
        # GroupNorm(C//2, C) over a (rows, C) slab: per-group (2 adjacent channels
        # x rows elements) mean / biased variance, then per-channel affine.
        # Single MXU dot produces both group sums (mean and E[x^2]); the affine is
        # folded into the normalization scale/shift.
        rows, c = y.shape
        pm = pair_matrix(c)
        cnt = 2.0 * rows
        sums = jnp.concatenate(
            [jnp.sum(y, axis=0, keepdims=True),
             jnp.sum(y * y, axis=0, keepdims=True)], axis=0)      # (2, C)
        stats = jnp.dot(sums, pm, preferred_element_type=jnp.float32,
                        precision=_PREC) / cnt                    # (2, C)
        mean = stats[0:1]
        ex2 = stats[1:2]
        inv = jax.lax.rsqrt(ex2 - mean * mean + EPS_GN)           # (1, C)
        scale = inv * gamma_ref[...]
        shift = beta_ref[...] - mean * scale
        out = y * scale + shift
        if relu:
            out = jnp.maximum(out, 0.0)
        return out

    for bi in range(batch):                                       # static unroll (B=2)
        p = p_ref[bi]                                             # (N, 3)
        f = f_ref[bi]                                             # (N, CF)

        # normalize_p (centroid subtraction) / normalize_f (L2 over channels)
        p_c = p - jnp.mean(p, axis=0, keepdims=True)
        f_norm = jnp.sqrt(jnp.sum(f * f, axis=1, keepdims=True))
        f_n = f / jnp.maximum(f_norm, EPS_NORMALIZE)

        # ---- STN: proj(fcs(maxpool(convs(p_c)))) ----
        x = p_c
        for (w, b, g, be) in stn_convs:
            x = group_norm(dense(x, w, b), g, be, relu=True)
        y = jnp.max(x, axis=0, keepdims=True)                     # (1, 32)
        for (w, b, g, be) in stn_fcs:
            y = group_norm(dense(y, w, b), g, be, relu=True)
        proj = dense(y, proj_w, proj_b)                           # (1, 9); T = view(3,3) + I

        # ---- first main conv, with the 3x3 transform and the [p_t, f_n]
        #      concatenation folded in:
        #        p_t[:, i] = p_c[:, i] + p_c @ proj[3i:3i+3]
        #        x1 = p_t @ W1[:3] + f_n @ W1[3:] + b1
        x = dense(f_n, c1_wf, c1_b)                               # (N, 32)
        for i in range(K_STN):
            t_row = proj[:, 3 * i:3 * i + 3]                      # (1, 3) = row i of (T - I)
            col = p_c[:, i:i + 1] + jnp.sum(p_c * t_row, axis=1, keepdims=True)
            x = x + col * c1_wp[i:i + 1, :]                       # (N,1) * (1,32)
        x = group_norm(x, c1_g, c1_be, relu=True)

        w, b, g, be = conv2
        x = group_norm(dense(x, w, b), g, be, relu=True)          # (N, 64)

        # ---- global descriptor ----
        pooled = jnp.max(x, axis=0, keepdims=True)                # (1, 64)
        w, b, g, be = fc1
        h = group_norm(dense(pooled, w, b), g, be, relu=True)
        # TODO(synk): nn.Dropout(prelast_do=0.5) is identity at inference; not applied.
        gd = dense(h, fc2_w, fc2_b)                               # (1, 16)

        # ---- desc head, [x, repeat(global_desc)] concat folded via split weights ----
        z = (jnp.dot(x, d1_wx[...], preferred_element_type=jnp.float32,
                     precision=_PREC)
             + jnp.dot(gd, d1_wg[...], preferred_element_type=jnp.float32,
                       precision=_PREC)
             + d1_b[...])
        z = group_norm(z, d1_g, d1_be, relu=True)
        w, b, g, be = d2
        z = group_norm(dense(z, w, b), g, be, relu=False)         # end_relu=False
        out_ref[bi] = z.astype(out_ref.dtype)


# ---------------- wrapper ----------------

def flatten_params(params):
    flat = []
    for layer in params['stn_convs']:
        flat.extend(layer)
    for layer in params['stn_fcs']:
        flat.extend(layer)
    flat.extend(params['stn_proj'])
    w1, b1, g1, be1 = params['convs'][0]
    flat.extend([w1[:K_STN], w1[K_STN:], b1, g1, be1])            # split [p_t | f_n] weight
    flat.extend(params['convs'][1])
    flat.extend(params['fcs'][0])
    w2, b2, _, _ = params['fcs'][1]
    flat.extend([w2, b2])                                         # last_ac=False -> no GN/ReLU
    wd1, bd1, gd1, bed1 = params['convs_desc'][0]
    flat.extend([wd1[:NF_CONV[-1]], wd1[NF_CONV[-1]:], bd1, gd1, bed1])  # split [x | gd] weight
    flat.extend(params['convs_desc'][1])
    return flat


@jax.jit
def pointnet_forward(params, input_p, input_f):
    # input_p: (B, 3, N), input_f: (B, CF, N) -- PyTorch channel-first layout.
    b, _, n = input_p.shape
    p = jnp.transpose(input_p, (0, 2, 1)).astype(jnp.float32)     # (B, N, 3)
    f = jnp.transpose(input_f, (0, 2, 1)).astype(jnp.float32)     # (B, N, CF)
    flat = flatten_params(params)

    out = pl.pallas_call(
        functools.partial(pointnet_fused_kernel, batch=b),
        out_shape=jax.ShapeDtypeStruct((b, n, NF_CONV_DESC[-1]), jnp.float32),
    )(p, f, *flat)                                                # everything resident in VMEM

    # channel-last -> channel-first to match the PyTorch module output (B, C, N)
    return jnp.transpose(out, (0, 2, 1))


# ---------------- parameter construction (deterministic) ----------------

def build_params(key):
    keys = iter(jax.random.split(key, 32))

    def lin(cin, cout):
        k1, k2 = jax.random.split(next(keys))
        w = (jax.random.normal(k1, (cin, cout)) * 0.1).astype(jnp.float32)
        b = (jax.random.normal(k2, (1, cout)) * 0.01).astype(jnp.float32)
        return w, b

    def gn(c):
        return jnp.ones((1, c), jnp.float32), jnp.zeros((1, c), jnp.float32)

    params = {}

    stn_convs, cin = [], K_STN
    for cout in NF_CONV_STN:
        w, b = lin(cin, cout)
        g, be = gn(cout)
        stn_convs.append((w, b, g, be))
        cin = cout
    params['stn_convs'] = stn_convs

    stn_fcs, cin = [], NF_CONV_STN[-1]
    for cout in NF_FC_STN:
        w, b = lin(cin, cout)
        g, be = gn(cout)
        stn_fcs.append((w, b, g, be))
        cin = cout
    params['stn_fcs'] = stn_fcs

    # STN projection: zero-initialized (nn.init.constant_(..., 0))
    params['stn_proj'] = (jnp.zeros((NF_FC_STN[-1], K_STN * K_STN), jnp.float32),
                          jnp.zeros((1, K_STN * K_STN), jnp.float32))

    convs, cin = [], K_STN + CF
    for cout in NF_CONV:
        w, b = lin(cin, cout)
        g, be = gn(cout)
        convs.append((w, b, g, be))
        cin = cout
    params['convs'] = convs

    fcs, cin = [], NF_CONV[-1]
    for cout in NF_FC:
        w, b = lin(cin, cout)
        g, be = gn(cout)
        fcs.append((w, b, g, be))
        cin = cout
    params['fcs'] = fcs

    convs_desc, cin = [], NF_CONV[-1] + NF_FC[-1]
    for cout in NF_CONV_DESC:
        w, b = lin(cin, cout)
        g, be = gn(cout)
        convs_desc.append((w, b, g, be))
        cin = cout
    params['convs_desc'] = convs_desc

    return params


# ---------------- pure-JAX reference (mirrors the PyTorch module) ----------------

def _gn_ref(x, gamma, beta):
    # GroupNorm(C//2, C); x is (B, C) or (B, C, N), channel-first.
    if x.ndim == 2:
        bb, c = x.shape
        xr = x.reshape(bb, c // 2, 2)
        mean = jnp.mean(xr, axis=2, keepdims=True)
        var = jnp.mean((xr - mean) ** 2, axis=2, keepdims=True)
        xn = ((xr - mean) * jax.lax.rsqrt(var + EPS_GN)).reshape(bb, c)
        return xn * gamma.reshape(1, c) + beta.reshape(1, c)
    bb, c, n = x.shape
    xr = x.reshape(bb, c // 2, 2, n)
    mean = jnp.mean(xr, axis=(2, 3), keepdims=True)
    var = jnp.mean((xr - mean) ** 2, axis=(2, 3), keepdims=True)
    xn = ((xr - mean) * jax.lax.rsqrt(var + EPS_GN)).reshape(bb, c, n)
    return xn * gamma.reshape(1, c, 1) + beta.reshape(1, c, 1)


def _conv_ref(x, w, b):
    return jnp.einsum('bcn,cd->bdn', x, w, precision=_PREC) + b[0][None, :, None]


def _lin_ref(x, w, b):
    return jnp.dot(x, w, precision=_PREC) + b


def reference_forward(params, input_p, input_f):
    p = input_p - jnp.mean(input_p, axis=2, keepdims=True)
    f_norm = jnp.sqrt(jnp.sum(input_f * input_f, axis=1, keepdims=True))
    f = input_f / jnp.maximum(f_norm, EPS_NORMALIZE)

    x = p
    for (w, b, g, be) in params['stn_convs']:
        x = jnp.maximum(_gn_ref(_conv_ref(x, w, b), g[0], be[0]), 0.0)
    y = jnp.max(x, axis=2)
    for (w, b, g, be) in params['stn_fcs']:
        y = jnp.maximum(_gn_ref(_lin_ref(y, w, b), g[0], be[0]), 0.0)
    wp, bp = params['stn_proj']
    proj = _lin_ref(y, wp, bp)
    T = proj.reshape(-1, K_STN, K_STN) + jnp.eye(K_STN, dtype=jnp.float32)[None]

    p_t = jnp.einsum('bij,bjn->bin', T, p, precision=_PREC)
    x = jnp.concatenate([p_t, f], axis=1)
    for (w, b, g, be) in params['convs']:
        x = jnp.maximum(_gn_ref(_conv_ref(x, w, b), g[0], be[0]), 0.0)
    mx = jnp.max(x, axis=2)
    w, b, g, be = params['fcs'][0]
    h = jnp.maximum(_gn_ref(_lin_ref(mx, w, b), g[0], be[0]), 0.0)
    w, b, _, _ = params['fcs'][1]
    gd = _lin_ref(h, w, b)
    z = jnp.concatenate(
        [x, jnp.broadcast_to(gd[:, :, None], (x.shape[0], gd.shape[1], x.shape[2]))],
        axis=1)
    w, b, g, be = params['convs_desc'][0]
    z = jnp.maximum(_gn_ref(_conv_ref(z, w, b), g[0], be[0]), 0.0)
    w, b, g, be = params['convs_desc'][1]
    z = _gn_ref(_conv_ref(z, w, b), g[0], be[0])
    return z


# ---------------- main ----------------

if __name__ == "__main__":
    key = jax.random.PRNGKey(0)
    kp, kf, kparams = jax.random.split(key, 3)

    input_p = jax.random.normal(kp, (B, 3, N_POINTS), dtype=jnp.float32)
    input_f = jax.random.normal(kf, (B, CF, N_POINTS), dtype=jnp.float32)

    params = build_params(kparams)

    out = pointnet_forward(params, input_p, input_f)
    out = jax.block_until_ready(out)

    assert out.shape == (B, NF_CONV_DESC[-1], N_POINTS), out.shape
    assert bool(jnp.all(jnp.isfinite(out)))

    ref = reference_forward(params, input_p, input_f)
    err = float(jnp.max(jnp.abs(out - ref)))
    assert err < 1e-2, f"max abs err vs pure-JAX reference: {err}"

    print("KERNEL_OK")
</pallas_src>

<mosaic_0001>
module attributes {stable_mosaic.version = 11 : i64} {
  func.func @pointnet_fused_kernel(%arg0: memref<2x16x3xf32, #tpu.memory_space<vmem>>, %arg1: memref<2x16x5xf32, #tpu.memory_space<vmem>>, %arg2: memref<3x16xf32, #tpu.memory_space<vmem>>, %arg3: memref<1x16xf32, #tpu.memory_space<vmem>>, %arg4: memref<1x16xf32, #tpu.memory_space<vmem>>, %arg5: memref<1x16xf32, #tpu.memory_space<vmem>>, %arg6: memref<16x32xf32, #tpu.memory_space<vmem>>, %arg7: memref<1x32xf32, #tpu.memory_space<vmem>>, %arg8: memref<1x32xf32, #tpu.memory_space<vmem>>, %arg9: memref<1x32xf32, #tpu.memory_space<vmem>>, %arg10: memref<32x32xf32, #tpu.memory_space<vmem>>, %arg11: memref<1x32xf32, #tpu.memory_space<vmem>>, %arg12: memref<1x32xf32, #tpu.memory_space<vmem>>, %arg13: memref<1x32xf32, #tpu.memory_space<vmem>>, %arg14: memref<32x16xf32, #tpu.memory_space<vmem>>, %arg15: memref<1x16xf32, #tpu.memory_space<vmem>>, %arg16: memref<1x16xf32, #tpu.memory_space<vmem>>, %arg17: memref<1x16xf32, #tpu.memory_space<vmem>>, %arg18: memref<16x9xf32, #tpu.memory_space<vmem>>, %arg19: memref<1x9xf32, #tpu.memory_space<vmem>>, %arg20: memref<3x32xf32, #tpu.memory_space<vmem>>, %arg21: memref<5x32xf32, #tpu.memory_space<vmem>>, %arg22: memref<1x32xf32, #tpu.memory_space<vmem>>, %arg23: memref<1x32xf32, #tpu.memory_space<vmem>>, %arg24: memref<1x32xf32, #tpu.memory_space<vmem>>, %arg25: memref<32x64xf32, #tpu.memory_space<vmem>>, %arg26: memref<1x64xf32, #tpu.memory_space<vmem>>, %arg27: memref<1x64xf32, #tpu.memory_space<vmem>>, %arg28: memref<1x64xf32, #tpu.memory_space<vmem>>, %arg29: memref<64x32xf32, #tpu.memory_space<vmem>>, %arg30: memref<1x32xf32, #tpu.memory_space<vmem>>, %arg31: memref<1x32xf32, #tpu.memory_space<vmem>>, %arg32: memref<1x32xf32, #tpu.memory_space<vmem>>, %arg33: memref<32x16xf32, #tpu.memory_space<vmem>>, %arg34: memref<1x16xf32, #tpu.memory_space<vmem>>, %arg35: memref<64x32xf32, #tpu.memory_space<vmem>>, %arg36: memref<16x32xf32, #tpu.memory_space<vmem>>, %arg37: memref<1x32xf32, #tpu.memory_space<vmem>>, %arg38: memref<1x32xf32, #tpu.memory_space<vmem>>, %arg39: memref<1x32xf32, #tpu.memory_space<vmem>>, %arg40: memref<32x16xf32, #tpu.memory_space<vmem>>, %arg41: memref<1x16xf32, #tpu.memory_space<vmem>>, %arg42: memref<1x16xf32, #tpu.memory_space<vmem>>, %arg43: memref<1x16xf32, #tpu.memory_space<vmem>>, %arg44: memref<2x16x16xf32, #tpu.memory_space<vmem>>) attributes {dimension_semantics = [], scalar_prefetch = 0 : i64, scratch_operands = 0 : i64, tpu.core_type = #tpu.core_type<tc>} {
    %c0 = arith.constant 0 : index
    %c0_0 = arith.constant 0 : index
    %c0_1 = arith.constant 0 : index
    %0 = vector.load %arg0[%c0, %c0_0, %c0_1] : memref<2x16x3xf32, #tpu.memory_space<vmem>>, vector<1x16x3xf32>
    %1 = vector.shape_cast %0 : vector<1x16x3xf32> to vector<16x3xf32>
    %c0_2 = arith.constant 0 : index
    %c0_3 = arith.constant 0 : index
    %c0_4 = arith.constant 0 : index
    %2 = vector.load %arg1[%c0_2, %c0_3, %c0_4] : memref<2x16x5xf32, #tpu.memory_space<vmem>>, vector<1x16x5xf32>
    %3 = vector.shape_cast %2 : vector<1x16x5xf32> to vector<16x5xf32>
    %cst = arith.constant dense<0.000000e+00> : vector<3xf32>
    %4 = vector.multi_reduction <add>, %1, %cst [0] : vector<16x3xf32> to vector<3xf32>
    %5 = vector.shape_cast %4 : vector<3xf32> to vector<1x3xf32>
    %cst_5 = arith.constant 1.600000e+01 : f32
    %6 = vector.broadcast %cst_5 : f32 to vector<1x3xf32>
    %7 = arith.divf %5, %6 : vector<1x3xf32>
    %8 = vector.broadcast %7 : vector<1x3xf32> to vector<16x3xf32>
    %9 = arith.subf %1, %8 : vector<16x3xf32>
    %10 = arith.mulf %3, %3 : vector<16x5xf32>
    %cst_6 = arith.constant dense<0.000000e+00> : vector<16xf32>
    %11 = vector.multi_reduction <add>, %10, %cst_6 [1] : vector<16x5xf32> to vector<16xf32>
    %12 = vector.shape_cast %11 : vector<16xf32> to vector<16x1xf32>
    %13 = math.sqrt %12 : vector<16x1xf32>
    %cst_7 = arith.constant 9.99999996E-13 : f32
    %14 = vector.broadcast %cst_7 : f32 to vector<16x1xf32>
    %15 = arith.maximumf %13, %14 : vector<16x1xf32>
    %16 = vector.broadcast %15 : vector<16x1xf32> to vector<16x5xf32>
    %17 = arith.divf %3, %16 : vector<16x5xf32>
    %c0_8 = arith.constant 0 : index
    %c0_9 = arith.constant 0 : index
    %18 = vector.load %arg2[%c0_8, %c0_9] : memref<3x16xf32, #tpu.memory_space<vmem>>, vector<3x16xf32>
    %cst_10 = arith.constant dense<0.000000e+00> : vector<16x16xf32>
    %19 = tpu.matmul %9, %18, %cst_10 {dimension_numbers = #tpu.dot_dimension_numbers<[1], [0], [0], [1], [0, 0, 1, 1], [], []>, precision = #tpu.contract_precision<fp32>} : vector<16x3xf32>, vector<3x16xf32>, vector<16x16xf32> -> vector<16x16xf32>
    %c0_11 = arith.constant 0 : index
    %c0_12 = arith.constant 0 : index
    %20 = vector.load %arg3[%c0_11, %c0_12] : memref<1x16xf32, #tpu.memory_space<vmem>>, vector<1x16xf32>
    %21 = vector.broadcast %20 : vector<1x16xf32> to vector<16x16xf32>
    %22 = arith.addf %19, %21 : vector<16x16xf32>
    %23 = tpu.iota {dimensions = array<i32: 0>} : vector<16x16xi32>
    %24 = tpu.iota {dimensions = array<i32: 1>} : vector<16x16xi32>
    %c1_i32 = arith.constant 1 : i32
    %25 = vector.broadcast %c1_i32 : i32 to vector<16x16xi32>
    %26 = arith.shrsi %23, %25 : vector<16x16xi32>
    %c1_i32_13 = arith.constant 1 : i32
    %27 = vector.broadcast %c1_i32_13 : i32 to vector<16x16xi32>
    %28 = arith.shrsi %24, %27 : vector<16x16xi32>
    %29 = arith.cmpi eq, %26, %28 : vector<16x16xi32>
    %cst_14 = arith.constant 1.000000e+00 : f32
    %cst_15 = arith.constant 0.000000e+00 : f32
    %30 = vector.broadcast %cst_14 : f32 to vector<16x16xf32>
    %31 = vector.broadcast %cst_15 : f32 to vector<16x16xf32>
    %32 = arith.select %29, %30, %31 : vector<16x16xi1>, vector<16x16xf32>
    %cst_16 = arith.constant dense<0.000000e+00> : vector<16xf32>
    %33 = vector.multi_reduction <add>, %22, %cst_16 [0] : vector<16x16xf32> to vector<16xf32>
    %34 = vector.shape_cast %33 : vector<16xf32> to vector<1x16xf32>
    %35 = arith.mulf %22, %22 : vector<16x16xf32>
    %cst_17 = arith.constant dense<0.000000e+00> : vector<16xf32>
    %36 = vector.multi_reduction <add>, %35, %cst_17 [0] : vector<16x16xf32> to vector<16xf32>
    %37 = vector.shape_cast %36 : vector<16xf32> to vector<1x16xf32>
    %38 = tpu.concatenate %34, %37 in 0 : vector<1x16xf32>, vector<1x16xf32> -> vector<2x16xf32>
    %cst_18 = arith.constant dense<0.000000e+00> : vector<2x16xf32>
    %39 = tpu.matmul %38, %32, %cst_18 {dimension_numbers = #tpu.dot_dimension_numbers<[1], [0], [0], [1], [0, 0, 1, 1], [], []>, precision = #tpu.contract_precision<fp32>} : vector<2x16xf32>, vector<16x16xf32>, vector<2x16xf32> -> vector<2x16xf32>
    %cst_19 = arith.constant 3.200000e+01 : f32
    %40 = vector.broadcast %cst_19 : f32 to vector<2x16xf32>
    %41 = arith.divf %39, %40 : vector<2x16xf32>
    %42 = vector.extract_strided_slice %41 {offsets = [0, 0], sizes = [1, 16], strides = [1, 1]} : vector<2x16xf32> to vector<1x16xf32>
    %43 = vector.extract_strided_slice %41 {offsets = [1, 0], sizes = [1, 16], strides = [1, 1]} : vector<2x16xf32> to vector<1x16xf32>
    %44 = arith.mulf %42, %42 : vector<1x16xf32>
    %45 = arith.subf %43, %44 : vector<1x16xf32>
    %cst_20 = arith.constant 9.99999974E-6 : f32
    %46 = vector.broadcast %cst_20 : f32 to vector<1x16xf32>
    %47 = arith.addf %45, %46 : vector<1x16xf32>
    %48 = math.rsqrt %47 : vector<1x16xf32>
    %c0_21 = arith.constant 0 : index
    %c0_22 = arith.constant 0 : index
    %49 = vector.load %arg4[%c0_21, %c0_22] : memref<1x16xf32, #tpu.memory_space<vmem>>, vector<1x16xf32>
    %50 = arith.mulf %48, %49 : vector<1x16xf32>
    %c0_23 = arith.constant 0 : index
    %c0_24 = arith.constant 0 : index
    %51 = vector.load %arg5[%c0_23, %c0_24] : memref<1x16xf32, #tpu.memory_space<vmem>>, vector<1x16xf32>
    %52 = arith.mulf %42, %50 : vector<1x16xf32>
    %53 = arith.subf %51, %52 : vector<1x16xf32>
    %54 = vector.broadcast %50 : vector<1x16xf32> to vector<16x16xf32>
    %55 = arith.mulf %22, %54 : vector<16x16xf32>
    %56 = vector.broadcast %53 : vector<1x16xf32> to vector<16x16xf32>
    %57 = arith.addf %55, %56 : vector<16x16xf32>
    %cst_25 = arith.constant 0.000000e+00 : f32
    %58 = vector.broadcast %cst_25 : f32 to vector<16x16xf32>
    %59 = arith.maximumf %57, %58 : vector<16x16xf32>
    %c0_26 = arith.constant 0 : index
    %c0_27 = arith.constant 0 : index
    %60 = vector.load %arg6[%c0_26, %c0_27] : memref<16x32xf32, #tpu.memory_space<vmem>>, vector<16x32xf32>
    %cst_28 = arith.constant dense<0.000000e+00> : vector<16x32xf32>
    %61 = tpu.matmul %59, %60, %cst_28 {dimension_numbers = #tpu.dot_dimension_numbers<[1], [0], [0], [1], [0, 0, 1, 1], [], []>, precision = #tpu.contract_precision<fp32>} : vector<16x16xf32>, vector<16x32xf32>, vector<16x32xf32> -> vector<16x32xf32>
    %c0_29 = arith.constant 0 : index
    %c0_30 = arith.constant 0 : index
    %62 = vector.load %arg7[%c0_29, %c0_30] : memref<1x32xf32, #tpu.memory_space<vmem>>, vector<1x32xf32>
    %63 = vector.broadcast %62 : vector<1x32xf32> to vector<16x32xf32>
    %64 = arith.addf %61, %63 : vector<16x32xf32>
    %65 = tpu.iota {dimensions = array<i32: 0>} : vector<32x32xi32>
    %66 = tpu.iota {dimensions = array<i32: 1>} : vector<32x32xi32>
    %c1_i32_31 = arith.constant 1 : i32
    %67 = vector.broadcast %c1_i32_31 : i32 to vector<32x32xi32>
    %68 = arith.shrsi %65, %67 : vector<32x32xi32>
    %c1_i32_32 = arith.constant 1 : i32
    %69 = vector.broadcast %c1_i32_32 : i32 to vector<32x32xi32>
    %70 = arith.shrsi %66, %69 : vector<32x32xi32>
    %71 = arith.cmpi eq, %68, %70 : vector<32x32xi32>
    %cst_33 = arith.constant 1.000000e+00 : f32
    %cst_34 = arith.constant 0.000000e+00 : f32
    %72 = vector.broadcast %cst_33 : f32 to vector<32x32xf32>
    %73 = vector.broadcast %cst_34 : f32 to vector<32x32xf32>
    %74 = arith.select %71, %72, %73 : vector<32x32xi1>, vector<32x32xf32>
    %cst_35 = arith.constant dense<0.000000e+00> : vector<32xf32>
    %75 = vector.multi_reduction <add>, %64, %cst_35 [0] : vector<16x32xf32> to vector<32xf32>
    %76 = vector.shape_cast %75 : vector<32xf32> to vector<1x32xf32>
    %77 = arith.mulf %64, %64 : vector<16x32xf32>
    %cst_36 = arith.constant dense<0.000000e+00> : vector<32xf32>
    %78 = vector.multi_reduction <add>, %77, %cst_36 [0] : vector<16x32xf32> to vector<32xf32>
    %79 = vector.shape_cast %78 : vector<32xf32> to vector<1x32xf32>
    %80 = tpu.concatenate %76, %79 in 0 : vector<1x32xf32>, vector<1x32xf32> -> vector<2x32xf32>
    %cst_37 = arith.constant dense<0.000000e+00> : vector<2x32xf32>
    %81 = tpu.matmul %80, %74, %cst_37 {dimension_numbers = #tpu.dot_dimension_numbers<[1], [0], [0], [1], [0, 0, 1, 1], [], []>, precision = #tpu.contract_precision<fp32>} : vector<2x32xf32>, vector<32x32xf32>, vector<2x32xf32> -> vector<2x32xf32>
    %cst_38 = arith.constant 3.200000e+01 : f32
    %82 = vector.broadcast %cst_38 : f32 to vector<2x32xf32>
    %83 = arith.divf %81, %82 : vector<2x32xf32>
    %84 = vector.extract_strided_slice %83 {offsets = [0, 0], sizes = [1, 32], strides = [1, 1]} : vector<2x32xf32> to vector<1x32xf32>
    %85 = vector.extract_strided_slice %83 {offsets = [1, 0], sizes = [1, 32], strides = [1, 1]} : vector<2x32xf32> to vector<1x32xf32>
    %86 = arith.mulf %84, %84 : vector<1x32xf32>
    %87 = arith.subf %85, %86 : vector<1x32xf32>
    %cst_39 = arith.constant 9.99999974E-6 : f32
    %88 = vector.broadcast %cst_39 : f32 to vector<1x32xf32>
    %89 = arith.addf %87, %88 : vector<1x32xf32>
    %90 = math.rsqrt %89 : vector<1x32xf32>
    %c0_40 = arith.constant 0 : index
    %c0_41 = arith.constant 0 : index
    %91 = vector.load %arg8[%c0_40, %c0_41] : memref<1x32xf32, #tpu.memory_space<vmem>>, vector<1x32xf32>
    %92 = arith.mulf %90, %91 : vector<1x32xf32>
    %c0_42 = arith.constant 0 : index
    %c0_43 = arith.constant 0 : index
    %93 = vector.load %arg9[%c0_42, %c0_43] : memref<1x32xf32, #tpu.memory_space<vmem>>, vector<1x32xf32>
    %94 = arith.mulf %84, %92 : vector<1x32xf32>
    %95 = arith.subf %93, %94 : vector<1x32xf32>
    %96 = vector.broadcast %92 : vector<1x32xf32> to vector<16x32xf32>
    %97 = arith.mulf %64, %96 : vector<16x32xf32>
    %98 = vector.broadcast %95 : vector<1x32xf32> to vector<16x32xf32>
    %99 = arith.addf %97, %98 : vector<16x32xf32>
    %cst_44 = arith.constant 0.000000e+00 : f32
    %100 = vector.broadcast %cst_44 : f32 to vector<16x32xf32>
    %101 = arith.maximumf %99, %100 : vector<16x32xf32>
    %cst_45 = arith.constant dense<0xFF800000> : vector<32xf32>
    %102 = vector.multi_reduction <maximumf>, %101, %cst_45 [0] : vector<16x32xf32> to vector<32xf32>
    %103 = vector.shape_cast %102 : vector<32xf32> to vector<1x32xf32>
    %c0_46 = arith.constant 0 : index
    %c0_47 = arith.constant 0 : index
    %104 = vector.load %arg10[%c0_46, %c0_47] : memref<32x32xf32, #tpu.memory_space<vmem>>, vector<32x32xf32>
    %cst_48 = arith.constant dense<0.000000e+00> : vector<1x32xf32>
    %105 = tpu.matmul %103, %104, %cst_48 {dimension_numbers = #tpu.dot_dimension_numbers<[1], [0], [0], [1], [0, 0, 1, 1], [], []>, precision = #tpu.contract_precision<fp32>} : vector<1x32xf32>, vector<32x32xf32>, vector<1x32xf32> -> vector<1x32xf32>
    %c0_49 = arith.constant 0 : index
    %c0_50 = arith.constant 0 : index
    %106 = vector.load %arg11[%c0_49, %c0_50] : memref<1x32xf32, #tpu.memory_space<vmem>>, vector<1x32xf32>
    %107 = arith.addf %105, %106 : vector<1x32xf32>
    %cst_51 = arith.constant dense<0.000000e+00> : vector<32xf32>
    %108 = vector.multi_reduction <add>, %107, %cst_51 [0] : vector<1x32xf32> to vector<32xf32>
    %109 = vector.shape_cast %108 : vector<32xf32> to vector<1x32xf32>
    %110 = arith.mulf %107, %107 : vector<1x32xf32>
    %cst_52 = arith.constant dense<0.000000e+00> : vector<32xf32>
    %111 = vector.multi_reduction <add>, %110, %cst_52 [0] : vector<1x32xf32> to vector<32xf32>
    %112 = vector.shape_cast %111 : vector<32xf32> to vector<1x32xf32>
    %113 = tpu.concatenate %109, %112 in 0 : vector<1x32xf32>, vector<1x32xf32> -> vector<2x32xf32>
    %cst_53 = arith.constant dense<0.000000e+00> : vector<2x32xf32>
    %114 = tpu.matmul %113, %74, %cst_53 {dimension_numbers = #tpu.dot_dimension_numbers<[1], [0], [0], [1], [0, 0, 1, 1], [], []>, precision = #tpu.contract_precision<fp32>} : vector<2x32xf32>, vector<32x32xf32>, vector<2x32xf32> -> vector<2x32xf32>
    %cst_54 = arith.constant 2.000000e+00 : f32
    %115 = vector.broadcast %cst_54 : f32 to vector<2x32xf32>
    %116 = arith.divf %114, %115 : vector<2x32xf32>
    %117 = vector.extract_strided_slice %116 {offsets = [0, 0], sizes = [1, 32], strides = [1, 1]} : vector<2x32xf32> to vector<1x32xf32>
    %118 = vector.extract_strided_slice %116 {offsets = [1, 0], sizes = [1, 32], strides = [1, 1]} : vector<2x32xf32> to vector<1x32xf32>
    %119 = arith.mulf %117, %117 : vector<1x32xf32>
    %120 = arith.subf %118, %119 : vector<1x32xf32>
    %cst_55 = arith.constant 9.99999974E-6 : f32
    %121 = vector.broadcast %cst_55 : f32 to vector<1x32xf32>
    %122 = arith.addf %120, %121 : vector<1x32xf32>
    %123 = math.rsqrt %122 : vector<1x32xf32>
    %c0_56 = arith.constant 0 : index
    %c0_57 = arith.constant 0 : index
    %124 = vector.load %arg12[%c0_56, %c0_57] : memref<1x32xf32, #tpu.memory_space<vmem>>, vector<1x32xf32>
    %125 = arith.mulf %123, %124 : vector<1x32xf32>
    %c0_58 = arith.constant 0 : index
    %c0_59 = arith.constant 0 : index
    %126 = vector.load %arg13[%c0_58, %c0_59] : memref<1x32xf32, #tpu.memory_space<vmem>>, vector<1x32xf32>
    %127 = arith.mulf %117, %125 : vector<1x32xf32>
    %128 = arith.subf %126, %127 : vector<1x32xf32>
    %129 = arith.mulf %107, %125 : vector<1x32xf32>
    %130 = arith.addf %129, %128 : vector<1x32xf32>
    %cst_60 = arith.constant 0.000000e+00 : f32
    %131 = vector.broadcast %cst_60 : f32 to vector<1x32xf32>
    %132 = arith.maximumf %130, %131 : vector<1x32xf32>
    %c0_61 = arith.constant 0 : index
    %c0_62 = arith.constant 0 : index
    %133 = vector.load %arg14[%c0_61, %c0_62] : memref<32x16xf32, #tpu.memory_space<vmem>>, vector<32x16xf32>
    %cst_63 = arith.constant dense<0.000000e+00> : vector<1x16xf32>
    %134 = tpu.matmul %132, %133, %cst_63 {dimension_numbers = #tpu.dot_dimension_numbers<[1], [0], [0], [1], [0, 0, 1, 1], [], []>, precision = #tpu.contract_precision<fp32>} : vector<1x32xf32>, vector<32x16xf32>, vector<1x16xf32> -> vector<1x16xf32>
    %c0_64 = arith.constant 0 : index
    %c0_65 = arith.constant 0 : index
    %135 = vector.load %arg15[%c0_64, %c0_65] : memref<1x16xf32, #tpu.memory_space<vmem>>, vector<1x16xf32>
    %136 = arith.addf %134, %135 : vector<1x16xf32>
    %cst_66 = arith.constant dense<0.000000e+00> : vector<16xf32>
    %137 = vector.multi_reduction <add>, %136, %cst_66 [0] : vector<1x16xf32> to vector<16xf32>
    %138 = vector.shape_cast %137 : vector<16xf32> to vector<1x16xf32>
    %139 = arith.mulf %136, %136 : vector<1x16xf32>
    %cst_67 = arith.constant dense<0.000000e+00> : vector<16xf32>
    %140 = vector.multi_reduction <add>, %139, %cst_67 [0] : vector<1x16xf32> to vector<16xf32>
    %141 = vector.shape_cast %140 : vector<16xf32> to vector<1x16xf32>
    %142 = tpu.concatenate %138, %141 in 0 : vector<1x16xf32>, vector<1x16xf32> -> vector<2x16xf32>
    %cst_68 = arith.constant dense<0.000000e+00> : vector<2x16xf32>
    %143 = tpu.matmul %142, %32, %cst_68 {dimension_numbers = #tpu.dot_dimension_numbers<[1], [0], [0], [1], [0, 0, 1, 1], [], []>, precision = #tpu.contract_precision<fp32>} : vector<2x16xf32>, vector<16x16xf32>, vector<2x16xf32> -> vector<2x16xf32>
    %cst_69 = arith.constant 2.000000e+00 : f32
    %144 = vector.broadcast %cst_69 : f32 to vector<2x16xf32>
    %145 = arith.divf %143, %144 : vector<2x16xf32>
    %146 = vector.extract_strided_slice %145 {offsets = [0, 0], sizes = [1, 16], strides = [1, 1]} : vector<2x16xf32> to vector<1x16xf32>
    %147 = vector.extract_strided_slice %145 {offsets = [1, 0], sizes = [1, 16], strides = [1, 1]} : vector<2x16xf32> to vector<1x16xf32>
    %148 = arith.mulf %146, %146 : vector<1x16xf32>
    %149 = arith.subf %147, %148 : vector<1x16xf32>
    %cst_70 = arith.constant 9.99999974E-6 : f32
    %150 = vector.broadcast %cst_70 : f32 to vector<1x16xf32>
    %151 = arith.addf %149, %150 : vector<1x16xf32>
    %152 = math.rsqrt %151 : vector<1x16xf32>
    %c0_71 = arith.constant 0 : index
    %c0_72 = arith.constant 0 : index
    %153 = vector.load %arg16[%c0_71, %c0_72] : memref<1x16xf32, #tpu.memory_space<vmem>>, vector<1x16xf32>
    %154 = arith.mulf %152, %153 : vector<1x16xf32>
    %c0_73 = arith.constant 0 : index
    %c0_74 = arith.constant 0 : index
    %155 = vector.load %arg17[%c0_73, %c0_74] : memref<1x16xf32, #tpu.memory_space<vmem>>, vector<1x16xf32>
    %156 = arith.mulf %146, %154 : vector<1x16xf32>
    %157 = arith.subf %155, %156 : vector<1x16xf32>
    %158 = arith.mulf %136, %154 : vector<1x16xf32>
    %159 = arith.addf %158, %157 : vector<1x16xf32>
    %cst_75 = arith.constant 0.000000e+00 : f32
    %160 = vector.broadcast %cst_75 : f32 to vector<1x16xf32>
    %161 = arith.maximumf %159, %160 : vector<1x16xf32>
    %c0_76 = arith.constant 0 : index
    %c0_77 = arith.constant 0 : index
    %162 = vector.load %arg18[%c0_76, %c0_77] : memref<16x9xf32, #tpu.memory_space<vmem>>, vector<16x9xf32>
    %cst_78 = arith.constant dense<0.000000e+00> : vector<1x9xf32>
    %163 = tpu.matmul %161, %162, %cst_78 {dimension_numbers = #tpu.dot_dimension_numbers<[1], [0], [0], [1], [0, 0, 1, 1], [], []>, precision = #tpu.contract_precision<fp32>} : vector<1x16xf32>, vector<16x9xf32>, vector<1x9xf32> -> vector<1x9xf32>
    %c0_79 = arith.constant 0 : index
    %c0_80 = arith.constant 0 : index
    %164 = vector.load %arg19[%c0_79, %c0_80] : memref<1x9xf32, #tpu.memory_space<vmem>>, vector<1x9xf32>
    %165 = arith.addf %163, %164 : vector<1x9xf32>
    %c0_81 = arith.constant 0 : index
    %c0_82 = arith.constant 0 : index
    %166 = vector.load %arg21[%c0_81, %c0_82] : memref<5x32xf32, #tpu.memory_space<vmem>>, vector<5x32xf32>
    %cst_83 = arith.constant dense<0.000000e+00> : vector<16x32xf32>
    %167 = tpu.matmul %17, %166, %cst_83 {dimension_numbers = #tpu.dot_dimension_numbers<[1], [0], [0], [1], [0, 0, 1, 1], [], []>, precision = #tpu.contract_precision<fp32>} : vector<16x5xf32>, vector<5x32xf32>, vector<16x32xf32> -> vector<16x32xf32>
    %c0_84 = arith.constant 0 : index
    %c0_85 = arith.constant 0 : index
    %168 = vector.load %arg22[%c0_84, %c0_85] : memref<1x32xf32, #tpu.memory_space<vmem>>, vector<1x32xf32>
    %169 = vector.broadcast %168 : vector<1x32xf32> to vector<16x32xf32>
    %170 = arith.addf %167, %169 : vector<16x32xf32>
    %171 = vector.extract_strided_slice %165 {offsets = [0, 0], sizes = [1, 3], strides = [1, 1]} : vector<1x9xf32> to vector<1x3xf32>
    %172 = vector.extract_strided_slice %9 {offsets = [0, 0], sizes = [16, 1], strides = [1, 1]} : vector<16x3xf32> to vector<16x1xf32>
    %173 = vector.broadcast %171 : vector<1x3xf32> to vector<16x3xf32>
    %174 = arith.mulf %9, %173 : vector<16x3xf32>
    %cst_86 = arith.constant dense<0.000000e+00> : vector<16xf32>
    %175 = vector.multi_reduction <add>, %174, %cst_86 [1] : vector<16x3xf32> to vector<16xf32>
    %176 = vector.shape_cast %175 : vector<16xf32> to vector<16x1xf32>
    %177 = arith.addf %172, %176 : vector<16x1xf32>
    %c0_87 = arith.constant 0 : index
    %c0_88 = arith.constant 0 : index
    %178 = vector.load %arg20[%c0_87, %c0_88] : memref<3x32xf32, #tpu.memory_space<vmem>>, vector<1x32xf32>
    %179 = vector.broadcast %177 : vector<16x1xf32> to vector<16x32xf32>
    %180 = vector.broadcast %178 : vector<1x32xf32> to vector<16x32xf32>
    %181 = arith.mulf %179, %180 : vector<16x32xf32>
    %182 = arith.addf %170, %181 : vector<16x32xf32>
    %183 = vector.extract_strided_slice %165 {offsets = [0, 3], sizes = [1, 3], strides = [1, 1]} : vector<1x9xf32> to vector<1x3xf32>
    %184 = vector.extract_strided_slice %9 {offsets = [0, 1], sizes = [16, 1], strides = [1, 1]} : vector<16x3xf32> to vector<16x1xf32>
    %185 = vector.broadcast %183 : vector<1x3xf32> to vector<16x3xf32>
    %186 = arith.mulf %9, %185 : vector<16x3xf32>
    %cst_89 = arith.constant dense<0.000000e+00> : vector<16xf32>
    %187 = vector.multi_reduction <add>, %186, %cst_89 [1] : vector<16x3xf32> to vector<16xf32>
    %188 = vector.shape_cast %187 : vector<16xf32> to vector<16x1xf32>
    %189 = arith.addf %184, %188 : vector<16x1xf32>
    %c1 = arith.constant 1 : index
    %c0_90 = arith.constant 0 : index
    %190 = vector.load %arg20[%c1, %c0_90] : memref<3x32xf32, #tpu.memory_space<vmem>>, vector<1x32xf32>
    %191 = vector.broadcast %189 : vector<16x1xf32> to vector<16x32xf32>
    %192 = vector.broadcast %190 : vector<1x32xf32> to vector<16x32xf32>
    %193 = arith.mulf %191, %192 : vector<16x32xf32>
    %194 = arith.addf %182, %193 : vector<16x32xf32>
    %195 = vector.extract_strided_slice %165 {offsets = [0, 6], sizes = [1, 3], strides = [1, 1]} : vector<1x9xf32> to vector<1x3xf32>
    %196 = vector.extract_strided_slice %9 {offsets = [0, 2], sizes = [16, 1], strides = [1, 1]} : vector<16x3xf32> to vector<16x1xf32>
    %197 = vector.broadcast %195 : vector<1x3xf32> to vector<16x3xf32>
    %198 = arith.mulf %9, %197 : vector<16x3xf32>
    %cst_91 = arith.constant dense<0.000000e+00> : vector<16xf32>
    %199 = vector.multi_reduction <add>, %198, %cst_91 [1] : vector<16x3xf32> to vector<16xf32>
    %200 = vector.shape_cast %199 : vector<16xf32> to vector<16x1xf32>
    %201 = arith.addf %196, %200 : vector<16x1xf32>
    %c2 = arith.constant 2 : index
    %c0_92 = arith.constant 0 : index
    %202 = vector.load %arg20[%c2, %c0_92] : memref<3x32xf32, #tpu.memory_space<vmem>>, vector<1x32xf32>
    %203 = vector.broadcast %201 : vector<16x1xf32> to vector<16x32xf32>
    %204 = vector.broadcast %202 : vector<1x32xf32> to vector<16x32xf32>
    %205 = arith.mulf %203, %204 : vector<16x32xf32>
    %206 = arith.addf %194, %205 : vector<16x32xf32>
    %cst_93 = arith.constant dense<0.000000e+00> : vector<32xf32>
    %207 = vector.multi_reduction <add>, %206, %cst_93 [0] : vector<16x32xf32> to vector<32xf32>
    %208 = vector.shape_cast %207 : vector<32xf32> to vector<1x32xf32>
    %209 = arith.mulf %206, %206 : vector<16x32xf32>
    %cst_94 = arith.constant dense<0.000000e+00> : vector<32xf32>
    %210 = vector.multi_reduction <add>, %209, %cst_94 [0] : vector<16x32xf32> to vector<32xf32>
    %211 = vector.shape_cast %210 : vector<32xf32> to vector<1x32xf32>
    %212 = tpu.concatenate %208, %211 in 0 : vector<1x32xf32>, vector<1x32xf32> -> vector<2x32xf32>
    %cst_95 = arith.constant dense<0.000000e+00> : vector<2x32xf32>
    %213 = tpu.matmul %212, %74, %cst_95 {dimension_numbers = #tpu.dot_dimension_numbers<[1], [0], [0], [1], [0, 0, 1, 1], [], []>, precision = #tpu.contract_precision<fp32>} : vector<2x32xf32>, vector<32x32xf32>, vector<2x32xf32> -> vector<2x32xf32>
    %cst_96 = arith.constant 3.200000e+01 : f32
    %214 = vector.broadcast %cst_96 : f32 to vector<2x32xf32>
    %215 = arith.divf %213, %214 : vector<2x32xf32>
    %216 = vector.extract_strided_slice %215 {offsets = [0, 0], sizes = [1, 32], strides = [1, 1]} : vector<2x32xf32> to vector<1x32xf32>
    %217 = vector.extract_strided_slice %215 {offsets = [1, 0], sizes = [1, 32], strides = [1, 1]} : vector<2x32xf32> to vector<1x32xf32>
    %218 = arith.mulf %216, %216 : vector<1x32xf32>
    %219 = arith.subf %217, %218 : vector<1x32xf32>
    %cst_97 = arith.constant 9.99999974E-6 : f32
    %220 = vector.broadcast %cst_97 : f32 to vector<1x32xf32>
    %221 = arith.addf %219, %220 : vector<1x32xf32>
    %222 = math.rsqrt %221 : vector<1x32xf32>
    %c0_98 = arith.constant 0 : index
    %c0_99 = arith.constant 0 : index
    %223 = vector.load %arg23[%c0_98, %c0_99] : memref<1x32xf32, #tpu.memory_space<vmem>>, vector<1x32xf32>
    %224 = arith.mulf %222, %223 : vector<1x32xf32>
    %c0_100 = arith.constant 0 : index
    %c0_101 = arith.constant 0 : index
    %225 = vector.load %arg24[%c0_100, %c0_101] : memref<1x32xf32, #tpu.memory_space<vmem>>, vector<1x32xf32>
    %226 = arith.mulf %216, %224 : vector<1x32xf32>
    %227 = arith.subf %225, %226 : vector<1x32xf32>
    %228 = vector.broadcast %224 : vector<1x32xf32> to vector<16x32xf32>
    %229 = arith.mulf %206, %228 : vector<16x32xf32>
    %230 = vector.broadcast %227 : vector<1x32xf32> to vector<16x32xf32>
    %231 = arith.addf %229, %230 : vector<16x32xf32>
    %cst_102 = arith.constant 0.000000e+00 : f32
    %232 = vector.broadcast %cst_102 : f32 to vector<16x32xf32>
    %233 = arith.maximumf %231, %232 : vector<16x32xf32>
    %c0_103 = arith.constant 0 : index
    %c0_104 = arith.constant 0 : index
    %234 = vector.load %arg25[%c0_103, %c0_104] : memref<32x64xf32, #tpu.memory_space<vmem>>, vector<32x64xf32>
    %cst_105 = arith.constant dense<0.000000e+00> : vector<16x64xf32>
    %235 = tpu.matmul %233, %234, %cst_105 {dimension_numbers = #tpu.dot_dimension_numbers<[1], [0], [0], [1], [0, 0, 1, 1], [], []>, precision = #tpu.contract_precision<fp32>} : vector<16x32xf32>, vector<32x64xf32>, vector<16x64xf32> -> vector<16x64xf32>
    %c0_106 = arith.constant 0 : index
    %c0_107 = arith.constant 0 : index
    %236 = vector.load %arg26[%c0_106, %c0_107] : memref<1x64xf32, #tpu.memory_space<vmem>>, vector<1x64xf32>
    %237 = vector.broadcast %236 : vector<1x64xf32> to vector<16x64xf32>
    %238 = arith.addf %235, %237 : vector<16x64xf32>
    %239 = tpu.iota {dimensions = array<i32: 0>} : vector<64x64xi32>
    %240 = tpu.iota {dimensions = array<i32: 1>} : vector<64x64xi32>
    %c1_i32_108 = arith.constant 1 : i32
    %241 = vector.broadcast %c1_i32_108 : i32 to vector<64x64xi32>
    %242 = arith.shrsi %239, %241 : vector<64x64xi32>
    %c1_i32_109 = arith.constant 1 : i32
    %243 = vector.broadcast %c1_i32_109 : i32 to vector<64x64xi32>
    %244 = arith.shrsi %240, %243 : vector<64x64xi32>
    %245 = arith.cmpi eq, %242, %244 : vector<64x64xi32>
    %cst_110 = arith.constant 1.000000e+00 : f32
    %cst_111 = arith.constant 0.000000e+00 : f32
    %246 = vector.broadcast %cst_110 : f32 to vector<64x64xf32>
    %247 = vector.broadcast %cst_111 : f32 to vector<64x64xf32>
    %248 = arith.select %245, %246, %247 : vector<64x64xi1>, vector<64x64xf32>
    %cst_112 = arith.constant dense<0.000000e+00> : vector<64xf32>
    %249 = vector.multi_reduction <add>, %238, %cst_112 [0] : vector<16x64xf32> to vector<64xf32>
    %250 = vector.shape_cast %249 : vector<64xf32> to vector<1x64xf32>
    %251 = arith.mulf %238, %238 : vector<16x64xf32>
    %cst_113 = arith.constant dense<0.000000e+00> : vector<64xf32>
    %252 = vector.multi_reduction <add>, %251, %cst_113 [0] : vector<16x64xf32> to vector<64xf32>
    %253 = vector.shape_cast %252 : vector<64xf32> to vector<1x64xf32>
    %254 = tpu.concatenate %250, %253 in 0 : vector<1x64xf32>, vector<1x64xf32> -> vector<2x64xf32>
    %cst_114 = arith.constant dense<0.000000e+00> : vector<2x64xf32>
    %255 = tpu.matmul %254, %248, %cst_114 {dimension_numbers = #tpu.dot_dimension_numbers<[1], [0], [0], [1], [0, 0, 1, 1], [], []>, precision = #tpu.contract_precision<fp32>} : vector<2x64xf32>, vector<64x64xf32>, vector<2x64xf32> -> vector<2x64xf32>
    %cst_115 = arith.constant 3.200000e+01 : f32
    %256 = vector.broadcast %cst_115 : f32 to vector<2x64xf32>
    %257 = arith.divf %255, %256 : vector<2x64xf32>
    %258 = vector.extract_strided_slice %257 {offsets = [0, 0], sizes = [1, 64], strides = [1, 1]} : vector<2x64xf32> to vector<1x64xf32>
    %259 = vector.extract_strided_slice %257 {offsets = [1, 0], sizes = [1, 64], strides = [1, 1]} : vector<2x64xf32> to vector<1x64xf32>
    %260 = arith.mulf %258, %258 : vector<1x64xf32>
    %261 = arith.subf %259, %260 : vector<1x64xf32>
    %cst_116 = arith.constant 9.99999974E-6 : f32
    %262 = vector.broadcast %cst_116 : f32 to vector<1x64xf32>
    %263 = arith.addf %261, %262 : vector<1x64xf32>
    %264 = math.rsqrt %263 : vector<1x64xf32>
    %c0_117 = arith.constant 0 : index
    %c0_118 = arith.constant 0 : index
    %265 = vector.load %arg27[%c0_117, %c0_118] : memref<1x64xf32, #tpu.memory_space<vmem>>, vector<1x64xf32>
    %266 = arith.mulf %264, %265 : vector<1x64xf32>
    %c0_119 = arith.constant 0 : index
    %c0_120 = arith.constant 0 : index
    %267 = vector.load %arg28[%c0_119, %c0_120] : memref<1x64xf32, #tpu.memory_space<vmem>>, vector<1x64xf32>
    %268 = arith.mulf %258, %266 : vector<1x64xf32>
    %269 = arith.subf %267, %268 : vector<1x64xf32>
    %270 = vector.broadcast %266 : vector<1x64xf32> to vector<16x64xf32>
    %271 = arith.mulf %238, %270 : vector<16x64xf32>
    %272 = vector.broadcast %269 : vector<1x64xf32> to vector<16x64xf32>
    %273 = arith.addf %271, %272 : vector<16x64xf32>
    %cst_121 = arith.constant 0.000000e+00 : f32
    %274 = vector.broadcast %cst_121 : f32 to vector<16x64xf32>
    %275 = arith.maximumf %273, %274 : vector<16x64xf32>
    %cst_122 = arith.constant dense<0xFF800000> : vector<64xf32>
    %276 = vector.multi_reduction <maximumf>, %275, %cst_122 [0] : vector<16x64xf32> to vector<64xf32>
    %277 = vector.shape_cast %276 : vector<64xf32> to vector<1x64xf32>
    %c0_123 = arith.constant 0 : index
    %c0_124 = arith.constant 0 : index
    %278 = vector.load %arg29[%c0_123, %c0_124] : memref<64x32xf32, #tpu.memory_space<vmem>>, vector<64x32xf32>
    %cst_125 = arith.constant dense<0.000000e+00> : vector<1x32xf32>
    %279 = tpu.matmul %277, %278, %cst_125 {dimension_numbers = #tpu.dot_dimension_numbers<[1], [0], [0], [1], [0, 0, 1, 1], [], []>, precision = #tpu.contract_precision<fp32>} : vector<1x64xf32>, vector<64x32xf32>, vector<1x32xf32> -> vector<1x32xf32>
    %c0_126 = arith.constant 0 : index
    %c0_127 = arith.constant 0 : index
    %280 = vector.load %arg30[%c0_126, %c0_127] : memref<1x32xf32, #tpu.memory_space<vmem>>, vector<1x32xf32>
    %281 = arith.addf %279, %280 : vector<1x32xf32>
    %cst_128 = arith.constant dense<0.000000e+00> : vector<32xf32>
    %282 = vector.multi_reduction <add>, %281, %cst_128 [0] : vector<1x32xf32> to vector<32xf32>
    %283 = vector.shape_cast %282 : vector<32xf32> to vector<1x32xf32>
    %284 = arith.mulf %281, %281 : vector<1x32xf32>
    %cst_129 = arith.constant dense<0.000000e+00> : vector<32xf32>
    %285 = vector.multi_reduction <add>, %284, %cst_129 [0] : vector<1x32xf32> to vector<32xf32>
    %286 = vector.shape_cast %285 : vector<32xf32> to vector<1x32xf32>
    %287 = tpu.concatenate %283, %286 in 0 : vector<1x32xf32>, vector<1x32xf32> -> vector<2x32xf32>
    %cst_130 = arith.constant dense<0.000000e+00> : vector<2x32xf32>
    %288 = tpu.matmul %287, %74, %cst_130 {dimension_numbers = #tpu.dot_dimension_numbers<[1], [0], [0], [1], [0, 0, 1, 1], [], []>, precision = #tpu.contract_precision<fp32>} : vector<2x32xf32>, vector<32x32xf32>, vector<2x32xf32> -> vector<2x32xf32>
    %cst_131 = arith.constant 2.000000e+00 : f32
    %289 = vector.broadcast %cst_131 : f32 to vector<2x32xf32>
    %290 = arith.divf %288, %289 : vector<2x32xf32>
    %291 = vector.extract_strided_slice %290 {offsets = [0, 0], sizes = [1, 32], strides = [1, 1]} : vector<2x32xf32> to vector<1x32xf32>
    %292 = vector.extract_strided_slice %290 {offsets = [1, 0], sizes = [1, 32], strides = [1, 1]} : vector<2x32xf32> to vector<1x32xf32>
    %293 = arith.mulf %291, %291 : vector<1x32xf32>
    %294 = arith.subf %292, %293 : vector<1x32xf32>
    %cst_132 = arith.constant 9.99999974E-6 : f32
    %295 = vector.broadcast %cst_132 : f32 to vector<1x32xf32>
    %296 = arith.addf %294, %295 : vector<1x32xf32>
    %297 = math.rsqrt %296 : vector<1x32xf32>
    %c0_133 = arith.constant 0 : index
    %c0_134 = arith.constant 0 : index
    %298 = vector.load %arg31[%c0_133, %c0_134] : memref<1x32xf32, #tpu.memory_space<vmem>>, vector<1x32xf32>
    %299 = arith.mulf %297, %298 : vector<1x32xf32>
    %c0_135 = arith.constant 0 : index
    %c0_136 = arith.constant 0 : index
    %300 = vector.load %arg32[%c0_135, %c0_136] : memref<1x32xf32, #tpu.memory_space<vmem>>, vector<1x32xf32>
    %301 = arith.mulf %291, %299 : vector<1x32xf32>
    %302 = arith.subf %300, %301 : vector<1x32xf32>
    %303 = arith.mulf %281, %299 : vector<1x32xf32>
    %304 = arith.addf %303, %302 : vector<1x32xf32>
    %cst_137 = arith.constant 0.000000e+00 : f32
    %305 = vector.broadcast %cst_137 : f32 to vector<1x32xf32>
    %306 = arith.maximumf %304, %305 : vector<1x32xf32>
    %c0_138 = arith.constant 0 : index
    %c0_139 = arith.constant 0 : index
    %307 = vector.load %arg33[%c0_138, %c0_139] : memref<32x16xf32, #tpu.memory_space<vmem>>, vector<32x16xf32>
    %cst_140 = arith.constant dense<0.000000e+00> : vector<1x16xf32>
    %308 = tpu.matmul %306, %307, %cst_140 {dimension_numbers = #tpu.dot_dimension_numbers<[1], [0], [0], [1], [0, 0, 1, 1], [], []>, precision = #tpu.contract_precision<fp32>} : vector<1x32xf32>, vector<32x16xf32>, vector<1x16xf32> -> vector<1x16xf32>
    %c0_141 = arith.constant 0 : index
    %c0_142 = arith.constant 0 : index
    %309 = vector.load %arg34[%c0_141, %c0_142] : memref<1x16xf32, #tpu.memory_space<vmem>>, vector<1x16xf32>
    %310 = arith.addf %308, %309 : vector<1x16xf32>
    %c0_143 = arith.constant 0 : index
    %c0_144 = arith.constant 0 : index
    %311 = vector.load %arg35[%c0_143, %c0_144] : memref<64x32xf32, #tpu.memory_space<vmem>>, vector<64x32xf32>
    %cst_145 = arith.constant dense<0.000000e+00> : vector<16x32xf32>
    %312 = tpu.matmul %275, %311, %cst_145 {dimension_numbers = #tpu.dot_dimension_numbers<[1], [0], [0], [1], [0, 0, 1, 1], [], []>, precision = #tpu.contract_precision<fp32>} : vector<16x64xf32>, vector<64x32xf32>, vector<16x32xf32> -> vector<16x32xf32>
    %c0_146 = arith.constant 0 : index
    %c0_147 = arith.constant 0 : index
    %313 = vector.load %arg36[%c0_146, %c0_147] : memref<16x32xf32, #tpu.memory_space<vmem>>, vector<16x32xf32>
    %cst_148 = arith.constant dense<0.000000e+00> : vector<1x32xf32>
    %314 = tpu.matmul %310, %313, %cst_148 {dimension_numbers = #tpu.dot_dimension_numbers<[1], [0], [0], [1], [0, 0, 1, 1], [], []>, precision = #tpu.contract_precision<fp32>} : vector<1x16xf32>, vector<16x32xf32>, vector<1x32xf32> -> vector<1x32xf32>
    %315 = vector.broadcast %314 : vector<1x32xf32> to vector<16x32xf32>
    %316 = arith.addf %312, %315 : vector<16x32xf32>
    %c0_149 = arith.constant 0 : index
    %c0_150 = arith.constant 0 : index
    %317 = vector.load %arg37[%c0_149, %c0_150] : memref<1x32xf32, #tpu.memory_space<vmem>>, vector<1x32xf32>
    %318 = vector.broadcast %317 : vector<1x32xf32> to vector<16x32xf32>
    %319 = arith.addf %316, %318 : vector<16x32xf32>
    %cst_151 = arith.constant dense<0.000000e+00> : vector<32xf32>
    %320 = vector.multi_reduction <add>, %319, %cst_151 [0] : vector<16x32xf32> to vector<32xf32>
    %321 = vector.shape_cast %320 : vector<32xf32> to vector<1x32xf32>
    %322 = arith.mulf %319, %319 : vector<16x32xf32>
    %cst_152 = arith.constant dense<0.000000e+00> : vector<32xf32>
    %323 = vector.multi_reduction <add>, %322, %cst_152 [0] : vector<16x32xf32> to vector<32xf32>
    %324 = vector.shape_cast %323 : vector<32xf32> to vector<1x32xf32>
    %325 = tpu.concatenate %321, %324 in 0 : vector<1x32xf32>, vector<1x32xf32> -> vector<2x32xf32>
    %cst_153 = arith.constant dense<0.000000e+00> : vector<2x32xf32>
    %326 = tpu.matmul %325, %74, %cst_153 {dimension_numbers = #tpu.dot_dimension_numbers<[1], [0], [0], [1], [0, 0, 1, 1], [], []>, precision = #tpu.contract_precision<fp32>} : vector<2x32xf32>, vector<32x32xf32>, vector<2x32xf32> -> vector<2x32xf32>
    %cst_154 = arith.constant 3.200000e+01 : f32
    %327 = vector.broadcast %cst_154 : f32 to vector<2x32xf32>
    %328 = arith.divf %326, %327 : vector<2x32xf32>
    %329 = vector.extract_strided_slice %328 {offsets = [0, 0], sizes = [1, 32], strides = [1, 1]} : vector<2x32xf32> to vector<1x32xf32>
    %330 = vector.extract_strided_slice %328 {offsets = [1, 0], sizes = [1, 32], strides = [1, 1]} : vector<2x32xf32> to vector<1x32xf32>
    %331 = arith.mulf %329, %329 : vector<1x32xf32>
    %332 = arith.subf %330, %331 : vector<1x32xf32>
    %cst_155 = arith.constant 9.99999974E-6 : f32
    %333 = vector.broadcast %cst_155 : f32 to vector<1x32xf32>
    %334 = arith.addf %332, %333 : vector<1x32xf32>
    %335 = math.rsqrt %334 : vector<1x32xf32>
    %c0_156 = arith.constant 0 : index
    %c0_157 = arith.constant 0 : index
    %336 = vector.load %arg38[%c0_156, %c0_157] : memref<1x32xf32, #tpu.memory_space<vmem>>, vector<1x32xf32>
    %337 = arith.mulf %335, %336 : vector<1x32xf32>
    %c0_158 = arith.constant 0 : index
    %c0_159 = arith.constant 0 : index
    %338 = vector.load %arg39[%c0_158, %c0_159] : memref<1x32xf32, #tpu.memory_space<vmem>>, vector<1x32xf32>
    %339 = arith.mulf %329, %337 : vector<1x32xf32>
    %340 = arith.subf %338, %339 : vector<1x32xf32>
    %341 = vector.broadcast %337 : vector<1x32xf32> to vector<16x32xf32>
    %342 = arith.mulf %319, %341 : vector<16x32xf32>
    %343 = vector.broadcast %340 : vector<1x32xf32> to vector<16x32xf32>
    %344 = arith.addf %342, %343 : vector<16x32xf32>
    %cst_160 = arith.constant 0.000000e+00 : f32
    %345 = vector.broadcast %cst_160 : f32 to vector<16x32xf32>
    %346 = arith.maximumf %344, %345 : vector<16x32xf32>
    %c0_161 = arith.constant 0 : index
    %c0_162 = arith.constant 0 : index
    %347 = vector.load %arg40[%c0_161, %c0_162] : memref<32x16xf32, #tpu.memory_space<vmem>>, vector<32x16xf32>
    %cst_163 = arith.constant dense<0.000000e+00> : vector<16x16xf32>
    %348 = tpu.matmul %346, %347, %cst_163 {dimension_numbers = #tpu.dot_dimension_numbers<[1], [0], [0], [1], [0, 0, 1, 1], [], []>, precision = #tpu.contract_precision<fp32>} : vector<16x32xf32>, vector<32x16xf32>, vector<16x16xf32> -> vector<16x16xf32>
    %c0_164 = arith.constant 0 : index
    %c0_165 = arith.constant 0 : index
    %349 = vector.load %arg41[%c0_164, %c0_165] : memref<1x16xf32, #tpu.memory_space<vmem>>, vector<1x16xf32>
    %350 = vector.broadcast %349 : vector<1x16xf32> to vector<16x16xf32>
    %351 = arith.addf %348, %350 : vector<16x16xf32>
    %cst_166 = arith.constant dense<0.000000e+00> : vector<16xf32>
    %352 = vector.multi_reduction <add>, %351, %cst_166 [0] : vector<16x16xf32> to vector<16xf32>
    %353 = vector.shape_cast %352 : vector<16xf32> to vector<1x16xf32>
    %354 = arith.mulf %351, %351 : vector<16x16xf32>
    %cst_167 = arith.constant dense<0.000000e+00> : vector<16xf32>
    %355 = vector.multi_reduction <add>, %354, %cst_167 [0] : vector<16x16xf32> to vector<16xf32>
    %356 = vector.shape_cast %355 : vector<16xf32> to vector<1x16xf32>
    %357 = tpu.concatenate %353, %356 in 0 : vector<1x16xf32>, vector<1x16xf32> -> vector<2x16xf32>
    %cst_168 = arith.constant dense<0.000000e+00> : vector<2x16xf32>
    %358 = tpu.matmul %357, %32, %cst_168 {dimension_numbers = #tpu.dot_dimension_numbers<[1], [0], [0], [1], [0, 0, 1, 1], [], []>, precision = #tpu.contract_precision<fp32>} : vector<2x16xf32>, vector<16x16xf32>, vector<2x16xf32> -> vector<2x16xf32>
    %cst_169 = arith.constant 3.200000e+01 : f32
    %359 = vector.broadcast %cst_169 : f32 to vector<2x16xf32>
    %360 = arith.divf %358, %359 : vector<2x16xf32>
    %361 = vector.extract_strided_slice %360 {offsets = [0, 0], sizes = [1, 16], strides = [1, 1]} : vector<2x16xf32> to vector<1x16xf32>
    %362 = vector.extract_strided_slice %360 {offsets = [1, 0], sizes = [1, 16], strides = [1, 1]} : vector<2x16xf32> to vector<1x16xf32>
    %363 = arith.mulf %361, %361 : vector<1x16xf32>
    %364 = arith.subf %362, %363 : vector<1x16xf32>
    %cst_170 = arith.constant 9.99999974E-6 : f32
    %365 = vector.broadcast %cst_170 : f32 to vector<1x16xf32>
    %366 = arith.addf %364, %365 : vector<1x16xf32>
    %367 = math.rsqrt %366 : vector<1x16xf32>
    %c0_171 = arith.constant 0 : index
    %c0_172 = arith.constant 0 : index
    %368 = vector.load %arg42[%c0_171, %c0_172] : memref<1x16xf32, #tpu.memory_space<vmem>>, vector<1x16xf32>
    %369 = arith.mulf %367, %368 : vector<1x16xf32>
    %c0_173 = arith.constant 0 : index
    %c0_174 = arith.constant 0 : index
    %370 = vector.load %arg43[%c0_173, %c0_174] : memref<1x16xf32, #tpu.memory_space<vmem>>, vector<1x16xf32>
    %371 = arith.mulf %361, %369 : vector<1x16xf32>
    %372 = arith.subf %370, %371 : vector<1x16xf32>
    %373 = vector.broadcast %369 : vector<1x16xf32> to vector<16x16xf32>
    %374 = arith.mulf %351, %373 : vector<16x16xf32>
    %375 = vector.broadcast %372 : vector<1x16xf32> to vector<16x16xf32>
    %376 = arith.addf %374, %375 : vector<16x16xf32>
    %c0_175 = arith.constant 0 : index
    %c0_176 = arith.constant 0 : index
    %c0_177 = arith.constant 0 : index
    %377 = vector.load %arg44[%c0_175, %c0_176, %c0_177] : memref<2x16x16xf32, #tpu.memory_space<vmem>>, vector<1x16x16xf32>
    %378 = vector.shape_cast %377 : vector<1x16x16xf32> to vector<16x16xf32>
    %379 = vector.shape_cast %376 : vector<16x16xf32> to vector<1x16x16xf32>
    tpu.vector_store %arg44[%c0_175, %c0_176, %c0_177], %379 {strides = array<i32>} : memref<2x16x16xf32, #tpu.memory_space<vmem>>, vector<1x16x16xf32>,
    %c1_178 = arith.constant 1 : index
    %c0_179 = arith.constant 0 : index
    %c0_180 = arith.constant 0 : index
    %380 = vector.load %arg0[%c1_178, %c0_179, %c0_180] : memref<2x16x3xf32, #tpu.memory_space<vmem>>, vector<1x16x3xf32>
    %381 = vector.shape_cast %380 : vector<1x16x3xf32> to vector<16x3xf32>
    %c1_181 = arith.constant 1 : index
    %c0_182 = arith.constant 0 : index
    %c0_183 = arith.constant 0 : index
    %382 = vector.load %arg1[%c1_181, %c0_182, %c0_183] : memref<2x16x5xf32, #tpu.memory_space<vmem>>, vector<1x16x5xf32>
    %383 = vector.shape_cast %382 : vector<1x16x5xf32> to vector<16x5xf32>
    %cst_184 = arith.constant dense<0.000000e+00> : vector<3xf32>
    %384 = vector.multi_reduction <add>, %381, %cst_184 [0] : vector<16x3xf32> to vector<3xf32>
    %385 = vector.shape_cast %384 : vector<3xf32> to vector<1x3xf32>
    %cst_185 = arith.constant 1.600000e+01 : f32
    %386 = vector.broadcast %cst_185 : f32 to vector<1x3xf32>
    %387 = arith.divf %385, %386 : vector<1x3xf32>
    %388 = vector.broadcast %387 : vector<1x3xf32> to vector<16x3xf32>
    %389 = arith.subf %381, %388 : vector<16x3xf32>
    %390 = arith.mulf %383, %383 : vector<16x5xf32>
    %cst_186 = arith.constant dense<0.000000e+00> : vector<16xf32>
    %391 = vector.multi_reduction <add>, %390, %cst_186 [1] : vector<16x5xf32> to vector<16xf32>
    %392 = vector.shape_cast %391 : vector<16xf32> to vector<16x1xf32>
    %393 = math.sqrt %392 : vector<16x1xf32>
    %cst_187 = arith.constant 9.99999996E-13 : f32
    %394 = vector.broadcast %cst_187 : f32 to vector<16x1xf32>
    %395 = arith.maximumf %393, %394 : vector<16x1xf32>
    %396 = vector.broadcast %395 : vector<16x1xf32> to vector<16x5xf32>
    %397 = arith.divf %383, %396 : vector<16x5xf32>
    %c0_188 = arith.constant 0 : index
    %c0_189 = arith.constant 0 : index
    %398 = vector.load %arg2[%c0_188, %c0_189] : memref<3x16xf32, #tpu.memory_space<vmem>>, vector<3x16xf32>
    %cst_190 = arith.constant dense<0.000000e+00> : vector<16x16xf32>
    %399 = tpu.matmul %389, %398, %cst_190 {dimension_numbers = #tpu.dot_dimension_numbers<[1], [0], [0], [1], [0, 0, 1, 1], [], []>, precision = #tpu.contract_precision<fp32>} : vector<16x3xf32>, vector<3x16xf32>, vector<16x16xf32> -> vector<16x16xf32>
    %c0_191 = arith.constant 0 : index
    %c0_192 = arith.constant 0 : index
    %400 = vector.load %arg3[%c0_191, %c0_192] : memref<1x16xf32, #tpu.memory_space<vmem>>, vector<1x16xf32>
    %401 = vector.broadcast %400 : vector<1x16xf32> to vector<16x16xf32>
    %402 = arith.addf %399, %401 : vector<16x16xf32>
    %cst_193 = arith.constant dense<0.000000e+00> : vector<16xf32>
    %403 = vector.multi_reduction <add>, %402, %cst_193 [0] : vector<16x16xf32> to vector<16xf32>
    %404 = vector.shape_cast %403 : vector<16xf32> to vector<1x16xf32>
    %405 = arith.mulf %402, %402 : vector<16x16xf32>
    %cst_194 = arith.constant dense<0.000000e+00> : vector<16xf32>
    %406 = vector.multi_reduction <add>, %405, %cst_194 [0] : vector<16x16xf32> to vector<16xf32>
    %407 = vector.shape_cast %406 : vector<16xf32> to vector<1x16xf32>
    %408 = tpu.concatenate %404, %407 in 0 : vector<1x16xf32>, vector<1x16xf32> -> vector<2x16xf32>
    %cst_195 = arith.constant dense<0.000000e+00> : vector<2x16xf32>
    %409 = tpu.matmul %408, %32, %cst_195 {dimension_numbers = #tpu.dot_dimension_numbers<[1], [0], [0], [1], [0, 0, 1, 1], [], []>, precision = #tpu.contract_precision<fp32>} : vector<2x16xf32>, vector<16x16xf32>, vector<2x16xf32> -> vector<2x16xf32>
    %cst_196 = arith.constant 3.200000e+01 : f32
    %410 = vector.broadcast %cst_196 : f32 to vector<2x16xf32>
    %411 = arith.divf %409, %410 : vector<2x16xf32>
    %412 = vector.extract_strided_slice %411 {offsets = [0, 0], sizes = [1, 16], strides = [1, 1]} : vector<2x16xf32> to vector<1x16xf32>
    %413 = vector.extract_strided_slice %411 {offsets = [1, 0], sizes = [1, 16], strides = [1, 1]} : vector<2x16xf32> to vector<1x16xf32>
    %414 = arith.mulf %412, %412 : vector<1x16xf32>
    %415 = arith.subf %413, %414 : vector<1x16xf32>
    %cst_197 = arith.constant 9.99999974E-6 : f32
    %416 = vector.broadcast %cst_197 : f32 to vector<1x16xf32>
    %417 = arith.addf %415, %416 : vector<1x16xf32>
    %418 = math.rsqrt %417 : vector<1x16xf32>
    %c0_198 = arith.constant 0 : index
    %c0_199 = arith.constant 0 : index
    %419 = vector.load %arg4[%c0_198, %c0_199] : memref<1x16xf32, #tpu.memory_space<vmem>>, vector<1x16xf32>
    %420 = arith.mulf %418, %419 : vector<1x16xf32>
    %c0_200 = arith.constant 0 : index
    %c0_201 = arith.constant 0 : index
    %421 = vector.load %arg5[%c0_200, %c0_201] : memref<1x16xf32, #tpu.memory_space<vmem>>, vector<1x16xf32>
    %422 = arith.mulf %412, %420 : vector<1x16xf32>
    %423 = arith.subf %421, %422 : vector<1x16xf32>
    %424 = vector.broadcast %420 : vector<1x16xf32> to vector<16x16xf32>
    %425 = arith.mulf %402, %424 : vector<16x16xf32>
    %426 = vector.broadcast %423 : vector<1x16xf32> to vector<16x16xf32>
    %427 = arith.addf %425, %426 : vector<16x16xf32>
    %cst_202 = arith.constant 0.000000e+00 : f32
    %428 = vector.broadcast %cst_202 : f32 to vector<16x16xf32>
    %429 = arith.maximumf %427, %428 : vector<16x16xf32>
    %c0_203 = arith.constant 0 : index
    %c0_204 = arith.constant 0 : index
    %430 = vector.load %arg6[%c0_203, %c0_204] : memref<16x32xf32, #tpu.memory_space<vmem>>, vector<16x32xf32>
    %cst_205 = arith.constant dense<0.000000e+00> : vector<16x32xf32>
    %431 = tpu.matmul %429, %430, %cst_205 {dimension_numbers = #tpu.dot_dimension_numbers<[1], [0], [0], [1], [0, 0, 1, 1], [], []>, precision = #tpu.contract_precision<fp32>} : vector<16x16xf32>, vector<16x32xf32>, vector<16x32xf32> -> vector<16x32xf32>
    %c0_206 = arith.constant 0 : index
    %c0_207 = arith.constant 0 : index
    %432 = vector.load %arg7[%c0_206, %c0_207] : memref<1x32xf32, #tpu.memory_space<vmem>>, vector<1x32xf32>
    %433 = vector.broadcast %432 : vector<1x32xf32> to vector<16x32xf32>
    %434 = arith.addf %431, %433 : vector<16x32xf32>
    %cst_208 = arith.constant dense<0.000000e+00> : vector<32xf32>
    %435 = vector.multi_reduction <add>, %434, %cst_208 [0] : vector<16x32xf32> to vector<32xf32>
    %436 = vector.shape_cast %435 : vector<32xf32> to vector<1x32xf32>
    %437 = arith.mulf %434, %434 : vector<16x32xf32>
    %cst_209 = arith.constant dense<0.000000e+00> : vector<32xf32>
    %438 = vector.multi_reduction <add>, %437, %cst_209 [0] : vector<16x32xf32> to vector<32xf32>
    %439 = vector.shape_cast %438 : vector<32xf32> to vector<1x32xf32>
    %440 = tpu.concatenate %436, %439 in 0 : vector<1x32xf32>, vector<1x32xf32> -> vector<2x32xf32>
    %cst_210 = arith.constant dense<0.000000e+00> : vector<2x32xf32>
    %441 = tpu.matmul %440, %74, %cst_210 {dimension_numbers = #tpu.dot_dimension_numbers<[1], [0], [0], [1], [0, 0, 1, 1], [], []>, precision = #tpu.contract_precision<fp32>} : vector<2x32xf32>, vector<32x32xf32>, vector<2x32xf32> -> vector<2x32xf32>
    %cst_211 = arith.constant 3.200000e+01 : f32
    %442 = vector.broadcast %cst_211 : f32 to vector<2x32xf32>
    %443 = arith.divf %441, %442 : vector<2x32xf32>
    %444 = vector.extract_strided_slice %443 {offsets = [0, 0], sizes = [1, 32], strides = [1, 1]} : vector<2x32xf32> to vector<1x32xf32>
    %445 = vector.extract_strided_slice %443 {offsets = [1, 0], sizes = [1, 32], strides = [1, 1]} : vector<2x32xf32> to vector<1x32xf32>
    %446 = arith.mulf %444, %444 : vector<1x32xf32>
    %447 = arith.subf %445, %446 : vector<1x32xf32>
    %cst_212 = arith.constant 9.99999974E-6 : f32
    %448 = vector.broadcast %cst_212 : f32 to vector<1x32xf32>
    %449 = arith.addf %447, %448 : vector<1x32xf32>
    %450 = math.rsqrt %449 : vector<1x32xf32>
    %c0_213 = arith.constant 0 : index
    %c0_214 = arith.constant 0 : index
    %451 = vector.load %arg8[%c0_213, %c0_214] : memref<1x32xf32, #tpu.memory_space<vmem>>, vector<1x32xf32>
    %452 = arith.mulf %450, %451 : vector<1x32xf32>
    %c0_215 = arith.constant 0 : index
    %c0_216 = arith.constant 0 : index
    %453 = vector.load %arg9[%c0_215, %c0_216] : memref<1x32xf32, #tpu.memory_space<vmem>>, vector<1x32xf32>
    %454 = arith.mulf %444, %452 : vector<1x32xf32>
    %455 = arith.subf %453, %454 : vector<1x32xf32>
    %456 = vector.broadcast %452 : vector<1x32xf32> to vector<16x32xf32>
    %457 = arith.mulf %434, %456 : vector<16x32xf32>
    %458 = vector.broadcast %455 : vector<1x32xf32> to vector<16x32xf32>
    %459 = arith.addf %457, %458 : vector<16x32xf32>
    %cst_217 = arith.constant 0.000000e+00 : f32
    %460 = vector.broadcast %cst_217 : f32 to vector<16x32xf32>
    %461 = arith.maximumf %459, %460 : vector<16x32xf32>
    %cst_218 = arith.constant dense<0xFF800000> : vector<32xf32>
    %462 = vector.multi_reduction <maximumf>, %461, %cst_218 [0] : vector<16x32xf32> to vector<32xf32>
    %463 = vector.shape_cast %462 : vector<32xf32> to vector<1x32xf32>
    %c0_219 = arith.constant 0 : index
    %c0_220 = arith.constant 0 : index
    %464 = vector.load %arg10[%c0_219, %c0_220] : memref<32x32xf32, #tpu.memory_space<vmem>>, vector<32x32xf32>
    %cst_221 = arith.constant dense<0.000000e+00> : vector<1x32xf32>
    %465 = tpu.matmul %463, %464, %cst_221 {dimension_numbers = #tpu.dot_dimension_numbers<[1], [0], [0], [1], [0, 0, 1, 1], [], []>, precision = #tpu.contract_precision<fp32>} : vector<1x32xf32>, vector<32x32xf32>, vector<1x32xf32> -> vector<1x32xf32>
    %c0_222 = arith.constant 0 : index
    %c0_223 = arith.constant 0 : index
    %466 = vector.load %arg11[%c0_222, %c0_223] : memref<1x32xf32, #tpu.memory_space<vmem>>, vector<1x32xf32>
    %467 = arith.addf %465, %466 : vector<1x32xf32>
    %cst_224 = arith.constant dense<0.000000e+00> : vector<32xf32>
    %468 = vector.multi_reduction <add>, %467, %cst_224 [0] : vector<1x32xf32> to vector<32xf32>
    %469 = vector.shape_cast %468 : vector<32xf32> to vector<1x32xf32>
    %470 = arith.mulf %467, %467 : vector<1x32xf32>
    %cst_225 = arith.constant dense<0.000000e+00> : vector<32xf32>
    %471 = vector.multi_reduction <add>, %470, %cst_225 [0] : vector<1x32xf32> to vector<32xf32>
    %472 = vector.shape_cast %471 : vector<32xf32> to vector<1x32xf32>
    %473 = tpu.concatenate %469, %472 in 0 : vector<1x32xf32>, vector<1x32xf32> -> vector<2x32xf32>
    %cst_226 = arith.constant dense<0.000000e+00> : vector<2x32xf32>
    %474 = tpu.matmul %473, %74, %cst_226 {dimension_numbers = #tpu.dot_dimension_numbers<[1], [0], [0], [1], [0, 0, 1, 1], [], []>, precision = #tpu.contract_precision<fp32>} : vector<2x32xf32>, vector<32x32xf32>, vector<2x32xf32> -> vector<2x32xf32>
    %cst_227 = arith.constant 2.000000e+00 : f32
    %475 = vector.broadcast %cst_227 : f32 to vector<2x32xf32>
    %476 = arith.divf %474, %475 : vector<2x32xf32>
    %477 = vector.extract_strided_slice %476 {offsets = [0, 0], sizes = [1, 32], strides = [1, 1]} : vector<2x32xf32> to vector<1x32xf32>
    %478 = vector.extract_strided_slice %476 {offsets = [1, 0], sizes = [1, 32], strides = [1, 1]} : vector<2x32xf32> to vector<1x32xf32>
    %479 = arith.mulf %477, %477 : vector<1x32xf32>
    %480 = arith.subf %478, %479 : vector<1x32xf32>
    %cst_228 = arith.constant 9.99999974E-6 : f32
    %481 = vector.broadcast %cst_228 : f32 to vector<1x32xf32>
    %482 = arith.addf %480, %481 : vector<1x32xf32>
    %483 = math.rsqrt %482 : vector<1x32xf32>
    %c0_229 = arith.constant 0 : index
    %c0_230 = arith.constant 0 : index
    %484 = vector.load %arg12[%c0_229, %c0_230] : memref<1x32xf32, #tpu.memory_space<vmem>>, vector<1x32xf32>
    %485 = arith.mulf %483, %484 : vector<1x32xf32>
    %c0_231 = arith.constant 0 : index
    %c0_232 = arith.constant 0 : index
    %486 = vector.load %arg13[%c0_231, %c0_232] : memref<1x32xf32, #tpu.memory_space<vmem>>, vector<1x32xf32>
    %487 = arith.mulf %477, %485 : vector<1x32xf32>
    %488 = arith.subf %486, %487 : vector<1x32xf32>
    %489 = arith.mulf %467, %485 : vector<1x32xf32>
    %490 = arith.addf %489, %488 : vector<1x32xf32>
    %cst_233 = arith.constant 0.000000e+00 : f32
    %491 = vector.broadcast %cst_233 : f32 to vector<1x32xf32>
    %492 = arith.maximumf %490, %491 : vector<1x32xf32>
    %c0_234 = arith.constant 0 : index
    %c0_235 = arith.constant 0 : index
    %493 = vector.load %arg14[%c0_234, %c0_235] : memref<32x16xf32, #tpu.memory_space<vmem>>, vector<32x16xf32>
    %cst_236 = arith.constant dense<0.000000e+00> : vector<1x16xf32>
    %494 = tpu.matmul %492, %493, %cst_236 {dimension_numbers = #tpu.dot_dimension_numbers<[1], [0], [0], [1], [0, 0, 1, 1], [], []>, precision = #tpu.contract_precision<fp32>} : vector<1x32xf32>, vector<32x16xf32>, vector<1x16xf32> -> vector<1x16xf32>
    %c0_237 = arith.constant 0 : index
    %c0_238 = arith.constant 0 : index
    %495 = vector.load %arg15[%c0_237, %c0_238] : memref<1x16xf32, #tpu.memory_space<vmem>>, vector<1x16xf32>
    %496 = arith.addf %494, %495 : vector<1x16xf32>
    %cst_239 = arith.constant dense<0.000000e+00> : vector<16xf32>
    %497 = vector.multi_reduction <add>, %496, %cst_239 [0] : vector<1x16xf32> to vector<16xf32>
    %498 = vector.shape_cast %497 : vector<16xf32> to vector<1x16xf32>
    %499 = arith.mulf %496, %496 : vector<1x16xf32>
    %cst_240 = arith.constant dense<0.000000e+00> : vector<16xf32>
    %500 = vector.multi_reduction <add>, %499, %cst_240 [0] : vector<1x16xf32> to vector<16xf32>
    %501 = vector.shape_cast %500 : vector<16xf32> to vector<1x16xf32>
    %502 = tpu.concatenate %498, %501 in 0 : vector<1x16xf32>, vector<1x16xf32> -> vector<2x16xf32>
    %cst_241 = arith.constant dense<0.000000e+00> : vector<2x16xf32>
    %503 = tpu.matmul %502, %32, %cst_241 {dimension_numbers = #tpu.dot_dimension_numbers<[1], [0], [0], [1], [0, 0, 1, 1], [], []>, precision = #tpu.contract_precision<fp32>} : vector<2x16xf32>, vector<16x16xf32>, vector<2x16xf32> -> vector<2x16xf32>
    %cst_242 = arith.constant 2.000000e+00 : f32
    %504 = vector.broadcast %cst_242 : f32 to vector<2x16xf32>
    %505 = arith.divf %503, %504 : vector<2x16xf32>
    %506 = vector.extract_strided_slice %505 {offsets = [0, 0], sizes = [1, 16], strides = [1, 1]} : vector<2x16xf32> to vector<1x16xf32>
    %507 = vector.extract_strided_slice %505 {offsets = [1, 0], sizes = [1, 16], strides = [1, 1]} : vector<2x16xf32> to vector<1x16xf32>
    %508 = arith.mulf %506, %506 : vector<1x16xf32>
    %509 = arith.subf %507, %508 : vector<1x16xf32>
    %cst_243 = arith.constant 9.99999974E-6 : f32
    %510 = vector.broadcast %cst_243 : f32 to vector<1x16xf32>
    %511 = arith.addf %509, %510 : vector<1x16xf32>
    %512 = math.rsqrt %511 : vector<1x16xf32>
    %c0_244 = arith.constant 0 : index
    %c0_245 = arith.constant 0 : index
    %513 = vector.load %arg16[%c0_244, %c0_245] : memref<1x16xf32, #tpu.memory_space<vmem>>, vector<1x16xf32>
    %514 = arith.mulf %512, %513 : vector<1x16xf32>
    %c0_246 = arith.constant 0 : index
    %c0_247 = arith.constant 0 : index
    %515 = vector.load %arg17[%c0_246, %c0_247] : memref<1x16xf32, #tpu.memory_space<vmem>>, vector<1x16xf32>
    %516 = arith.mulf %506, %514 : vector<1x16xf32>
    %517 = arith.subf %515, %516 : vector<1x16xf32>
    %518 = arith.mulf %496, %514 : vector<1x16xf32>
    %519 = arith.addf %518, %517 : vector<1x16xf32>
    %cst_248 = arith.constant 0.000000e+00 : f32
    %520 = vector.broadcast %cst_248 : f32 to vector<1x16xf32>
    %521 = arith.maximumf %519, %520 : vector<1x16xf32>
    %c0_249 = arith.constant 0 : index
    %c0_250 = arith.constant 0 : index
    %522 = vector.load %arg18[%c0_249, %c0_250] : memref<16x9xf32, #tpu.memory_space<vmem>>, vector<16x9xf32>
    %cst_251 = arith.constant dense<0.000000e+00> : vector<1x9xf32>
    %523 = tpu.matmul %521, %522, %cst_251 {dimension_numbers = #tpu.dot_dimension_numbers<[1], [0], [0], [1], [0, 0, 1, 1], [], []>, precision = #tpu.contract_precision<fp32>} : vector<1x16xf32>, vector<16x9xf32>, vector<1x9xf32> -> vector<1x9xf32>
    %c0_252 = arith.constant 0 : index
    %c0_253 = arith.constant 0 : index
    %524 = vector.load %arg19[%c0_252, %c0_253] : memref<1x9xf32, #tpu.memory_space<vmem>>, vector<1x9xf32>
    %525 = arith.addf %523, %524 : vector<1x9xf32>
    %c0_254 = arith.constant 0 : index
    %c0_255 = arith.constant 0 : index
    %526 = vector.load %arg21[%c0_254, %c0_255] : memref<5x32xf32, #tpu.memory_space<vmem>>, vector<5x32xf32>
    %cst_256 = arith.constant dense<0.000000e+00> : vector<16x32xf32>
    %527 = tpu.matmul %397, %526, %cst_256 {dimension_numbers = #tpu.dot_dimension_numbers<[1], [0], [0], [1], [0, 0, 1, 1], [], []>, precision = #tpu.contract_precision<fp32>} : vector<16x5xf32>, vector<5x32xf32>, vector<16x32xf32> -> vector<16x32xf32>
    %c0_257 = arith.constant 0 : index
    %c0_258 = arith.constant 0 : index
    %528 = vector.load %arg22[%c0_257, %c0_258] : memref<1x32xf32, #tpu.memory_space<vmem>>, vector<1x32xf32>
    %529 = vector.broadcast %528 : vector<1x32xf32> to vector<16x32xf32>
    %530 = arith.addf %527, %529 : vector<16x32xf32>
    %531 = vector.extract_strided_slice %525 {offsets = [0, 0], sizes = [1, 3], strides = [1, 1]} : vector<1x9xf32> to vector<1x3xf32>
    %532 = vector.extract_strided_slice %389 {offsets = [0, 0], sizes = [16, 1], strides = [1, 1]} : vector<16x3xf32> to vector<16x1xf32>
    %533 = vector.broadcast %531 : vector<1x3xf32> to vector<16x3xf32>
    %534 = arith.mulf %389, %533 : vector<16x3xf32>
    %cst_259 = arith.constant dense<0.000000e+00> : vector<16xf32>
    %535 = vector.multi_reduction <add>, %534, %cst_259 [1] : vector<16x3xf32> to vector<16xf32>
    %536 = vector.shape_cast %535 : vector<16xf32> to vector<16x1xf32>
    %537 = arith.addf %532, %536 : vector<16x1xf32>
    %c0_260 = arith.constant 0 : index
    %c0_261 = arith.constant 0 : index
    %538 = vector.load %arg20[%c0_260, %c0_261] : memref<3x32xf32, #tpu.memory_space<vmem>>, vector<1x32xf32>
    %539 = vector.broadcast %537 : vector<16x1xf32> to vector<16x32xf32>
    %540 = vector.broadcast %538 : vector<1x32xf32> to vector<16x32xf32>
    %541 = arith.mulf %539, %540 : vector<16x32xf32>
    %542 = arith.addf %530, %541 : vector<16x32xf32>
    %543 = vector.extract_strided_slice %525 {offsets = [0, 3], sizes = [1, 3], strides = [1, 1]} : vector<1x9xf32> to vector<1x3xf32>
    %544 = vector.extract_strided_slice %389 {offsets = [0, 1], sizes = [16, 1], strides = [1, 1]} : vector<16x3xf32> to vector<16x1xf32>
    %545 = vector.broadcast %543 : vector<1x3xf32> to vector<16x3xf32>
    %546 = arith.mulf %389, %545 : vector<16x3xf32>
    %cst_262 = arith.constant dense<0.000000e+00> : vector<16xf32>
    %547 = vector.multi_reduction <add>, %546, %cst_262 [1] : vector<16x3xf32> to vector<16xf32>
    %548 = vector.shape_cast %547 : vector<16xf32> to vector<16x1xf32>
    %549 = arith.addf %544, %548 : vector<16x1xf32>
    %c1_263 = arith.constant 1 : index
    %c0_264 = arith.constant 0 : index
    %550 = vector.load %arg20[%c1_263, %c0_264] : memref<3x32xf32, #tpu.memory_space<vmem>>, vector<1x32xf32>
    %551 = vector.broadcast %549 : vector<16x1xf32> to vector<16x32xf32>
    %552 = vector.broadcast %550 : vector<1x32xf32> to vector<16x32xf32>
    %553 = arith.mulf %551, %552 : vector<16x32xf32>
    %554 = arith.addf %542, %553 : vector<16x32xf32>
    %555 = vector.extract_strided_slice %525 {offsets = [0, 6], sizes = [1, 3], strides = [1, 1]} : vector<1x9xf32> to vector<1x3xf32>
    %556 = vector.extract_strided_slice %389 {offsets = [0, 2], sizes = [16, 1], strides = [1, 1]} : vector<16x3xf32> to vector<16x1xf32>
    %557 = vector.broadcast %555 : vector<1x3xf32> to vector<16x3xf32>
    %558 = arith.mulf %389, %557 : vector<16x3xf32>
    %cst_265 = arith.constant dense<0.000000e+00> : vector<16xf32>
    %559 = vector.multi_reduction <add>, %558, %cst_265 [1] : vector<16x3xf32> to vector<16xf32>
    %560 = vector.shape_cast %559 : vector<16xf32> to vector<16x1xf32>
    %561 = arith.addf %556, %560 : vector<16x1xf32>
    %c2_266 = arith.constant 2 : index
    %c0_267 = arith.constant 0 : index
    %562 = vector.load %arg20[%c2_266, %c0_267] : memref<3x32xf32, #tpu.memory_space<vmem>>, vector<1x32xf32>
    %563 = vector.broadcast %561 : vector<16x1xf32> to vector<16x32xf32>
    %564 = vector.broadcast %562 : vector<1x32xf32> to vector<16x32xf32>
    %565 = arith.mulf %563, %564 : vector<16x32xf32>
    %566 = arith.addf %554, %565 : vector<16x32xf32>
    %cst_268 = arith.constant dense<0.000000e+00> : vector<32xf32>
    %567 = vector.multi_reduction <add>, %566, %cst_268 [0] : vector<16x32xf32> to vector<32xf32>
    %568 = vector.shape_cast %567 : vector<32xf32> to vector<1x32xf32>
    %569 = arith.mulf %566, %566 : vector<16x32xf32>
    %cst_269 = arith.constant dense<0.000000e+00> : vector<32xf32>
    %570 = vector.multi_reduction <add>, %569, %cst_269 [0] : vector<16x32xf32> to vector<32xf32>
    %571 = vector.shape_cast %570 : vector<32xf32> to vector<1x32xf32>
    %572 = tpu.concatenate %568, %571 in 0 : vector<1x32xf32>, vector<1x32xf32> -> vector<2x32xf32>
    %cst_270 = arith.constant dense<0.000000e+00> : vector<2x32xf32>
    %573 = tpu.matmul %572, %74, %cst_270 {dimension_numbers = #tpu.dot_dimension_numbers<[1], [0], [0], [1], [0, 0, 1, 1], [], []>, precision = #tpu.contract_precision<fp32>} : vector<2x32xf32>, vector<32x32xf32>, vector<2x32xf32> -> vector<2x32xf32>
    %cst_271 = arith.constant 3.200000e+01 : f32
    %574 = vector.broadcast %cst_271 : f32 to vector<2x32xf32>
    %575 = arith.divf %573, %574 : vector<2x32xf32>
    %576 = vector.extract_strided_slice %575 {offsets = [0, 0], sizes = [1, 32], strides = [1, 1]} : vector<2x32xf32> to vector<1x32xf32>
    %577 = vector.extract_strided_slice %575 {offsets = [1, 0], sizes = [1, 32], strides = [1, 1]} : vector<2x32xf32> to vector<1x32xf32>
    %578 = arith.mulf %576, %576 : vector<1x32xf32>
    %579 = arith.subf %577, %578 : vector<1x32xf32>
    %cst_272 = arith.constant 9.99999974E-6 : f32
    %580 = vector.broadcast %cst_272 : f32 to vector<1x32xf32>
    %581 = arith.addf %579, %580 : vector<1x32xf32>
    %582 = math.rsqrt %581 : vector<1x32xf32>
    %c0_273 = arith.constant 0 : index
    %c0_274 = arith.constant 0 : index
    %583 = vector.load %arg23[%c0_273, %c0_274] : memref<1x32xf32, #tpu.memory_space<vmem>>, vector<1x32xf32>
    %584 = arith.mulf %582, %583 : vector<1x32xf32>
    %c0_275 = arith.constant 0 : index
    %c0_276 = arith.constant 0 : index
    %585 = vector.load %arg24[%c0_275, %c0_276] : memref<1x32xf32, #tpu.memory_space<vmem>>, vector<1x32xf32>
    %586 = arith.mulf %576, %584 : vector<1x32xf32>
    %587 = arith.subf %585, %586 : vector<1x32xf32>
    %588 = vector.broadcast %584 : vector<1x32xf32> to vector<16x32xf32>
    %589 = arith.mulf %566, %588 : vector<16x32xf32>
    %590 = vector.broadcast %587 : vector<1x32xf32> to vector<16x32xf32>
    %591 = arith.addf %589, %590 : vector<16x32xf32>
    %cst_277 = arith.constant 0.000000e+00 : f32
    %592 = vector.broadcast %cst_277 : f32 to vector<16x32xf32>
    %593 = arith.maximumf %591, %592 : vector<16x32xf32>
    %c0_278 = arith.constant 0 : index
    %c0_279 = arith.constant 0 : index
    %594 = vector.load %arg25[%c0_278, %c0_279] : memref<32x64xf32, #tpu.memory_space<vmem>>, vector<32x64xf32>
    %cst_280 = arith.constant dense<0.000000e+00> : vector<16x64xf32>
    %595 = tpu.matmul %593, %594, %cst_280 {dimension_numbers = #tpu.dot_dimension_numbers<[1], [0], [0], [1], [0, 0, 1, 1], [], []>, precision = #tpu.contract_precision<fp32>} : vector<16x32xf32>, vector<32x64xf32>, vector<16x64xf32> -> vector<16x64xf32>
    %c0_281 = arith.constant 0 : index
    %c0_282 = arith.constant 0 : index
    %596 = vector.load %arg26[%c0_281, %c0_282] : memref<1x64xf32, #tpu.memory_space<vmem>>, vector<1x64xf32>
    %597 = vector.broadcast %596 : vector<1x64xf32> to vector<16x64xf32>
    %598 = arith.addf %595, %597 : vector<16x64xf32>
    %cst_283 = arith.constant dense<0.000000e+00> : vector<64xf32>
    %599 = vector.multi_reduction <add>, %598, %cst_283 [0] : vector<16x64xf32> to vector<64xf32>
    %600 = vector.shape_cast %599 : vector<64xf32> to vector<1x64xf32>
    %601 = arith.mulf %598, %598 : vector<16x64xf32>
    %cst_284 = arith.constant dense<0.000000e+00> : vector<64xf32>
    %602 = vector.multi_reduction <add>, %601, %cst_284 [0] : vector<16x64xf32> to vector<64xf32>
    %603 = vector.shape_cast %602 : vector<64xf32> to vector<1x64xf32>
    %604 = tpu.concatenate %600, %603 in 0 : vector<1x64xf32>, vector<1x64xf32> -> vector<2x64xf32>
    %cst_285 = arith.constant dense<0.000000e+00> : vector<2x64xf32>
    %605 = tpu.matmul %604, %248, %cst_285 {dimension_numbers = #tpu.dot_dimension_numbers<[1], [0], [0], [1], [0, 0, 1, 1], [], []>, precision = #tpu.contract_precision<fp32>} : vector<2x64xf32>, vector<64x64xf32>, vector<2x64xf32> -> vector<2x64xf32>
    %cst_286 = arith.constant 3.200000e+01 : f32
    %606 = vector.broadcast %cst_286 : f32 to vector<2x64xf32>
    %607 = arith.divf %605, %606 : vector<2x64xf32>
    %608 = vector.extract_strided_slice %607 {offsets = [0, 0], sizes = [1, 64], strides = [1, 1]} : vector<2x64xf32> to vector<1x64xf32>
    %609 = vector.extract_strided_slice %607 {offsets = [1, 0], sizes = [1, 64], strides = [1, 1]} : vector<2x64xf32> to vector<1x64xf32>
    %610 = arith.mulf %608, %608 : vector<1x64xf32>
    %611 = arith.subf %609, %610 : vector<1x64xf32>
    %cst_287 = arith.constant 9.99999974E-6 : f32
    %612 = vector.broadcast %cst_287 : f32 to vector<1x64xf32>
    %613 = arith.addf %611, %612 : vector<1x64xf32>
    %614 = math.rsqrt %613 : vector<1x64xf32>
    %c0_288 = arith.constant 0 : index
    %c0_289 = arith.constant 0 : index
    %615 = vector.load %arg27[%c0_288, %c0_289] : memref<1x64xf32, #tpu.memory_space<vmem>>, vector<1x64xf32>
    %616 = arith.mulf %614, %615 : vector<1x64xf32>
    %c0_290 = arith.constant 0 : index
    %c0_291 = arith.constant 0 : index
    %617 = vector.load %arg28[%c0_290, %c0_291] : memref<1x64xf32, #tpu.memory_space<vmem>>, vector<1x64xf32>
    %618 = arith.mulf %608, %616 : vector<1x64xf32>
    %619 = arith.subf %617, %618 : vector<1x64xf32>
    %620 = vector.broadcast %616 : vector<1x64xf32> to vector<16x64xf32>
    %621 = arith.mulf %598, %620 : vector<16x64xf32>
    %622 = vector.broadcast %619 : vector<1x64xf32> to vector<16x64xf32>
    %623 = arith.addf %621, %622 : vector<16x64xf32>
    %cst_292 = arith.constant 0.000000e+00 : f32
    %624 = vector.broadcast %cst_292 : f32 to vector<16x64xf32>
    %625 = arith.maximumf %623, %624 : vector<16x64xf32>
    %cst_293 = arith.constant dense<0xFF800000> : vector<64xf32>
    %626 = vector.multi_reduction <maximumf>, %625, %cst_293 [0] : vector<16x64xf32> to vector<64xf32>
    %627 = vector.shape_cast %626 : vector<64xf32> to vector<1x64xf32>
    %c0_294 = arith.constant 0 : index
    %c0_295 = arith.constant 0 : index
    %628 = vector.load %arg29[%c0_294, %c0_295] : memref<64x32xf32, #tpu.memory_space<vmem>>, vector<64x32xf32>
    %cst_296 = arith.constant dense<0.000000e+00> : vector<1x32xf32>
    %629 = tpu.matmul %627, %628, %cst_296 {dimension_numbers = #tpu.dot_dimension_numbers<[1], [0], [0], [1], [0, 0, 1, 1], [], []>, precision = #tpu.contract_precision<fp32>} : vector<1x64xf32>, vector<64x32xf32>, vector<1x32xf32> -> vector<1x32xf32>
    %c0_297 = arith.constant 0 : index
    %c0_298 = arith.constant 0 : index
    %630 = vector.load %arg30[%c0_297, %c0_298] : memref<1x32xf32, #tpu.memory_space<vmem>>, vector<1x32xf32>
    %631 = arith.addf %629, %630 : vector<1x32xf32>
    %cst_299 = arith.constant dense<0.000000e+00> : vector<32xf32>
    %632 = vector.multi_reduction <add>, %631, %cst_299 [0] : vector<1x32xf32> to vector<32xf32>
    %633 = vector.shape_cast %632 : vector<32xf32> to vector<1x32xf32>
    %634 = arith.mulf %631, %631 : vector<1x32xf32>
    %cst_300 = arith.constant dense<0.000000e+00> : vector<32xf32>
    %635 = vector.multi_reduction <add>, %634, %cst_300 [0] : vector<1x32xf32> to vector<32xf32>
    %636 = vector.shape_cast %635 : vector<32xf32> to vector<1x32xf32>
    %637 = tpu.concatenate %633, %636 in 0 : vector<1x32xf32>, vector<1x32xf32> -> vector<2x32xf32>
    %cst_301 = arith.constant dense<0.000000e+00> : vector<2x32xf32>
    %638 = tpu.matmul %637, %74, %cst_301 {dimension_numbers = #tpu.dot_dimension_numbers<[1], [0], [0], [1], [0, 0, 1, 1], [], []>, precision = #tpu.contract_precision<fp32>} : vector<2x32xf32>, vector<32x32xf32>, vector<2x32xf32> -> vector<2x32xf32>
    %cst_302 = arith.constant 2.000000e+00 : f32
    %639 = vector.broadcast %cst_302 : f32 to vector<2x32xf32>
    %640 = arith.divf %638, %639 : vector<2x32xf32>
    %641 = vector.extract_strided_slice %640 {offsets = [0, 0], sizes = [1, 32], strides = [1, 1]} : vector<2x32xf32> to vector<1x32xf32>
    %642 = vector.extract_strided_slice %640 {offsets = [1, 0], sizes = [1, 32], strides = [1, 1]} : vector<2x32xf32> to vector<1x32xf32>
    %643 = arith.mulf %641, %641 : vector<1x32xf32>
    %644 = arith.subf %642, %643 : vector<1x32xf32>
    %cst_303 = arith.constant 9.99999974E-6 : f32
    %645 = vector.broadcast %cst_303 : f32 to vector<1x32xf32>
    %646 = arith.addf %644, %645 : vector<1x32xf32>
    %647 = math.rsqrt %646 : vector<1x32xf32>
    %c0_304 = arith.constant 0 : index
    %c0_305 = arith.constant 0 : index
    %648 = vector.load %arg31[%c0_304, %c0_305] : memref<1x32xf32, #tpu.memory_space<vmem>>, vector<1x32xf32>
    %649 = arith.mulf %647, %648 : vector<1x32xf32>
    %c0_306 = arith.constant 0 : index
    %c0_307 = arith.constant 0 : index
    %650 = vector.load %arg32[%c0_306, %c0_307] : memref<1x32xf32, #tpu.memory_space<vmem>>, vector<1x32xf32>
    %651 = arith.mulf %641, %649 : vector<1x32xf32>
    %652 = arith.subf %650, %651 : vector<1x32xf32>
    %653 = arith.mulf %631, %649 : vector<1x32xf32>
    %654 = arith.addf %653, %652 : vector<1x32xf32>
    %cst_308 = arith.constant 0.000000e+00 : f32
    %655 = vector.broadcast %cst_308 : f32 to vector<1x32xf32>
    %656 = arith.maximumf %654, %655 : vector<1x32xf32>
    %c0_309 = arith.constant 0 : index
    %c0_310 = arith.constant 0 : index
    %657 = vector.load %arg33[%c0_309, %c0_310] : memref<32x16xf32, #tpu.memory_space<vmem>>, vector<32x16xf32>
    %cst_311 = arith.constant dense<0.000000e+00> : vector<1x16xf32>
    %658 = tpu.matmul %656, %657, %cst_311 {dimension_numbers = #tpu.dot_dimension_numbers<[1], [0], [0], [1], [0, 0, 1, 1], [], []>, precision = #tpu.contract_precision<fp32>} : vector<1x32xf32>, vector<32x16xf32>, vector<1x16xf32> -> vector<1x16xf32>
    %c0_312 = arith.constant 0 : index
    %c0_313 = arith.constant 0 : index
    %659 = vector.load %arg34[%c0_312, %c0_313] : memref<1x16xf32, #tpu.memory_space<vmem>>, vector<1x16xf32>
    %660 = arith.addf %658, %659 : vector<1x16xf32>
    %c0_314 = arith.constant 0 : index
    %c0_315 = arith.constant 0 : index
    %661 = vector.load %arg35[%c0_314, %c0_315] : memref<64x32xf32, #tpu.memory_space<vmem>>, vector<64x32xf32>
    %cst_316 = arith.constant dense<0.000000e+00> : vector<16x32xf32>
    %662 = tpu.matmul %625, %661, %cst_316 {dimension_numbers = #tpu.dot_dimension_numbers<[1], [0], [0], [1], [0, 0, 1, 1], [], []>, precision = #tpu.contract_precision<fp32>} : vector<16x64xf32>, vector<64x32xf32>, vector<16x32xf32> -> vector<16x32xf32>
    %c0_317 = arith.constant 0 : index
    %c0_318 = arith.constant 0 : index
    %663 = vector.load %arg36[%c0_317, %c0_318] : memref<16x32xf32, #tpu.memory_space<vmem>>, vector<16x32xf32>
    %cst_319 = arith.constant dense<0.000000e+00> : vector<1x32xf32>
    %664 = tpu.matmul %660, %663, %cst_319 {dimension_numbers = #tpu.dot_dimension_numbers<[1], [0], [0], [1], [0, 0, 1, 1], [], []>, precision = #tpu.contract_precision<fp32>} : vector<1x16xf32>, vector<16x32xf32>, vector<1x32xf32> -> vector<1x32xf32>
    %665 = vector.broadcast %664 : vector<1x32xf32> to vector<16x32xf32>
    %666 = arith.addf %662, %665 : vector<16x32xf32>
    %c0_320 = arith.constant 0 : index
    %c0_321 = arith.constant 0 : index
    %667 = vector.load %arg37[%c0_320, %c0_321] : memref<1x32xf32, #tpu.memory_space<vmem>>, vector<1x32xf32>
    %668 = vector.broadcast %667 : vector<1x32xf32> to vector<16x32xf32>
    %669 = arith.addf %666, %668 : vector<16x32xf32>
    %cst_322 = arith.constant dense<0.000000e+00> : vector<32xf32>
    %670 = vector.multi_reduction <add>, %669, %cst_322 [0] : vector<16x32xf32> to vector<32xf32>
    %671 = vector.shape_cast %670 : vector<32xf32> to vector<1x32xf32>
    %672 = arith.mulf %669, %669 : vector<16x32xf32>
    %cst_323 = arith.constant dense<0.000000e+00> : vector<32xf32>
    %673 = vector.multi_reduction <add>, %672, %cst_323 [0] : vector<16x32xf32> to vector<32xf32>
    %674 = vector.shape_cast %673 : vector<32xf32> to vector<1x32xf32>
    %675 = tpu.concatenate %671, %674 in 0 : vector<1x32xf32>, vector<1x32xf32> -> vector<2x32xf32>
    %cst_324 = arith.constant dense<0.000000e+00> : vector<2x32xf32>
    %676 = tpu.matmul %675, %74, %cst_324 {dimension_numbers = #tpu.dot_dimension_numbers<[1], [0], [0], [1], [0, 0, 1, 1], [], []>, precision = #tpu.contract_precision<fp32>} : vector<2x32xf32>, vector<32x32xf32>, vector<2x32xf32> -> vector<2x32xf32>
    %cst_325 = arith.constant 3.200000e+01 : f32
    %677 = vector.broadcast %cst_325 : f32 to vector<2x32xf32>
    %678 = arith.divf %676, %677 : vector<2x32xf32>
    %679 = vector.extract_strided_slice %678 {offsets = [0, 0], sizes = [1, 32], strides = [1, 1]} : vector<2x32xf32> to vector<1x32xf32>
    %680 = vector.extract_strided_slice %678 {offsets = [1, 0], sizes = [1, 32], strides = [1, 1]} : vector<2x32xf32> to vector<1x32xf32>
    %681 = arith.mulf %679, %679 : vector<1x32xf32>
    %682 = arith.subf %680, %681 : vector<1x32xf32>
    %cst_326 = arith.constant 9.99999974E-6 : f32
    %683 = vector.broadcast %cst_326 : f32 to vector<1x32xf32>
    %684 = arith.addf %682, %683 : vector<1x32xf32>
    %685 = math.rsqrt %684 : vector<1x32xf32>
    %c0_327 = arith.constant 0 : index
    %c0_328 = arith.constant 0 : index
    %686 = vector.load %arg38[%c0_327, %c0_328] : memref<1x32xf32, #tpu.memory_space<vmem>>, vector<1x32xf32>
    %687 = arith.mulf %685, %686 : vector<1x32xf32>
    %c0_329 = arith.constant 0 : index
    %c0_330 = arith.constant 0 : index
    %688 = vector.load %arg39[%c0_329, %c0_330] : memref<1x32xf32, #tpu.memory_space<vmem>>, vector<1x32xf32>
    %689 = arith.mulf %679, %687 : vector<1x32xf32>
    %690 = arith.subf %688, %689 : vector<1x32xf32>
    %691 = vector.broadcast %687 : vector<1x32xf32> to vector<16x32xf32>
    %692 = arith.mulf %669, %691 : vector<16x32xf32>
    %693 = vector.broadcast %690 : vector<1x32xf32> to vector<16x32xf32>
    %694 = arith.addf %692, %693 : vector<16x32xf32>
    %cst_331 = arith.constant 0.000000e+00 : f32
    %695 = vector.broadcast %cst_331 : f32 to vector<16x32xf32>
    %696 = arith.maximumf %694, %695 : vector<16x32xf32>
    %c0_332 = arith.constant 0 : index
    %c0_333 = arith.constant 0 : index
    %697 = vector.load %arg40[%c0_332, %c0_333] : memref<32x16xf32, #tpu.memory_space<vmem>>, vector<32x16xf32>
    %cst_334 = arith.constant dense<0.000000e+00> : vector<16x16xf32>
    %698 = tpu.matmul %696, %697, %cst_334 {dimension_numbers = #tpu.dot_dimension_numbers<[1], [0], [0], [1], [0, 0, 1, 1], [], []>, precision = #tpu.contract_precision<fp32>} : vector<16x32xf32>, vector<32x16xf32>, vector<16x16xf32> -> vector<16x16xf32>
    %c0_335 = arith.constant 0 : index
    %c0_336 = arith.constant 0 : index
    %699 = vector.load %arg41[%c0_335, %c0_336] : memref<1x16xf32, #tpu.memory_space<vmem>>, vector<1x16xf32>
    %700 = vector.broadcast %699 : vector<1x16xf32> to vector<16x16xf32>
    %701 = arith.addf %698, %700 : vector<16x16xf32>
    %cst_337 = arith.constant dense<0.000000e+00> : vector<16xf32>
    %702 = vector.multi_reduction <add>, %701, %cst_337 [0] : vector<16x16xf32> to vector<16xf32>
    %703 = vector.shape_cast %702 : vector<16xf32> to vector<1x16xf32>
    %704 = arith.mulf %701, %701 : vector<16x16xf32>
    %cst_338 = arith.constant dense<0.000000e+00> : vector<16xf32>
    %705 = vector.multi_reduction <add>, %704, %cst_338 [0] : vector<16x16xf32> to vector<16xf32>
    %706 = vector.shape_cast %705 : vector<16xf32> to vector<1x16xf32>
    %707 = tpu.concatenate %703, %706 in 0 : vector<1x16xf32>, vector<1x16xf32> -> vector<2x16xf32>
    %cst_339 = arith.constant dense<0.000000e+00> : vector<2x16xf32>
    %708 = tpu.matmul %707, %32, %cst_339 {dimension_numbers = #tpu.dot_dimension_numbers<[1], [0], [0], [1], [0, 0, 1, 1], [], []>, precision = #tpu.contract_precision<fp32>} : vector<2x16xf32>, vector<16x16xf32>, vector<2x16xf32> -> vector<2x16xf32>
    %cst_340 = arith.constant 3.200000e+01 : f32
    %709 = vector.broadcast %cst_340 : f32 to vector<2x16xf32>
    %710 = arith.divf %708, %709 : vector<2x16xf32>
    %711 = vector.extract_strided_slice %710 {offsets = [0, 0], sizes = [1, 16], strides = [1, 1]} : vector<2x16xf32> to vector<1x16xf32>
    %712 = vector.extract_strided_slice %710 {offsets = [1, 0], sizes = [1, 16], strides = [1, 1]} : vector<2x16xf32> to vector<1x16xf32>
    %713 = arith.mulf %711, %711 : vector<1x16xf32>
    %714 = arith.subf %712, %713 : vector<1x16xf32>
    %cst_341 = arith.constant 9.99999974E-6 : f32
    %715 = vector.broadcast %cst_341 : f32 to vector<1x16xf32>
    %716 = arith.addf %714, %715 : vector<1x16xf32>
    %717 = math.rsqrt %716 : vector<1x16xf32>
    %c0_342 = arith.constant 0 : index
    %c0_343 = arith.constant 0 : index
    %718 = vector.load %arg42[%c0_342, %c0_343] : memref<1x16xf32, #tpu.memory_space<vmem>>, vector<1x16xf32>
    %719 = arith.mulf %717, %718 : vector<1x16xf32>
    %c0_344 = arith.constant 0 : index
    %c0_345 = arith.constant 0 : index
    %720 = vector.load %arg43[%c0_344, %c0_345] : memref<1x16xf32, #tpu.memory_space<vmem>>, vector<1x16xf32>
    %721 = arith.mulf %711, %719 : vector<1x16xf32>
    %722 = arith.subf %720, %721 : vector<1x16xf32>
    %723 = vector.broadcast %719 : vector<1x16xf32> to vector<16x16xf32>
    %724 = arith.mulf %701, %723 : vector<16x16xf32>
    %725 = vector.broadcast %722 : vector<1x16xf32> to vector<16x16xf32>
    %726 = arith.addf %724, %725 : vector<16x16xf32>
    %c1_346 = arith.constant 1 : index
    %c0_347 = arith.constant 0 : index
    %c0_348 = arith.constant 0 : index
    %727 = vector.load %arg44[%c1_346, %c0_347, %c0_348] : memref<2x16x16xf32, #tpu.memory_space<vmem>>, vector<1x16x16xf32>
    %728 = vector.shape_cast %727 : vector<1x16x16xf32> to vector<16x16xf32>
    %729 = vector.shape_cast %726 : vector<16x16xf32> to vector<1x16x16xf32>
    tpu.vector_store %arg44[%c1_346, %c0_347, %c0_348], %729 {strides = array<i32>} : memref<2x16x16xf32, #tpu.memory_space<vmem>>, vector<1x16x16xf32>,
    return
  }
}

</mosaic_0001>

<bundles_post_ra>
// kernel: pointnet_forward.1
= control target key start
LH: loop header
LB: loop body
LE: loop exit
PB: predicated region body
PF: predicated region fallthrough
CT: control target
= control target key end

     0   :  { %s28369_s3 = smov 2   ;;  %vm243_vm0 = vcmask 1042432   ;;  %vm186_vm1 = vcmask 23552   ;;  %v736_v33 = vlaneseq  ;;  %v28370_v34 = vmov 0.0|0.0   ;;  %s28374_s10 = smov 3   ;;  %s31125_s0 = inlined_call_operand.smem [shape: u32[45], index: -1, kind: input, shape index: {}] }
   0x1   :  { %s28430_s6 = sld [smem:[%s31125_s0 + %s28369_s3]]   ;;  %26324 = vmatprep.subr.bf16.mxu1 %v28370_v34  ;;  %vm28371_vm2 = vmmov 0   ;;  %v28372_v37 = vmov 0.0   ;;  %v28373_v45 = vmov 1.0|1.0   ;;  %vm748_vm6 = vcmask 130048   ;;  %s28375_s14 = smov 6  }
   0x2   :  { %s28435_s9 = sld [smem:[%s31125_s0]]   ;;  %v28452_v35 = vshrl.u32 %v736_v33, 7  ;;  %v740_v36 = vand.u32 127, %v736_v33  ;;  %23730 = vmatprep.mubr.msk.f32.mxu1 %vm28371_vm2, %v28372_v37  ;;  %vm769_vm7 = vcmask 1040384   ;;  %s28376_s18 = smov 4   ;;  %vm1785_vm11 = vcmask 261120  }
   0x3   :  { %s28481_s13 = sld [smem:[%s31125_s0 + %s28374_s10]]   ;;  %s28377_s22 = smov 5   ;;  %vm202_vm12 = vcmask 39936  }
   0x4   :  { %v738_v38 = vadd.s32 8, %v28452_v35  ;;  %v741_v39 = vshra.s32 %v28452_v35, 1  ;;  %v28458_v40 = vshra.s32 %v740_v36, 1  ;;  %s28533_s17 = sld [smem:[%s31125_s0 + %s28375_s14]]   ;;  %s28378_s26 = smov 7  }
   0x5   :  { %s28544_s21 = sld [smem:[%s31125_s0 + %s28376_s18]]   ;;  %s28379_s30 = smov 10  }
   0x6   :  { %v742_v41 = vshra.s32 %v738_v38, 1  ;;  %vm744_vm3 = vcmp.eq.s32.totalorder %v741_v39, %v28458_v40  ;;  %s28549_s25 = sld [smem:[%s31125_s0 + %s28377_s22]]   ;;  %s28380_s4 = smov 8  }
   0x7   :  { %v229_v0 = vld [vmem:[%s28430_s6] sm:$0x7]  ;;  %v746_v43 = vsel %vm744_vm3, 1.0, %v28372_v37  ;;  %s28595_s29 = sld [smem:[%s31125_s0 + %s28378_s26]]   ;;  %s28381_s10 = smov 9  }
   0x8   :  { %v182_v1 = vld [vmem:[%s28435_s9] sm:$0xff]  ;;  %v183_v2 = vld [vmem:[%s28435_s9 + $0x8] sm:$0xff]  ;;  %v245_v3 = vsel %vm243_vm0, %v229_v0, 0  ;;  %vm745_vm4 = vcmp.eq.s32.totalorder %v742_v41, %v28458_v40  ;;  %v850_v46 = vsub.f32 %v746_v43, %v746_v43  ;;  %s28665_s3 = sld [smem:[%s31125_s0 + %s28379_s30]]   ;;  %s28382_s15 = smov 11  }
   0x9   :  { %v187_v4 = vsel %vm186_vm1, %v182_v1, 0.0  ;;  %v188_v5 = vsel %vm186_vm1, %v183_v2, 0.0  ;;  %v248_v6 = vand.u32 4294901760, %v245_v3  ;;  %vm28462_vm5 = vmpackc.low %vm745_vm4, %vm744_vm3  ;;  %v747_v44 = vsel %vm745_vm4, 1.0, %v28372_v37  ;;  %v22190_v57 = vld [vmem:[%s28481_s13] ss:$0 sm:$0xff]  ;;  %s28704_s8 = sld [smem:[%s31125_s0 + %s28380_s4]]  }
   0xa   :  { %v189_v7 = vadd.f32 %v188_v5, %v187_v4  ;;  %26326 = vmatpush3.bf16.msk.msra.mxu1 %vm28462_vm5, %v28373_v45  ;;  %v856_v47 = vsub.f32 %v747_v44, %v747_v44  ;;  %v851_v48 = vand.u32 4294901760, %v850_v46  ;;  %s28709_s14 = sld [smem:[%s31125_s0 + %s28381_s10]]   ;;  %s28383_s20 = smov 14   ;;  %vm4762_vm4 = vcmask 1044480  }
   0xb   :  { %23696 = vmatprep.subr.mxu0 %v248_v6  ;;  %v335_v9 = vsub.f32 %v245_v3, %v248_v6  ;;  %26327 = vmatprep.subr.bf16.mxu1 %v28370_v34  ;;  %s28750_s19 = sld [smem:[%s31125_s0 + %s28382_s15]]   ;;  %s28384_s26 = smov 12  }
   0xc   :  { %v190_v8 = vrot.slane %v189_v7, 4  ;;  %23697 = vmatpush3.msra.mxu0 %v248_v6  ;;  %v857_v49 = vand.u32 4294901760, %v856_v47  ;;  %v852_v50 = vsub.f32 %v850_v46, %v851_v48  ;;  %v28474_v55 = vpack.c.bf16 %v856_v47, %v850_v46  ;;  %s28807_s24 = sld [smem:[%s31125_s0 + %s28383_s20]]   ;;  %s28385_s1 = smov 13  }
   0xd   :  { %v336_v11 = vand.u32 4294901760, %v335_v9  ;;  %s28834_s30 = sld [smem:[%s31125_s0 + %s28384_s26]]   ;;  %s28386_s7 = smov 15  }
   0xe   :  { %v191_v10 = vadd.f32 %v190_v8, %v189_v7  ;;  %v858_v51 = vsub.f32 %v856_v47, %v857_v49  ;;  %v853_v52 = vand.u32 4294901760, %v852_v50  ;;  %v28476_v56 = vpack.c.bf16 %v857_v49, %v851_v48  ;;  %s28839_s5 = sld [smem:[%s31125_s0 + %s28385_s1]]   ;;  %s28387_s15 = smov 18  }
   0xf   :  { %v337_v13 = vsub.f32 %v335_v9, %v336_v11  ;;  %s28874_s12 = sld [smem:[%s31125_s0 + %s28386_s7]]   ;;  %s28388_s22 = smov 1  }
  0x10   :  { %v192_v12 = vrot.slane %v191_v10, 2  ;;  %v859_v53 = vand.u32 4294901760, %v858_v51  ;;  %s28910_s20 = sld [smem:[%s31125_s0 + %s28387_s15]]   ;;  %s28389_s28 = smov 16  }
  0x11   :  { %v338_v15 = vand.u32 4294901760, %v337_v13  ;;  %s28921_s27 = sld [smem:[%s31125_s0 + %s28388_s22]]   ;;  %s28390_s7 = smov 17  }
  0x12   :  { %v193_v14 = vadd.f32 %v192_v12, %v191_v10  ;;  %v28472_v54 = vpack.c.bf16 %v859_v53, %v853_v52  ;;  %s28938_s4 = sld [smem:[%s31125_s0 + %s28389_s28]]   ;;  %s28391_s16 = smov 21  }
  0x13   :  { %23701 = vmatprep.subr.mxu0 %v338_v15  ;;  %s28943_s15 = sld [smem:[%s31125_s0 + %s28390_s7]]   ;;  %s28392_s26 = smov 19  }
  0x14   :  { %v194_v16 = vrot.slane %v193_v14, 1  ;;  %s28981_s23 = sld [smem:[%s31125_s0 + %s28391_s16]]   ;;  %s31126_s7 = smov 125  }
  0x15   :  { %s28990_s2 = sld [smem:[%s31125_s0 + %s28392_s26]]   ;;  %s31127_s10 = smov 122  }
  0x16   :  { %v195_v17 = vadd.f32 %v194_v16, %v193_v14  ;;  %s28398_s11 = smov 22   ;;  %s28399_s26 = smov 20  }
  0x17   :  { %s29020_s22 = sld [smem:[%s31125_s0 + %s28398_s11]]   ;;  %s28400_s11 = smov 25  }
  0x18   :  { %v197_v18 = vmul.f32 0.0625, %v195_v17  ;;  %s28401_s28 = smov 23   ;;  %s28402_s18 = smov 24  }
  0x19   :  { %s29115_s16 = sld [smem:[%s31125_s0 + %s28401_s28]]   ;;  %s28405_s28 = smov 27  }
  0x1a   :  { %v28443_v19 = vsub.f32 %v182_v1, %v197_v18  ;;  %v28445_v20 = vsub.f32 %v183_v2, %v197_v18 }
  0x1c   :  { %v238_v21 = vsel %vm186_vm1, %v28443_v19, 0  ;;  %v241_v22 = vsel %vm186_vm1, %v28445_v20, 0 }
  0x1d   :  { %v313_v23 = vand.u32 4294901760, %v238_v21  ;;  %v323_v24 = vand.u32 4294901760, %v241_v22  ;;  %31158 = sst [smem:[#allocation2_spill]] %s29020_s22 }
  0x1f   :  { %v314_v25 = vsub.f32 %v238_v21, %v313_v23  ;;  %v324_v26 = vsub.f32 %v241_v22, %v323_v24  ;;  %31160 = sst [smem:[#allocation4_spill]] %s29115_s16 }
  0x21   :  { %v315_v27 = vand.u32 4294901760, %v314_v25  ;;  %v325_v28 = vand.u32 4294901760, %v324_v26 }
  0x23   :  { %v316_v29 = vsub.f32 %v314_v25, %v315_v27  ;;  %v326_v30 = vsub.f32 %v324_v26, %v325_v28 }
  0x25   :  { %v317_v31 = vand.u32 4294901760, %v316_v29  ;;  %v327_v32 = vand.u32 4294901760, %v326_v30 }
  0x27   :  { %23698 = vmatprep.mubr.f32.mxu0 %v317_v31 }
  0x28   :  { %23699 = vmatmul.mubr.f32.vlgmr.msra.gmra.mrb[0].mxu0 %v327_v32 }
  0x29   :  { %23702 = vmatpush3.msra.mxu0 %v338_v15  ;;  %23703 = vmatprep.mubr.f32.mxu0 %v313_v23 }
  0x2a   :  { %23706 = vmatprep.subr.mxu0 %v335_v9 }
  0x30   :  { %23704 = vmatmul.mubr.f32.vlgmr.msra.gmra.mrb[0].mxu0 %v323_v24 }
  0x31   :  { %23707 = vmatpush3.msra.mxu0 %v335_v9  ;;  %23708 = vmatprep.mubr.f32.mxu0 %v314_v25 }
  0x32   :  { %23711 = vmatprep.subr.mxu0 %v248_v6 }
  0x38   :  { %23709 = vmatmul.mubr.f32.vlgmr.msra.gmra.mrb[0].mxu0 %v324_v26 }
  0x39   :  { %23712 = vmatpush3.msra.mxu0 %v248_v6  ;;  %23713 = vmatprep.mubr.f32.mxu0 %v315_v27  ;;  %v1260_v27 = vld [vmem:[%s28533_s17] sm:$0xff] }
  0x3a   :  { %23716 = vmatprep.subr.mxu0 %v336_v11  ;;  %v1276_v29 = vand.u32 4294901760, %v1260_v27 }
  0x3c   :  { %v1364_v32 = vsub.f32 %v1260_v27, %v1276_v29  ;;  %v1778_v27 = vadd.s32 24, %v28452_v35 }
  0x3e   :  { %v1365_v36 = vand.u32 4294901760, %v1364_v32 }
  0x40   :  { %23714 = vmatmul.mubr.f32.vlgmr.msra.gmra.mrb[0].mxu0 %v325_v28  ;;  %v1261_v28 = vld [vmem:[%s28533_s17 + $0x8] sm:$0xff]  ;;  %v1366_v39 = vsub.f32 %v1364_v32, %v1365_v36 }
  0x41   :  { %23717 = vmatpush3.msra.mxu0 %v336_v11  ;;  %23718 = vmatprep.mubr.f32.mxu0 %v313_v23  ;;  %v1279_v30 = vand.u32 4294901760, %v1261_v28 }
  0x42   :  { %23721 = vmatprep.subr.mxu0 %v248_v6  ;;  %v1367_v43 = vand.u32 4294901760, %v1366_v39 }
  0x43   :  { %v28537_v31 = vpack.c.bf16 %v1279_v30, %v1276_v29  ;;  %v1371_v33 = vsub.f32 %v1261_v28, %v1279_v30  ;;  %v1780_v29 = vshra.s32 %v1778_v27, 1  ;;  %v2320_v27 = vld [vmem:[%s28665_s3 + $0x10] sm:$0xff] }
  0x45   :  { %v1372_v38 = vand.u32 4294901760, %v1371_v33  ;;  %v26350_v46 = vpack.c.bf16 %v1371_v33, %v1364_v32  ;;  %vm1782_vm9 = vcmp.eq.s32.totalorder %v1780_v29, %v28458_v40 }
  0x46   :  { %v1784_v32 = vsel %vm1782_vm9, 1.0, %v28372_v37 }
  0x47   :  { %v1373_v41 = vsub.f32 %v1371_v33, %v1372_v38  ;;  %v26358_v48 = vpack.c.bf16 %v1372_v38, %v1365_v36  ;;  %v1904_v36 = vsub.f32 %v1784_v32, %v1784_v32  ;;  %v2333_v32 = vand.u32 4294901760, %v2320_v27 }
  0x48   :  { %23719 = vmatmul.mubr.f32.vlgmr.msra.gmra.mrb[0].mxu0 %v323_v24 }
  0x49   :  { %23722 = vmatpush3.msra.mxu0 %v248_v6  ;;  %23723 = vmatprep.mubr.f32.mxu0 %v313_v23  ;;  %v1374_v44 = vand.u32 4294901760, %v1373_v41  ;;  %v1905_v39 = vand.u32 4294901760, %v1904_v36 }
  0x4a   :  { %26343 = vmatprep.subr.bf16.mxu0 %v28537_v31 }
  0x4b   :  { %v26346_v47 = vpack.c.bf16 %v1374_v44, %v1367_v43  ;;  %v1906_v43 = vsub.f32 %v1904_v36, %v1905_v39 }
  0x50   :  { %23724 = vmatmul.mubr.f32.vlgmr.msra.gmra.mrb[0].mxu0 %v323_v24 }
  0x51   :  { %26345 = vmatpush3.bf16.msra.mxu0 %v28537_v31 }
  0x52   :  { %26347 = vmatprep.subr.bf16.mxu0 %v26346_v47 }
 0x123   :  { %v23725_v58 = vpop.f32.mrb[0].mxu0 }
 0x124   :  { %v28484_v59 = vadd.f32 %v23725_v58, %v22190_v57  ;;  %v726_v60 = vpop.f32.mrb[1].mxu0 }
 0x125   :  { %v28486_v61 = vadd.f32 %v22190_v57, %v726_v60  ;;  %v22197_v60 = vld [vmem:[%s28544_s21] ss:$0 sm:$0xff] }
 0x126   :  { %v750_v62 = vsel %vm748_vm6, %v28484_v59, 0.0  ;;  %v759_v63 = vmul.f32 %v28484_v59, %v28484_v59 }
 0x127   :  { %v749_v0 = vsel %vm748_vm6, %v28486_v61, 0.0  ;;  %v758_v1 = vmul.f32 %v28486_v61, %v28486_v61 }
 0x128   :  { %v761_v2 = vsel %vm748_vm6, %v759_v63, 0.0  ;;  %v751_v3 = vadd.f32 %v750_v62, %v749_v0  ;;  %v28553_v0 = vsub.s32 1, %v28452_v35 }
 0x129   :  { %v760_v4 = vsel %vm748_vm6, %v758_v1, 0.0 }
 0x12a   :  { %v752_v5 = vrot.slane %v751_v3, 4  ;;  %v762_v6 = vadd.f32 %v761_v2, %v760_v4  ;;  %v1238_v2 = vld [vmem:[%s28549_s25] sm:$0x1] }
 0x12c   :  { %v753_v7 = vadd.f32 %v752_v5, %v751_v3  ;;  %v763_v8 = vrot.slane %v762_v6, 4  ;;  %v28558_v5 = vsub.s32 0, %v28452_v35 }
 0x12e   :  { %v754_v9 = vrot.slane %v753_v7, 2  ;;  %v764_v10 = vadd.f32 %v763_v8, %v762_v6 }
 0x130   :  { %v755_v11 = vadd.f32 %v754_v9, %v753_v7  ;;  %v765_v12 = vrot.slane %v764_v10, 2 }
 0x132   :  { %v756_v13 = vrot.slane %v755_v11, 1  ;;  %v766_v14 = vadd.f32 %v765_v12, %v764_v10 }
 0x134   :  { %v767_v15 = vrot.slane %v766_v14, 1  ;;  %v757_v16 = vadd.f32 %v756_v13, %v755_v11 }
 0x136   :  { %v768_v17 = vadd.f32 %v767_v15, %v766_v14 }
 0x138   :  { %v770_v18 = vsel %vm769_vm7, %v757_v16, %v768_v17 }
 0x139   :  { %v772_v21 = vsel %vm748_vm6, %v770_v18, 0 }
 0x13a   :  { %v839_v22 = vand.u32 4294901760, %v772_v21 }
 0x13c   :  { %v840_v23 = vsub.f32 %v772_v21, %v839_v22 }
 0x13e   :  { %v841_v24 = vand.u32 4294901760, %v840_v23 }
 0x140   :  { %v842_v25 = vsub.f32 %v840_v23, %v841_v24 }
 0x142   :  { %v843_v26 = vand.u32 4294901760, %v842_v25 }
 0x144   :  { %23731 = vmatmul.mubr.f32.vlgmr.msra.gmra.mrb[0].mxu1 %v843_v26  ;;  %v1777_v26 = vadd.s32 16, %v28452_v35 }
 0x145   :  { %26329 = vmatpush3.bf16.msra.mxu1 %v28472_v54  ;;  %23737 = vmatprep.mubr.msk.f32.mxu1 %vm28371_vm2, %v28372_v37 }
 0x146   :  { %26330 = vmatprep.subr.bf16.mxu1 %v28370_v34  ;;  %v1779_v28 = vshra.s32 %v1777_v26, 1  ;;  %v2319_v26 = vld [vmem:[%s28665_s3 + $0x8] sm:$0xff] }
 0x147   :  { %v2330_v29 = vand.u32 4294901760, %v2319_v26 }
 0x148   :  { %vm1781_vm8 = vcmp.eq.s32.totalorder %v1779_v28, %v28458_v40 }
 0x149   :  { %vm28576_vm10 = vmpackc.low %vm1782_vm9, %vm1781_vm8 }
 0x14c   :  { %23738 = vmatmul.mubr.f32.vlgmr.msra.gmra.mrb[0].mxu1 %v839_v22 }
 0x14d   :  { %26332 = vmatpush3.bf16.msra.mxu1 %v28474_v55  ;;  %23744 = vmatprep.mubr.msk.f32.mxu1 %vm28371_vm2, %v28372_v37 }
 0x14e   :  { %26333 = vmatprep.subr.bf16.mxu1 %v28370_v34 }
 0x154   :  { %23745 = vmatmul.mubr.f32.vlgmr.msra.gmra.mrb[0].mxu1 %v840_v23 }
 0x155   :  { %26335 = vmatpush3.bf16.msk.msra.mxu1 %vm28462_vm5, %v28373_v45  ;;  %23751 = vmatprep.mubr.msk.f32.mxu1 %vm28371_vm2, %v28372_v37 }
 0x156   :  { %26336 = vmatprep.subr.bf16.mxu1 %v28370_v34 }
 0x15c   :  { %23752 = vmatmul.mubr.f32.vlgmr.msra.gmra.mrb[0].mxu1 %v841_v24 }
 0x15d   :  { %26338 = vmatpush3.bf16.msra.mxu1 %v28476_v56  ;;  %23758 = vmatprep.mubr.msk.f32.mxu1 %vm28371_vm2, %v28372_v37 }
 0x15e   :  { %26339 = vmatprep.subr.bf16.mxu1 %v28370_v34 }
 0x164   :  { %23759 = vmatmul.mubr.f32.vlgmr.msra.gmra.mrb[0].mxu1 %v839_v22 }
 0x165   :  { %26341 = vmatpush3.bf16.msk.msra.mxu1 %vm28462_vm5, %v28373_v45  ;;  %23765 = vmatprep.mubr.msk.f32.mxu1 %vm28371_vm2, %v28372_v37 }
 0x166   :  { %26366 = vmatprep.subr.bf16.mxu1 %v28370_v34 }
 0x16c   :  { %23766 = vmatmul.mubr.f32.vlgmr.msra.gmra.mrb[0].mxu1 %v839_v22 }
 0x16d   :  { %26368 = vmatpush3.bf16.msk.msra.mxu1 %vm28462_vm5, %v28373_v45  ;;  %23818 = vmatprep.mubr.msk.f32.mxu1 %vm28371_vm2, %v28372_v37 }
 0x16e   :  { %26369 = vmatprep.subr.bf16.mxu1 %v28370_v34 }
 0x171   :  { %26371 = vmatpush3.bf16.msk.msra.mxu1 %vm28576_vm10, %v28373_v45 }
 0x172   :  { %26372 = vmatprep.subr.bf16.mxu1 %v28370_v34 }
 0x23f   :  { %v1217_v49 = vpop.f32.mrb[0].mxu1 }
 0x240   :  { %v1222_v50 = vmul.f32 0.03125, %v1217_v49  ;;  %v23767_v51 = vpop.f32.mrb[1].mxu1 }
 0x242   :  { %v1223_v52 = vmul.f32 %v1222_v50, %v1222_v50 }
 0x244   :  { %v1225_v53 = vrot.slane %v1223_v52, 7 }
 0x246   :  { %v1227_v57 = vsub.f32 %v1222_v50, %v1225_v53 }
 0x248   :  { %v1228_v58 = vadd.f32 1e-05, %v1227_v57 }
 0x24a   :  { %28317 = vrsqrt.f32 %v1228_v58 }
 0x254   :  { %v28318_v62 = vpop.eup %28317 }
 0x255   :  { %v1237_v63 = vmul.f32 %v28318_v62, %v22197_v60 }
 0x257   :  { %v1240_v1 = vrot.slane %v1237_v63, 1  ;;  %v1247_v4 = vrot.slane %v1237_v63, %v28553_v0 }
 0x259   :  { %v1242_v3 = vmul.f32 %v1240_v1, %v1222_v50  ;;  %v1248_v7 = vmul.f32 %v28486_v61, %v1247_v4  ;;  %v1249_v8 = vmul.f32 %v28484_v59, %v1247_v4  ;;  %v22198_v50 = vld [vmem:[%s28595_s29] ss:$0 sm:$0xff] }
 0x25b   :  { %v1243_v6 = vsub.f32 %v1238_v2, %v1242_v3 }
 0x25d   :  { %v1254_v9 = vrot.slane %v1243_v6, %v28558_v5 }
 0x25f   :  { %v1256_v10 = vadd.f32 %v1254_v9, %v1248_v7  ;;  %v1257_v11 = vadd.f32 %v1254_v9, %v1249_v8 }
 0x261   :  { %v1258_v12 = vmax.f32 %v1256_v10, 0.0  ;;  %v1259_v13 = vmax.f32 %v1257_v11, 0.0 }
 0x263   :  { %v1270_v14 = vsel %vm748_vm6, %v1258_v12, 0  ;;  %v1273_v15 = vsel %vm748_vm6, %v1259_v13, 0 }
 0x264   :  { %v1342_v16 = vand.u32 4294901760, %v1270_v14  ;;  %v1352_v17 = vand.u32 4294901760, %v1273_v15 }
 0x266   :  { %v1343_v18 = vsub.f32 %v1270_v14, %v1342_v16  ;;  %v1353_v21 = vsub.f32 %v1273_v15, %v1352_v17 }
 0x268   :  { %v1344_v22 = vand.u32 4294901760, %v1343_v18  ;;  %v1354_v23 = vand.u32 4294901760, %v1353_v21 }
 0x26a   :  { %v1345_v24 = vsub.f32 %v1343_v18, %v1344_v22  ;;  %v1355_v61 = vsub.f32 %v1353_v21, %v1354_v23 }
 0x26c   :  { %v1346_v25 = vand.u32 4294901760, %v1345_v24  ;;  %v1356_v59 = vand.u32 4294901760, %v1355_v61 }
 0x26e   :  { %23772 = vmatprep.mubr.f32.mxu0 %v1346_v25 }
 0x26f   :  { %23773 = vmatmul.mubr.f32.vlgmr.msra.gmra.mrb[2].mxu0 %v1356_v59  ;;  %v2318_v59 = vld [vmem:[%s28665_s3] sm:$0xff] }
 0x270   :  { %26349 = vmatpush3.bf16.msra.mxu0 %v26346_v47  ;;  %23779 = vmatprep.mubr.f32.mxu0 %v1342_v16  ;;  %v2327_v28 = vand.u32 4294901760, %v2318_v59 }
 0x271   :  { %26351 = vmatprep.subr.bf16.mxu0 %v26350_v46 }
 0x277   :  { %23780 = vmatmul.mubr.f32.vlgmr.msra.gmra.mrb[2].mxu0 %v1352_v17 }
 0x278   :  { %26353 = vmatpush3.bf16.msra.mxu0 %v26350_v46  ;;  %23786 = vmatprep.mubr.f32.mxu0 %v1343_v18  ;;  %v1907_v46 = vand.u32 4294901760, %v1906_v43 }
 0x279   :  { %26355 = vmatprep.subr.bf16.mxu0 %v28537_v31 }
 0x27f   :  { %23787 = vmatmul.mubr.f32.vlgmr.msra.gmra.mrb[2].mxu0 %v1353_v21 }
 0x280   :  { %26357 = vmatpush3.bf16.msra.mxu0 %v28537_v31  ;;  %23793 = vmatprep.mubr.f32.mxu0 %v1344_v22 }
 0x281   :  { %26359 = vmatprep.subr.bf16.mxu0 %v26358_v48 }
 0x287   :  { %23794 = vmatmul.mubr.f32.vlgmr.msra.gmra.mrb[2].mxu0 %v1354_v23 }
 0x288   :  { %26361 = vmatpush3.bf16.msra.mxu0 %v26358_v48  ;;  %23800 = vmatprep.mubr.f32.mxu0 %v1342_v16 }
 0x289   :  { %26363 = vmatprep.subr.bf16.mxu0 %v28537_v31 }
 0x28f   :  { %23801 = vmatmul.mubr.f32.vlgmr.msra.gmra.mrb[2].mxu0 %v1352_v17 }
 0x290   :  { %26365 = vmatpush3.bf16.msra.mxu0 %v28537_v31  ;;  %23807 = vmatprep.mubr.f32.mxu0 %v1342_v16  ;;  %v1783_v31 = vsel %vm1781_vm8, 1.0, %v28372_v37 }
 0x291   :  { %26402 = vmatprep.subr.bf16.mxu0 %v28370_v34  ;;  %v1898_v33 = vsub.f32 %v1783_v31, %v1783_v31  ;;  %v2321_v31 = vld [vmem:[%s28665_s3 + $0x18] sm:$0xff] }
 0x293   :  { %v1899_v38 = vand.u32 4294901760, %v1898_v33  ;;  %v28588_v48 = vpack.c.bf16 %v1904_v36, %v1898_v33  ;;  %v28671_v36 = vpack.c.bf16 %v2330_v29, %v2327_v28 }
 0x295   :  { %v1900_v41 = vsub.f32 %v1898_v33, %v1899_v38  ;;  %v28590_v49 = vpack.c.bf16 %v1905_v39, %v1899_v38  ;;  %v2336_v33 = vand.u32 4294901760, %v2321_v31  ;;  %v28673_v38 = vsub.f32 %v2318_v59, %v2327_v28 }
 0x296   :  { %v28675_v39 = vsub.f32 %v2319_v26, %v2330_v29 }
 0x297   :  { %23808 = vmatmul.mubr.f32.vlgmr.msra.gmra.mrb[2].mxu0 %v1352_v17  ;;  %v1901_v44 = vand.u32 4294901760, %v1900_v41  ;;  %v28677_v41 = vsub.f32 %v2320_v27, %v2333_v32  ;;  %v28679_v43 = vsub.f32 %v2321_v31, %v2336_v33 }
 0x298   :  { %23884 = vmatprep.mubr.msk.f32.mxu0 %vm28371_vm2, %v28372_v37  ;;  %26404 = vmatpush3.bf16.msra.mxu0 %v28671_v36 }
 0x299   :  { %v28586_v47 = vpack.c.bf16 %v1907_v46, %v1901_v44  ;;  %v28682_v44 = vpack.c.bf16 %v2336_v33, %v2333_v32  ;;  %v2408_v46 = vand.u32 4294901760, %v28673_v38  ;;  %26405 = vmatprep.subr.bf16.mxu0 %v28370_v34 }
 0x29c   :  { %26407 = vmatpush3.bf16.msra.mxu0 %v28682_v44 }
 0x29d   :  { %26408 = vmatprep.subr.bf16.mxu0 %v28370_v34 }
 0x36a   :  { %v23809_v51 = vpop.f32.mrb[2].mxu0 }
 0x36b   :  { %v28598_v52 = vadd.f32 %v23809_v51, %v22198_v50  ;;  %v1767_v53 = vpop.f32.mrb[3].mxu0  ;;  %v2409_v51 = vsub.f32 %v28673_v38, %v2408_v46 }
 0x36c   :  { %v28600_v57 = vadd.f32 %v22198_v50, %v1767_v53  ;;  %v2415_v50 = vand.u32 4294901760, %v28675_v39 }
 0x36d   :  { %v1787_v58 = vsel %vm1785_vm11, %v28598_v52, 0.0  ;;  %v1796_v60 = vmul.f32 %v28598_v52, %v28598_v52 }
 0x36e   :  { %v1786_v62 = vsel %vm1785_vm11, %v28600_v57, 0.0  ;;  %v1795_v63 = vmul.f32 %v28600_v57, %v28600_v57  ;;  %v2416_v53 = vsub.f32 %v28675_v39, %v2415_v50 }
 0x36f   :  { %v1798_v1 = vsel %vm1785_vm11, %v1796_v60, 0.0  ;;  %v1788_v2 = vadd.f32 %v1787_v58, %v1786_v62  ;;  %v2410_v58 = vand.u32 4294901760, %v2409_v51  ;;  %v2422_v62 = vand.u32 4294901760, %v28677_v41 }
 0x370   :  { %v1797_v3 = vsel %vm1785_vm11, %v1795_v63, 0.0  ;;  %v2417_v60 = vand.u32 4294901760, %v2416_v53  ;;  %v2429_v63 = vand.u32 4294901760, %v28679_v43 }
 0x371   :  { %v1789_v4 = vrot.slane %v1788_v2, 4  ;;  %v1799_v6 = vadd.f32 %v1798_v1, %v1797_v3 }
 0x372   :  { %v26409_v1 = vpack.c.bf16 %v2417_v60, %v2410_v58  ;;  %v2430_v3 = vsub.f32 %v28679_v43, %v2429_v63 }
 0x373   :  { %v1790_v7 = vadd.f32 %v1789_v4, %v1788_v2  ;;  %v1800_v8 = vrot.slane %v1799_v6, 4  ;;  %v2423_v2 = vsub.f32 %v28677_v41, %v2422_v62 }
 0x375   :  { %v1791_v9 = vrot.slane %v1790_v7, 2  ;;  %v1801_v10 = vadd.f32 %v1800_v8, %v1799_v6  ;;  %v2424_v4 = vand.u32 4294901760, %v2423_v2  ;;  %v2431_v6 = vand.u32 4294901760, %v2430_v3 }
 0x376   :  { %v26415_v8 = vpack.c.bf16 %v28675_v39, %v28673_v38 }
 0x377   :  { %v1792_v11 = vadd.f32 %v1791_v9, %v1790_v7  ;;  %v1802_v12 = vrot.slane %v1801_v10, 2  ;;  %v26412_v7 = vpack.c.bf16 %v2431_v6, %v2424_v4  ;;  %v26418_v9 = vpack.c.bf16 %v28679_v43, %v28677_v41 }
 0x379   :  { %v1793_v13 = vrot.slane %v1792_v11, 1  ;;  %v1803_v14 = vadd.f32 %v1802_v12, %v1801_v10  ;;  %v26427_v10 = vpack.c.bf16 %v2415_v50, %v2408_v46 }
 0x37b   :  { %v1804_v15 = vrot.slane %v1803_v14, 1  ;;  %v1794_v16 = vadd.f32 %v1793_v13, %v1792_v11  ;;  %v28699_v11 = vpack.c.bf16 %v2429_v63, %v2422_v62 }
 0x37d   :  { %v1805_v17 = vadd.f32 %v1804_v15, %v1803_v14 }
 0x37f   :  { %v1806_v18 = vsel %vm769_vm7, %v1794_v16, %v1805_v17 }
 0x380   :  { %v1808_v21 = vsel %vm1785_vm11, %v1806_v18, 0 }
 0x381   :  { %v1875_v22 = vand.u32 4294901760, %v1808_v21 }
 0x383   :  { %v1876_v23 = vsub.f32 %v1808_v21, %v1875_v22  ;;  %v22211_v21 = vld [vmem:[%s28704_s8] ss:$0 sm:$0xff] }
 0x385   :  { %v1877_v24 = vand.u32 4294901760, %v1876_v23 }
 0x387   :  { %v1878_v61 = vsub.f32 %v1876_v23, %v1877_v24 }
 0x389   :  { %v1879_v25 = vand.u32 4294901760, %v1878_v61  ;;  %v2287_v61 = vld [vmem:[%s28709_s14] sm:$0x1] }
 0x38b   :  { %23819 = vmatmul.mubr.f32.vlgmr.msra.gmra.mrb[2].mxu1 %v1879_v25 }
 0x38c   :  { %26374 = vmatpush3.bf16.msra.mxu1 %v28472_v54  ;;  %23829 = vmatprep.mubr.msk.f32.mxu1 %vm28371_vm2, %v28372_v37 }
 0x38d   :  { %26375 = vmatprep.subr.bf16.mxu1 %v28370_v34 }
 0x390   :  { %26377 = vmatpush3.bf16.msra.mxu1 %v28586_v47 }
 0x391   :  { %26378 = vmatprep.subr.bf16.mxu1 %v28370_v34 }
 0x393   :  { %23830 = vmatmul.mubr.f32.vlgmr.msra.gmra.mrb[2].mxu1 %v1875_v22 }
 0x394   :  { %26380 = vmatpush3.bf16.msra.mxu1 %v28474_v55  ;;  %23840 = vmatprep.mubr.msk.f32.mxu1 %vm28371_vm2, %v28372_v37 }
 0x395   :  { %26381 = vmatprep.subr.bf16.mxu1 %v28370_v34 }
 0x398   :  { %26383 = vmatpush3.bf16.msra.mxu1 %v28588_v48 }
 0x399   :  { %26384 = vmatprep.subr.bf16.mxu1 %v28370_v34 }
 0x39b   :  { %23841 = vmatmul.mubr.f32.vlgmr.msra.gmra.mrb[2].mxu1 %v1876_v23 }
 0x39c   :  { %26386 = vmatpush3.bf16.msk.msra.mxu1 %vm28462_vm5, %v28373_v45  ;;  %23851 = vmatprep.mubr.msk.f32.mxu1 %vm28371_vm2, %v28372_v37 }
 0x39d   :  { %26387 = vmatprep.subr.bf16.mxu1 %v28370_v34 }
 0x3a0   :  { %26389 = vmatpush3.bf16.msk.msra.mxu1 %vm28576_vm10, %v28373_v45 }
 0x3a1   :  { %26390 = vmatprep.subr.bf16.mxu1 %v28370_v34 }
 0x3a3   :  { %23852 = vmatmul.mubr.f32.vlgmr.msra.gmra.mrb[2].mxu1 %v1877_v24 }
 0x3a4   :  { %26392 = vmatpush3.bf16.msra.mxu1 %v28476_v56  ;;  %23862 = vmatprep.mubr.msk.f32.mxu1 %vm28371_vm2, %v28372_v37 }
 0x3a5   :  { %26393 = vmatprep.subr.bf16.mxu1 %v28370_v34 }
 0x3a8   :  { %26395 = vmatpush3.bf16.msra.mxu1 %v28590_v49 }
 0x3a9   :  { %26396 = vmatprep.subr.bf16.mxu1 %v28370_v34 }
 0x3ab   :  { %23863 = vmatmul.mubr.f32.vlgmr.msra.gmra.mrb[2].mxu1 %v1875_v22 }
 0x3ac   :  { %26398 = vmatpush3.bf16.msk.msra.mxu1 %vm28462_vm5, %v28373_v45  ;;  %23873 = vmatprep.mubr.msk.f32.mxu1 %vm28371_vm2, %v28372_v37 }
 0x3ad   :  { %26399 = vmatprep.subr.bf16.mxu1 %v28370_v34 }
 0x3b0   :  { %26401 = vmatpush3.bf16.msk.msra.mxu1 %vm28576_vm10, %v28373_v45 }
 0x3b1   :  { %26438 = vmatprep.subr.bf16.mxu1 %v28370_v34 }
 0x3b3   :  { %23874 = vmatmul.mubr.f32.vlgmr.msra.gmra.mrb[2].mxu1 %v1875_v22 }
 0x3b4   :  { %26440 = vmatpush3.bf16.msk.msra.mxu1 %vm28462_vm5, %v28373_v45  ;;  %23950 = vmatprep.mubr.msk.f32.mxu1 %vm28371_vm2, %v28372_v37 }
 0x3b5   :  { %26441 = vmatprep.subr.bf16.mxu1 %v28370_v34 }
 0x3b8   :  { %26443 = vmatpush3.bf16.msk.msra.mxu1 %vm28576_vm10, %v28373_v45 }
 0x3b9   :  { %26444 = vmatprep.subr.bf16.mxu1 %v28370_v34 }
 0x486   :  { %v2267_v12 = vpop.f32.mrb[2].mxu1 }
 0x487   :  { %v2271_v13 = vmul.f32 0.03125, %v2267_v12  ;;  %v23875_v14 = vpop.f32.mrb[3].mxu1 }
 0x489   :  { %v2272_v15 = vmul.f32 %v2271_v13, %v2271_v13 }
 0x48b   :  { %v2274_v16 = vrot.slane %v2272_v15, 7  ;;  %v3308_v15 = vld [vmem:[%s28807_s24] sm:$0xff] }
 0x48d   :  { %v2276_v17 = vsub.f32 %v2271_v13, %v2274_v16  ;;  %v3309_v16 = vld [vmem:[%s28807_s24 + $0x8] sm:$0xff] }
 0x48f   :  { %v2277_v18 = vadd.f32 1e-05, %v2276_v17  ;;  %v3317_v17 = vand.u32 4294901760, %v3308_v15 }
 0x491   :  { %28319 = vrsqrt.f32 %v2277_v18  ;;  %v3320_v18 = vand.u32 4294901760, %v3309_v16 }
 0x49b   :  { %v28320_v22 = vpop.eup %28319 }
 0x49c   :  { %v2286_v23 = vmul.f32 %v28320_v22, %v22211_v21  ;;  %v3310_v21 = vld [vmem:[%s28807_s24 + $0x10] sm:$0xff]  ;;  %v3311_v22 = vld [vmem:[%s28807_s24 + $0x18] sm:$0xff] }
 0x49e   :  { %v2289_v24 = vrot.slane %v2286_v23, 1  ;;  %v2296_v59 = vrot.slane %v2286_v23, %v28553_v0  ;;  %v28813_v23 = vpack.c.bf16 %v3320_v18, %v3317_v17 }
 0x4a0   :  { %v2291_v25 = vmul.f32 %v2289_v24, %v2271_v13  ;;  %v2297_v27 = vmul.f32 %v28600_v57, %v2296_v59  ;;  %v2298_v28 = vmul.f32 %v28598_v52, %v2296_v59  ;;  %v28815_v24 = vsub.f32 %v3308_v15, %v3317_v17 }
 0x4a1   :  { %v3326_v59 = vand.u32 4294901760, %v3311_v22 }
 0x4a2   :  { %v2292_v26 = vsub.f32 %v2287_v61, %v2291_v25  ;;  %v28817_v61 = vsub.f32 %v3309_v16, %v3320_v18  ;;  %v3323_v25 = vand.u32 4294901760, %v3310_v21 }
 0x4a4   :  { %v2303_v29 = vrot.slane %v2292_v26, %v28558_v5  ;;  %v3411_v26 = vsub.f32 %v3310_v21, %v3323_v25 }
 0x4a6   :  { %v2305_v31 = vadd.f32 %v2303_v29, %v2297_v27  ;;  %v2306_v32 = vadd.f32 %v2303_v29, %v2298_v28  ;;  %v3398_v27 = vand.u32 4294901760, %v28815_v24  ;;  %v3405_v28 = vand.u32 4294901760, %v28817_v61 }
 0x4a7   :  { %v28823_v29 = vpack.c.bf16 %v3326_v59, %v3323_v25 }
 0x4a8   :  { %v2307_v33 = vmax.f32 %v2305_v31, 0.0  ;;  %v2308_v38 = vmax.f32 %v2306_v32, 0.0  ;;  %v3418_v31 = vsub.f32 %v3311_v22, %v3326_v59  ;;  %v3399_v32 = vsub.f32 %v28815_v24, %v3398_v27 }
 0x4aa   :  { %v2309_v39 = vsel %vm1785_vm11, %v2307_v33, -inf  ;;  %v2310_v41 = vsel %vm1785_vm11, %v2308_v38, -inf  ;;  %v3406_v33 = vsub.f32 %v28817_v61, %v3405_v28  ;;  %v3400_v38 = vand.u32 4294901760, %v3399_v32 }
 0x4ab   :  { %v2311_v43 = vmax.f32 %v2309_v39, %v2310_v41  ;;  %v3412_v41 = vand.u32 4294901760, %v3411_v26 }
 0x4ac   :  { %v3407_v39 = vand.u32 4294901760, %v3406_v33 }
 0x4ad   :  { %v2312_v46 = vrot.slane %v2311_v43, 4 }
 0x4af   :  { %v2313_v50 = vmax.f32 %v2311_v43, %v2312_v46  ;;  %v3419_v43 = vand.u32 4294901760, %v3418_v31  ;;  %v26481_v46 = vpack.c.bf16 %v3407_v39, %v3400_v38 }
 0x4b1   :  { %v2314_v51 = vrot.slane %v2313_v50, 2 }
 0x4b3   :  { %v2315_v53 = vmax.f32 %v2313_v50, %v2314_v51  ;;  %v3413_v50 = vsub.f32 %v3411_v26, %v3412_v41  ;;  %v3420_v51 = vsub.f32 %v3418_v31, %v3419_v43 }
 0x4b5   :  { %v2316_v58 = vrot.slane %v2315_v53, 1 }
 0x4b7   :  { %v2317_v60 = vmax.f32 %v2315_v53, %v2316_v58  ;;  %v3414_v53 = vand.u32 4294901760, %v3413_v50  ;;  %v3421_v58 = vand.u32 4294901760, %v3420_v51 }
 0x4b9   :  { %v2324_v57 = vsel %vm1785_vm11, %v2317_v60, 0  ;;  %v26484_v60 = vpack.c.bf16 %v3421_v58, %v3414_v53 }
 0x4ba   :  { %v2395_v52 = vand.u32 4294901760, %v2324_v57 }
 0x4bc   :  { %v2396_v62 = vsub.f32 %v2324_v57, %v2395_v52  ;;  %v26487_v57 = vpack.c.bf16 %v28817_v61, %v28815_v24 }
 0x4be   :  { %v2397_v63 = vand.u32 4294901760, %v2396_v62 }
 0x4c0   :  { %v2398_v2 = vsub.f32 %v2396_v62, %v2397_v63 }
 0x4c2   :  { %v2399_v3 = vand.u32 4294901760, %v2398_v2 }
 0x4c4   :  { %23885 = vmatmul.mubr.f32.vlgmr.msra.gmra.mrb[4].mxu0 %v2399_v3 }
 0x4c5   :  { %26410 = vmatpush3.bf16.msra.mxu0 %v26409_v1  ;;  %23895 = vmatprep.mubr.msk.f32.mxu0 %vm28371_vm2, %v28372_v37 }
 0x4c6   :  { %26411 = vmatprep.subr.bf16.mxu0 %v28370_v34 }
 0x4c9   :  { %26413 = vmatpush3.bf16.msra.mxu0 %v26412_v7 }
 0x4ca   :  { %26414 = vmatprep.subr.bf16.mxu0 %v28370_v34 }
 0x4cc   :  { %23896 = vmatmul.mubr.f32.vlgmr.msra.gmra.mrb[4].mxu0 %v2395_v52 }
 0x4cd   :  { %26416 = vmatpush3.bf16.msra.mxu0 %v26415_v8  ;;  %23906 = vmatprep.mubr.msk.f32.mxu0 %vm28371_vm2, %v28372_v37 }
 0x4ce   :  { %26417 = vmatprep.subr.bf16.mxu0 %v28370_v34 }
 0x4d1   :  { %26419 = vmatpush3.bf16.msra.mxu0 %v26418_v9 }
 0x4d2   :  { %26420 = vmatprep.subr.bf16.mxu0 %v28370_v34 }
 0x4d4   :  { %23907 = vmatmul.mubr.f32.vlgmr.msra.gmra.mrb[4].mxu0 %v2396_v62  ;;  %v26499_v62 = vpack.c.bf16 %v3405_v28, %v3398_v27 }
 0x4d5   :  { %26422 = vmatpush3.bf16.msra.mxu0 %v28671_v36  ;;  %23917 = vmatprep.mubr.msk.f32.mxu0 %vm28371_vm2, %v28372_v37 }
 0x4d6   :  { %26423 = vmatprep.subr.bf16.mxu0 %v28370_v34 }
 0x4d9   :  { %26425 = vmatpush3.bf16.msra.mxu0 %v28682_v44 }
 0x4da   :  { %26426 = vmatprep.subr.bf16.mxu0 %v28370_v34 }
 0x4dc   :  { %23918 = vmatmul.mubr.f32.vlgmr.msra.gmra.mrb[4].mxu0 %v2397_v63  ;;  %v26502_v63 = vpack.c.bf16 %v3419_v43, %v3412_v41  ;;  %v4283_v43 = vld [vmem:[%s28910_s20] sm:$0xff] }
 0x4dd   :  { %26428 = vmatpush3.bf16.msra.mxu0 %v26427_v10  ;;  %23928 = vmatprep.mubr.msk.f32.mxu0 %vm28371_vm2, %v28372_v37  ;;  %v4290_v50 = vand.u32 4294901760, %v4283_v43 }
 0x4de   :  { %26429 = vmatprep.subr.bf16.mxu0 %v28370_v34 }
 0x4df   :  { %v4368_v58 = vsub.f32 %v4283_v43, %v4290_v50 }
 0x4e1   :  { %26431 = vmatpush3.bf16.msra.mxu0 %v28699_v11 }
 0x4e2   :  { %26432 = vmatprep.subr.bf16.mxu0 %v28370_v34 }
 0x4e4   :  { %23929 = vmatmul.mubr.f32.vlgmr.msra.gmra.mrb[4].mxu0 %v2395_v52 }
 0x4e5   :  { %26434 = vmatpush3.bf16.msra.mxu0 %v28671_v36  ;;  %23939 = vmatprep.mubr.msk.f32.mxu0 %vm28371_vm2, %v28372_v37  ;;  %v2322_v36 = vld [vmem:[%s28750_s19] sm:$0x1] }
 0x4e6   :  { %26435 = vmatprep.subr.bf16.mxu0 %v28370_v34 }
 0x4e9   :  { %26437 = vmatpush3.bf16.msra.mxu0 %v28682_v44 }
 0x4ea   :  { %26474 = vmatprep.subr.bf16.mxu0 %v28370_v34 }
 0x4ec   :  { %23940 = vmatmul.mubr.f32.vlgmr.msra.gmra.mrb[4].mxu0 %v2395_v52  ;;  %v26490_v52 = vpack.c.bf16 %v3418_v31, %v3411_v26 }
 0x4ed   :  { %24016 = vmatprep.mubr.msk.f32.mxu0 %vm28371_vm2, %v28372_v37  ;;  %26476 = vmatpush3.bf16.msra.mxu0 %v28813_v23 }
 0x4ee   :  { %26477 = vmatprep.subr.bf16.mxu0 %v28370_v34 }
 0x4f1   :  { %26479 = vmatpush3.bf16.msra.mxu0 %v28823_v29 }
 0x4f2   :  { %26480 = vmatprep.subr.bf16.mxu0 %v28370_v34 }
 0x5bf   :  { %v2807_v1 = vpop.f32.mrb[4].mxu0 }
 0x5c0   :  { %v28753_v4 = vadd.f32 %v2807_v1, %v2322_v36  ;;  %v23941_v6 = vpop.f32.mrb[5].mxu0 }
 0x5c2   :  { %v2812_v44 = vmul.f32 %v28753_v4, %v28753_v4 }
 0x5c4   :  { %v2815_v7 = vrot.slane %v2812_v44, 7 }
 0x5c6   :  { %v2817_v8 = vsel %vm769_vm7, %v28753_v4, %v2815_v7 }
 0x5c7   :  { %v2819_v9 = vsel %vm1785_vm11, %v2817_v8, 0  ;;  %v22224_v8 = vld [vmem:[%s28834_s30] ss:$0 sm:$0xff] }
 0x5c8   :  { %v2886_v10 = vand.u32 4294901760, %v2819_v9 }
 0x5ca   :  { %v2887_v11 = vsub.f32 %v2819_v9, %v2886_v10 }
 0x5cc   :  { %v2888_v12 = vand.u32 4294901760, %v2887_v11 }
 0x5ce   :  { %v2889_v13 = vsub.f32 %v2887_v11, %v2888_v12 }
 0x5d0   :  { %v2890_v14 = vand.u32 4294901760, %v2889_v13 }
 0x5d2   :  { %23951 = vmatmul.mubr.f32.vlgmr.msra.gmra.mrb[4].mxu1 %v2890_v14 }
 0x5d3   :  { %26446 = vmatpush3.bf16.msra.mxu1 %v28472_v54  ;;  %23961 = vmatprep.mubr.msk.f32.mxu1 %vm28371_vm2, %v28372_v37 }
 0x5d4   :  { %26447 = vmatprep.subr.bf16.mxu1 %v28370_v34 }
 0x5d7   :  { %26449 = vmatpush3.bf16.msra.mxu1 %v28586_v47 }
 0x5d8   :  { %26450 = vmatprep.subr.bf16.mxu1 %v28370_v34 }
 0x5da   :  { %23962 = vmatmul.mubr.f32.vlgmr.msra.gmra.mrb[4].mxu1 %v2886_v10 }
 0x5db   :  { %26452 = vmatpush3.bf16.msra.mxu1 %v28474_v55  ;;  %23972 = vmatprep.mubr.msk.f32.mxu1 %vm28371_vm2, %v28372_v37 }
 0x5dc   :  { %26453 = vmatprep.subr.bf16.mxu1 %v28370_v34 }
 0x5df   :  { %26455 = vmatpush3.bf16.msra.mxu1 %v28588_v48 }
 0x5e0   :  { %26456 = vmatprep.subr.bf16.mxu1 %v28370_v34 }
 0x5e2   :  { %23973 = vmatmul.mubr.f32.vlgmr.msra.gmra.mrb[4].mxu1 %v2887_v11 }
 0x5e3   :  { %26458 = vmatpush3.bf16.msk.msra.mxu1 %vm28462_vm5, %v28373_v45  ;;  %23983 = vmatprep.mubr.msk.f32.mxu1 %vm28371_vm2, %v28372_v37 }
 0x5e4   :  { %26459 = vmatprep.subr.bf16.mxu1 %v28370_v34 }
 0x5e7   :  { %26461 = vmatpush3.bf16.msk.msra.mxu1 %vm28576_vm10, %v28373_v45 }
 0x5e8   :  { %26462 = vmatprep.subr.bf16.mxu1 %v28370_v34 }
 0x5ea   :  { %23984 = vmatmul.mubr.f32.vlgmr.msra.gmra.mrb[4].mxu1 %v2888_v12  ;;  %v3299_v12 = vld [vmem:[%s28839_s5] sm:$0x1] }
 0x5eb   :  { %26464 = vmatpush3.bf16.msra.mxu1 %v28476_v56  ;;  %23994 = vmatprep.mubr.msk.f32.mxu1 %vm28371_vm2, %v28372_v37 }
 0x5ec   :  { %26465 = vmatprep.subr.bf16.mxu1 %v28370_v34 }
 0x5ef   :  { %26467 = vmatpush3.bf16.msra.mxu1 %v28590_v49 }
 0x5f0   :  { %26468 = vmatprep.subr.bf16.mxu1 %v28370_v34 }
 0x5f2   :  { %23995 = vmatmul.mubr.f32.vlgmr.msra.gmra.mrb[4].mxu1 %v2886_v10 }
 0x5f3   :  { %26470 = vmatpush3.bf16.msk.msra.mxu1 %vm28462_vm5, %v28373_v45  ;;  %24005 = vmatprep.mubr.msk.f32.mxu1 %vm28371_vm2, %v28372_v37 }
 0x5f4   :  { %26471 = vmatprep.subr.bf16.mxu1 %v28370_v34 }
 0x5f7   :  { %26473 = vmatpush3.bf16.msk.msra.mxu1 %vm28576_vm10, %v28373_v45 }
 0x5f8   :  { %26510 = vmatprep.subr.bf16.mxu1 %v28370_v34 }
 0x5fa   :  { %24006 = vmatmul.mubr.f32.vlgmr.msra.gmra.mrb[4].mxu1 %v2886_v10 }
 0x5fb   :  { %26512 = vmatpush3.bf16.msk.msra.mxu1 %vm28462_vm5, %v28373_v45  ;;  %24078 = vmatprep.mubr.msk.f32.mxu1 %vm28371_vm2, %v28372_v37 }
 0x5fc   :  { %26513 = vmatprep.subr.bf16.mxu1 %v28370_v34 }
 0x6cd   :  { %v3278_v2 = vpop.f32.mrb[4].mxu1 }
 0x6ce   :  { %v3283_v3 = vmul.f32 0.5, %v3278_v2  ;;  %v24007_v36 = vpop.f32.mrb[5].mxu1 }
 0x6d0   :  { %v3284_v1 = vmul.f32 %v3283_v3, %v3283_v3 }
 0x6d2   :  { %v3286_v6 = vrot.slane %v3284_v1, 7 }
 0x6d4   :  { %v3288_v44 = vsub.f32 %v3283_v3, %v3286_v6 }
 0x6d6   :  { %v3289_v7 = vadd.f32 1e-05, %v3288_v44  ;;  %v28924_v44 = vld [vmem:[%s28921_s27] sm:$0xff] }
 0x6d8   :  { %28321 = vrsqrt.f32 %v3289_v7  ;;  %v28927_v7 = vld [vmem:[%s28921_s27 + $0x8] sm:$0xff] }
 0x6e2   :  { %v28322_v9 = vpop.eup %28321 }
 0x6e3   :  { %v3298_v10 = vmul.f32 %v28322_v9, %v22224_v8  ;;  %v200_v8 = vmul.f32 %v28924_v44, %v28924_v44  ;;  %v201_v9 = vmul.f32 %v28927_v7, %v28927_v7 }
 0x6e5   :  { %v3301_v11 = vrot.slane %v3298_v10, 1  ;;  %v203_v10 = vsel %vm202_vm12, %v200_v8, 0.0 }
 0x6e6   :  { %204 = vadd.xlane.f32.xlu0 %v203_v10 }
 0x6e7   :  { %v3303_v13 = vmul.f32 %v3301_v11, %v3283_v3  ;;  %v3305_v15 = vmul.f32 %v28753_v4, %v3301_v11  ;;  %v3312_v4 = vld [vmem:[%s28874_s12] sm:$0x1]  ;;  %v206_v11 = vsel %vm202_vm12, %v201_v9, 0.0 }
 0x6e9   :  { %v3304_v14 = vsub.f32 %v3299_v12, %v3303_v13 }
 0x6ea   :  { %207 = vadd.xlane.f32.xlu0 %v206_v11 }
 0x6eb   :  { %v3306_v16 = vadd.f32 %v3305_v15, %v3304_v14 }
 0x6ed   :  { %v3307_v17 = vmax.f32 %v3306_v16, 0.0 }
 0x6ef   :  { %v3314_v18 = vsel %vm1785_vm11, %v3307_v17, 0 }
 0x6f0   :  { %v3385_v21 = vand.u32 4294901760, %v3314_v18 }
 0x6f2   :  { %v3386_v22 = vsub.f32 %v3314_v18, %v3385_v21 }
 0x6f4   :  { %v3387_v24 = vand.u32 4294901760, %v3386_v22 }
 0x6f6   :  { %v3388_v61 = vsub.f32 %v3386_v22, %v3387_v24 }
 0x6f8   :  { %v3389_v25 = vand.u32 4294901760, %v3388_v61 }
 0x6fa   :  { %24017 = vmatmul.mubr.f32.vlgmr.msra.gmra.mrb[6].mxu0 %v3389_v25  ;;  %v4274_v25 = vld [vmem:[%s28943_s15] sm:$0x1] }
 0x6fb   :  { %26482 = vmatpush3.bf16.msra.mxu0 %v26481_v46  ;;  %24027 = vmatprep.mubr.msk.f32.mxu0 %vm28371_vm2, %v28372_v37  ;;  %v4284_v46 = vld [vmem:[%s28910_s20 + $0x8] sm:$0xff] }
 0x6fc   :  { %26483 = vmatprep.subr.bf16.mxu0 %v28370_v34  ;;  %v4293_v51 = vand.u32 4294901760, %v4284_v46 }
 0x6fe   :  { %v28914_v53 = vpack.c.bf16 %v4293_v51, %v4290_v50 }
 0x6ff   :  { %26485 = vmatpush3.bf16.msra.mxu0 %v26484_v60  ;;  %v4375_v60 = vsub.f32 %v4284_v46, %v4293_v51 }
 0x700   :  { %26486 = vmatprep.subr.bf16.mxu0 %v28370_v34 }
 0x701   :  { %v26535_v1 = vpack.c.bf16 %v4375_v60, %v4368_v58 }
 0x702   :  { %24028 = vmatmul.mubr.f32.vlgmr.msra.gmra.mrb[6].mxu0 %v3385_v21 }
 0x703   :  { %26488 = vmatpush3.bf16.msra.mxu0 %v26487_v57  ;;  %24038 = vmatprep.mubr.msk.f32.mxu0 %vm28371_vm2, %v28372_v37  ;;  %v4369_v57 = vand.u32 4294901760, %v4368_v58 }
 0x704   :  { %26489 = vmatprep.subr.bf16.mxu0 %v28370_v34 }
 0x707   :  { %26491 = vmatpush3.bf16.msra.mxu0 %v26490_v52  ;;  %v4376_v52 = vand.u32 4294901760, %v4375_v60 }
 0x708   :  { %26492 = vmatprep.subr.bf16.mxu0 %v28370_v34 }
 0x709   :  { %v26541_v6 = vpack.c.bf16 %v4376_v52, %v4369_v57 }
 0x70a   :  { %24039 = vmatmul.mubr.f32.vlgmr.msra.gmra.mrb[6].mxu0 %v3386_v22 }
 0x70b   :  { %26494 = vmatpush3.bf16.msra.mxu0 %v28813_v23  ;;  %24049 = vmatprep.mubr.msk.f32.mxu0 %vm28371_vm2, %v28372_v37 }
 0x70c   :  { %26495 = vmatprep.subr.bf16.mxu0 %v28370_v34 }
 0x70f   :  { %26497 = vmatpush3.bf16.msra.mxu0 %v28823_v29 }
 0x710   :  { %26498 = vmatprep.subr.bf16.mxu0 %v28370_v34 }
 0x712   :  { %24050 = vmatmul.mubr.f32.vlgmr.msra.gmra.mrb[6].mxu0 %v3387_v24 }
 0x713   :  { %26500 = vmatpush3.bf16.msra.mxu0 %v26499_v62  ;;  %24060 = vmatprep.mubr.msk.f32.mxu0 %vm28371_vm2, %v28372_v37  ;;  %v4370_v62 = vsub.f32 %v4368_v58, %v4369_v57 }
 0x714   :  { %26501 = vmatprep.subr.bf16.mxu0 %v28370_v34 }
 0x715   :  { %v4371_v2 = vand.u32 4294901760, %v4370_v62 }
 0x717   :  { %26503 = vmatpush3.bf16.msra.mxu0 %v26502_v63  ;;  %v4377_v63 = vsub.f32 %v4375_v60, %v4376_v52 }
 0x718   :  { %26504 = vmatprep.subr.bf16.mxu0 %v28370_v34 }
 0x719   :  { %v4378_v3 = vand.u32 4294901760, %v4377_v63 }
 0x71a   :  { %24061 = vmatmul.mubr.f32.vlgmr.msra.gmra.mrb[6].mxu0 %v3385_v21 }
 0x71b   :  { %26506 = vmatpush3.bf16.msra.mxu0 %v28813_v23  ;;  %24071 = vmatprep.mubr.msk.f32.mxu0 %vm28371_vm2, %v28372_v37  ;;  %v26532_v36 = vpack.c.bf16 %v4378_v3, %v4371_v2 }
 0x71c   :  { %26507 = vmatprep.subr.bf16.mxu0 %v28370_v34 }
 0x71f   :  { %26509 = vmatpush3.bf16.msra.mxu0 %v28823_v29 }
 0x720   :  { %26528 = vmatprep.subr.bf16.mxu0 %v28370_v34 }
 0x722   :  { %24072 = vmatmul.mubr.f32.vlgmr.msra.gmra.mrb[6].mxu0 %v3385_v21  ;;  %v22231_v21 = vld [vmem:[%s28938_s4] ss:$0 sm:$0xff] }
 0x723   :  { %24120 = vmatprep.mubr.msk.f32.mxu0 %vm28371_vm2, %v28372_v37  ;;  %26530 = vmatpush3.bf16.msra.mxu0 %v28914_v53 }
 0x724   :  { %26531 = vmatprep.subr.bf16.mxu0 %v28370_v34 }
 0x7f5   :  { %v3797_v23 = vpop.f32.mrb[6].mxu0 }
 0x7f6   :  { %v28877_v59 = vadd.f32 %v3797_v23, %v3312_v4  ;;  %v24073_v26 = vpop.f32.mrb[7].mxu0 }
 0x7f8   :  { %v3802_v27 = vmul.f32 %v28877_v59, %v28877_v59 }
 0x7fa   :  { %v3805_v28 = vrot.slane %v3802_v27, 7 }
 0x7fc   :  { %v3807_v29 = vsel %vm769_vm7, %v28877_v59, %v3805_v28 }
 0x7fd   :  { %v3809_v31 = vsel %vm748_vm6, %v3807_v29, 0 }
 0x7fe   :  { %v3876_v32 = vand.u32 4294901760, %v3809_v31 }
 0x800   :  { %v3877_v33 = vsub.f32 %v3809_v31, %v3876_v32 }
 0x802   :  { %v3878_v38 = vand.u32 4294901760, %v3877_v33 }
 0x804   :  { %v3879_v39 = vsub.f32 %v3877_v33, %v3878_v38 }
 0x806   :  { %v3880_v41 = vand.u32 4294901760, %v3879_v39 }
 0x808   :  { %24079 = vmatmul.mubr.f32.vlgmr.msra.gmra.mrb[6].mxu1 %v3880_v41 }
 0x809   :  { %26515 = vmatpush3.bf16.msra.mxu1 %v28472_v54  ;;  %24085 = vmatprep.mubr.msk.f32.mxu1 %vm28371_vm2, %v28372_v37 }
 0x80a   :  { %26516 = vmatprep.subr.bf16.mxu1 %v28370_v34 }
 0x810   :  { %24086 = vmatmul.mubr.f32.vlgmr.msra.gmra.mrb[6].mxu1 %v3876_v32 }
 0x811   :  { %26518 = vmatpush3.bf16.msra.mxu1 %v28474_v55  ;;  %24092 = vmatprep.mubr.msk.f32.mxu1 %vm28371_vm2, %v28372_v37 }
 0x812   :  { %26519 = vmatprep.subr.bf16.mxu1 %v28370_v34 }
 0x818   :  { %24093 = vmatmul.mubr.f32.vlgmr.msra.gmra.mrb[6].mxu1 %v3877_v33 }
 0x819   :  { %26521 = vmatpush3.bf16.msk.msra.mxu1 %vm28462_vm5, %v28373_v45  ;;  %24099 = vmatprep.mubr.msk.f32.mxu1 %vm28371_vm2, %v28372_v37 }
 0x81a   :  { %26522 = vmatprep.subr.bf16.mxu1 %v28370_v34 }
 0x820   :  { %24100 = vmatmul.mubr.f32.vlgmr.msra.gmra.mrb[6].mxu1 %v3878_v38 }
 0x821   :  { %26524 = vmatpush3.bf16.msra.mxu1 %v28476_v56  ;;  %24106 = vmatprep.mubr.msk.f32.mxu1 %vm28371_vm2, %v28372_v37 }
 0x822   :  { %26525 = vmatprep.subr.bf16.mxu1 %v28370_v34 }
 0x828   :  { %24107 = vmatmul.mubr.f32.vlgmr.msra.gmra.mrb[6].mxu1 %v3876_v32 }
 0x829   :  { %26527 = vmatpush3.bf16.msk.msra.mxu1 %vm28462_vm5, %v28373_v45  ;;  %24113 = vmatprep.mubr.msk.f32.mxu1 %vm28371_vm2, %v28372_v37 }
 0x830   :  { %24114 = vmatmul.mubr.f32.vlgmr.msra.gmra.mrb[6].mxu1 %v3876_v32 }
 0x903   :  { %v4254_v12 = vpop.f32.mrb[6].mxu1 }
 0x904   :  { %v4258_v13 = vmul.f32 0.5, %v4254_v12  ;;  %v24115_v14 = vpop.f32.mrb[7].mxu1 }
 0x905   :  { %v4748_v14 = vld [vmem:[%s28981_s23] sm:$0x1f] }
 0x906   :  { %v4259_v15 = vmul.f32 %v4258_v13, %v4258_v13 }
 0x908   :  { %v4261_v16 = vrot.slane %v4259_v15, 7 }
 0x90a   :  { %v4263_v17 = vsub.f32 %v4258_v13, %v4261_v16 }
 0x90c   :  { %v4264_v18 = vadd.f32 1e-05, %v4263_v17 }
 0x90e   :  { %28323 = vrsqrt.f32 %v4264_v18 }
 0x918   :  { %v28324_v22 = vpop.eup %28323 }
 0x919   :  { %v4273_v24 = vmul.f32 %v28324_v22, %v22231_v21 }
 0x91b   :  { %v4276_v61 = vrot.slane %v4273_v24, 1 }
 0x91d   :  { %v4278_v4 = vmul.f32 %v4276_v61, %v4258_v13  ;;  %v4280_v26 = vmul.f32 %v28877_v59, %v4276_v61  ;;  %v205_v59 = vpop.xlane.xlu0 %204 }
 0x91e   :  { %28325 = vrsqrt.f32 %v205_v59  ;;  %vm211_vm13 = vcmp.eq.f32.partialorder %v205_v59, inf  ;;  %vm213_vm15 = vcmp.eq.f32.partialorder %v205_v59, 0.0 }
 0x91f   :  { %v4279_v23 = vsub.f32 %v4274_v25, %v4278_v4 }
 0x921   :  { %v4281_v27 = vadd.f32 %v4280_v26, %v4279_v23  ;;  %v208_v41 = vpop.xlane.xlu0 %207  ;;  %v4285_v23 = vld [vmem:[%s28990_s2] sm:$0x1] }
 0x922   :  { %28327 = vrsqrt.f32 %v208_v41  ;;  %vm218_vm14 = vcmp.eq.f32.partialorder %v208_v41, inf  ;;  %v221_v60 = vand.u32 2147483648, %v208_v41  ;;  %vm220_vm3 = vcmp.eq.f32.partialorder %v208_v41, 0.0 }
 0x923   :  { %v4282_v28 = vmax.f32 %v4281_v27, 0.0 }
 0x925   :  { %v4287_v29 = vsel %vm748_vm6, %v4282_v28, 0 }
 0x926   :  { %v4356_v31 = vand.u32 4294901760, %v4287_v29 }
 0x928   :  { %v4357_v32 = vsub.f32 %v4287_v29, %v4356_v31  ;;  %v28326_v43 = vpop.eup %28325 }
 0x929   :  { %v210_v50 = vmul.f32 %v28326_v43, %v205_v59 }
 0x92a   :  { %v4358_v33 = vand.u32 4294901760, %v4357_v32 }
 0x92b   :  { %v212_v58 = vsel %vm211_vm13, %v205_v59, %v210_v50 }
 0x92c   :  { %v4359_v38 = vsub.f32 %v4357_v32, %v4358_v33  ;;  %v28328_v46 = vpop.eup %28327 }
 0x92d   :  { %v217_v51 = vmul.f32 %v28328_v46, %v208_v41 }
 0x92e   :  { %v4360_v39 = vand.u32 4294901760, %v4359_v38 }
 0x92f   :  { %v219_v57 = vsel %vm218_vm14, %v208_v41, %v217_v51 }
 0x930   :  { %24121 = vmatmul.mubr.f32.vlgmr.msra.gmra.mrb[8].mxu0 %v4360_v39  ;;  %v222_v62 = vsel %vm220_vm3, %v221_v60, %v219_v57 }
 0x931   :  { %26533 = vmatpush3.bf16.msra.mxu0 %v26532_v36  ;;  %24127 = vmatprep.mubr.msk.f32.mxu0 %vm28371_vm2, %v28372_v37  ;;  %v224_v2 = vmax.f32 %v222_v62, 1e-12 }
 0x932   :  { %26534 = vmatprep.subr.bf16.mxu0 %v28370_v34 }
 0x938   :  { %24128 = vmatmul.mubr.f32.vlgmr.msra.gmra.mrb[8].mxu0 %v4356_v31 }
 0x939   :  { %26536 = vmatpush3.bf16.msra.mxu0 %v26535_v1  ;;  %24134 = vmatprep.mubr.msk.f32.mxu0 %vm28371_vm2, %v28372_v37 }
 0x93a   :  { %26537 = vmatprep.subr.bf16.mxu0 %v28370_v34 }
 0x940   :  { %24135 = vmatmul.mubr.f32.vlgmr.msra.gmra.mrb[8].mxu0 %v4357_v32 }
 0x941   :  { %26539 = vmatpush3.bf16.msra.mxu0 %v28914_v53  ;;  %24141 = vmatprep.mubr.msk.f32.mxu0 %vm28371_vm2, %v28372_v37 }
 0x942   :  { %26540 = vmatprep.subr.bf16.mxu0 %v28370_v34 }
 0x948   :  { %24142 = vmatmul.mubr.f32.vlgmr.msra.gmra.mrb[8].mxu0 %v4358_v33  ;;  %v28395_v33 = vmov 0  }
 0x949   :  { %26542 = vmatpush3.bf16.msra.mxu0 %v26541_v6  ;;  %24148 = vmatprep.mubr.msk.f32.mxu0 %vm28371_vm2, %v28372_v37 }
 0x94a   :  { %26543 = vmatprep.subr.bf16.mxu0 %v28370_v34  ;;  %28307 = vset.pattern.permute.xlu0 %v28395_v33 }
 0x94b   :  { %28308 = vset.pattern.permute.xlu1 %v28395_v33 }
 0x950   :  { %24149 = vmatmul.mubr.f32.vlgmr.msra.gmra.mrb[8].mxu0 %v4356_v31 }
 0x951   :  { %26545 = vmatpush3.bf16.msra.mxu0 %v28914_v53  ;;  %24155 = vmatprep.mubr.msk.f32.mxu0 %vm28371_vm2, %v28372_v37  ;;  %v214_v53 = vand.u32 2147483648, %v205_v59 }
 0x952   :  { %26546 = vmatprep.subr.bf16.mxu0 %v28370_v34 }
 0x953   :  { %v215_v52 = vsel %vm213_vm15, %v214_v53, %v212_v58 }
 0x954   :  { %v223_v63 = vmax.f32 %v215_v52, 1e-12 }
 0x956   :  { %28329 = vrcp.f32 %v223_v63 }
 0x957   :  { %28331 = vrcp.f32 %v224_v2 }
 0x958   :  { %24156 = vmatmul.mubr.f32.vlgmr.msra.gmra.mrb[8].mxu0 %v4356_v31 }
 0x959   :  { %26548 = vmatpush3.bf16.msk.msra.mxu0 %vm28462_vm5, %v28373_v45  ;;  %24196 = vmatprep.mubr.msk.f32.mxu0 %vm28371_vm2, %v28372_v37 }
 0x95a   :  { %26549 = vmatprep.subr.bf16.mxu0 %v28370_v34 }
 0x95d   :  { %26551 = vmatpush3.bf16.msk.msra.mxu0 %vm28576_vm10, %v28373_v45 }
 0x95e   :  { %26552 = vmatprep.subr.bf16.mxu0 %v28370_v34 }
 0x960   :  { %v28330_v3 = vpop.eup %28329 }
 0x961   :  { %v28332_v36 = vpop.eup %28331  ;;  %v226_v1 = vmul.f32 %v28330_v3, %v28924_v44  ;;  %v28396_v3 = vmov 2  }
 0x962   :  { %v228_v6 = vmul.f32 %v28332_v36, %v28927_v7  ;;  %v4764_v7 = vsel %vm4762_vm4, %v4748_v14, 0 }
 0x963   :  { %v4757_v8 = vsel %vm202_vm12, %v226_v1, 0  ;;  %v4767_v16 = vand.u32 4294901760, %v4764_v7 }
 0x964   :  { %v4760_v9 = vsel %vm202_vm12, %v228_v6, 0  ;;  %v4832_v10 = vand.u32 4294901760, %v4757_v8  ;;  %v31141_v6 = vmov 1  }
 0x965   :  { %v4842_v11 = vand.u32 4294901760, %v4760_v9  ;;  %24158 = vmatprep.subr.mxu1 %v4767_v16  ;;  %v4854_v24 = vsub.f32 %v4764_v7, %v4767_v16 }
 0x966   :  { %v4833_v12 = vsub.f32 %v4757_v8, %v4832_v10  ;;  %24159 = vmatpush3.msra.mxu1 %v4767_v16 }
 0x967   :  { %v4843_v13 = vsub.f32 %v4760_v9, %v4842_v11  ;;  %v4855_v61 = vand.u32 4294901760, %v4854_v24 }
 0x968   :  { %v4834_v44 = vand.u32 4294901760, %v4833_v12 }
 0x969   :  { %v4844_v15 = vand.u32 4294901760, %v4843_v13  ;;  %v4856_v25 = vsub.f32 %v4854_v24, %v4855_v61 }
 0x96a   :  { %v4835_v17 = vsub.f32 %v4833_v12, %v4834_v44 }
 0x96b   :  { %v4845_v18 = vsub.f32 %v4843_v13, %v4844_v15  ;;  %v4857_v4 = vand.u32 4294901760, %v4856_v25 }
 0x96c   :  { %v4836_v21 = vand.u32 4294901760, %v4835_v17 }
 0x96d   :  { %v4846_v22 = vand.u32 4294901760, %v4845_v18  ;;  %24163 = vmatprep.subr.mxu1 %v4857_v4 }
 0x96e   :  { %24160 = vmatprep.mubr.f32.mxu1 %v4836_v21 }
 0x96f   :  { %24161 = vmatmul.mubr.f32.vlgmr.msra.gmra.mrb[8].mxu1 %v4846_v22 }
 0x970   :  { %24165 = vmatprep.mubr.f32.mxu1 %v4832_v10  ;;  %24164 = vmatpush3.msra.mxu1 %v4857_v4 }
 0x971   :  { %24168 = vmatprep.subr.mxu1 %v4854_v24 }
 0x977   :  { %24166 = vmatmul.mubr.f32.vlgmr.msra.gmra.mrb[8].mxu1 %v4842_v11 }
 0x978   :  { %24169 = vmatpush3.msra.mxu1 %v4854_v24  ;;  %24170 = vmatprep.mubr.f32.mxu1 %v4833_v12 }
 0x979   :  { %24173 = vmatprep.subr.mxu1 %v4767_v16 }
 0x97f   :  { %24171 = vmatmul.mubr.f32.vlgmr.msra.gmra.mrb[8].mxu1 %v4843_v13 }
 0x980   :  { %24174 = vmatpush3.msra.mxu1 %v4767_v16  ;;  %24175 = vmatprep.mubr.f32.mxu1 %v4834_v44 }
 0x981   :  { %24178 = vmatprep.subr.mxu1 %v4855_v61 }
 0x987   :  { %24176 = vmatmul.mubr.f32.vlgmr.msra.gmra.mrb[8].mxu1 %v4844_v15  ;;  %v22232_v15 = vld [vmem:[%s29020_s22] ss:$0 sm:$0xff]  ;;  %s29120_s22 = sld [smem:[%s31125_s0 + %s28402_s18]]  }
 0x988   :  { %24179 = vmatpush3.msra.mxu1 %v4855_v61  ;;  %24180 = vmatprep.mubr.f32.mxu1 %v4832_v10 }
 0x989   :  { %24183 = vmatprep.subr.mxu1 %v4767_v16 }
 0x98d   :  { %31161 = sst [smem:[#allocation5_spill]] %s29120_s22 }
 0x98f   :  { %24181 = vmatmul.mubr.f32.vlgmr.msra.gmra.mrb[8].mxu1 %v4842_v11 }
 0x990   :  { %24184 = vmatpush3.msra.mxu1 %v4767_v16  ;;  %24185 = vmatprep.mubr.f32.mxu1 %v4832_v10 }
 0x997   :  { %24186 = vmatmul.mubr.f32.vlgmr.msra.gmra.mrb[8].mxu1 %v4842_v11 }
 0xa2b   :  { %v4744_v26 = vpop.f32.mrb[8].mxu0 }
 0xa2c   :  { %v27806_v27 = vadd.f32 %v4744_v26, %v4285_v23  ;;  %v24157_v28 = vpop.f32.mrb[9].mxu0 }
 0xa2e   :  { %v5258_v29 = vrot.slane %v27806_v27, %v28558_v5 }
 0xa30   :  { %5289 = vrot.lane.b32.xlu1 %v5258_v29, %s31126_s7  ;;  %v5259_v31 = vmul.f32 %v5258_v29, %v28443_v19  ;;  %v5260_v38 = vmul.f32 %v5258_v29, %v28445_v20  ;;  %s29025_s7 = sld [smem:[%s31125_s0 + %s28399_s26]]  }
 0xa31   :  { %s29098_s26 = sld [smem:[%s31125_s0 + %s28400_s11]]   ;;  %s28404_s11 = smov 29  }
 0xa32   :  { %v5261_v32 = vsel %vm186_vm1, %v5259_v31, 0.0  ;;  %v5264_v39 = vsel %vm186_vm1, %v5260_v38, 0.0 }
 0xa33   :  { %5262 = vadd.xlane.f32.xlu0 %v5261_v32 }
 0xa34   :  { %5321 = vrot.lane.b32.xlu1 %v5258_v29, %s31127_s10  ;;  %s28403_s10 = smov 26  }
 0xa35   :  { %s29184_s1 = sld [smem:[%s31125_s0 + %s28403_s10]]  }
 0xa36   :  { %v22233_v7 = vld [vmem:[%s29025_s7] ss:$0 sm:$0xff]  ;;  %v22234_v17 = vld [vmem:[%s29025_s7 + $0x1] ss:$0 sm:$0xff]  ;;  %v22235_v4 = vld [vmem:[%s29025_s7 + $0x2] ss:$0 sm:$0xff]  ;;  %s29363_s10 = sld [smem:[%s31125_s0 + %s28405_s28]]  }
 0xa37   :  { %31159 = sst [smem:[#allocation3_spill]] %s29098_s26 }
 0xa3b   :  { %31166 = sst [smem:[#allocation6_spill]] %s29184_s1 }
 0xa3c   :  { %31168 = sst [smem:[#allocation8_spill]] %s29363_s10 }
 0xa58   :  { %5265 = vadd.xlane.f32.xlu1 %v5264_v39 }
 0xa6a   :  { %v24187_v52 = vpop.f32.mrb[8].mxu1 }
 0xa6b   :  { %v5245_v2 = vpop.f32.mrb[9].mxu1  ;;  %v27807_v61 = vadd.f32 %v24187_v52, %v22232_v15 }
 0xa6c   :  { %v27808_v21 = vadd.f32 %v22232_v15, %v5245_v2 }
 0xaa2   :  { %v5290_v59 = vpop.permute.xlu1 %5289 }
 0xaa3   :  { %v5292_v41 = vmul.f32 %v5290_v59, %v28443_v19  ;;  %v5293_v43 = vmul.f32 %v5290_v59, %v28445_v20 }
 0xaa5   :  { %v5294_v46 = vsel %vm186_vm1, %v5292_v41, 0.0  ;;  %v5297_v53 = vsel %vm186_vm1, %v5293_v43, 0.0 }
 0xaa6   :  { %v5322_v50 = vpop.permute.xlu1 %5321  ;;  %5295 = vadd.xlane.f32.xlu0 %v5294_v46 }
 0xaa7   :  { %v5324_v51 = vmul.f32 %v5322_v50, %v28443_v19  ;;  %v5325_v58 = vmul.f32 %v5322_v50, %v28445_v20 }
 0xaa9   :  { %v5326_v60 = vsel %vm186_vm1, %v5324_v51, 0.0  ;;  %v5329_v57 = vsel %vm186_vm1, %v5325_v58, 0.0 }
 0xaaa   :  { %5298 = vadd.xlane.f32.xlu0 %v5297_v53 }
 0xaae   :  { %5327 = vadd.xlane.f32.xlu0 %v5326_v60 }
 0xab2   :  { %5330 = vadd.xlane.f32.xlu0 %v5329_v57 }
 0xac0   :  { %v5263_v62 = vpop.xlane.xlu0 %5262 }
 0xac1   :  { %v5267_v63 = vadd.f32 %v5263_v62, %v28443_v19 }
 0xac8   :  { %5272 = vperm.xlu0 %28307, %v5267_v63  }
 0xacc   :  { %28311 = vset.pattern.permute.xlu0 %v28396_v3 }
 0xae5   :  { %v5266_v36 = vpop.xlane.xlu1 %5265 }
 0xae6   :  { %v5268_v1 = vadd.f32 %v5266_v36, %v28445_v20 }
 0xae8   :  { %5277 = vperm.xlu1 %28308, %v5268_v1  }
 0xaec   :  { %28309 = vset.pattern.permute.xlu1 %v31141_v6 }
 0xb33   :  { %v5296_v8 = vpop.xlane.xlu0 %5295 }
 0xb34   :  { %v5300_v9 = vadd.f32 %v5296_v8, %v28443_v19 }
 0xb36   :  { %5305 = vperm.xlu1 %28309, %v5300_v9  }
 0xb37   :  { %v5299_v10 = vpop.xlane.xlu0 %5298 }
 0xb38   :  { %v5301_v11 = vadd.f32 %v5299_v10, %v28445_v20 }
 0xb3a   :  { %5310 = vperm.xlu1 %28309, %v5301_v11  }
 0xb3b   :  { %v5328_v12 = vpop.xlane.xlu0 %5327 }
 0xb3c   :  { %v5332_v13 = vadd.f32 %v5328_v12, %v28443_v19 }
 0xb3e   :  { %28310 = vset.pattern.permute.xlu1 %v28396_v3 }
 0xb3f   :  { %5337 = vperm.xlu1 %28310, %v5332_v13   ;;  %v5331_v14 = vpop.xlane.xlu0 %5330 }
 0xb40   :  { %v5333_v44 = vadd.f32 %v5331_v14, %v28445_v20 }
 0xb42   :  { %5342 = vperm.xlu0 %28311, %v5333_v44  }
 0xb43   :  { %28312 = vset.pattern.permute.xlu1 %v28395_v33 }
 0xb46   :  { %28313 = vset.pattern.permute.xlu0 %v28395_v33 }
 0xb47   :  { %v5273_v16 = vpop.permute.xlu0 %5272 }
 0xb48   :  { %v5284_v18 = vmul.f32 %v22233_v7, %v5273_v16  ;;  %v5876_v16 = vld [vmem:[%s29098_s26] sm:$0xff] }
 0xb4a   :  { %v5286_v23 = vadd.f32 %v27808_v21, %v5284_v18  ;;  %v5878_v18 = vld [vmem:[%s29098_s26 + $0x10] sm:$0xff]  ;;  %v5894_v21 = vand.u32 4294901760, %v5876_v16 }
 0xb67   :  { %v5278_v19 = vpop.permute.xlu1 %5277 }
 0xb68   :  { %v5285_v25 = vmul.f32 %v22233_v7, %v5278_v19 }
 0xb6a   :  { %v5287_v31 = vadd.f32 %v27807_v61, %v5285_v25  ;;  %v5900_v61 = vand.u32 4294901760, %v5878_v18 }
 0xbb5   :  { %v5306_v20 = vpop.permute.xlu1 %5305 }
 0xbb6   :  { %v5317_v24 = vmul.f32 %v22234_v17, %v5306_v20 }
 0xbb8   :  { %v5319_v28 = vadd.f32 %v5317_v24, %v5286_v23  ;;  %v5879_v24 = vld [vmem:[%s29098_s26 + $0x18] sm:$0xff]  ;;  %v5984_v23 = vsub.f32 %v5876_v16, %v5894_v21 }
 0xbb9   :  { %v5311_v22 = vpop.permute.xlu1 %5310  ;;  %v5903_v25 = vand.u32 4294901760, %v5879_v24 }
 0xbba   :  { %v5318_v26 = vmul.f32 %v22234_v17, %v5311_v22  ;;  %v5877_v17 = vld [vmem:[%s29098_s26 + $0x8] sm:$0xff]  ;;  %s29282_s26 = sld [smem:[%s31125_s0 + %s28404_s11]]   ;;  %s28408_s11 = smov 33  }
 0xbbb   :  { %v5897_v22 = vand.u32 4294901760, %v5877_v17 }
 0xbbc   :  { %v5320_v38 = vadd.f32 %v5318_v26, %v5287_v31 }
 0xbbd   :  { %v5991_v26 = vsub.f32 %v5877_v17, %v5897_v22 }
 0xbbe   :  { %v5338_v27 = vpop.permute.xlu1 %5337 }
 0xbbf   :  { %v5349_v29 = vmul.f32 %v22235_v4, %v5338_v27  ;;  %v29106_v27 = vpack.c.bf16 %v5903_v25, %v5900_v61 }
 0xbc0   :  { %31167 = sst [smem:[#allocation7_spill]] %s29282_s26 }
 0xbc1   :  { %v29031_v32 = vadd.f32 %v5349_v29, %v5319_v28  ;;  %v5343_v33 = vpop.permute.xlu0 %5342  ;;  %v5985_v28 = vand.u32 4294901760, %v5984_v23  ;;  %v5992_v29 = vand.u32 4294901760, %v5991_v26 }
 0xbc2   :  { %v5350_v39 = vmul.f32 %v22235_v4, %v5343_v33  ;;  %v29104_v4 = vpack.c.bf16 %v5897_v22, %v5894_v21 }
 0xbc3   :  { %v5362_v59 = vmul.f32 %v29031_v32, %v29031_v32  ;;  %v5353_v43 = vsel %vm1785_vm11, %v29031_v32, 0.0  ;;  %v5986_v31 = vsub.f32 %v5984_v23, %v5985_v28  ;;  %v5993_v33 = vsub.f32 %v5991_v26, %v5992_v29 }
 0xbc4   :  { %v29035_v41 = vadd.f32 %v5350_v39, %v5320_v38  ;;  %26583 = vmatprep.subr.bf16.mxu1 %v29104_v4  ;;  %v5998_v38 = vsub.f32 %v5878_v18, %v5900_v61  ;;  %v6005_v39 = vsub.f32 %v5879_v24, %v5903_v25 }
 0xbc5   :  { %v5364_v53 = vsel %vm1785_vm11, %v5362_v59, 0.0  ;;  %26585 = vmatpush3.bf16.msra.mxu1 %v29104_v4  ;;  %v5987_v59 = vand.u32 4294901760, %v5986_v31 }
 0xbc6   :  { %v5354_v46 = vsel %vm1785_vm11, %v29035_v41, 0.0  ;;  %v5363_v50 = vmul.f32 %v29035_v41, %v29035_v41  ;;  %26587 = vmatprep.subr.bf16.mxu1 %v29106_v27 }
 0xbc7   :  { %v5355_v51 = vadd.f32 %v5354_v46, %v5353_v43  ;;  %v5994_v43 = vand.u32 4294901760, %v5993_v33  ;;  %v5999_v46 = vand.u32 4294901760, %v5998_v38 }
 0xbc8   :  { %v5365_v58 = vsel %vm1785_vm11, %v5363_v50, 0.0  ;;  %v6006_v50 = vand.u32 4294901760, %v6005_v39 }
 0xbc9   :  { %v5356_v60 = vrot.slane %v5355_v51, 4  ;;  %v5366_v57 = vadd.f32 %v5365_v58, %v5364_v53  ;;  %26589 = vmatpush3.bf16.msra.mxu1 %v29106_v27  ;;  %v6000_v53 = vsub.f32 %v5998_v38, %v5999_v46 }
 0xbca   :  { %v6007_v58 = vsub.f32 %v6005_v39, %v6006_v50 }
 0xbcb   :  { %v5357_v52 = vadd.f32 %v5356_v60, %v5355_v51  ;;  %v5367_v62 = vrot.slane %v5366_v57, 4  ;;  %v26590_v51 = vpack.c.bf16 %v5994_v43, %v5987_v59  ;;  %v6001_v60 = vand.u32 4294901760, %v6000_v53 }
 0xbcc   :  { %v6423_v53 = vadd.s32 48, %v28452_v35 }
 0xbcd   :  { %v5358_v63 = vrot.slane %v5357_v52, 2  ;;  %v5368_v2 = vadd.f32 %v5367_v62, %v5366_v57  ;;  %26591 = vmatprep.subr.bf16.mxu1 %v26590_v51  ;;  %v6008_v57 = vand.u32 4294901760, %v6007_v58  ;;  %v26598_v62 = vpack.c.bf16 %v5991_v26, %v5984_v23 }
 0xbce   :  { %v6424_v58 = vadd.s32 56, %v28452_v35 }
 0xbcf   :  { %v5359_v36 = vadd.f32 %v5358_v63, %v5357_v52  ;;  %v5369_v1 = vrot.slane %v5368_v2, 2  ;;  %v26594_v52 = vpack.c.bf16 %v6008_v57, %v6001_v60  ;;  %v26602_v63 = vpack.c.bf16 %v6005_v39, %v5998_v38 }
 0xbd0   :  { %v6427_v57 = vshra.s32 %v6423_v53, 1 }
 0xbd1   :  { %v5360_v8 = vrot.slane %v5359_v36, 1  ;;  %v5370_v9 = vadd.f32 %v5369_v1, %v5368_v2  ;;  %v26614_v2 = vpack.c.bf16 %v5992_v29, %v5985_v28 }
 0xbd2   :  { %vm6431_vm13 = vcmp.eq.s32.totalorder %v6427_v57, %v28458_v40 }
 0xbd3   :  { %v5371_v10 = vrot.slane %v5370_v9, 1  ;;  %v5361_v11 = vadd.f32 %v5360_v8, %v5359_v36  ;;  %v26618_v36 = vpack.c.bf16 %v6006_v50, %v5999_v46  ;;  %v6421_v50 = vadd.s32 32, %v28452_v35 }
 0xbd5   :  { %v5372_v12 = vadd.f32 %v5371_v10, %v5370_v9 }
 0xbd7   :  { %v5373_v13 = vsel %vm769_vm7, %v5361_v11, %v5372_v12 }
 0xbd8   :  { %v5375_v14 = vsel %vm1785_vm11, %v5373_v13, 0 }
 0xbd9   :  { %v5442_v44 = vand.u32 4294901760, %v5375_v14 }
 0xbdb   :  { %v5443_v19 = vsub.f32 %v5375_v14, %v5442_v44  ;;  %v22248_v14 = vld [vmem:[%s29115_s16] ss:$0 sm:$0xff] }
 0xbdd   :  { %v5444_v20 = vand.u32 4294901760, %v5443_v19 }
 0xbdf   :  { %v5445_v15 = vsub.f32 %v5443_v19, %v5444_v20 }
 0xbe1   :  { %v5446_v7 = vand.u32 4294901760, %v5445_v15  ;;  %v5854_v15 = vld [vmem:[%s29120_s22] sm:$0x1]  ;;  %s28407_s22 = smov 30  }
 0xbe2   :  { %s29444_s28 = sld [smem:[%s31125_s0 + %s28407_s22]]  }
 0xbe3   :  { %24197 = vmatmul.mubr.f32.vlgmr.msra.gmra.mrb[10].mxu0 %v5446_v7 }
 0xbe4   :  { %26554 = vmatpush3.bf16.msra.mxu0 %v28472_v54  ;;  %24207 = vmatprep.mubr.msk.f32.mxu0 %vm28371_vm2, %v28372_v37 }
 0xbe5   :  { %26555 = vmatprep.subr.bf16.mxu0 %v28370_v34 }
 0xbe8   :  { %26557 = vmatpush3.bf16.msra.mxu0 %v28586_v47  ;;  %31170 = sst [smem:[#allocation10_spill]] %s29444_s28 }
 0xbe9   :  { %26558 = vmatprep.subr.bf16.mxu0 %v28370_v34 }
 0xbeb   :  { %24208 = vmatmul.mubr.f32.vlgmr.msra.gmra.mrb[10].mxu0 %v5442_v44 }
 0xbec   :  { %26560 = vmatpush3.bf16.msra.mxu0 %v28474_v55  ;;  %24218 = vmatprep.mubr.msk.f32.mxu0 %vm28371_vm2, %v28372_v37 }
 0xbed   :  { %26561 = vmatprep.subr.bf16.mxu0 %v28370_v34 }
 0xbf0   :  { %26563 = vmatpush3.bf16.msra.mxu0 %v28588_v48 }
 0xbf1   :  { %26564 = vmatprep.subr.bf16.mxu0 %v28370_v34 }
 0xbf3   :  { %24219 = vmatmul.mubr.f32.vlgmr.msra.gmra.mrb[10].mxu0 %v5443_v19 }
 0xbf4   :  { %26566 = vmatpush3.bf16.msk.msra.mxu0 %vm28462_vm5, %v28373_v45  ;;  %24229 = vmatprep.mubr.msk.f32.mxu0 %vm28371_vm2, %v28372_v37 }
 0xbf5   :  { %26567 = vmatprep.subr.bf16.mxu0 %v28370_v34 }
 0xbf8   :  { %26569 = vmatpush3.bf16.msk.msra.mxu0 %vm28576_vm10, %v28373_v45 }
 0xbf9   :  { %26570 = vmatprep.subr.bf16.mxu0 %v28370_v34 }
 0xbfb   :  { %24230 = vmatmul.mubr.f32.vlgmr.msra.gmra.mrb[10].mxu0 %v5444_v20 }
 0xbfc   :  { %26572 = vmatpush3.bf16.msra.mxu0 %v28476_v56  ;;  %24240 = vmatprep.mubr.msk.f32.mxu0 %vm28371_vm2, %v28372_v37 }
 0xbfd   :  { %26573 = vmatprep.subr.bf16.mxu0 %v28370_v34 }
 0xc00   :  { %26575 = vmatpush3.bf16.msra.mxu0 %v28590_v49 }
 0xc01   :  { %26576 = vmatprep.subr.bf16.mxu0 %v28370_v34 }
 0xc03   :  { %24241 = vmatmul.mubr.f32.vlgmr.msra.gmra.mrb[10].mxu0 %v5442_v44 }
 0xc04   :  { %26578 = vmatpush3.bf16.msk.msra.mxu0 %vm28462_vm5, %v28373_v45  ;;  %24251 = vmatprep.mubr.msk.f32.mxu0 %vm28371_vm2, %v28372_v37 }
 0xc05   :  { %26579 = vmatprep.subr.bf16.mxu0 %v28370_v34 }
 0xc08   :  { %26581 = vmatpush3.bf16.msk.msra.mxu0 %vm28576_vm10, %v28373_v45 }
 0xc09   :  { %26630 = vmatprep.subr.bf16.mxu0 %v28370_v34 }
 0xc0b   :  { %24252 = vmatmul.mubr.f32.vlgmr.msra.gmra.mrb[10].mxu0 %v5442_v44 }
 0xc0c   :  { %26632 = vmatpush3.bf16.msk.msra.mxu0 %vm28462_vm5, %v28373_v45  ;;  %24336 = vmatprep.mubr.msk.f32.mxu0 %vm28371_vm2, %v28372_v37 }
 0xc0d   :  { %26633 = vmatprep.subr.bf16.mxu0 %v28370_v34 }
 0xc10   :  { %26635 = vmatpush3.bf16.msk.msra.mxu0 %vm28576_vm10, %v28373_v45 }
 0xc11   :  { %26636 = vmatprep.subr.bf16.mxu0 %v28370_v34 }
 0xcde   :  { %v5834_v1 = vpop.f32.mrb[10].mxu0 }
 0xcdf   :  { %v5838_v8 = vmul.f32 0.03125, %v5834_v1  ;;  %v24253_v9 = vpop.f32.mrb[11].mxu0 }
 0xce1   :  { %v5839_v10 = vmul.f32 %v5838_v8, %v5838_v8 }
 0xce3   :  { %v5841_v11 = vrot.slane %v5839_v10, 7 }
 0xce5   :  { %v5843_v12 = vsub.f32 %v5838_v8, %v5841_v11 }
 0xce7   :  { %v5844_v13 = vadd.f32 1e-05, %v5843_v12 }
 0xce9   :  { %28333 = vrsqrt.f32 %v5844_v13 }
 0xcf3   :  { %v28334_v44 = vpop.eup %28333 }
 0xcf4   :  { %v5853_v19 = vmul.f32 %v28334_v44, %v22248_v14 }
 0xcf6   :  { %v5856_v20 = vrot.slane %v5853_v19, 1  ;;  %v5863_v16 = vrot.slane %v5853_v19, %v28553_v0 }
 0xcf8   :  { %v5858_v7 = vmul.f32 %v5856_v20, %v5838_v8  ;;  %v5864_v18 = vmul.f32 %v5863_v16, %v29031_v32  ;;  %v5865_v21 = vmul.f32 %v5863_v16, %v29035_v41 }
 0xcfa   :  { %v5859_v17 = vsub.f32 %v5854_v15, %v5858_v7 }
 0xcfc   :  { %v5870_v22 = vrot.slane %v5859_v17, %v28558_v5 }
 0xcfe   :  { %v5872_v24 = vadd.f32 %v5870_v22, %v5864_v18  ;;  %v5873_v61 = vadd.f32 %v5870_v22, %v5865_v21 }
 0xd00   :  { %v5874_v25 = vmax.f32 %v5872_v24, 0.0  ;;  %v5875_v23 = vmax.f32 %v5873_v61, 0.0 }
 0xd02   :  { %v5888_v26 = vsel %vm1785_vm11, %v5874_v25, 0  ;;  %v5891_v28 = vsel %vm1785_vm11, %v5875_v23, 0  ;;  %v22249_v23 = vld [vmem:[%s29184_s1] ss:$0 sm:$0xff]  ;;  %s29497_s1 = sld [smem:[%s31125_s0 + %s28408_s11]]   ;;  %s28412_s11 = smov 36  }
 0xd03   :  { %v5962_v29 = vand.u32 4294901760, %v5888_v26  ;;  %v5972_v31 = vand.u32 4294901760, %v5891_v28 }
 0xd05   :  { %v5963_v33 = vsub.f32 %v5888_v26, %v5962_v29  ;;  %v5973_v38 = vsub.f32 %v5891_v28, %v5972_v31 }
 0xd07   :  { %v5964_v39 = vand.u32 4294901760, %v5963_v33  ;;  %v5974_v59 = vand.u32 4294901760, %v5973_v38 }
 0xd08   :  { %31171 = sst [smem:[#allocation11_spill]] %s29497_s1 }
 0xd09   :  { %v5965_v43 = vsub.f32 %v5963_v33, %v5964_v39  ;;  %v5975_v32 = vsub.f32 %v5973_v38, %v5974_v59 }
 0xd0b   :  { %v5966_v46 = vand.u32 4294901760, %v5965_v43  ;;  %v5976_v41 = vand.u32 4294901760, %v5975_v32 }
 0xd0d   :  { %24262 = vmatprep.mubr.f32.mxu1 %v5966_v46 }
 0xd0e   :  { %24263 = vmatmul.mubr.f32.vlgmr.msra.gmra.mrb[10].mxu1 %v5976_v41 }
 0xd0f   :  { %26593 = vmatpush3.bf16.msra.mxu1 %v26590_v51  ;;  %24273 = vmatprep.mubr.f32.mxu1 %v5962_v29  ;;  %v6422_v51 = vadd.s32 40, %v28452_v35 }
 0xd10   :  { %26595 = vmatprep.subr.bf16.mxu1 %v26594_v52 }
 0xd11   :  { %v6426_v60 = vshra.s32 %v6422_v51, 1 }
 0xd13   :  { %26597 = vmatpush3.bf16.msra.mxu1 %v26594_v52  ;;  %v6428_v52 = vshra.s32 %v6424_v58, 1  ;;  %vm6430_vm9 = vcmp.eq.s32.totalorder %v6426_v60, %v28458_v40 }
 0xd14   :  { %26599 = vmatprep.subr.bf16.mxu1 %v26598_v62 }
 0xd15   :  { %vm6432_vm14 = vcmp.eq.s32.totalorder %v6428_v52, %v28458_v40 }
 0xd16   :  { %24274 = vmatmul.mubr.f32.vlgmr.msra.gmra.mrb[10].mxu1 %v5972_v31  ;;  %vm29157_vm3 = vmpackc.low %vm6432_vm14, %vm6431_vm13  ;;  %v6436_v1 = vsel %vm6432_vm14, 1.0, %v28372_v37 }
 0xd17   :  { %26601 = vmatpush3.bf16.msra.mxu1 %v26598_v62  ;;  %24284 = vmatprep.mubr.f32.mxu1 %v5963_v33  ;;  %v6580_v9 = vsub.f32 %v6436_v1, %v6436_v1 }
 0xd18   :  { %26603 = vmatprep.subr.bf16.mxu1 %v26602_v63 }
 0xd19   :  { %v6581_v20 = vand.u32 4294901760, %v6580_v9 }
 0xd1b   :  { %26605 = vmatpush3.bf16.msra.mxu1 %v26602_v63  ;;  %v6434_v63 = vsel %vm6430_vm9, 1.0, %v28372_v37  ;;  %v6582_v16 = vsub.f32 %v6580_v9, %v6581_v20 }
 0xd1c   :  { %26607 = vmatprep.subr.bf16.mxu1 %v29104_v4 }
 0xd1d   :  { %v6583_v18 = vand.u32 4294901760, %v6582_v16  ;;  %v7002_v16 = vld [vmem:[%s29282_s26 + $0x20] sm:$0xff] }
 0xd1e   :  { %24285 = vmatmul.mubr.f32.vlgmr.msra.gmra.mrb[10].mxu1 %v5973_v38 }
 0xd1f   :  { %26609 = vmatpush3.bf16.msra.mxu1 %v29104_v4  ;;  %24295 = vmatprep.mubr.f32.mxu1 %v5964_v39 }
 0xd20   :  { %26611 = vmatprep.subr.bf16.mxu1 %v29106_v27 }
 0xd23   :  { %26613 = vmatpush3.bf16.msra.mxu1 %v29106_v27 }
 0xd24   :  { %26615 = vmatprep.subr.bf16.mxu1 %v26614_v2 }
 0xd26   :  { %24296 = vmatmul.mubr.f32.vlgmr.msra.gmra.mrb[10].mxu1 %v5974_v59 }
 0xd27   :  { %26617 = vmatpush3.bf16.msra.mxu1 %v26614_v2  ;;  %24306 = vmatprep.mubr.f32.mxu1 %v5962_v29  ;;  %v6568_v2 = vsub.f32 %v6434_v63, %v6434_v63 }
 0xd28   :  { %26619 = vmatprep.subr.bf16.mxu1 %v26618_v36 }
 0xd29   :  { %v6569_v11 = vand.u32 4294901760, %v6568_v2 }
 0xd2b   :  { %26621 = vmatpush3.bf16.msra.mxu1 %v26618_v36  ;;  %v6435_v36 = vsel %vm6431_vm13, 1.0, %v28372_v37  ;;  %v6570_v13 = vsub.f32 %v6568_v2, %v6569_v11 }
 0xd2c   :  { %26623 = vmatprep.subr.bf16.mxu1 %v29104_v4  ;;  %v6574_v8 = vsub.f32 %v6435_v36, %v6435_v36 }
 0xd2d   :  { %v6571_v44 = vand.u32 4294901760, %v6570_v13  ;;  %v6998_v13 = vld [vmem:[%s29282_s26] sm:$0xff] }
 0xd2e   :  { %24307 = vmatmul.mubr.f32.vlgmr.msra.gmra.mrb[10].mxu1 %v5972_v31  ;;  %v6575_v19 = vand.u32 4294901760, %v6574_v8  ;;  %v29175_v24 = vpack.c.bf16 %v6580_v9, %v6574_v8 }
 0xd2f   :  { %26625 = vmatpush3.bf16.msra.mxu1 %v29104_v4  ;;  %24317 = vmatprep.mubr.f32.mxu1 %v5962_v29  ;;  %v6425_v4 = vshra.s32 %v6421_v50, 1 }
 0xd30   :  { %26627 = vmatprep.subr.bf16.mxu1 %v29106_v27  ;;  %v6576_v7 = vsub.f32 %v6574_v8, %v6575_v19  ;;  %v29179_v25 = vpack.c.bf16 %v6581_v20, %v6575_v19  ;;  %v7000_v20 = vld [vmem:[%s29282_s26 + $0x10] sm:$0xff] }
 0xd31   :  { %vm6429_vm8 = vcmp.eq.s32.totalorder %v6425_v4, %v28458_v40 }
 0xd32   :  { %vm29149_vm15 = vmpackc.low %vm6430_vm9, %vm6429_vm8  ;;  %v6433_v62 = vsel %vm6429_vm8, 1.0, %v28372_v37  ;;  %v6577_v17 = vand.u32 4294901760, %v6576_v7  ;;  %vm6437_vm8 = vcmask 523264   ;;  %v7001_v7 = vld [vmem:[%s29282_s26 + $0x18] sm:$0xff] }
 0xd33   :  { %26629 = vmatpush3.bf16.msra.mxu1 %v29106_v27  ;;  %26638 = vmatpush3.bf16.msk.msra.mxu0 %vm29149_vm15, %v28373_v45  ;;  %v6562_v40 = vsub.f32 %v6433_v62, %v6433_v62 }
 0xd34   :  { %26702 = vmatprep.subr.bf16.mxu1 %v28370_v34  ;;  %26639 = vmatprep.subr.bf16.mxu0 %v28370_v34  ;;  %v29171_v21 = vpack.c.bf16 %v6583_v18, %v6577_v17 }
 0xd35   :  { %v6563_v10 = vand.u32 4294901760, %v6562_v40  ;;  %v29173_v22 = vpack.c.bf16 %v6568_v2, %v6562_v40 }
 0xd36   :  { %24318 = vmatmul.mubr.f32.vlgmr.msra.gmra.mrb[10].mxu1 %v5972_v31 }
 0xd37   :  { %24450 = vmatprep.mubr.msk.f32.mxu1 %vm28371_vm2, %v28372_v37  ;;  %26641 = vmatpush3.bf16.msk.msra.mxu0 %vm29157_vm3, %v28373_v45  ;;  %v6564_v12 = vsub.f32 %v6562_v40, %v6563_v10  ;;  %v29177_v61 = vpack.c.bf16 %v6569_v11, %v6563_v10 }
 0xd38   :  { %26642 = vmatprep.subr.bf16.mxu0 %v28370_v34 }
 0xd39   :  { %v6565_v14 = vand.u32 4294901760, %v6564_v12 }
 0xd3b   :  { %v29169_v15 = vpack.c.bf16 %v6571_v44, %v6565_v14  ;;  %v6999_v14 = vld [vmem:[%s29282_s26 + $0x8] sm:$0xff]  ;;  %v7011_v44 = vand.u32 4294901760, %v6998_v13 }
 0xd3c   :  { %v7014_v19 = vand.u32 4294901760, %v6999_v14 }
 0xd3d   :  { %v29291_v18 = vsub.f32 %v6998_v13, %v7011_v44 }
 0xd3e   :  { %v29289_v17 = vpack.c.bf16 %v7014_v19, %v7011_v44 }
 0xd40   :  { %26704 = vmatpush3.bf16.msra.mxu1 %v29289_v17 }
 0xd41   :  { %26705 = vmatprep.subr.bf16.mxu1 %v28370_v34 }
 0xe09   :  { %v24319_v26 = vpop.f32.mrb[10].mxu1 }
 0xe0a   :  { %v29187_v28 = vadd.f32 %v24319_v26, %v22249_v23  ;;  %v6411_v29 = vpop.f32.mrb[11].mxu1  ;;  %v7017_v26 = vand.u32 4294901760, %v7000_v20 }
 0xe0b   :  { %v29189_v31 = vadd.f32 %v22249_v23, %v6411_v29  ;;  %v29293_v23 = vsub.f32 %v6999_v14, %v7014_v19  ;;  %v7003_v29 = vld [vmem:[%s29282_s26 + $0x28] sm:$0xff] }
 0xe0c   :  { %v6439_v33 = vsel %vm6437_vm8, %v29187_v28, 0.0  ;;  %v6448_v38 = vmul.f32 %v29187_v28, %v29187_v28 }
 0xe0d   :  { %v6438_v39 = vsel %vm6437_vm8, %v29189_v31, 0.0  ;;  %v6447_v59 = vmul.f32 %v29189_v31, %v29189_v31 }
 0xe0e   :  { %v6450_v43 = vsel %vm6437_vm8, %v6448_v38, 0.0  ;;  %v6440_v32 = vadd.f32 %v6439_v33, %v6438_v39  ;;  %v7004_v33 = vld [vmem:[%s29282_s26 + $0x30] sm:$0xff]  ;;  %v7005_v38 = vld [vmem:[%s29282_s26 + $0x38] sm:$0xff]  ;;  %v7020_v39 = vand.u32 4294901760, %v7001_v7  ;;  %s28406_s26 = smov 28  }
 0xe0f   :  { %v6449_v46 = vsel %vm6437_vm8, %v6447_v59, 0.0  ;;  %v7023_v59 = vand.u32 4294901760, %v7002_v16  ;;  %s29368_s16 = sld [smem:[%s31125_s0 + %s28406_s26]]   ;;  %s28409_s26 = smov 31  }
 0xe10   :  { %v6441_v41 = vrot.slane %v6440_v32, 4  ;;  %v6451_v50 = vadd.f32 %v6450_v43, %v6449_v46  ;;  %v29299_v43 = vsub.f32 %v7000_v20, %v7017_v26  ;;  %v7029_v46 = vand.u32 4294901760, %v7004_v33  ;;  %s29524_s22 = sld [smem:[%s31125_s0 + %s28409_s26]]  }
 0xe12   :  { %v6442_v51 = vadd.f32 %v6441_v41, %v6440_v32  ;;  %v6452_v53 = vrot.slane %v6451_v50, 4  ;;  %v7026_v32 = vand.u32 4294901760, %v7003_v29  ;;  %v7032_v41 = vand.u32 4294901760, %v7005_v38 }
 0xe14   :  { %v6443_v58 = vrot.slane %v6442_v51, 2  ;;  %v6453_v4 = vadd.f32 %v6452_v53, %v6451_v50  ;;  %v29302_v50 = vpack.c.bf16 %v7020_v39, %v7017_v26  ;;  %v29306_v53 = vsub.f32 %v7002_v16, %v7023_v59 }
 0xe15   :  { %31169 = sst [smem:[#allocation9_spill]] %s29368_s16 }
 0xe16   :  { %v6444_v60 = vadd.f32 %v6443_v58, %v6442_v51  ;;  %v6454_v57 = vrot.slane %v6453_v4, 2  ;;  %v29304_v51 = vsub.f32 %v7001_v7, %v7020_v39  ;;  %v29308_v58 = vsub.f32 %v7003_v29, %v7026_v32  ;;  %26707 = vmatpush3.bf16.msra.mxu1 %v29302_v50  ;;  %31172 = sst [smem:[#allocation12_spill]] %s29524_s22 }
 0xe17   :  { %26708 = vmatprep.subr.bf16.mxu1 %v28370_v34  ;;  %v7124_v44 = vand.u32 4294901760, %v29306_v53 }
 0xe18   :  { %v6445_v52 = vrot.slane %v6444_v60, 1  ;;  %v6455_v62 = vadd.f32 %v6454_v57, %v6453_v4  ;;  %v29310_v4 = vsub.f32 %v7004_v33, %v7029_v46  ;;  %v29315_v57 = vpack.c.bf16 %v7026_v32, %v7023_v59 }
 0xe19   :  { %v7131_v19 = vand.u32 4294901760, %v29308_v58  ;;  %v7125_v7 = vsub.f32 %v29306_v53, %v7124_v44 }
 0xe1a   :  { %v6456_v63 = vrot.slane %v6455_v62, 1  ;;  %v6446_v40 = vadd.f32 %v6445_v52, %v6444_v60  ;;  %v29312_v60 = vsub.f32 %v7005_v38, %v7032_v41  ;;  %26710 = vmatpush3.bf16.msra.mxu1 %v29315_v57  ;;  %v29319_v52 = vpack.c.bf16 %v7032_v41, %v7029_v46 }
 0xe1b   :  { %26711 = vmatprep.subr.bf16.mxu1 %v28370_v34  ;;  %v7132_v16 = vsub.f32 %v29308_v58, %v7131_v19  ;;  %v7126_v26 = vand.u32 4294901760, %v7125_v7  ;;  %v7138_v33 = vand.u32 4294901760, %v29310_v4 }
 0xe1c   :  { %v6457_v2 = vadd.f32 %v6456_v63, %v6455_v62  ;;  %v7096_v62 = vand.u32 4294901760, %v29291_v18  ;;  %v7103_v63 = vand.u32 4294901760, %v29293_v23  ;;  %v7145_v38 = vand.u32 4294901760, %v29312_v60 }
 0xe1d   :  { %v7133_v29 = vand.u32 4294901760, %v7132_v16  ;;  %v7139_v59 = vsub.f32 %v29310_v4, %v7138_v33 }
 0xe1e   :  { %v6458_v36 = vsel %vm769_vm7, %v6446_v40, %v6457_v2  ;;  %v7097_v40 = vsub.f32 %v29291_v18, %v7096_v62  ;;  %v7104_v2 = vsub.f32 %v29293_v23, %v7103_v63  ;;  %26713 = vmatpush3.bf16.msra.mxu1 %v29319_v52  ;;  %v7146_v32 = vsub.f32 %v29312_v60, %v7145_v38 }
 0xe1f   :  { %v6460_v1 = vsel %vm6437_vm8, %v6458_v36, 0  ;;  %26714 = vmatprep.subr.bf16.mxu1 %v28370_v34  ;;  %v26721_v39 = vpack.c.bf16 %v7133_v29, %v7126_v26  ;;  %v7140_v46 = vand.u32 4294901760, %v7139_v59  ;;  %v29358_v7 = vpack.c.bf16 %v7145_v38, %v7138_v33 }
 0xe20   :  { %v6527_v8 = vand.u32 4294901760, %v6460_v1  ;;  %v7098_v36 = vand.u32 4294901760, %v7097_v40  ;;  %v7147_v41 = vand.u32 4294901760, %v7146_v32 }
 0xe22   :  { %v6528_v9 = vsub.f32 %v6460_v1, %v6527_v8  ;;  %v7105_v1 = vand.u32 4294901760, %v7104_v2  ;;  %v26724_v40 = vpack.c.bf16 %v7147_v41, %v7140_v46  ;;  %v26727_v2 = vpack.c.bf16 %v29293_v23, %v29291_v18 }
 0xe24   :  { %v6529_v10 = vand.u32 4294901760, %v6528_v9 }
 0xe26   :  { %v6530_v11 = vsub.f32 %v6528_v9, %v6529_v10 }
 0xe28   :  { %v6531_v12 = vand.u32 4294901760, %v6530_v11 }
 0xe2a   :  { %24337 = vmatmul.mubr.f32.vlgmr.msra.gmra.mrb[12].mxu0 %v6531_v12 }
 0xe2b   :  { %26644 = vmatpush3.bf16.msra.mxu0 %v28472_v54  ;;  %24355 = vmatprep.mubr.msk.f32.mxu0 %vm28371_vm2, %v28372_v37 }
 0xe2c   :  { %26645 = vmatprep.subr.bf16.mxu0 %v28370_v34 }
 0xe2f   :  { %26647 = vmatpush3.bf16.msra.mxu0 %v28586_v47 }
 0xe30   :  { %26648 = vmatprep.subr.bf16.mxu0 %v28370_v34 }
 0xe33   :  { %26650 = vmatpush3.bf16.msra.mxu0 %v29169_v15 }
 0xe34   :  { %26651 = vmatprep.subr.bf16.mxu0 %v28370_v34 }
 0xe37   :  { %26653 = vmatpush3.bf16.msra.mxu0 %v29171_v21 }
 0xe38   :  { %26654 = vmatprep.subr.bf16.mxu0 %v28370_v34 }
 0xe3a   :  { %24356 = vmatmul.mubr.f32.vlgmr.msra.gmra.mrb[12].mxu0 %v6527_v8 }
 0xe3b   :  { %26656 = vmatpush3.bf16.msra.mxu0 %v28474_v55  ;;  %24374 = vmatprep.mubr.msk.f32.mxu0 %vm28371_vm2, %v28372_v37 }
 0xe3c   :  { %26657 = vmatprep.subr.bf16.mxu0 %v28370_v34 }
 0xe3f   :  { %26659 = vmatpush3.bf16.msra.mxu0 %v28588_v48 }
 0xe40   :  { %26660 = vmatprep.subr.bf16.mxu0 %v28370_v34 }
 0xe43   :  { %26662 = vmatpush3.bf16.msra.mxu0 %v29173_v22 }
 0xe44   :  { %26663 = vmatprep.subr.bf16.mxu0 %v28370_v34 }
 0xe47   :  { %26665 = vmatpush3.bf16.msra.mxu0 %v29175_v24 }
 0xe48   :  { %26666 = vmatprep.subr.bf16.mxu0 %v28370_v34 }
 0xe4a   :  { %24375 = vmatmul.mubr.f32.vlgmr.msra.gmra.mrb[12].mxu0 %v6528_v9  ;;  %v7117_v9 = vand.u32 4294901760, %v29304_v51 }
 0xe4b   :  { %26668 = vmatpush3.bf16.msk.msra.mxu0 %vm28462_vm5, %v28373_v45  ;;  %24393 = vmatprep.mubr.msk.f32.mxu0 %vm28371_vm2, %v28372_v37 }
 0xe4c   :  { %26669 = vmatprep.subr.bf16.mxu0 %v28370_v34  ;;  %v7118_v12 = vsub.f32 %v29304_v51, %v7117_v9 }
 0xe4e   :  { %v7119_v14 = vand.u32 4294901760, %v7118_v12  ;;  %v29352_v12 = vpack.c.bf16 %v7103_v63, %v7096_v62  ;;  %v22274_v62 = vld [vmem:[%s29363_s10] ss:$0 sm:$0xff] }
 0xe4f   :  { %26671 = vmatpush3.bf16.msk.msra.mxu0 %vm28576_vm10, %v28373_v45 }
 0xe50   :  { %26672 = vmatprep.subr.bf16.mxu0 %v28370_v34 }
 0xe53   :  { %26674 = vmatpush3.bf16.msk.msra.mxu0 %vm29149_vm15, %v28373_v45 }
 0xe54   :  { %26675 = vmatprep.subr.bf16.mxu0 %v28370_v34 }
 0xe57   :  { %26677 = vmatpush3.bf16.msk.msra.mxu0 %vm29157_vm3, %v28373_v45 }
 0xe58   :  { %26678 = vmatprep.subr.bf16.mxu0 %v28370_v34 }
 0xe5a   :  { %24394 = vmatmul.mubr.f32.vlgmr.msra.gmra.mrb[12].mxu0 %v6529_v10  ;;  %v29330_v10 = vpack.c.bf16 %v7105_v1, %v7098_v36  ;;  %v26730_v36 = vpack.c.bf16 %v29304_v51, %v29299_v43  ;;  %v26733_v1 = vpack.c.bf16 %v29308_v58, %v29306_v53 }
 0xe5b   :  { %26680 = vmatpush3.bf16.msra.mxu0 %v28476_v56  ;;  %24412 = vmatprep.mubr.msk.f32.mxu0 %vm28371_vm2, %v28372_v37 }
 0xe5c   :  { %26681 = vmatprep.subr.bf16.mxu0 %v28370_v34 }
 0xe5f   :  { %26683 = vmatpush3.bf16.msra.mxu0 %v28590_v49 }
 0xe60   :  { %26684 = vmatprep.subr.bf16.mxu0 %v28370_v34 }
 0xe63   :  { %26686 = vmatpush3.bf16.msra.mxu0 %v29177_v61 }
 0xe64   :  { %26687 = vmatprep.subr.bf16.mxu0 %v28370_v34 }
 0xe67   :  { %26689 = vmatpush3.bf16.msra.mxu0 %v29179_v25 }
 0xe68   :  { %26690 = vmatprep.subr.bf16.mxu0 %v28370_v34 }
 0xe6a   :  { %24413 = vmatmul.mubr.f32.vlgmr.msra.gmra.mrb[12].mxu0 %v6527_v8 }
 0xe6b   :  { %26692 = vmatpush3.bf16.msk.msra.mxu0 %vm28462_vm5, %v28373_v45  ;;  %24431 = vmatprep.mubr.msk.f32.mxu0 %vm28371_vm2, %v28372_v37 }
 0xe6c   :  { %26693 = vmatprep.subr.bf16.mxu0 %v28370_v34 }
 0xe6f   :  { %26695 = vmatpush3.bf16.msk.msra.mxu0 %vm28576_vm10, %v28373_v45 }
 0xe70   :  { %26696 = vmatprep.subr.bf16.mxu0 %v28370_v34 }
 0xe73   :  { %26698 = vmatpush3.bf16.msk.msra.mxu0 %vm29149_vm15, %v28373_v45 }
 0xe74   :  { %26699 = vmatprep.subr.bf16.mxu0 %v28370_v34 }
 0xe77   :  { %26701 = vmatpush3.bf16.msk.msra.mxu0 %vm29157_vm3, %v28373_v45 }
 0xe78   :  { %26774 = vmatprep.subr.bf16.mxu0 %v28370_v34 }
 0xe7a   :  { %24432 = vmatmul.mubr.f32.vlgmr.msra.gmra.mrb[12].mxu0 %v6527_v8  ;;  %v7110_v8 = vand.u32 4294901760, %v29299_v43 }
 0xe7b   :  { %26776 = vmatpush3.bf16.msk.msra.mxu0 %vm28462_vm5, %v28373_v45  ;;  %24556 = vmatprep.mubr.msk.f32.mxu0 %vm28371_vm2, %v28372_v37 }
 0xe7c   :  { %26777 = vmatprep.subr.bf16.mxu0 %v28370_v34  ;;  %v7111_v11 = vsub.f32 %v29299_v43, %v7110_v8 }
 0xe7e   :  { %v7112_v13 = vand.u32 4294901760, %v7111_v11  ;;  %v26736_v11 = vpack.c.bf16 %v29312_v60, %v29310_v4 }
 0xe7f   :  { %26779 = vmatpush3.bf16.msk.msra.mxu0 %vm28576_vm10, %v28373_v45 }
 0xe80   :  { %26780 = vmatprep.subr.bf16.mxu0 %v28370_v34  ;;  %v29336_v20 = vpack.c.bf16 %v7119_v14, %v7112_v13  ;;  %v29354_v13 = vpack.c.bf16 %v7117_v9, %v7110_v8  ;;  %v29356_v14 = vpack.c.bf16 %v7131_v19, %v7124_v44  ;;  %v6967_v44 = vld [vmem:[%s29368_s16] sm:$0x1]  ;;  %s28411_s16 = smov 35  }
 0xe81   :  { %s29554_s26 = sld [smem:[%s31125_s0 + %s28411_s16]]  }
 0xe87   :  { %31174 = sst [smem:[#allocation14_spill]] %s29554_s26 }
 0xf4d   :  { %v6947_v16 = vpop.f32.mrb[12].mxu0 }
 0xf4e   :  { %v6951_v26 = vmul.f32 0.03125, %v6947_v16  ;;  %v24433_v18 = vpop.f32.mrb[13].mxu0 }
 0xf50   :  { %v6952_v23 = vmul.f32 %v6951_v26, %v6951_v26 }
 0xf52   :  { %v6954_v29 = vrot.slane %v6952_v23, 7 }
 0xf54   :  { %v6956_v43 = vsub.f32 %v6951_v26, %v6954_v29 }
 0xf56   :  { %v6957_v51 = vadd.f32 1e-05, %v6956_v43 }
 0xf58   :  { %28335 = vrsqrt.f32 %v6957_v51 }
 0xf62   :  { %v28336_v63 = vpop.eup %28335 }
 0xf63   :  { %v6966_v8 = vmul.f32 %v28336_v63, %v22274_v62 }
 0xf65   :  { %v6969_v9 = vrot.slane %v6966_v8, 1  ;;  %v6976_v33 = vrot.slane %v6966_v8, %v28553_v0 }
 0xf67   :  { %v6971_v19 = vmul.f32 %v6969_v9, %v6951_v26  ;;  %v6977_v59 = vmul.f32 %v29189_v31, %v6976_v33  ;;  %v6978_v32 = vmul.f32 %v29187_v28, %v6976_v33 }
 0xf69   :  { %v6972_v38 = vsub.f32 %v6967_v44, %v6971_v19 }
 0xf6b   :  { %v6983_v46 = vrot.slane %v6972_v38, %v28558_v5 }
 0xf6d   :  { %v29376_v41 = vadd.f32 %v6983_v46, %v6977_v59  ;;  %v29378_v16 = vadd.f32 %v6983_v46, %v6978_v32  ;;  %v8045_v32 = vld [vmem:[%s29497_s1 + $0x10] sm:$0xff]  ;;  %v8046_v46 = vld [vmem:[%s29497_s1 + $0x18] sm:$0xff] }
 0xf6f   :  { %v6987_v18 = vmax.f32 %v29376_v41, 0.0  ;;  %v6988_v23 = vmax.f32 %v29378_v16, 0.0  ;;  %v8536_v41 = vld [vmem:[%s29554_s26] sm:$0xff]  ;;  %v8542_v16 = vld [vmem:[%s29554_s26 + $0x30] sm:$0xff] }
 0xf71   :  { %v6989_v26 = vsel %vm6437_vm8, %v6987_v18, -inf  ;;  %v6990_v31 = vsel %vm6437_vm8, %v6988_v23, -inf }
 0xf72   :  { %v6991_v29 = vmax.f32 %v6989_v26, %v6990_v31  ;;  %v8058_v26 = vand.u32 4294901760, %v8045_v32  ;;  %v8061_v31 = vand.u32 4294901760, %v8046_v46 }
 0xf74   :  { %v6992_v28 = vrot.slane %v6991_v29, 4 }
 0xf76   :  { %v6993_v43 = vmax.f32 %v6991_v29, %v6992_v28 }
 0xf78   :  { %v6994_v51 = vrot.slane %v6993_v43, 2 }
 0xf7a   :  { %v6995_v62 = vmax.f32 %v6993_v43, %v6994_v51  ;;  %v29513_v43 = vpack.c.bf16 %v8061_v31, %v8058_v26  ;;  %v8146_v51 = vsub.f32 %v8045_v32, %v8058_v26 }
 0xf7c   :  { %v6996_v63 = vrot.slane %v6995_v62, 1 }
 0xf7e   :  { %v6997_v8 = vmax.f32 %v6995_v62, %v6996_v63  ;;  %v8153_v62 = vsub.f32 %v8046_v46, %v8061_v31 }
 0xf80   :  { %v7008_v9 = vsel %vm6437_vm8, %v6997_v8, 0 }
 0xf81   :  { %v7083_v44 = vand.u32 4294901760, %v7008_v9 }
 0xf83   :  { %v7084_v19 = vsub.f32 %v7008_v9, %v7083_v44 }
 0xf85   :  { %v7085_v33 = vand.u32 4294901760, %v7084_v19 }
 0xf87   :  { %v7086_v38 = vsub.f32 %v7084_v19, %v7085_v33 }
 0xf89   :  { %v7087_v59 = vand.u32 4294901760, %v7086_v38 }
 0xf8b   :  { %24451 = vmatmul.mubr.f32.vlgmr.msra.gmra.mrb[12].mxu1 %v7087_v59 }
 0xf8c   :  { %26716 = vmatpush3.bf16.msra.mxu1 %v29330_v10  ;;  %24469 = vmatprep.mubr.msk.f32.mxu1 %vm28371_vm2, %v28372_v37 }
 0xf8d   :  { %26717 = vmatprep.subr.bf16.mxu1 %v28370_v34 }
 0xf90   :  { %26719 = vmatpush3.bf16.msra.mxu1 %v29336_v20 }
 0xf91   :  { %26720 = vmatprep.subr.bf16.mxu1 %v28370_v34 }
 0xf94   :  { %26722 = vmatpush3.bf16.msra.mxu1 %v26721_v39 }
 0xf95   :  { %26723 = vmatprep.subr.bf16.mxu1 %v28370_v34 }
 0xf98   :  { %26725 = vmatpush3.bf16.msra.mxu1 %v26724_v40 }
 0xf99   :  { %26726 = vmatprep.subr.bf16.mxu1 %v28370_v34 }
 0xf9b   :  { %24470 = vmatmul.mubr.f32.vlgmr.msra.gmra.mrb[12].mxu1 %v7083_v44 }
 0xf9c   :  { %26728 = vmatpush3.bf16.msra.mxu1 %v26727_v2  ;;  %24488 = vmatprep.mubr.msk.f32.mxu1 %vm28371_vm2, %v28372_v37 }
 0xf9d   :  { %26729 = vmatprep.subr.bf16.mxu1 %v28370_v34 }
 0xfa0   :  { %26731 = vmatpush3.bf16.msra.mxu1 %v26730_v36  ;;  %v8043_v36 = vld [vmem:[%s29497_s1] sm:$0xff] }
 0xfa1   :  { %26732 = vmatprep.subr.bf16.mxu1 %v28370_v34 }
 0xfa4   :  { %26734 = vmatpush3.bf16.msra.mxu1 %v26733_v1  ;;  %v8044_v1 = vld [vmem:[%s29497_s1 + $0x8] sm:$0xff]  ;;  %s28410_s1 = smov 32  }
 0xfa5   :  { %26735 = vmatprep.subr.bf16.mxu1 %v28370_v34  ;;  %s29529_s10 = sld [smem:[%s31125_s0 + %s28410_s1]]   ;;  %s28413_s1 = smov 34  }
 0xfa6   :  { %s29727_s16 = sld [smem:[%s31125_s0 + %s28413_s1]]   ;;  %s28414_s1 = smov 37  }
 0xfa8   :  { %26737 = vmatpush3.bf16.msra.mxu1 %v26736_v11  ;;  %v8052_v11 = vand.u32 4294901760, %v8043_v36 }
 0xfa9   :  { %26738 = vmatprep.subr.bf16.mxu1 %v28370_v34 }
 0xfab   :  { %24489 = vmatmul.mubr.f32.vlgmr.msra.gmra.mrb[12].mxu1 %v7084_v19  ;;  %v8147_v19 = vand.u32 4294901760, %v8146_v51  ;;  %31173 = sst [smem:[#allocation13_spill]] %s29529_s10  ;;  %v8034_v46 = vld [vmem:[%s29529_s10] sm:$0x1]  ;;  %s28421_s10 = smov 44  }
 0xfac   :  { %26740 = vmatpush3.bf16.msra.mxu1 %v29289_v17  ;;  %24507 = vmatprep.mubr.msk.f32.mxu1 %vm28371_vm2, %v28372_v37  ;;  %31176 = sst [smem:[#allocation16_spill]] %s29727_s16 }
 0xfad   :  { %26741 = vmatprep.subr.bf16.mxu1 %v28370_v34  ;;  %v8148_v59 = vsub.f32 %v8146_v51, %v8147_v19 }
 0xfb0   :  { %26743 = vmatpush3.bf16.msra.mxu1 %v29302_v50 }
 0xfb1   :  { %26744 = vmatprep.subr.bf16.mxu1 %v28370_v34 }
 0xfb4   :  { %26746 = vmatpush3.bf16.msra.mxu1 %v29315_v57 }
 0xfb5   :  { %26747 = vmatprep.subr.bf16.mxu1 %v28370_v34 }
 0xfb8   :  { %26749 = vmatpush3.bf16.msra.mxu1 %v29319_v52 }
 0xfb9   :  { %26750 = vmatprep.subr.bf16.mxu1 %v28370_v34 }
 0xfbb   :  { %24508 = vmatmul.mubr.f32.vlgmr.msra.gmra.mrb[12].mxu1 %v7085_v33  ;;  %v8154_v33 = vand.u32 4294901760, %v8153_v62 }
 0xfbc   :  { %26752 = vmatpush3.bf16.msra.mxu1 %v29352_v12  ;;  %24526 = vmatprep.mubr.msk.f32.mxu1 %vm28371_vm2, %v28372_v37  ;;  %v8055_v12 = vand.u32 4294901760, %v8044_v1 }
 0xfbd   :  { %26753 = vmatprep.subr.bf16.mxu1 %v28370_v34 }
 0xfc0   :  { %26755 = vmatpush3.bf16.msra.mxu1 %v29354_v13  ;;  %v29501_v13 = vpack.c.bf16 %v8055_v12, %v8052_v11 }
 0xfc1   :  { %26756 = vmatprep.subr.bf16.mxu1 %v28370_v34 }
 0xfc4   :  { %26758 = vmatpush3.bf16.msra.mxu1 %v29356_v14  ;;  %v29503_v14 = vsub.f32 %v8043_v36, %v8052_v11 }
 0xfc5   :  { %26759 = vmatprep.subr.bf16.mxu1 %v28370_v34 }
 0xfc6   :  { %v8133_v29 = vand.u32 4294901760, %v29503_v14 }
 0xfc8   :  { %26761 = vmatpush3.bf16.msra.mxu1 %v29358_v7  ;;  %v29505_v7 = vsub.f32 %v8044_v1, %v8055_v12  ;;  %v8134_v63 = vsub.f32 %v29503_v14, %v8133_v29  ;;  %v22287_v12 = vld [vmem:[%s29524_s22] ss:$0 sm:$0xff] }
 0xfc9   :  { %26762 = vmatprep.subr.bf16.mxu1 %v28370_v34 }
 0xfca   :  { %v8140_v28 = vand.u32 4294901760, %v29505_v7  ;;  %v8135_v9 = vand.u32 4294901760, %v8134_v63 }
 0xfcb   :  { %24527 = vmatmul.mubr.f32.vlgmr.msra.gmra.mrb[12].mxu1 %v7083_v44 }
 0xfcc   :  { %26764 = vmatpush3.bf16.msra.mxu1 %v29289_v17  ;;  %24545 = vmatprep.mubr.msk.f32.mxu1 %vm28371_vm2, %v28372_v37  ;;  %v7006_v17 = vld [vmem:[%s29444_s28] sm:$0x1]  ;;  %v8141_v8 = vsub.f32 %v29505_v7, %v8140_v28  ;;  %s29706_s28 = sld [smem:[%s31125_s0 + %s28412_s11]]   ;;  %s28420_s11 = smov 43  }
 0xfcd   :  { %26765 = vmatprep.subr.bf16.mxu1 %v28370_v34 }
 0xfd0   :  { %26767 = vmatpush3.bf16.msra.mxu1 %v29302_v50 }
 0xfd1   :  { %26768 = vmatprep.subr.bf16.mxu1 %v28370_v34 }
 0xfd2   :  { %31175 = sst [smem:[#allocation15_spill]] %s29706_s28 }
 0xfd4   :  { %26770 = vmatpush3.bf16.msra.mxu1 %v29315_v57 }
 0xfd5   :  { %26771 = vmatprep.subr.bf16.mxu1 %v28370_v34 }
 0xfd8   :  { %26773 = vmatpush3.bf16.msra.mxu1 %v29319_v52 }
 0xfd9   :  { %26810 = vmatprep.subr.bf16.mxu1 %v28370_v34 }
 0xfdb   :  { %24546 = vmatmul.mubr.f32.vlgmr.msra.gmra.mrb[12].mxu1 %v7083_v44  ;;  %v8142_v44 = vand.u32 4294901760, %v8141_v8 }
 0xfdc   :  { %24622 = vmatprep.mubr.msk.f32.mxu1 %vm28371_vm2, %v28372_v37  ;;  %26812 = vmatpush3.bf16.msra.mxu1 %v29501_v13 }
 0xfdd   :  { %26813 = vmatprep.subr.bf16.mxu1 %v28370_v34  ;;  %v26817_v38 = vpack.c.bf16 %v8142_v44, %v8135_v9 }
 0xfe0   :  { %26815 = vmatpush3.bf16.msra.mxu1 %v29513_v43 }
 0xfe1   :  { %26816 = vmatprep.subr.bf16.mxu1 %v28370_v34 }
0x10ae   :  { %v7543_v50 = vpop.f32.mrb[12].mxu1 }
0x10af   :  { %v29447_v53 = vadd.f32 %v7543_v50, %v7006_v17  ;;  %v24547_v58 = vpop.f32.mrb[13].mxu1  ;;  %v8155_v17 = vsub.f32 %v8153_v62, %v8154_v33  ;;  %v8149_v50 = vand.u32 4294901760, %v8148_v59 }
0x10b1   :  { %v7548_v4 = vmul.f32 %v29447_v53, %v29447_v53  ;;  %v8156_v58 = vand.u32 4294901760, %v8155_v17 }
0x10b3   :  { %v7551_v60 = vrot.slane %v7548_v4, 7  ;;  %v26820_v4 = vpack.c.bf16 %v8156_v58, %v8149_v50  ;;  %v8538_v58 = vld [vmem:[%s29554_s26 + $0x10] sm:$0xff] }
0x10b5   :  { %v7553_v57 = vsel %vm769_vm7, %v29447_v53, %v7551_v60  ;;  %v26823_v60 = vpack.c.bf16 %v29505_v7, %v29503_v14 }
0x10b6   :  { %v7555_v52 = vsel %vm1785_vm11, %v7553_v57, 0  ;;  %v26826_v57 = vpack.c.bf16 %v8153_v62, %v8146_v51 }
0x10b7   :  { %v7622_v10 = vand.u32 4294901760, %v7555_v52 }
0x10b9   :  { %v7623_v20 = vsub.f32 %v7555_v52, %v7622_v10  ;;  %v26835_v52 = vpack.c.bf16 %v8140_v28, %v8133_v29 }
0x10bb   :  { %v7624_v39 = vand.u32 4294901760, %v7623_v20 }
0x10bd   :  { %v7625_v40 = vsub.f32 %v7623_v20, %v7624_v39 }
0x10bf   :  { %v7626_v2 = vand.u32 4294901760, %v7625_v40 }
0x10c1   :  { %24557 = vmatmul.mubr.f32.vlgmr.msra.gmra.mrb[14].mxu0 %v7626_v2 }
0x10c2   :  { %26782 = vmatpush3.bf16.msra.mxu0 %v28472_v54  ;;  %24567 = vmatprep.mubr.msk.f32.mxu0 %vm28371_vm2, %v28372_v37 }
0x10c3   :  { %26783 = vmatprep.subr.bf16.mxu0 %v28370_v34 }
0x10c6   :  { %26785 = vmatpush3.bf16.msra.mxu0 %v28586_v47 }
0x10c7   :  { %26786 = vmatprep.subr.bf16.mxu0 %v28370_v34 }
0x10c9   :  { %24568 = vmatmul.mubr.f32.vlgmr.msra.gmra.mrb[14].mxu0 %v7622_v10 }
0x10ca   :  { %26788 = vmatpush3.bf16.msra.mxu0 %v28474_v55  ;;  %24578 = vmatprep.mubr.msk.f32.mxu0 %vm28371_vm2, %v28372_v37 }
0x10cb   :  { %26789 = vmatprep.subr.bf16.mxu0 %v28370_v34 }
0x10ce   :  { %26791 = vmatpush3.bf16.msra.mxu0 %v28588_v48 }
0x10cf   :  { %26792 = vmatprep.subr.bf16.mxu0 %v28370_v34 }
0x10d1   :  { %24579 = vmatmul.mubr.f32.vlgmr.msra.gmra.mrb[14].mxu0 %v7623_v20 }
0x10d2   :  { %26794 = vmatpush3.bf16.msk.msra.mxu0 %vm28462_vm5, %v28373_v45  ;;  %24589 = vmatprep.mubr.msk.f32.mxu0 %vm28371_vm2, %v28372_v37 }
0x10d3   :  { %26795 = vmatprep.subr.bf16.mxu0 %v28370_v34 }
0x10d6   :  { %26797 = vmatpush3.bf16.msk.msra.mxu0 %vm28576_vm10, %v28373_v45 }
0x10d7   :  { %26798 = vmatprep.subr.bf16.mxu0 %v28370_v34 }
0x10d9   :  { %24590 = vmatmul.mubr.f32.vlgmr.msra.gmra.mrb[14].mxu0 %v7624_v39 }
0x10da   :  { %26800 = vmatpush3.bf16.msra.mxu0 %v28476_v56  ;;  %24600 = vmatprep.mubr.msk.f32.mxu0 %vm28371_vm2, %v28372_v37 }
0x10db   :  { %26801 = vmatprep.subr.bf16.mxu0 %v28370_v34 }
0x10de   :  { %26803 = vmatpush3.bf16.msra.mxu0 %v28590_v49 }
0x10df   :  { %26804 = vmatprep.subr.bf16.mxu0 %v28370_v34 }
0x10e1   :  { %24601 = vmatmul.mubr.f32.vlgmr.msra.gmra.mrb[14].mxu0 %v7622_v10 }
0x10e2   :  { %26806 = vmatpush3.bf16.msk.msra.mxu0 %vm28462_vm5, %v28373_v45  ;;  %24611 = vmatprep.mubr.msk.f32.mxu0 %vm28371_vm2, %v28372_v37 }
0x10e3   :  { %26807 = vmatprep.subr.bf16.mxu0 %v28370_v34 }
0x10e6   :  { %26809 = vmatpush3.bf16.msk.msra.mxu0 %vm28576_vm10, %v28373_v45 }
0x10e7   :  { %26846 = vmatprep.subr.bf16.mxu0 %v28370_v34 }
0x10e9   :  { %24612 = vmatmul.mubr.f32.vlgmr.msra.gmra.mrb[14].mxu0 %v7622_v10  ;;  %v26838_v10 = vpack.c.bf16 %v8154_v33, %v8147_v19 }
0x10ea   :  { %24684 = vmatprep.mubr.msk.f32.mxu0 %vm28371_vm2, %v28372_v37 }
0x11bc   :  { %v8014_v20 = vpop.f32.mrb[14].mxu0 }
0x11bd   :  { %v8018_v39 = vmul.f32 0.5, %v8014_v20  ;;  %v24613_v40 = vpop.f32.mrb[15].mxu0  ;;  %v9025_v20 = vand.u32 4294901760, %v8538_v58 }
0x11be   :  { %v8540_v40 = vld [vmem:[%s29554_s26 + $0x20] sm:$0xff] }
0x11bf   :  { %v8019_v2 = vmul.f32 %v8018_v39, %v8018_v39 }
0x11c1   :  { %v8021_v36 = vrot.slane %v8019_v2, 7  ;;  %v8541_v2 = vld [vmem:[%s29554_s26 + $0x28] sm:$0xff] }
0x11c3   :  { %v8023_v1 = vsub.f32 %v8018_v39, %v8021_v36 }
0x11c5   :  { %v8024_v11 = vadd.f32 1e-05, %v8023_v1 }
0x11c7   :  { %28337 = vrsqrt.f32 %v8024_v11 }
0x11d1   :  { %v28338_v14 = vpop.eup %28337 }
0x11d2   :  { %v8033_v7 = vmul.f32 %v28338_v14, %v22287_v12  ;;  %v29601_v12 = vsub.f32 %v8538_v58, %v9025_v20 }
0x11d4   :  { %v8036_v32 = vrot.slane %v8033_v7, 1 }
0x11d6   :  { %v8038_v26 = vmul.f32 %v8036_v32, %v8018_v39  ;;  %v8040_v29 = vmul.f32 %v29447_v53, %v8036_v32  ;;  %v9013_v53 = vsel %vm6437_vm8, %v6987_v18, 0  ;;  %v9019_v18 = vand.u32 4294901760, %v8536_v41 }
0x11d7   :  { %v29561_v33 = vand.u32 4294901760, %v9013_v53  ;;  %v9031_v32 = vand.u32 4294901760, %v8540_v40 }
0x11d8   :  { %v8039_v31 = vsub.f32 %v8034_v46, %v8038_v26  ;;  %v9034_v46 = vand.u32 4294901760, %v8541_v2 }
0x11d9   :  { %v29569_v59 = vsub.f32 %v9013_v53, %v29561_v33 }
0x11da   :  { %v8041_v28 = vadd.f32 %v8040_v29, %v8039_v31 }
0x11db   :  { %v9093_v50 = vand.u32 4294901760, %v29569_v59 }
0x11dc   :  { %v8042_v51 = vmax.f32 %v8041_v28, 0.0 }
0x11de   :  { %v8049_v62 = vsel %vm1785_vm11, %v8042_v51, 0 }
0x11df   :  { %v29535_v63 = vand.u32 4294901760, %v8049_v62 }
0x11e1   :  { %v8121_v8 = vsub.f32 %v8049_v62, %v29535_v63  ;;  %v9128_v62 = vand.u32 4294901760, %v29601_v12 }
0x11e3   :  { %v8122_v9 = vand.u32 4294901760, %v8121_v8 }
0x11e5   :  { %v8123_v44 = vsub.f32 %v8121_v8, %v8122_v9 }
0x11e7   :  { %v8124_v19 = vand.u32 4294901760, %v8123_v44  ;;  %v29626_v44 = vsub.f32 %v8541_v2, %v9034_v46 }
0x11e9   :  { %24623 = vmatmul.mubr.f32.vlgmr.msra.gmra.mrb[14].mxu1 %v8124_v19 }
0x11ea   :  { %26818 = vmatpush3.bf16.msra.mxu1 %v26817_v38  ;;  %24633 = vmatprep.mubr.msk.f32.mxu1 %vm28371_vm2, %v28372_v37  ;;  %v8537_v38 = vld [vmem:[%s29554_s26 + $0x8] sm:$0xff] }
0x11eb   :  { %26819 = vmatprep.subr.bf16.mxu1 %v28370_v34  ;;  %v9022_v17 = vand.u32 4294901760, %v8537_v38 }
0x11ee   :  { %26821 = vmatpush3.bf16.msra.mxu1 %v26820_v4  ;;  %v8539_v4 = vld [vmem:[%s29554_s26 + $0x18] sm:$0xff] }
0x11ef   :  { %26822 = vmatprep.subr.bf16.mxu1 %v28370_v34  ;;  %v9028_v39 = vand.u32 4294901760, %v8539_v4 }
0x11f1   :  { %24634 = vmatmul.mubr.f32.vlgmr.msra.gmra.mrb[14].mxu1 %v29535_v63  ;;  %v29603_v14 = vsub.f32 %v8539_v4, %v9028_v39  ;;  %v29606_v7 = vpack.c.bf16 %v9028_v39, %v9025_v20  ;;  %v9149_v4 = vand.u32 4294901760, %v29626_v44 }
0x11f2   :  { %26824 = vmatpush3.bf16.msra.mxu1 %v26823_v60  ;;  %24644 = vmatprep.mubr.msk.f32.mxu1 %vm28371_vm2, %v28372_v37  ;;  %v9016_v60 = vsel %vm6437_vm8, %v6988_v23, 0  ;;  %v8543_v23 = vld [vmem:[%s29554_s26 + $0x38] sm:$0xff] }
0x11f3   :  { %26825 = vmatprep.subr.bf16.mxu1 %v28370_v34  ;;  %v29594_v36 = vand.u32 4294901760, %v9016_v60  ;;  %v9040_v31 = vand.u32 4294901760, %v8543_v23 }
0x11f5   :  { %v29610_v29 = vsub.f32 %v9016_v60, %v29594_v36  ;;  %v29643_v20 = vsub.f32 %v8543_v23, %v9040_v31 }
0x11f6   :  { %26827 = vmatpush3.bf16.msra.mxu1 %v26826_v57  ;;  %v29582_v57 = vsub.f32 %v8536_v41, %v9019_v18 }
0x11f7   :  { %26828 = vmatprep.subr.bf16.mxu1 %v28370_v34  ;;  %v9103_v53 = vand.u32 4294901760, %v29610_v29 }
0x11f8   :  { %v9114_v1 = vand.u32 4294901760, %v29582_v57 }
0x11f9   :  { %24645 = vmatmul.mubr.f32.vlgmr.msra.gmra.mrb[14].mxu1 %v8121_v8  ;;  %v29622_v8 = vpack.c.bf16 %v9034_v46, %v9031_v32  ;;  %v9104_v39 = vsub.f32 %v29610_v29, %v9103_v53  ;;  %v9163_v46 = vand.u32 4294901760, %v29643_v20 }
0x11fa   :  { %26830 = vmatpush3.bf16.msra.mxu1 %v29501_v13  ;;  %24655 = vmatprep.mubr.msk.f32.mxu1 %vm28371_vm2, %v28372_v37  ;;  %v9115_v28 = vsub.f32 %v29582_v57, %v9114_v1 }
0x11fb   :  { %26831 = vmatprep.subr.bf16.mxu1 %v28370_v34 }
0x11fc   :  { %v9116_v41 = vand.u32 4294901760, %v9115_v28 }
0x11fe   :  { %26833 = vmatpush3.bf16.msra.mxu1 %v29513_v43 }
0x11ff   :  { %26834 = vmatprep.subr.bf16.mxu1 %v28370_v34 }
0x1201   :  { %24656 = vmatmul.mubr.f32.vlgmr.msra.gmra.mrb[14].mxu1 %v8122_v9  ;;  %v29624_v9 = vsub.f32 %v8540_v40, %v9031_v32 }
0x1202   :  { %26836 = vmatpush3.bf16.msra.mxu1 %v26835_v52  ;;  %24666 = vmatprep.mubr.msk.f32.mxu1 %vm28371_vm2, %v28372_v37  ;;  %v29584_v52 = vsub.f32 %v8537_v38, %v9022_v17 }
0x1203   :  { %26837 = vmatprep.subr.bf16.mxu1 %v28370_v34  ;;  %v9142_v58 = vand.u32 4294901760, %v29624_v9 }
0x1204   :  { %v9121_v11 = vand.u32 4294901760, %v29584_v52 }
0x1205   :  { %v9143_v32 = vsub.f32 %v29624_v9, %v9142_v58 }
0x1206   :  { %26839 = vmatpush3.bf16.msra.mxu1 %v26838_v10  ;;  %v29587_v10 = vpack.c.bf16 %v9022_v17, %v9019_v18  ;;  %v9122_v51 = vsub.f32 %v29584_v52, %v9121_v11  ;;  %v9129_v18 = vsub.f32 %v29601_v12, %v9128_v62 }
0x1207   :  { %26840 = vmatprep.subr.bf16.mxu1 %v28370_v34 }
0x1208   :  { %v9123_v38 = vand.u32 4294901760, %v9122_v51  ;;  %v9130_v40 = vand.u32 4294901760, %v9129_v18 }
0x1209   :  { %24667 = vmatmul.mubr.f32.vlgmr.msra.gmra.mrb[14].mxu1 %v29535_v63 }
0x120a   :  { %26842 = vmatpush3.bf16.msra.mxu1 %v29501_v13  ;;  %24677 = vmatprep.mubr.msk.f32.mxu1 %vm28371_vm2, %v28372_v37  ;;  %v9094_v13 = vsub.f32 %v29569_v59, %v9093_v50 }
0x120b   :  { %26843 = vmatprep.subr.bf16.mxu1 %v28370_v34 }
0x120c   :  { %v9095_v26 = vand.u32 4294901760, %v9094_v13  ;;  %v26880_v13 = vpack.c.bf16 %v9123_v38, %v9116_v41  ;;  %v9164_v41 = vsub.f32 %v29643_v20, %v9163_v46 }
0x120e   :  { %26845 = vmatpush3.bf16.msra.mxu1 %v29513_v43  ;;  %v9037_v43 = vand.u32 4294901760, %v8542_v16 }
0x120f   :  { %26865 = vmatprep.subr.bf16.mxu1 %v29587_v10 }
0x1210   :  { %v29628_v19 = vpack.c.bf16 %v9040_v31, %v9037_v43  ;;  %v29641_v60 = vsub.f32 %v8542_v16, %v9037_v43  ;;  %v9150_v16 = vsub.f32 %v29626_v44, %v9149_v4  ;;  %v9144_v31 = vand.u32 4294901760, %v9143_v32 }
0x1211   :  { %24678 = vmatmul.mubr.f32.vlgmr.msra.gmra.mrb[14].mxu1 %v29535_v63  ;;  %v9135_v63 = vand.u32 4294901760, %v29603_v14 }
0x1212   :  { %26867 = vmatpush3.bf16.msra.mxu1 %v29587_v10  ;;  %24738 = vmatprep.mubr.f32.mxu1 %v9095_v26  ;;  %v9156_v23 = vand.u32 4294901760, %v29641_v60  ;;  %v9105_v26 = vand.u32 4294901760, %v9104_v39  ;;  %v9151_v28 = vand.u32 4294901760, %v9150_v16  ;;  %v26896_v39 = vpack.c.bf16 %v29584_v52, %v29582_v57  ;;  %v8544_v52 = vld [vmem:[%s29706_s28] sm:$0xff] }
0x1213   :  { %26869 = vmatprep.subr.bf16.mxu1 %v29606_v7  ;;  %v9136_v17 = vsub.f32 %v29603_v14, %v9135_v63 }
0x1214   :  { %v9157_v51 = vsub.f32 %v29641_v60, %v9156_v23  ;;  %v26888_v38 = vpack.c.bf16 %v9151_v28, %v9144_v31  ;;  %v26940_v57 = vpack.c.bf16 %v9163_v46, %v9156_v23 }
0x1215   :  { %v9137_v2 = vand.u32 4294901760, %v9136_v17  ;;  %v9165_v17 = vand.u32 4294901760, %v9164_v41 }
0x1216   :  { %26871 = vmatpush3.bf16.msra.mxu1 %v29606_v7  ;;  %v9158_v18 = vand.u32 4294901760, %v9157_v51 }
0x1217   :  { %26873 = vmatprep.subr.bf16.mxu1 %v29622_v8  ;;  %v26884_v43 = vpack.c.bf16 %v9137_v2, %v9130_v40  ;;  %v26900_v40 = vpack.c.bf16 %v29603_v14, %v29601_v12  ;;  %v26908_v2 = vpack.c.bf16 %v29643_v20, %v29641_v60 }
0x1218   :  { %v26892_v6 = vpack.c.bf16 %v9165_v17, %v9158_v18 }
0x121a   :  { %26875 = vmatpush3.bf16.msra.mxu1 %v29622_v8 }
0x121b   :  { %26877 = vmatprep.subr.bf16.mxu1 %v29628_v19 }
0x121e   :  { %26879 = vmatpush3.bf16.msra.mxu1 %v29628_v19 }
0x121f   :  { %26881 = vmatprep.subr.bf16.mxu1 %v26880_v13 }
0x1221   :  { %24739 = vmatmul.mubr.f32.vlgmr.msra.gmra.mrb[16].mxu1 %v9105_v26 }
0x1222   :  { %26883 = vmatpush3.bf16.msra.mxu1 %v26880_v13  ;;  %24757 = vmatprep.mubr.f32.mxu1 %v29561_v33  ;;  %v26904_v13 = vpack.c.bf16 %v29626_v44, %v29624_v9 }
0x1223   :  { %26885 = vmatprep.subr.bf16.mxu1 %v26884_v43 }
0x1226   :  { %26887 = vmatpush3.bf16.msra.mxu1 %v26884_v43 }
0x1227   :  { %26889 = vmatprep.subr.bf16.mxu1 %v26888_v38 }
0x122a   :  { %26891 = vmatpush3.bf16.msra.mxu1 %v26888_v38 }
0x122b   :  { %26893 = vmatprep.subr.bf16.mxu1 %v26892_v6 }
0x122e   :  { %26895 = vmatpush3.bf16.msra.mxu1 %v26892_v6  ;;  %v26928_v6 = vpack.c.bf16 %v9121_v11, %v9114_v1 }
0x122f   :  { %26897 = vmatprep.subr.bf16.mxu1 %v26896_v39 }
0x1231   :  { %24758 = vmatmul.mubr.f32.vlgmr.msra.gmra.mrb[16].mxu1 %v29594_v36 }
0x1232   :  { %26899 = vmatpush3.bf16.msra.mxu1 %v26896_v39  ;;  %24776 = vmatprep.mubr.f32.mxu1 %v29569_v59  ;;  %v26932_v59 = vpack.c.bf16 %v9135_v63, %v9128_v62 }
0x1233   :  { %26901 = vmatprep.subr.bf16.mxu1 %v26900_v40 }
0x1236   :  { %26903 = vmatpush3.bf16.msra.mxu1 %v26900_v40 }
0x1237   :  { %26905 = vmatprep.subr.bf16.mxu1 %v26904_v13 }
0x123a   :  { %26907 = vmatpush3.bf16.msra.mxu1 %v26904_v13 }
0x123b   :  { %26909 = vmatprep.subr.bf16.mxu1 %v26908_v2 }
0x123e   :  { %26911 = vmatpush3.bf16.msra.mxu1 %v26908_v2 }
0x123f   :  { %26913 = vmatprep.subr.bf16.mxu1 %v29587_v10 }
0x1241   :  { %24777 = vmatmul.mubr.f32.vlgmr.msra.gmra.mrb[16].mxu1 %v29610_v29 }
0x1242   :  { %26915 = vmatpush3.bf16.msra.mxu1 %v29587_v10  ;;  %24795 = vmatprep.mubr.f32.mxu1 %v9093_v50  ;;  %v26936_v50 = vpack.c.bf16 %v9149_v4, %v9142_v58 }
0x1243   :  { %26917 = vmatprep.subr.bf16.mxu1 %v29606_v7 }
0x1246   :  { %26919 = vmatpush3.bf16.msra.mxu1 %v29606_v7 }
0x1247   :  { %26921 = vmatprep.subr.bf16.mxu1 %v29622_v8 }
0x124a   :  { %26923 = vmatpush3.bf16.msra.mxu1 %v29622_v8 }
0x124b   :  { %26925 = vmatprep.subr.bf16.mxu1 %v29628_v19 }
0x124e   :  { %26927 = vmatpush3.bf16.msra.mxu1 %v29628_v19 }
0x124f   :  { %26929 = vmatprep.subr.bf16.mxu1 %v26928_v6 }
0x1251   :  { %24796 = vmatmul.mubr.f32.vlgmr.msra.gmra.mrb[16].mxu1 %v9103_v53 }
0x1252   :  { %26931 = vmatpush3.bf16.msra.mxu1 %v26928_v6  ;;  %24814 = vmatprep.mubr.f32.mxu1 %v29561_v33 }
0x1253   :  { %26933 = vmatprep.subr.bf16.mxu1 %v26932_v59 }
0x1256   :  { %26935 = vmatpush3.bf16.msra.mxu1 %v26932_v59 }
0x1257   :  { %26937 = vmatprep.subr.bf16.mxu1 %v26936_v50 }
0x125a   :  { %26939 = vmatpush3.bf16.msra.mxu1 %v26936_v50 }
0x125b   :  { %26941 = vmatprep.subr.bf16.mxu1 %v26940_v57 }
0x125e   :  { %26943 = vmatpush3.bf16.msra.mxu1 %v26940_v57 }
0x125f   :  { %26945 = vmatprep.subr.bf16.mxu1 %v29587_v10 }
0x1261   :  { %24815 = vmatmul.mubr.f32.vlgmr.msra.gmra.mrb[16].mxu1 %v29594_v36 }
0x1262   :  { %26947 = vmatpush3.bf16.msra.mxu1 %v29587_v10  ;;  %24833 = vmatprep.mubr.f32.mxu1 %v29561_v33  ;;  %v8545_v33 = vld [vmem:[%s29706_s28 + $0x8] sm:$0xff]  ;;  %v8550_v10 = vand.u32 4294901760, %v8544_v52  ;;  %s28417_s28 = smov 39  }
0x1263   :  { %26949 = vmatprep.subr.bf16.mxu1 %v29606_v7  ;;  %v8553_v1 = vand.u32 4294901760, %v8545_v33  ;;  %s29847_s22 = sld [smem:[%s31125_s0 + %s28417_s28]]  }
0x1264   :  { %v8628_v12 = vsub.f32 %v8544_v52, %v8550_v10 }
0x1265   :  { %v26847_v11 = vpack.c.bf16 %v8553_v1, %v8550_v10  ;;  %v8635_v14 = vsub.f32 %v8545_v33, %v8553_v1 }
0x1266   :  { %26951 = vmatpush3.bf16.msra.mxu1 %v29606_v7  ;;  %v8629_v29 = vand.u32 4294901760, %v8628_v12 }
0x1267   :  { %26953 = vmatprep.subr.bf16.mxu1 %v29622_v8  ;;  %26848 = vmatpush3.bf16.msra.mxu0 %v26847_v11  ;;  %v8636_v7 = vand.u32 4294901760, %v8635_v14 }
0x1268   :  { %26849 = vmatprep.subr.bf16.mxu0 %v28370_v34  ;;  %v8630_v62 = vsub.f32 %v8628_v12, %v8629_v29 }
0x1269   :  { %v8637_v63 = vsub.f32 %v8635_v14, %v8636_v7  ;;  %v26859_v53 = vpack.c.bf16 %v8636_v7, %v8629_v29  ;;  %31179 = sst [smem:[#allocation19_spill]] %s29847_s22 }
0x126a   :  { %26955 = vmatpush3.bf16.msra.mxu1 %v29622_v8  ;;  %v8631_v8 = vand.u32 4294901760, %v8630_v62 }
0x126b   :  { %26957 = vmatprep.subr.bf16.mxu1 %v29628_v19  ;;  %v8638_v9 = vand.u32 4294901760, %v8637_v63 }
0x126d   :  { %v26850_v44 = vpack.c.bf16 %v8638_v9, %v8631_v8 }
0x126e   :  { %26959 = vmatpush3.bf16.msra.mxu1 %v29628_v19  ;;  %v26853_v19 = vpack.c.bf16 %v8635_v14, %v8628_v12 }
0x126f   :  { %27044 = vmatprep.subr.bf16.mxu1 %v28370_v34 }
0x1271   :  { %24834 = vmatmul.mubr.f32.vlgmr.msra.gmra.mrb[16].mxu1 %v29594_v36  ;;  %v8047_v36 = vld [vmem:[%s29727_s16] sm:$0x1]  ;;  %s29759_s16 = sld [smem:[%s31125_s0 + %s28414_s1]]   ;;  %s28415_s1 = smov 40  }
0x1272   :  { %27046 = vmatpush3.bf16.msk.msra.mxu1 %vm28462_vm5, %v28373_v45  ;;  %24972 = vmatprep.mubr.msk.f32.mxu1 %vm28371_vm2, %v28372_v37 }
0x1273   :  { %27047 = vmatprep.subr.bf16.mxu1 %v28370_v34 }
0x1277   :  { %31177 = sst [smem:[#allocation17_spill]] %s29759_s16  ;;  %v22288_v38 = vld [vmem:[%s29759_s16] ss:$0 sm:$0xff] }
0x1278   :  { %s29819_s16 = sld [smem:[%s31125_s0 + %s28415_s1]]   ;;  %s28416_s1 = smov 38  }
0x127e   :  { %31178 = sst [smem:[#allocation18_spill]] %s29819_s16 }
0x12e4   :  { %v8532_v58 = vpop.f32.mrb[14].mxu1 }
0x12e5   :  { %v27812_v4 = vadd.f32 %v8532_v58, %v8047_v36  ;;  %v24679_v60 = vpop.f32.mrb[15].mxu1 }
0x12e7   :  { %v8547_v20 = vsel %vm748_vm6, %v27812_v4, 0 }
0x12e8   :  { %v8616_v32 = vand.u32 4294901760, %v8547_v20 }
0x12ea   :  { %v8617_v16 = vsub.f32 %v8547_v20, %v8616_v32 }
0x12ec   :  { %v8618_v23 = vand.u32 4294901760, %v8617_v16 }
0x12ee   :  { %v8619_v46 = vsub.f32 %v8617_v16, %v8618_v23 }
0x12f0   :  { %v8620_v26 = vand.u32 4294901760, %v8619_v46 }
0x12f2   :  { %24685 = vmatmul.mubr.f32.vlgmr.msra.gmra.mrb[16].mxu0 %v8620_v26 }
0x12f3   :  { %26851 = vmatpush3.bf16.msra.mxu0 %v26850_v44  ;;  %24691 = vmatprep.mubr.msk.f32.mxu0 %vm28371_vm2, %v28372_v37 }
0x12f4   :  { %26852 = vmatprep.subr.bf16.mxu0 %v28370_v34 }
0x12fa   :  { %24692 = vmatmul.mubr.f32.vlgmr.msra.gmra.mrb[16].mxu0 %v8616_v32 }
0x12fb   :  { %26854 = vmatpush3.bf16.msra.mxu0 %v26853_v19  ;;  %24698 = vmatprep.mubr.msk.f32.mxu0 %vm28371_vm2, %v28372_v37 }
0x12fc   :  { %26855 = vmatprep.subr.bf16.mxu0 %v28370_v34 }
0x1302   :  { %24699 = vmatmul.mubr.f32.vlgmr.msra.gmra.mrb[16].mxu0 %v8617_v16  ;;  %v10131_v16 = vld [vmem:[%s29819_s16 + $0x8] sm:$0xff] }
0x1303   :  { %26857 = vmatpush3.bf16.msra.mxu0 %v26847_v11  ;;  %24705 = vmatprep.mubr.msk.f32.mxu0 %vm28371_vm2, %v28372_v37  ;;  %v10151_v26 = vand.u32 4294901760, %v10131_v16 }
0x1304   :  { %26858 = vmatprep.subr.bf16.mxu0 %v28370_v34 }
0x130a   :  { %24706 = vmatmul.mubr.f32.vlgmr.msra.gmra.mrb[16].mxu0 %v8618_v23  ;;  %v10132_v23 = vld [vmem:[%s29819_s16 + $0x10] sm:$0xff] }
0x130b   :  { %26860 = vmatpush3.bf16.msra.mxu0 %v26859_v53  ;;  %24712 = vmatprep.mubr.msk.f32.mxu0 %vm28371_vm2, %v28372_v37 }
0x130c   :  { %26861 = vmatprep.subr.bf16.mxu0 %v28370_v34 }
0x1312   :  { %24713 = vmatmul.mubr.f32.vlgmr.msra.gmra.mrb[16].mxu0 %v8616_v32 }
0x1313   :  { %26863 = vmatpush3.bf16.msra.mxu0 %v26847_v11  ;;  %24719 = vmatprep.mubr.msk.f32.mxu0 %vm28371_vm2, %v28372_v37 }
0x1314   :  { %26960 = vmatprep.subr.bf16.mxu0 %v28370_v34 }
0x131a   :  { %24720 = vmatmul.mubr.f32.vlgmr.msra.gmra.mrb[16].mxu0 %v8616_v32  ;;  %v10130_v32 = vld [vmem:[%s29819_s16] sm:$0xff] }
0x131b   :  { %26962 = vmatpush3.bf16.msk.msra.mxu0 %vm28462_vm5, %v28373_v45  ;;  %24844 = vmatprep.mubr.msk.f32.mxu0 %vm28371_vm2, %v28372_v37  ;;  %v10148_v46 = vand.u32 4294901760, %v10130_v32 }
0x131c   :  { %26963 = vmatprep.subr.bf16.mxu0 %v28370_v34 }
0x131f   :  { %26965 = vmatpush3.bf16.msk.msra.mxu0 %vm28576_vm10, %v28373_v45 }
0x1320   :  { %26966 = vmatprep.subr.bf16.mxu0 %v28370_v34 }
0x1344   :  { %v24835_v43 = vpop.f32.mrb[16].mxu1 }
0x1345   :  { %v9588_v31 = vpop.f32.mrb[17].mxu1 }
0x13ed   :  { %v9004_v28 = vpop.f32.mrb[16].mxu0 }
0x13ee   :  { %v9011_v51 = vrot.slane %v9004_v28, %v28558_v5  ;;  %v24721_v41 = vpop.f32.mrb[17].mxu0 }
0x13ef   :  { %v10238_v41 = vsub.f32 %v10130_v32, %v10148_v46 }
0x13f0   :  { %v27814_v18 = vadd.f32 %v9588_v31, %v9011_v51  ;;  %v27813_v17 = vadd.f32 %v24835_v43, %v9011_v51  ;;  %v10133_v43 = vld [vmem:[%s29819_s16 + $0x18] sm:$0xff]  ;;  %v10154_v31 = vand.u32 4294901760, %v10132_v23  ;;  %v29825_v51 = vpack.c.bf16 %v10151_v26, %v10148_v46  ;;  %s29842_s16 = sld [smem:[%s31125_s0 + %s28416_s1]]   ;;  %v22310_v46 = vld [vmem:[%s28435_s9 + $0x10] sm:$0xff] }
0x13f1   :  { %v10157_v28 = vand.u32 4294901760, %v10133_v43 }
0x13f2   :  { %v29763_v39 = vadd.f32 %v27814_v18, %v22288_v38  ;;  %v29765_v40 = vadd.f32 %v27813_v17, %v22288_v38  ;;  %v10245_v38 = vsub.f32 %v10131_v16, %v10151_v26  ;;  %v10239_v17 = vand.u32 4294901760, %v10238_v41  ;;  %v22311_v26 = vld [vmem:[%s28435_s9 + $0x18] sm:$0xff]  ;;  %s30015_s9 = sld [smem:[%s31125_s0 + %s28420_s11]]  }
0x13f3   :  { %v29827_v18 = vpack.c.bf16 %v10157_v28, %v10154_v31 }
0x13f4   :  { %v9607_v13 = vsel %vm1785_vm11, %v29763_v39, 0.0  ;;  %v9608_v2 = vsel %vm1785_vm11, %v29765_v40, 0.0  ;;  %v9616_v6 = vmul.f32 %v29763_v39, %v29763_v39  ;;  %v9617_v59 = vmul.f32 %v29765_v40, %v29765_v40 }
0x13f5   :  { %v9609_v50 = vadd.f32 %v9608_v2, %v9607_v13  ;;  %v10246_v13 = vand.u32 4294901760, %v10245_v38  ;;  %v10240_v2 = vsub.f32 %v10238_v41, %v10239_v17 }
0x13f6   :  { %v9618_v57 = vsel %vm1785_vm11, %v9616_v6, 0.0  ;;  %v9619_v52 = vsel %vm1785_vm11, %v9617_v59, 0.0  ;;  %v10252_v59 = vsub.f32 %v10132_v23, %v10154_v31 }
0x13f7   :  { %v9610_v33 = vrot.slane %v9609_v50, 4  ;;  %v9620_v10 = vadd.f32 %v9619_v52, %v9618_v57  ;;  %v10247_v6 = vsub.f32 %v10245_v38, %v10246_v13  ;;  %v10241_v57 = vand.u32 4294901760, %v10240_v2 }
0x13f9   :  { %v9611_v1 = vadd.f32 %v9610_v33, %v9609_v50  ;;  %v9621_v11 = vrot.slane %v9620_v10, 4  ;;  %v10259_v50 = vsub.f32 %v10133_v43, %v10157_v28  ;;  %v10248_v52 = vand.u32 4294901760, %v10247_v6  ;;  %v10108_v43 = vld [vmem:[%s29847_s22] sm:$0x1]  ;;  %s31201_s22 = sld [smem:[#allocation19_spill]] }
0x13fa   :  { %v10253_v33 = vand.u32 4294901760, %v10252_v59 }
0x13fb   :  { %v9612_v12 = vrot.slane %v9611_v1, 2  ;;  %v9622_v14 = vadd.f32 %v9621_v11, %v9620_v10  ;;  %v10260_v10 = vand.u32 4294901760, %v10259_v50 }
0x13fc   :  { %v10254_v11 = vsub.f32 %v10252_v59, %v10253_v33 }
0x13fd   :  { %v9613_v29 = vadd.f32 %v9612_v12, %v9611_v1  ;;  %v9623_v7 = vrot.slane %v9622_v14, 2  ;;  %v27004_v1 = vpack.c.bf16 %v10248_v52, %v10241_v57  ;;  %v10261_v12 = vsub.f32 %v10259_v50, %v10260_v10 }
0x13ff   :  { %v9614_v62 = vrot.slane %v9613_v29, 1  ;;  %v9624_v63 = vadd.f32 %v9623_v7, %v9622_v14  ;;  %v10255_v14 = vand.u32 4294901760, %v10254_v11 }
0x1401   :  { %v9625_v8 = vrot.slane %v9624_v63, 1  ;;  %v9615_v9 = vadd.f32 %v9614_v62, %v9613_v29  ;;  %v10262_v29 = vand.u32 4294901760, %v10261_v12  ;;  %v27012_v62 = vpack.c.bf16 %v10245_v38, %v10238_v41 }
0x1402   :  { %v11190_v41 = vsel %vm186_vm1, %v22310_v46, 0.0  ;;  %v11191_v38 = vsel %vm186_vm1, %v22311_v26, 0.0 }
0x1403   :  { %v9626_v44 = vadd.f32 %v9625_v8, %v9624_v63  ;;  %v27008_v7 = vpack.c.bf16 %v10262_v29, %v10255_v14  ;;  %v29833_v63 = vpack.c.bf16 %v10259_v50, %v10252_v59  ;;  %v29835_v8 = vpack.c.bf16 %v10246_v13, %v10239_v17 }
0x1404   :  { %v11192_v59 = vadd.f32 %v11191_v38, %v11190_v41 }
0x1405   :  { %v9627_v19 = vsel %vm769_vm7, %v9615_v9, %v9626_v44  ;;  %v29837_v9 = vpack.c.bf16 %v10260_v10, %v10253_v33 }
0x1406   :  { %v9629_v53 = vsel %vm1785_vm11, %v9627_v19, 0  ;;  %v11193_v10 = vrot.slane %v11192_v59, 4 }
0x1407   :  { %v9696_v36 = vand.u32 4294901760, %v9629_v53 }
0x1409   :  { %v9697_v58 = vsub.f32 %v9629_v53, %v9696_v36 }
0x140b   :  { %v9698_v4 = vand.u32 4294901760, %v9697_v58 }
0x140d   :  { %v9699_v60 = vsub.f32 %v9697_v58, %v9698_v4 }
0x140f   :  { %v9700_v20 = vand.u32 4294901760, %v9699_v60 }
0x1411   :  { %24845 = vmatmul.mubr.f32.vlgmr.msra.gmra.mrb[18].mxu0 %v9700_v20  ;;  %v22301_v20 = vld [vmem:[%s29842_s16] ss:$0 sm:$0xff] }
0x1412   :  { %26968 = vmatpush3.bf16.msra.mxu0 %v28472_v54  ;;  %24855 = vmatprep.mubr.msk.f32.mxu0 %vm28371_vm2, %v28372_v37 }
0x1413   :  { %26969 = vmatprep.subr.bf16.mxu0 %v28370_v34 }
0x1416   :  { %26971 = vmatpush3.bf16.msra.mxu0 %v28586_v47 }
0x1417   :  { %26972 = vmatprep.subr.bf16.mxu0 %v28370_v34 }
0x1419   :  { %24856 = vmatmul.mubr.f32.vlgmr.msra.gmra.mrb[18].mxu0 %v9696_v36 }
0x141a   :  { %26974 = vmatpush3.bf16.msra.mxu0 %v28474_v55  ;;  %24866 = vmatprep.mubr.msk.f32.mxu0 %vm28371_vm2, %v28372_v37 }
0x141b   :  { %26975 = vmatprep.subr.bf16.mxu0 %v28370_v34 }
0x141e   :  { %26977 = vmatpush3.bf16.msra.mxu0 %v28588_v48 }
0x141f   :  { %26978 = vmatprep.subr.bf16.mxu0 %v28370_v34 }
0x1421   :  { %24867 = vmatmul.mubr.f32.vlgmr.msra.gmra.mrb[18].mxu0 %v9697_v58 }
0x1422   :  { %26980 = vmatpush3.bf16.msk.msra.mxu0 %vm28462_vm5, %v28373_v45  ;;  %24877 = vmatprep.mubr.msk.f32.mxu0 %vm28371_vm2, %v28372_v37 }
0x1423   :  { %26981 = vmatprep.subr.bf16.mxu0 %v28370_v34 }
0x1426   :  { %26983 = vmatpush3.bf16.msk.msra.mxu0 %vm28576_vm10, %v28373_v45 }
0x1427   :  { %26984 = vmatprep.subr.bf16.mxu0 %v28370_v34 }
0x1429   :  { %24878 = vmatmul.mubr.f32.vlgmr.msra.gmra.mrb[18].mxu0 %v9698_v4 }
0x142a   :  { %26986 = vmatpush3.bf16.msra.mxu0 %v28476_v56  ;;  %24888 = vmatprep.mubr.msk.f32.mxu0 %vm28371_vm2, %v28372_v37 }
0x142b   :  { %26987 = vmatprep.subr.bf16.mxu0 %v28370_v34 }
0x142e   :  { %26989 = vmatpush3.bf16.msra.mxu0 %v28590_v49 }
0x142f   :  { %26990 = vmatprep.subr.bf16.mxu0 %v28370_v34 }
0x1431   :  { %24889 = vmatmul.mubr.f32.vlgmr.msra.gmra.mrb[18].mxu0 %v9696_v36 }
0x1432   :  { %26992 = vmatpush3.bf16.msk.msra.mxu0 %vm28462_vm5, %v28373_v45  ;;  %24899 = vmatprep.mubr.msk.f32.mxu0 %vm28371_vm2, %v28372_v37 }
0x1433   :  { %26993 = vmatprep.subr.bf16.mxu0 %v28370_v34 }
0x1436   :  { %26995 = vmatpush3.bf16.msk.msra.mxu0 %vm28576_vm10, %v28373_v45 }
0x1437   :  { %26997 = vmatprep.subr.bf16.mxu0 %v29825_v51 }
0x1439   :  { %24900 = vmatmul.mubr.f32.vlgmr.msra.gmra.mrb[18].mxu0 %v9696_v36 }
0x143a   :  { %26999 = vmatpush3.bf16.msra.mxu0 %v29825_v51 }
0x143b   :  { %27001 = vmatprep.subr.bf16.mxu0 %v29827_v18 }
0x143e   :  { %27003 = vmatpush3.bf16.msra.mxu0 %v29827_v18 }
0x143f   :  { %27005 = vmatprep.subr.bf16.mxu0 %v27004_v1 }
0x150c   :  { %v10088_v44 = vpop.f32.mrb[18].mxu0 }
0x150d   :  { %v10092_v19 = vmul.f32 0.03125, %v10088_v44  ;;  %v24901_v53 = vpop.f32.mrb[19].mxu0  ;;  %v11194_v44 = vadd.f32 %v11193_v10, %v11192_v59 }
0x150f   :  { %v10093_v36 = vmul.f32 %v10092_v19, %v10092_v19 }
0x1511   :  { %v10095_v58 = vrot.slane %v10093_v36, 7  ;;  %v11195_v36 = vrot.slane %v11194_v44, 2 }
0x1513   :  { %v10097_v4 = vsub.f32 %v10092_v19, %v10095_v58 }
0x1515   :  { %v10098_v60 = vadd.f32 1e-05, %v10097_v4 }
0x1517   :  { %28339 = vrsqrt.f32 %v10098_v60 }
0x1521   :  { %v28340_v32 = vpop.eup %28339 }
0x1522   :  { %v10107_v16 = vmul.f32 %v28340_v32, %v22301_v20  ;;  %v11196_v32 = vadd.f32 %v11195_v36, %v11194_v44 }
0x1524   :  { %v10110_v23 = vrot.slane %v10107_v16, 1  ;;  %v10117_v28 = vrot.slane %v10107_v16, %v28553_v0  ;;  %v11197_v16 = vrot.slane %v11196_v32, 1 }
0x1526   :  { %v10112_v31 = vmul.f32 %v10110_v23, %v10092_v19  ;;  %v10118_v13 = vmul.f32 %v10117_v28, %v29763_v39  ;;  %v10119_v2 = vmul.f32 %v10117_v28, %v29765_v40  ;;  %v11198_v23 = vadd.f32 %v11197_v16, %v11196_v32 }
0x1528   :  { %v10113_v17 = vsub.f32 %v10108_v43, %v10112_v31  ;;  %v11199_v43 = vmul.f32 0.0625, %v11198_v23 }
0x152a   :  { %v10124_v6 = vrot.slane %v10113_v17, %v28558_v5  ;;  %v29868_v31 = vsub.f32 %v22310_v46, %v11199_v43 }
0x152c   :  { %v10126_v50 = vadd.f32 %v10124_v6, %v10118_v13  ;;  %v10127_v57 = vadd.f32 %v10124_v6, %v10119_v2 }
0x152e   :  { %v10128_v52 = vmax.f32 %v10126_v50, 0.0  ;;  %v10129_v33 = vmax.f32 %v10127_v57, 0.0 }
0x1530   :  { %v10142_v11 = vsel %vm1785_vm11, %v10128_v52, 0  ;;  %v10145_v12 = vsel %vm1785_vm11, %v10129_v33, 0 }
0x1531   :  { %v10216_v14 = vand.u32 4294901760, %v10142_v11  ;;  %v29861_v29 = vand.u32 4294901760, %v10145_v12 }
0x1533   :  { %v10217_v19 = vsub.f32 %v10142_v11, %v10216_v14  ;;  %v10227_v39 = vsub.f32 %v10145_v12, %v29861_v29 }
0x1535   :  { %v10218_v40 = vand.u32 4294901760, %v10217_v19  ;;  %v10228_v53 = vand.u32 4294901760, %v10227_v39 }
0x1537   :  { %v10219_v58 = vsub.f32 %v10217_v19, %v10218_v40  ;;  %v10229_v4 = vsub.f32 %v10227_v39, %v10228_v53 }
0x1539   :  { %v10220_v60 = vand.u32 4294901760, %v10219_v58  ;;  %v10230_v20 = vand.u32 4294901760, %v10229_v4 }
0x153b   :  { %24910 = vmatprep.mubr.f32.mxu0 %v10220_v60 }
0x153c   :  { %24911 = vmatmul.mubr.f32.vlgmr.msra.gmra.mrb[20].mxu0 %v10230_v20 }
0x153d   :  { %27007 = vmatpush3.bf16.msra.mxu0 %v27004_v1  ;;  %24921 = vmatprep.mubr.f32.mxu0 %v10216_v14  ;;  %v11230_v1 = vld [vmem:[%s28430_s6] sm:$0x7]  ;;  %s28418_s6 = smov 41  }
0x153e   :  { %27009 = vmatprep.subr.bf16.mxu0 %v27008_v7  ;;  %v11245_v28 = vsel %vm243_vm0, %v11230_v1, 0  ;;  %s29894_s26 = sld [smem:[%s31125_s0 + %s28418_s6]]  }
0x153f   :  { %v11248_v41 = vand.u32 4294901760, %v11245_v28 }
0x1541   :  { %27011 = vmatpush3.bf16.msra.mxu0 %v27008_v7  ;;  %v29872_v7 = vsub.f32 %v22311_v26, %v11199_v43  ;;  %v11335_v17 = vsub.f32 %v11245_v28, %v11248_v41 }
0x1542   :  { %27013 = vmatprep.subr.bf16.mxu0 %v27012_v62 }
0x1543   :  { %v11242_v46 = vsel %vm186_vm1, %v29872_v7, 0  ;;  %v11336_v6 = vand.u32 4294901760, %v11335_v17 }
0x1544   :  { %24922 = vmatmul.mubr.f32.vlgmr.msra.gmra.mrb[20].mxu0 %v29861_v29  ;;  %v11323_v38 = vand.u32 4294901760, %v11242_v46  ;;  %31180 = sst [smem:[#allocation20_spill]] %s29894_s26 }
0x1545   :  { %27015 = vmatpush3.bf16.msra.mxu0 %v27012_v62  ;;  %24932 = vmatprep.mubr.f32.mxu0 %v10217_v19  ;;  %v11239_v62 = vsel %vm186_vm1, %v29868_v31, 0 }
0x1546   :  { %27017 = vmatprep.subr.bf16.mxu0 %v29833_v63  ;;  %v11324_v13 = vsub.f32 %v11242_v46, %v11323_v38 }
0x1548   :  { %v11325_v59 = vand.u32 4294901760, %v11324_v13 }
0x1549   :  { %27019 = vmatpush3.bf16.msra.mxu0 %v29833_v63  ;;  %v11313_v63 = vand.u32 4294901760, %v11239_v62 }
0x154a   :  { %27021 = vmatprep.subr.bf16.mxu0 %v29825_v51  ;;  %v11326_v57 = vsub.f32 %v11324_v13, %v11325_v59 }
0x154b   :  { %v11314_v26 = vsub.f32 %v11239_v62, %v11313_v63 }
0x154c   :  { %24933 = vmatmul.mubr.f32.vlgmr.msra.gmra.mrb[20].mxu0 %v10227_v39  ;;  %v11327_v33 = vand.u32 4294901760, %v11326_v57 }
0x154d   :  { %27023 = vmatpush3.bf16.msra.mxu0 %v29825_v51  ;;  %24943 = vmatprep.mubr.f32.mxu0 %v10218_v40  ;;  %v11315_v2 = vand.u32 4294901760, %v11314_v26 }
0x154e   :  { %27025 = vmatprep.subr.bf16.mxu0 %v29827_v18 }
0x154f   :  { %v11316_v50 = vsub.f32 %v11314_v26, %v11315_v2 }
0x1551   :  { %27027 = vmatpush3.bf16.msra.mxu0 %v29827_v18  ;;  %v11317_v52 = vand.u32 4294901760, %v11316_v50 }
0x1552   :  { %27029 = vmatprep.subr.bf16.mxu0 %v29835_v8 }
0x1554   :  { %24944 = vmatmul.mubr.f32.vlgmr.msra.gmra.mrb[20].mxu0 %v10228_v53 }
0x1555   :  { %27031 = vmatpush3.bf16.msra.mxu0 %v29835_v8  ;;  %24954 = vmatprep.mubr.f32.mxu0 %v10216_v14  ;;  %v11337_v8 = vsub.f32 %v11335_v17, %v11336_v6 }
0x1556   :  { %27033 = vmatprep.subr.bf16.mxu0 %v29837_v9 }
0x1559   :  { %27035 = vmatpush3.bf16.msra.mxu0 %v29837_v9  ;;  %v11338_v9 = vand.u32 4294901760, %v11337_v8 }
0x155a   :  { %27037 = vmatprep.subr.bf16.mxu0 %v29825_v51 }
0x155c   :  { %24955 = vmatmul.mubr.f32.vlgmr.msra.gmra.mrb[20].mxu0 %v29861_v29 }
0x155d   :  { %27039 = vmatpush3.bf16.msra.mxu0 %v29825_v51  ;;  %24965 = vmatprep.mubr.f32.mxu0 %v10216_v14  ;;  %v22302_v51 = vld [vmem:[%s29894_s26] ss:$0 sm:$0xff] }
0x155e   :  { %27041 = vmatprep.subr.bf16.mxu0 %v29827_v18 }
0x1561   :  { %27043 = vmatpush3.bf16.msra.mxu0 %v29827_v18 }
0x1562   :  { %25010 = vmatprep.subr.mxu0 %v11248_v41 }
0x1564   :  { %24966 = vmatmul.mubr.f32.vlgmr.msra.gmra.mrb[20].mxu0 %v29861_v29 }
0x1565   :  { %25011 = vmatpush3.msra.mxu0 %v11248_v41  ;;  %25012 = vmatprep.mubr.f32.mxu0 %v11317_v52 }
0x1566   :  { %25015 = vmatprep.subr.mxu0 %v11338_v9 }
0x1568   :  { %25013 = vmatmul.mubr.f32.vlgmr.msra.gmra.mrb[22].mxu0 %v11327_v33 }
0x1569   :  { %25016 = vmatpush3.msra.mxu0 %v11338_v9  ;;  %25017 = vmatprep.mubr.f32.mxu0 %v11313_v63 }
0x156a   :  { %25020 = vmatprep.subr.mxu0 %v11335_v17 }
0x1570   :  { %25018 = vmatmul.mubr.f32.vlgmr.msra.gmra.mrb[22].mxu0 %v11323_v38 }
0x1571   :  { %25021 = vmatpush3.msra.mxu0 %v11335_v17  ;;  %25022 = vmatprep.mubr.f32.mxu0 %v11314_v26 }
0x1572   :  { %25025 = vmatprep.subr.mxu0 %v11248_v41 }
0x1578   :  { %25023 = vmatmul.mubr.f32.vlgmr.msra.gmra.mrb[22].mxu0 %v11324_v13 }
0x1579   :  { %25026 = vmatpush3.msra.mxu0 %v11248_v41  ;;  %25027 = vmatprep.mubr.f32.mxu0 %v11315_v2 }
0x157a   :  { %25030 = vmatprep.subr.mxu0 %v11336_v6 }
0x1580   :  { %25028 = vmatmul.mubr.f32.vlgmr.msra.gmra.mrb[22].mxu0 %v11325_v59 }
0x1581   :  { %25031 = vmatpush3.msra.mxu0 %v11336_v6  ;;  %25032 = vmatprep.mubr.f32.mxu0 %v11313_v63  ;;  %v22314_v6 = vld [vmem:[%s28481_s13] ss:$0 sm:$0xff]  ;;  %s28419_s13 = smov 42  }
0x1582   :  { %25035 = vmatprep.subr.mxu0 %v11248_v41  ;;  %s30010_s1 = sld [smem:[%s31125_s0 + %s28419_s13]]  }
0x1583   :  { %s30022_s13 = sld [smem:[%s31125_s0 + %s28421_s10]]   ;;  %s31181_s0 = smov 122  }
0x1588   :  { %25033 = vmatmul.mubr.f32.vlgmr.msra.gmra.mrb[22].mxu0 %v11323_v38 }
0x1589   :  { %25036 = vmatpush3.msra.mxu0 %v11248_v41  ;;  %25037 = vmatprep.mubr.f32.mxu0 %v11313_v63 }
0x1590   :  { %25038 = vmatmul.mubr.f32.vlgmr.msra.gmra.mrb[22].mxu0 %v11323_v38 }
0x1637   :  { %v24967_v18 = vpop.f32.mrb[20].mxu0 }
0x1638   :  { %v29897_v10 = vadd.f32 %v24967_v18, %v22302_v51  ;;  %v10665_v11 = vpop.f32.mrb[21].mxu0 }
0x1639   :  { %v29899_v12 = vadd.f32 %v22302_v51, %v10665_v11 }
0x163a   :  { %v10676_v14 = vsel %vm748_vm6, %v29897_v10, 0.0  ;;  %v10685_v29 = vmul.f32 %v29897_v10, %v29897_v10 }
0x163b   :  { %v10675_v44 = vsel %vm748_vm6, %v29899_v12, 0.0  ;;  %v10684_v19 = vmul.f32 %v29899_v12, %v29899_v12 }
0x163c   :  { %v10687_v39 = vsel %vm748_vm6, %v10685_v29, 0.0  ;;  %v10677_v40 = vadd.f32 %v10676_v14, %v10675_v44 }
0x163d   :  { %v10686_v53 = vsel %vm748_vm6, %v10684_v19, 0.0 }
0x163e   :  { %v10678_v36 = vrot.slane %v10677_v40, 4  ;;  %v10688_v58 = vadd.f32 %v10687_v39, %v10686_v53 }
0x1640   :  { %v10679_v4 = vadd.f32 %v10678_v36, %v10677_v40  ;;  %v10689_v60 = vrot.slane %v10688_v58, 4 }
0x1642   :  { %v10680_v20 = vrot.slane %v10679_v4, 2  ;;  %v10690_v32 = vadd.f32 %v10689_v60, %v10688_v58 }
0x1644   :  { %v10681_v16 = vadd.f32 %v10680_v20, %v10679_v4  ;;  %v10691_v23 = vrot.slane %v10690_v32, 2 }
0x1646   :  { %v10682_v43 = vrot.slane %v10681_v16, 1  ;;  %v10692_v1 = vadd.f32 %v10691_v23, %v10690_v32 }
0x1648   :  { %v10693_v62 = vrot.slane %v10692_v1, 1  ;;  %v10683_v28 = vadd.f32 %v10682_v43, %v10681_v16 }
0x164a   :  { %v10694_v63 = vadd.f32 %v10693_v62, %v10692_v1 }
0x164c   :  { %v10695_v46 = vsel %vm769_vm7, %v10683_v28, %v10694_v63 }
0x164d   :  { %v10697_v41 = vsel %vm748_vm6, %v10695_v46, 0 }
0x164e   :  { %v10764_v38 = vand.u32 4294901760, %v10697_v41 }
0x1650   :  { %v10765_v26 = vsub.f32 %v10697_v41, %v10764_v38  ;;  %v12245_v41 = vld [vmem:[%s28533_s17] sm:$0xff] }
0x1652   :  { %v10766_v17 = vand.u32 4294901760, %v10765_v26 }
0x1654   :  { %v10767_v13 = vsub.f32 %v10765_v26, %v10766_v17 }
0x1656   :  { %v10768_v2 = vand.u32 4294901760, %v10767_v13 }
0x1658   :  { %24973 = vmatmul.mubr.f32.vlgmr.msra.gmra.mrb[18].mxu1 %v10768_v2 }
0x1659   :  { %27049 = vmatpush3.bf16.msra.mxu1 %v28472_v54  ;;  %24979 = vmatprep.mubr.msk.f32.mxu1 %vm28371_vm2, %v28372_v37 }
0x165a   :  { %27050 = vmatprep.subr.bf16.mxu1 %v28370_v34 }
0x1660   :  { %24980 = vmatmul.mubr.f32.vlgmr.msra.gmra.mrb[18].mxu1 %v10764_v38 }
0x1661   :  { %27052 = vmatpush3.bf16.msra.mxu1 %v28474_v55  ;;  %24986 = vmatprep.mubr.msk.f32.mxu1 %vm28371_vm2, %v28372_v37 }
0x1662   :  { %27053 = vmatprep.subr.bf16.mxu1 %v28370_v34 }
0x1663   :  { %v25039_v59 = vpop.f32.mrb[22].mxu0 }
0x1664   :  { %v29922_v50 = vadd.f32 %v25039_v59, %v22314_v6  ;;  %v11726_v8 = vpop.f32.mrb[23].mxu0 }
0x1665   :  { %v29924_v57 = vadd.f32 %v22314_v6, %v11726_v8 }
0x1666   :  { %v11737_v52 = vsel %vm748_vm6, %v29922_v50, 0.0  ;;  %v11746_v9 = vmul.f32 %v29922_v50, %v29922_v50 }
0x1667   :  { %v11736_v33 = vsel %vm748_vm6, %v29924_v57, 0.0  ;;  %v11745_v51 = vmul.f32 %v29924_v57, %v29924_v57 }
0x1668   :  { %v11748_v18 = vsel %vm748_vm6, %v11746_v9, 0.0  ;;  %v11738_v11 = vadd.f32 %v11737_v52, %v11736_v33  ;;  %24987 = vmatmul.mubr.f32.vlgmr.msra.gmra.mrb[18].mxu1 %v10765_v26  ;;  %v12261_v26 = vand.u32 4294901760, %v12245_v41 }
0x1669   :  { %v11747_v14 = vsel %vm748_vm6, %v11745_v51, 0.0  ;;  %27055 = vmatpush3.bf16.msk.msra.mxu1 %vm28462_vm5, %v28373_v45  ;;  %24993 = vmatprep.mubr.msk.f32.mxu1 %vm28371_vm2, %v28372_v37 }
0x166a   :  { %v11739_v29 = vrot.slane %v11738_v11, 4  ;;  %v11749_v44 = vadd.f32 %v11748_v18, %v11747_v14  ;;  %27056 = vmatprep.subr.bf16.mxu1 %v28370_v34  ;;  %v12349_v2 = vsub.f32 %v12245_v41, %v12261_v26 }
0x166c   :  { %v11740_v19 = vadd.f32 %v11739_v29, %v11738_v11  ;;  %v11750_v39 = vrot.slane %v11749_v44, 4  ;;  %v12350_v59 = vand.u32 4294901760, %v12349_v2 }
0x166e   :  { %v11741_v40 = vrot.slane %v11740_v19, 2  ;;  %v11751_v53 = vadd.f32 %v11750_v39, %v11749_v44  ;;  %v12351_v52 = vsub.f32 %v12349_v2, %v12350_v59 }
0x1670   :  { %v11742_v36 = vadd.f32 %v11741_v40, %v11740_v19  ;;  %v11752_v58 = vrot.slane %v11751_v53, 2  ;;  %24994 = vmatmul.mubr.f32.vlgmr.msra.gmra.mrb[18].mxu1 %v10766_v17  ;;  %v12352_v33 = vand.u32 4294901760, %v12351_v52 }
0x1671   :  { %27058 = vmatpush3.bf16.msra.mxu1 %v28476_v56  ;;  %25000 = vmatprep.mubr.msk.f32.mxu1 %vm28371_vm2, %v28372_v37 }
0x1672   :  { %v11743_v4 = vrot.slane %v11742_v36, 1  ;;  %v11753_v60 = vadd.f32 %v11752_v58, %v11751_v53  ;;  %27059 = vmatprep.subr.bf16.mxu1 %v28370_v34  ;;  %v22309_v58 = vld [vmem:[%s30010_s1] ss:$0 sm:$0xff] }
0x1674   :  { %v11754_v20 = vrot.slane %v11753_v60, 1  ;;  %v11744_v32 = vadd.f32 %v11743_v4, %v11742_v36 }
0x1676   :  { %v11755_v16 = vadd.f32 %v11754_v20, %v11753_v60 }
0x1678   :  { %25001 = vmatmul.mubr.f32.vlgmr.msra.gmra.mrb[18].mxu1 %v10764_v38  ;;  %v11756_v23 = vsel %vm769_vm7, %v11744_v32, %v11755_v16  ;;  %v11162_v32 = vld [vmem:[%s30015_s9] sm:$0x1] }
0x1679   :  { %27061 = vmatpush3.bf16.msk.msra.mxu1 %vm28462_vm5, %v28373_v45  ;;  %25007 = vmatprep.mubr.msk.f32.mxu1 %vm28371_vm2, %v28372_v37  ;;  %v11758_v43 = vsel %vm748_vm6, %v11756_v23, 0 }
0x167a   :  { %27062 = vmatprep.subr.bf16.mxu1 %v28370_v34  ;;  %v11825_v1 = vand.u32 4294901760, %v11758_v43 }
0x167c   :  { %v11826_v62 = vsub.f32 %v11758_v43, %v11825_v1 }
0x167e   :  { %v11827_v28 = vand.u32 4294901760, %v11826_v62 }
0x1680   :  { %25008 = vmatmul.mubr.f32.vlgmr.msra.gmra.mrb[18].mxu1 %v10764_v38  ;;  %v11828_v63 = vsub.f32 %v11826_v62, %v11827_v28  ;;  %v12246_v38 = vld [vmem:[%s28533_s17 + $0x8] sm:$0xff] }
0x1681   :  { %27064 = vmatpush3.bf16.msk.msra.mxu1 %vm28462_vm5, %v28373_v45  ;;  %25044 = vmatprep.mubr.msk.f32.mxu1 %vm28371_vm2, %v28372_v37  ;;  %v12264_v17 = vand.u32 4294901760, %v12246_v38 }
0x1682   :  { %27065 = vmatprep.subr.bf16.mxu1 %v28370_v34  ;;  %v11829_v46 = vand.u32 4294901760, %v11828_v63 }
0x1683   :  { %v29996_v13 = vpack.c.bf16 %v12264_v17, %v12261_v26  ;;  %v12356_v6 = vsub.f32 %v12246_v38, %v12264_v17 }
0x1684   :  { %25045 = vmatmul.mubr.f32.vlgmr.msra.gmra.mrb[20].mxu1 %v11829_v46 }
0x1685   :  { %27067 = vmatpush3.bf16.msra.mxu1 %v28472_v54  ;;  %25051 = vmatprep.mubr.msk.f32.mxu1 %vm28371_vm2, %v28372_v37  ;;  %v12357_v8 = vand.u32 4294901760, %v12356_v6  ;;  %v30000_v18 = vpack.c.bf16 %v12356_v6, %v12349_v2 }
0x1686   :  { %27068 = vmatprep.subr.bf16.mxu1 %v28370_v34  ;;  %27081 = vmatprep.subr.bf16.mxu0 %v29996_v13 }
0x1687   :  { %27083 = vmatpush3.bf16.msra.mxu0 %v29996_v13  ;;  %v12358_v9 = vsub.f32 %v12356_v6, %v12357_v8  ;;  %v30005_v14 = vpack.c.bf16 %v12357_v8, %v12350_v59 }
0x1689   :  { %v12359_v51 = vand.u32 4294901760, %v12358_v9  ;;  %v12223_v9 = vld [vmem:[%s28549_s25] sm:$0x1]  ;;  %s31184_s25 = sld [smem:[#allocation2_spill]] }
0x168b   :  { %v30002_v11 = vpack.c.bf16 %v12359_v51, %v12352_v33 }
0x168c   :  { %25052 = vmatmul.mubr.f32.vlgmr.msra.gmra.mrb[20].mxu1 %v11825_v1 }
0x168d   :  { %27070 = vmatpush3.bf16.msra.mxu1 %v28474_v55  ;;  %25058 = vmatprep.mubr.msk.f32.mxu1 %vm28371_vm2, %v28372_v37 }
0x168e   :  { %27071 = vmatprep.subr.bf16.mxu1 %v28370_v34  ;;  %27085 = vmatprep.subr.bf16.mxu0 %v30002_v11 }
0x1694   :  { %25059 = vmatmul.mubr.f32.vlgmr.msra.gmra.mrb[20].mxu1 %v11826_v62 }
0x1695   :  { %27073 = vmatpush3.bf16.msk.msra.mxu1 %vm28462_vm5, %v28373_v45  ;;  %25065 = vmatprep.mubr.msk.f32.mxu1 %vm28371_vm2, %v28372_v37 }
0x1696   :  { %27074 = vmatprep.subr.bf16.mxu1 %v28370_v34 }
0x169c   :  { %25066 = vmatmul.mubr.f32.vlgmr.msra.gmra.mrb[20].mxu1 %v11827_v28 }
0x169d   :  { %27076 = vmatpush3.bf16.msra.mxu1 %v28476_v56  ;;  %25072 = vmatprep.mubr.msk.f32.mxu1 %vm28371_vm2, %v28372_v37 }
0x169e   :  { %27077 = vmatprep.subr.bf16.mxu1 %v28370_v34 }
0x16a4   :  { %25073 = vmatmul.mubr.f32.vlgmr.msra.gmra.mrb[20].mxu1 %v11825_v1 }
0x16a5   :  { %27079 = vmatpush3.bf16.msk.msra.mxu1 %vm28462_vm5, %v28373_v45  ;;  %25079 = vmatprep.mubr.msk.f32.mxu1 %vm28371_vm2, %v28372_v37 }
0x16a6   :  { %27104 = vmatprep.subr.bf16.mxu1 %v28370_v34 }
0x16ac   :  { %25080 = vmatmul.mubr.f32.vlgmr.msra.gmra.mrb[20].mxu1 %v11825_v1 }
0x16ad   :  { %27106 = vmatpush3.bf16.msk.msra.mxu1 %vm28462_vm5, %v28373_v45  ;;  %25132 = vmatprep.mubr.msk.f32.mxu1 %vm28371_vm2, %v28372_v37 }
0x16ae   :  { %27107 = vmatprep.subr.bf16.mxu1 %v28370_v34 }
0x16b1   :  { %27109 = vmatpush3.bf16.msk.msra.mxu1 %vm28576_vm10, %v28373_v45 }
0x16b2   :  { %27110 = vmatprep.subr.bf16.mxu1 %v28370_v34 }
0x1753   :  { %v11142_v29 = vpop.f32.mrb[18].mxu1 }
0x1754   :  { %v11146_v44 = vmul.f32 0.03125, %v11142_v29  ;;  %v25009_v19 = vpop.f32.mrb[19].mxu1 }
0x1756   :  { %v11147_v39 = vmul.f32 %v11146_v44, %v11146_v44 }
0x1758   :  { %v11149_v40 = vrot.slane %v11147_v39, 7 }
0x175a   :  { %v11151_v53 = vsub.f32 %v11146_v44, %v11149_v40 }
0x175c   :  { %v11152_v36 = vadd.f32 1e-05, %v11151_v53 }
0x175e   :  { %28341 = vrsqrt.f32 %v11152_v36 }
0x1768   :  { %v28342_v4 = vpop.eup %28341 }
0x1769   :  { %v11161_v60 = vmul.f32 %v28342_v4, %v22309_v58 }
0x176b   :  { %v11164_v20 = vrot.slane %v11161_v60, 1  ;;  %v11171_v23 = vrot.slane %v11161_v60, %v28553_v0 }
0x176d   :  { %v11166_v16 = vmul.f32 %v11164_v20, %v11146_v44  ;;  %v11172_v1 = vmul.f32 %v29899_v12, %v11171_v23  ;;  %v11173_v62 = vmul.f32 %v29897_v10, %v11171_v23  ;;  %v22321_v12 = vld [vmem:[%s28544_s21] ss:$0 sm:$0xff]  ;;  %s31182_s21 = smov 125  }
0x176f   :  { %v11167_v43 = vsub.f32 %v11162_v32, %v11166_v16 }
0x1771   :  { %v11178_v28 = vrot.slane %v11167_v43, %v28558_v5 }
0x1773   :  { %v11180_v63 = vadd.f32 %v11178_v28, %v11172_v1  ;;  %v11181_v46 = vadd.f32 %v11178_v28, %v11173_v62 }
0x1775   :  { %11182 = vst.msk [vmem:[%s30022_s13] sm:$0xff] %vm748_vm6, %v11180_v63  ;;  %11183 = vst.msk [vmem:[%s30022_s13 + $0x8] sm:$0xff] %vm748_vm6, %v11181_v46 }
0x177f   :  { %v12203_v41 = vpop.f32.mrb[20].mxu1 }
0x1780   :  { %v12207_v38 = vmul.f32 0.03125, %v12203_v41  ;;  %v25081_v26 = vpop.f32.mrb[21].mxu1 }
0x1782   :  { %v12208_v17 = vmul.f32 %v12207_v38, %v12207_v38 }
0x1784   :  { %v12210_v2 = vrot.slane %v12208_v17, 7 }
0x1786   :  { %v12212_v6 = vsub.f32 %v12207_v38, %v12210_v2 }
0x1788   :  { %v12213_v59 = vadd.f32 1e-05, %v12212_v6 }
0x178a   :  { %28343 = vrsqrt.f32 %v12213_v59 }
0x1794   :  { %v28344_v8 = vpop.eup %28343 }
0x1795   :  { %v12222_v10 = vmul.f32 %v28344_v8, %v22321_v12 }
0x1797   :  { %v12225_v52 = vrot.slane %v12222_v10, 1  ;;  %v12232_v51 = vrot.slane %v12222_v10, %v28553_v0 }
0x1799   :  { %v12227_v33 = vmul.f32 %v12225_v52, %v12207_v38  ;;  %v12233_v44 = vmul.f32 %v29924_v57, %v12232_v51  ;;  %v12234_v19 = vmul.f32 %v29922_v50, %v12232_v51 }
0x179b   :  { %v12228_v29 = vsub.f32 %v12223_v9, %v12227_v33 }
0x179d   :  { %v12239_v39 = vrot.slane %v12228_v29, %v28558_v5 }
0x179f   :  { %v12241_v40 = vadd.f32 %v12239_v39, %v12233_v44  ;;  %v12242_v53 = vadd.f32 %v12239_v39, %v12234_v19 }
0x17a1   :  { %v12243_v36 = vmax.f32 %v12241_v40, 0.0  ;;  %v12244_v58 = vmax.f32 %v12242_v53, 0.0 }
0x17a3   :  { %v12255_v4 = vsel %vm748_vm6, %v12243_v36, 0  ;;  %v12258_v60 = vsel %vm748_vm6, %v12244_v58, 0 }
0x17a4   :  { %v12327_v20 = vand.u32 4294901760, %v12255_v4  ;;  %v12337_v32 = vand.u32 4294901760, %v12258_v60 }
0x17a6   :  { %v12328_v16 = vsub.f32 %v12255_v4, %v12327_v20  ;;  %v12338_v23 = vsub.f32 %v12258_v60, %v12337_v32 }
0x17a8   :  { %v12329_v43 = vand.u32 4294901760, %v12328_v16  ;;  %v12339_v1 = vand.u32 4294901760, %v12338_v23 }
0x17aa   :  { %v12330_v62 = vsub.f32 %v12328_v16, %v12329_v43  ;;  %v12340_v57 = vsub.f32 %v12338_v23, %v12339_v1 }
0x17ac   :  { %v12331_v28 = vand.u32 4294901760, %v12330_v62  ;;  %v12341_v50 = vand.u32 4294901760, %v12340_v57  ;;  %v13297_v57 = vld [vmem:[%s28665_s3 + $0x18] sm:$0xff] }
0x17ae   :  { %25086 = vmatprep.mubr.f32.mxu0 %v12331_v28 }
0x17af   :  { %25087 = vmatmul.mubr.f32.vlgmr.msra.gmra.mrb[24].mxu0 %v12341_v50  ;;  %v13312_v50 = vand.u32 4294901760, %v13297_v57 }
0x17b0   :  { %27087 = vmatpush3.bf16.msra.mxu0 %v30002_v11  ;;  %25093 = vmatprep.mubr.f32.mxu0 %v12327_v20 }
0x17b1   :  { %27089 = vmatprep.subr.bf16.mxu0 %v30000_v18 }
0x17b7   :  { %25094 = vmatmul.mubr.f32.vlgmr.msra.gmra.mrb[24].mxu0 %v12337_v32 }
0x17b8   :  { %27091 = vmatpush3.bf16.msra.mxu0 %v30000_v18  ;;  %25100 = vmatprep.mubr.f32.mxu0 %v12328_v16  ;;  %v22322_v18 = vld [vmem:[%s28595_s29] ss:$0 sm:$0xff]  ;;  %s31185_s29 = sld [smem:[#allocation3_spill]] }
0x17b9   :  { %27093 = vmatprep.subr.bf16.mxu0 %v29996_v13  ;;  %v13294_v16 = vld [vmem:[%s28665_s3] sm:$0xff] }
0x17bf   :  { %25101 = vmatmul.mubr.f32.vlgmr.msra.gmra.mrb[24].mxu0 %v12338_v23  ;;  %v13295_v23 = vld [vmem:[%s28665_s3 + $0x8] sm:$0xff] }
0x17c0   :  { %27095 = vmatpush3.bf16.msra.mxu0 %v29996_v13  ;;  %25107 = vmatprep.mubr.f32.mxu0 %v12329_v43  ;;  %v13296_v43 = vld [vmem:[%s28665_s3 + $0x10] sm:$0xff]  ;;  %v13306_v62 = vand.u32 4294901760, %v13295_v23  ;;  %s31186_s3 = sld [smem:[#allocation4_spill]] }
0x17c1   :  { %27097 = vmatprep.subr.bf16.mxu0 %v30005_v14  ;;  %v13309_v28 = vand.u32 4294901760, %v13296_v43 }
0x17c7   :  { %25108 = vmatmul.mubr.f32.vlgmr.msra.gmra.mrb[24].mxu0 %v12339_v1  ;;  %v13303_v1 = vand.u32 4294901760, %v13294_v16 }
0x17c8   :  { %27099 = vmatpush3.bf16.msra.mxu0 %v30005_v14  ;;  %25114 = vmatprep.mubr.f32.mxu0 %v12327_v20 }
0x17c9   :  { %27101 = vmatprep.subr.bf16.mxu0 %v29996_v13 }
0x17cf   :  { %25115 = vmatmul.mubr.f32.vlgmr.msra.gmra.mrb[24].mxu0 %v12337_v32 }
0x17d0   :  { %27103 = vmatpush3.bf16.msra.mxu0 %v29996_v13  ;;  %25121 = vmatprep.mubr.f32.mxu0 %v12327_v20 }
0x17d1   :  { %27140 = vmatprep.subr.bf16.mxu0 %v28370_v34 }
0x17d7   :  { %25122 = vmatmul.mubr.f32.vlgmr.msra.gmra.mrb[24].mxu0 %v12337_v32 }
0x17d8   :  { %25198 = vmatprep.mubr.msk.f32.mxu0 %vm28371_vm2, %v28372_v37 }
0x18aa   :  { %v25123_v11 = vpop.f32.mrb[24].mxu0 }
0x18ab   :  { %v30053_v63 = vadd.f32 %v25123_v11, %v22322_v18  ;;  %v12752_v46 = vpop.f32.mrb[25].mxu0  ;;  %v30123_v11 = vsub.f32 %v13294_v16, %v13303_v1 }
0x18ac   :  { %v30055_v41 = vadd.f32 %v22322_v18, %v12752_v46  ;;  %v30121_v18 = vpack.c.bf16 %v13306_v62, %v13303_v1  ;;  %v30125_v46 = vsub.f32 %v13295_v23, %v13306_v62  ;;  %v22335_v23 = vld [vmem:[%s28704_s8] ss:$0 sm:$0xff]  ;;  %s31187_s8 = sld [smem:[#allocation5_spill]] }
0x18ad   :  { %v12763_v14 = vsel %vm1785_vm11, %v30053_v63, 0.0  ;;  %v12772_v13 = vmul.f32 %v30053_v63, %v30053_v63 }
0x18ae   :  { %v12762_v38 = vsel %vm1785_vm11, %v30055_v41, 0.0  ;;  %v12771_v26 = vmul.f32 %v30055_v41, %v30055_v41  ;;  %27142 = vmatpush3.bf16.msra.mxu0 %v30121_v18 }
0x18af   :  { %v12774_v17 = vsel %vm1785_vm11, %v12772_v13, 0.0  ;;  %v12764_v2 = vadd.f32 %v12763_v14, %v12762_v38  ;;  %v30127_v14 = vsub.f32 %v13296_v43, %v13309_v28  ;;  %v30129_v13 = vsub.f32 %v13297_v57, %v13312_v50  ;;  %27143 = vmatprep.subr.bf16.mxu0 %v28370_v34  ;;  %v13263_v57 = vld [vmem:[%s28709_s14] sm:$0x1]  ;;  %s31188_s14 = sld [smem:[#allocation6_spill]] }
0x18b0   :  { %v12773_v6 = vsel %vm1785_vm11, %v12771_v26, 0.0  ;;  %v30132_v38 = vpack.c.bf16 %v13312_v50, %v13309_v28  ;;  %v13384_v26 = vand.u32 4294901760, %v30123_v11 }
0x18b1   :  { %v12765_v59 = vrot.slane %v12764_v2, 4  ;;  %v12775_v12 = vadd.f32 %v12774_v17, %v12773_v6  ;;  %v13391_v17 = vand.u32 4294901760, %v30125_v46 }
0x18b2   :  { %27145 = vmatpush3.bf16.msra.mxu0 %v30132_v38 }
0x18b3   :  { %v12766_v8 = vadd.f32 %v12765_v59, %v12764_v2  ;;  %v12776_v10 = vrot.slane %v12775_v12, 4  ;;  %27146 = vmatprep.subr.bf16.mxu0 %v28370_v34  ;;  %v13385_v2 = vsub.f32 %v30123_v11, %v13384_v26  ;;  %v13392_v6 = vsub.f32 %v30125_v46, %v13391_v17 }
0x18b5   :  { %v12767_v52 = vrot.slane %v12766_v8, 2  ;;  %v12777_v9 = vadd.f32 %v12776_v10, %v12775_v12  ;;  %v13386_v59 = vand.u32 4294901760, %v13385_v2  ;;  %v13393_v12 = vand.u32 4294901760, %v13392_v6 }
0x18b6   :  { %v13405_v10 = vand.u32 4294901760, %v30129_v13 }
0x18b7   :  { %v12768_v33 = vadd.f32 %v12767_v52, %v12766_v8  ;;  %v12778_v51 = vrot.slane %v12777_v9, 2  ;;  %v13398_v8 = vand.u32 4294901760, %v30127_v14  ;;  %v27147_v52 = vpack.c.bf16 %v13393_v12, %v13386_v59 }
0x18b9   :  { %v12769_v29 = vrot.slane %v12768_v33, 1  ;;  %v12779_v44 = vadd.f32 %v12778_v51, %v12777_v9  ;;  %v13399_v9 = vsub.f32 %v30127_v14, %v13398_v8 }
0x18bb   :  { %v12780_v19 = vrot.slane %v12779_v44, 1  ;;  %v12770_v39 = vadd.f32 %v12769_v29, %v12768_v33  ;;  %v13406_v33 = vsub.f32 %v30129_v13, %v13405_v10  ;;  %v13400_v51 = vand.u32 4294901760, %v13399_v9 }
0x18bd   :  { %v12781_v40 = vadd.f32 %v12780_v19, %v12779_v44  ;;  %v13407_v29 = vand.u32 4294901760, %v13406_v33  ;;  %v27153_v19 = vpack.c.bf16 %v30125_v46, %v30123_v11 }
0x18bf   :  { %v12782_v53 = vsel %vm769_vm7, %v12770_v39, %v12781_v40  ;;  %v27150_v44 = vpack.c.bf16 %v13407_v29, %v13400_v51  ;;  %v27156_v39 = vpack.c.bf16 %v30129_v13, %v30127_v14  ;;  %v27165_v40 = vpack.c.bf16 %v13391_v17, %v13384_v26 }
0x18c0   :  { %v12784_v36 = vsel %vm1785_vm11, %v12782_v53, 0  ;;  %v27168_v53 = vpack.c.bf16 %v13405_v10, %v13398_v8 }
0x18c1   :  { %v12851_v58 = vand.u32 4294901760, %v12784_v36 }
0x18c3   :  { %v12852_v4 = vsub.f32 %v12784_v36, %v12851_v58 }
0x18c5   :  { %v12853_v60 = vand.u32 4294901760, %v12852_v4 }
0x18c7   :  { %v12854_v20 = vsub.f32 %v12852_v4, %v12853_v60 }
0x18c9   :  { %v12855_v32 = vand.u32 4294901760, %v12854_v20 }
0x18cb   :  { %25133 = vmatmul.mubr.f32.vlgmr.msra.gmra.mrb[22].mxu1 %v12855_v32 }
0x18cc   :  { %27112 = vmatpush3.bf16.msra.mxu1 %v28472_v54  ;;  %25143 = vmatprep.mubr.msk.f32.mxu1 %vm28371_vm2, %v28372_v37 }
0x18cd   :  { %27113 = vmatprep.subr.bf16.mxu1 %v28370_v34 }
0x18d0   :  { %27115 = vmatpush3.bf16.msra.mxu1 %v28586_v47 }
0x18d1   :  { %27116 = vmatprep.subr.bf16.mxu1 %v28370_v34 }
0x18d3   :  { %25144 = vmatmul.mubr.f32.vlgmr.msra.gmra.mrb[22].mxu1 %v12851_v58 }
0x18d4   :  { %27118 = vmatpush3.bf16.msra.mxu1 %v28474_v55  ;;  %25154 = vmatprep.mubr.msk.f32.mxu1 %vm28371_vm2, %v28372_v37 }
0x18d5   :  { %27119 = vmatprep.subr.bf16.mxu1 %v28370_v34 }
0x18d8   :  { %27121 = vmatpush3.bf16.msra.mxu1 %v28588_v48 }
0x18d9   :  { %27122 = vmatprep.subr.bf16.mxu1 %v28370_v34 }
0x18db   :  { %25155 = vmatmul.mubr.f32.vlgmr.msra.gmra.mrb[22].mxu1 %v12852_v4 }
0x18dc   :  { %27124 = vmatpush3.bf16.msk.msra.mxu1 %vm28462_vm5, %v28373_v45  ;;  %25165 = vmatprep.mubr.msk.f32.mxu1 %vm28371_vm2, %v28372_v37 }
0x18dd   :  { %27125 = vmatprep.subr.bf16.mxu1 %v28370_v34 }
0x18e0   :  { %27127 = vmatpush3.bf16.msk.msra.mxu1 %vm28576_vm10, %v28373_v45 }
0x18e1   :  { %27128 = vmatprep.subr.bf16.mxu1 %v28370_v34 }
0x18e3   :  { %25166 = vmatmul.mubr.f32.vlgmr.msra.gmra.mrb[22].mxu1 %v12853_v60 }
0x18e4   :  { %27130 = vmatpush3.bf16.msra.mxu1 %v28476_v56  ;;  %25176 = vmatprep.mubr.msk.f32.mxu1 %vm28371_vm2, %v28372_v37 }
0x18e5   :  { %27131 = vmatprep.subr.bf16.mxu1 %v28370_v34 }
0x18e8   :  { %27133 = vmatpush3.bf16.msra.mxu1 %v28590_v49 }
0x18e9   :  { %27134 = vmatprep.subr.bf16.mxu1 %v28370_v34 }
0x18eb   :  { %25177 = vmatmul.mubr.f32.vlgmr.msra.gmra.mrb[22].mxu1 %v12851_v58 }
0x18ec   :  { %27136 = vmatpush3.bf16.msk.msra.mxu1 %vm28462_vm5, %v28373_v45  ;;  %25187 = vmatprep.mubr.msk.f32.mxu1 %vm28371_vm2, %v28372_v37 }
0x18ed   :  { %27137 = vmatprep.subr.bf16.mxu1 %v28370_v34 }
0x18f0   :  { %27139 = vmatpush3.bf16.msk.msra.mxu1 %vm28576_vm10, %v28373_v45 }
0x18f1   :  { %27176 = vmatprep.subr.bf16.mxu1 %v28370_v34 }
0x18f3   :  { %25188 = vmatmul.mubr.f32.vlgmr.msra.gmra.mrb[22].mxu1 %v12851_v58 }
0x18f4   :  { %27178 = vmatpush3.bf16.msk.msra.mxu1 %vm28462_vm5, %v28373_v45  ;;  %25264 = vmatprep.mubr.msk.f32.mxu1 %vm28371_vm2, %v28372_v37 }
0x18f5   :  { %27179 = vmatprep.subr.bf16.mxu1 %v28370_v34 }
0x18f8   :  { %27181 = vmatpush3.bf16.msk.msra.mxu1 %vm28576_vm10, %v28373_v45 }
0x18f9   :  { %27182 = vmatprep.subr.bf16.mxu1 %v28370_v34 }
0x19c6   :  { %v13243_v36 = vpop.f32.mrb[22].mxu1 }
0x19c7   :  { %v13247_v58 = vmul.f32 0.03125, %v13243_v36  ;;  %v25189_v4 = vpop.f32.mrb[23].mxu1 }
0x19c9   :  { %v13248_v60 = vmul.f32 %v13247_v58, %v13247_v58 }
0x19cb   :  { %v13250_v20 = vrot.slane %v13248_v60, 7 }
0x19cd   :  { %v13252_v32 = vsub.f32 %v13247_v58, %v13250_v20 }
0x19cf   :  { %v13253_v16 = vadd.f32 1e-05, %v13252_v32 }
0x19d1   :  { %28345 = vrsqrt.f32 %v13253_v16 }
0x19db   :  { %v28346_v43 = vpop.eup %28345 }
0x19dc   :  { %v13262_v1 = vmul.f32 %v28346_v43, %v22335_v23 }
0x19de   :  { %v13265_v62 = vrot.slane %v13262_v1, 1  ;;  %v13272_v50 = vrot.slane %v13262_v1, %v28553_v0 }
0x19e0   :  { %v13267_v28 = vmul.f32 %v13265_v62, %v13247_v58  ;;  %v13273_v46 = vmul.f32 %v30055_v41, %v13272_v50  ;;  %v13274_v14 = vmul.f32 %v30053_v63, %v13272_v50  ;;  %v14283_v62 = vld [vmem:[%s28807_s24] sm:$0xff] }
0x19e2   :  { %v13268_v11 = vsub.f32 %v13263_v57, %v13267_v28  ;;  %v14284_v57 = vld [vmem:[%s28807_s24 + $0x8] sm:$0xff]  ;;  %v14292_v28 = vand.u32 4294901760, %v14283_v62 }
0x19e3   :  { %v14295_v50 = vand.u32 4294901760, %v14284_v57 }
0x19e4   :  { %v13279_v13 = vrot.slane %v13268_v11, %v28558_v5  ;;  %v14285_v11 = vld [vmem:[%s28807_s24 + $0x10] sm:$0xff] }
0x19e6   :  { %v13281_v26 = vadd.f32 %v13279_v13, %v13273_v46  ;;  %v13282_v17 = vadd.f32 %v13279_v13, %v13274_v14  ;;  %v14286_v46 = vld [vmem:[%s28807_s24 + $0x18] sm:$0xff]  ;;  %v14298_v14 = vand.u32 4294901760, %v14285_v11  ;;  %s31190_s24 = sld [smem:[#allocation8_spill]] }
0x19e7   :  { %v14301_v13 = vand.u32 4294901760, %v14286_v46 }
0x19e8   :  { %v13283_v2 = vmax.f32 %v13281_v26, 0.0  ;;  %v13284_v6 = vmax.f32 %v13282_v17, 0.0  ;;  %v30240_v26 = vpack.c.bf16 %v14295_v50, %v14292_v28  ;;  %v14372_v17 = vsub.f32 %v14283_v62, %v14292_v28  ;;  %v22348_v62 = vld [vmem:[%s28834_s30] ss:$0 sm:$0xff]  ;;  %s31191_s30 = sld [smem:[#allocation9_spill]] }
0x19ea   :  { %v13285_v59 = vsel %vm1785_vm11, %v13283_v2, -inf  ;;  %v13286_v12 = vsel %vm1785_vm11, %v13284_v6, -inf  ;;  %v14379_v2 = vsub.f32 %v14284_v57, %v14295_v50  ;;  %v14386_v6 = vsub.f32 %v14285_v11, %v14298_v14  ;;  %v14274_v11 = vld [vmem:[%s28839_s5] sm:$0x1]  ;;  %s31192_s5 = sld [smem:[#allocation10_spill]] }
0x19eb   :  { %v13287_v8 = vmax.f32 %v13285_v59, %v13286_v12  ;;  %v14393_v59 = vsub.f32 %v14286_v46, %v14301_v13  ;;  %v30243_v12 = vpack.c.bf16 %v14301_v13, %v14298_v14 }
0x19ed   :  { %v13288_v10 = vrot.slane %v13287_v8, 4 }
0x19ef   :  { %v13289_v9 = vmax.f32 %v13287_v8, %v13288_v10  ;;  %v14373_v8 = vand.u32 4294901760, %v14372_v17  ;;  %v14380_v10 = vand.u32 4294901760, %v14379_v2 }
0x19f1   :  { %v13290_v33 = vrot.slane %v13289_v9, 2 }
0x19f3   :  { %v13291_v51 = vmax.f32 %v13289_v9, %v13290_v33  ;;  %v14374_v9 = vsub.f32 %v14372_v17, %v14373_v8  ;;  %v14381_v33 = vsub.f32 %v14379_v2, %v14380_v10 }
0x19f5   :  { %v13292_v29 = vrot.slane %v13291_v51, 1 }
0x19f7   :  { %v13293_v36 = vmax.f32 %v13291_v51, %v13292_v29  ;;  %v14375_v51 = vand.u32 4294901760, %v14374_v9  ;;  %v14382_v29 = vand.u32 4294901760, %v14381_v33 }
0x19f9   :  { %v13300_v41 = vsel %vm1785_vm11, %v13293_v36, 0  ;;  %v14387_v36 = vand.u32 4294901760, %v14386_v6 }
0x19fa   :  { %v13371_v63 = vand.u32 4294901760, %v13300_v41 }
0x19fc   :  { %v13372_v58 = vsub.f32 %v13300_v41, %v13371_v63  ;;  %v14394_v41 = vand.u32 4294901760, %v14393_v59 }
0x19fe   :  { %v13373_v4 = vand.u32 4294901760, %v13372_v58 }
0x1a00   :  { %v13374_v60 = vsub.f32 %v13372_v58, %v13373_v4 }
0x1a02   :  { %v13375_v20 = vand.u32 4294901760, %v13374_v60 }
0x1a04   :  { %25199 = vmatmul.mubr.f32.vlgmr.msra.gmra.mrb[26].mxu0 %v13375_v20 }
0x1a05   :  { %27148 = vmatpush3.bf16.msra.mxu0 %v27147_v52  ;;  %25209 = vmatprep.mubr.msk.f32.mxu0 %vm28371_vm2, %v28372_v37  ;;  %v13298_v52 = vld [vmem:[%s28750_s19] sm:$0x1]  ;;  %s31189_s19 = sld [smem:[#allocation7_spill]] }
0x1a06   :  { %27149 = vmatprep.subr.bf16.mxu0 %v28370_v34 }
0x1a09   :  { %27151 = vmatpush3.bf16.msra.mxu0 %v27150_v44 }
0x1a0a   :  { %27152 = vmatprep.subr.bf16.mxu0 %v28370_v34 }
0x1a0b   :  { %v17955_v27 = vld [vmem:[%s31189_s19] sm:$0xff]  ;;  %v17956_v35 = vld [vmem:[%s31189_s19 + $0x8] sm:$0xff] }
0x1a0c   :  { %25210 = vmatmul.mubr.f32.vlgmr.msra.gmra.mrb[26].mxu0 %v13371_v63 }
0x1a0d   :  { %27154 = vmatpush3.bf16.msra.mxu0 %v27153_v19  ;;  %25220 = vmatprep.mubr.msk.f32.mxu0 %vm28371_vm2, %v28372_v37 }
0x1a0e   :  { %27155 = vmatprep.subr.bf16.mxu0 %v28370_v34 }
0x1a11   :  { %27157 = vmatpush3.bf16.msra.mxu0 %v27156_v39 }
0x1a12   :  { %27158 = vmatprep.subr.bf16.mxu0 %v28370_v34 }
0x1a14   :  { %25221 = vmatmul.mubr.f32.vlgmr.msra.gmra.mrb[26].mxu0 %v13372_v58  ;;  %v14388_v58 = vsub.f32 %v14386_v6, %v14387_v36 }
0x1a15   :  { %27160 = vmatpush3.bf16.msra.mxu0 %v30121_v18  ;;  %25231 = vmatprep.mubr.msk.f32.mxu0 %vm28371_vm2, %v28372_v37 }
0x1a16   :  { %27161 = vmatprep.subr.bf16.mxu0 %v28370_v34  ;;  %v14389_v60 = vand.u32 4294901760, %v14388_v58 }
0x1a19   :  { %27163 = vmatpush3.bf16.msra.mxu0 %v30132_v38 }
0x1a1a   :  { %27164 = vmatprep.subr.bf16.mxu0 %v28370_v34 }
0x1a1c   :  { %25232 = vmatmul.mubr.f32.vlgmr.msra.gmra.mrb[26].mxu0 %v13373_v4  ;;  %v14395_v4 = vsub.f32 %v14393_v59, %v14394_v41 }
0x1a1d   :  { %27166 = vmatpush3.bf16.msra.mxu0 %v27165_v40  ;;  %25242 = vmatprep.mubr.msk.f32.mxu0 %vm28371_vm2, %v28372_v37 }
0x1a1e   :  { %27167 = vmatprep.subr.bf16.mxu0 %v28370_v34  ;;  %v14396_v20 = vand.u32 4294901760, %v14395_v4 }
0x1a21   :  { %27169 = vmatpush3.bf16.msra.mxu0 %v27168_v53 }
0x1a22   :  { %27170 = vmatprep.subr.bf16.mxu0 %v28370_v34 }
0x1a24   :  { %25243 = vmatmul.mubr.f32.vlgmr.msra.gmra.mrb[26].mxu0 %v13371_v63 }
0x1a25   :  { %27172 = vmatpush3.bf16.msra.mxu0 %v30121_v18  ;;  %25253 = vmatprep.mubr.msk.f32.mxu0 %vm28371_vm2, %v28372_v37 }
0x1a26   :  { %27173 = vmatprep.subr.bf16.mxu0 %v28370_v34 }
0x1a29   :  { %27175 = vmatpush3.bf16.msra.mxu0 %v30132_v38 }
0x1a2a   :  { %27212 = vmatprep.subr.bf16.mxu0 %v28370_v34 }
0x1a2c   :  { %25254 = vmatmul.mubr.f32.vlgmr.msra.gmra.mrb[26].mxu0 %v13371_v63  ;;  %v27219_v63 = vpack.c.bf16 %v14382_v29, %v14375_v51 }
0x1a2d   :  { %25330 = vmatprep.mubr.msk.f32.mxu0 %vm28371_vm2, %v28372_v37  ;;  %27214 = vmatpush3.bf16.msra.mxu0 %v30240_v26 }
0x1a2e   :  { %27215 = vmatprep.subr.bf16.mxu0 %v28370_v34 }
0x1a31   :  { %27217 = vmatpush3.bf16.msra.mxu0 %v30243_v12 }
0x1a32   :  { %27218 = vmatprep.subr.bf16.mxu0 %v28370_v34 }
0x1aff   :  { %v13783_v44 = vpop.f32.mrb[26].mxu0 }
0x1b00   :  { %v30185_v19 = vadd.f32 %v13783_v44, %v13298_v52  ;;  %v25255_v39 = vpop.f32.mrb[27].mxu0  ;;  %v27222_v52 = vpack.c.bf16 %v14396_v20, %v14389_v60  ;;  %v27225_v44 = vpack.c.bf16 %v14379_v2, %v14372_v17 }
0x1b01   :  { %v27228_v39 = vpack.c.bf16 %v14393_v59, %v14386_v6 }
0x1b02   :  { %v13788_v18 = vmul.f32 %v30185_v19, %v30185_v19 }
0x1b04   :  { %v13791_v40 = vrot.slane %v13788_v18, 7  ;;  %v27237_v18 = vpack.c.bf16 %v14380_v10, %v14373_v8 }
0x1b06   :  { %v13793_v53 = vsel %vm769_vm7, %v30185_v19, %v13791_v40  ;;  %v27240_v40 = vpack.c.bf16 %v14394_v41, %v14387_v36 }
0x1b07   :  { %v13795_v38 = vsel %vm1785_vm11, %v13793_v53, 0 }
0x1b08   :  { %v13862_v32 = vand.u32 4294901760, %v13795_v38 }
0x1b0a   :  { %v13863_v16 = vsub.f32 %v13795_v38, %v13862_v32 }
0x1b0c   :  { %v13864_v23 = vand.u32 4294901760, %v13863_v16 }
0x1b0e   :  { %v13865_v43 = vsub.f32 %v13863_v16, %v13864_v23 }
0x1b10   :  { %v13866_v1 = vand.u32 4294901760, %v13865_v43 }
0x1b12   :  { %25265 = vmatmul.mubr.f32.vlgmr.msra.gmra.mrb[24].mxu1 %v13866_v1 }
0x1b13   :  { %27184 = vmatpush3.bf16.msra.mxu1 %v28472_v54  ;;  %25275 = vmatprep.mubr.msk.f32.mxu1 %vm28371_vm2, %v28372_v37 }
0x1b14   :  { %27185 = vmatprep.subr.bf16.mxu1 %v28370_v34 }
0x1b17   :  { %27187 = vmatpush3.bf16.msra.mxu1 %v28586_v47 }
0x1b18   :  { %27188 = vmatprep.subr.bf16.mxu1 %v28370_v34 }
0x1b1a   :  { %25276 = vmatmul.mubr.f32.vlgmr.msra.gmra.mrb[24].mxu1 %v13862_v32 }
0x1b1b   :  { %27190 = vmatpush3.bf16.msra.mxu1 %v28474_v55  ;;  %25286 = vmatprep.mubr.msk.f32.mxu1 %vm28371_vm2, %v28372_v37 }
0x1b1c   :  { %27191 = vmatprep.subr.bf16.mxu1 %v28370_v34 }
0x1b1f   :  { %27193 = vmatpush3.bf16.msra.mxu1 %v28588_v48 }
0x1b20   :  { %27194 = vmatprep.subr.bf16.mxu1 %v28370_v34 }
0x1b22   :  { %25287 = vmatmul.mubr.f32.vlgmr.msra.gmra.mrb[24].mxu1 %v13863_v16 }
0x1b23   :  { %27196 = vmatpush3.bf16.msk.msra.mxu1 %vm28462_vm5, %v28373_v45  ;;  %25297 = vmatprep.mubr.msk.f32.mxu1 %vm28371_vm2, %v28372_v37 }
0x1b24   :  { %27197 = vmatprep.subr.bf16.mxu1 %v28370_v34 }
0x1b27   :  { %27199 = vmatpush3.bf16.msk.msra.mxu1 %vm28576_vm10, %v28373_v45 }
0x1b28   :  { %27200 = vmatprep.subr.bf16.mxu1 %v28370_v34 }
0x1b2a   :  { %25298 = vmatmul.mubr.f32.vlgmr.msra.gmra.mrb[24].mxu1 %v13864_v23 }
0x1b2b   :  { %27202 = vmatpush3.bf16.msra.mxu1 %v28476_v56  ;;  %25308 = vmatprep.mubr.msk.f32.mxu1 %vm28371_vm2, %v28372_v37 }
0x1b2c   :  { %27203 = vmatprep.subr.bf16.mxu1 %v28370_v34 }
0x1b2f   :  { %27205 = vmatpush3.bf16.msra.mxu1 %v28590_v49 }
0x1b30   :  { %27206 = vmatprep.subr.bf16.mxu1 %v28370_v34 }
0x1b32   :  { %25309 = vmatmul.mubr.f32.vlgmr.msra.gmra.mrb[24].mxu1 %v13862_v32 }
0x1b33   :  { %27208 = vmatpush3.bf16.msk.msra.mxu1 %vm28462_vm5, %v28373_v45  ;;  %25319 = vmatprep.mubr.msk.f32.mxu1 %vm28371_vm2, %v28372_v37 }
0x1b34   :  { %27209 = vmatprep.subr.bf16.mxu1 %v28370_v34 }
0x1b37   :  { %27211 = vmatpush3.bf16.msk.msra.mxu1 %vm28576_vm10, %v28373_v45 }
0x1b38   :  { %27248 = vmatprep.subr.bf16.mxu1 %v28370_v34 }
0x1b3a   :  { %25320 = vmatmul.mubr.f32.vlgmr.msra.gmra.mrb[24].mxu1 %v13862_v32 }
0x1b3b   :  { %27250 = vmatpush3.bf16.msk.msra.mxu1 %vm28462_vm5, %v28373_v45  ;;  %25392 = vmatprep.mubr.msk.f32.mxu1 %vm28371_vm2, %v28372_v37 }
0x1b3c   :  { %27251 = vmatprep.subr.bf16.mxu1 %v28370_v34 }
0x1c0d   :  { %v14254_v53 = vpop.f32.mrb[24].mxu1 }
0x1c0e   :  { %v14258_v38 = vmul.f32 0.5, %v14254_v53  ;;  %v25321_v32 = vpop.f32.mrb[25].mxu1 }
0x1c10   :  { %v14259_v16 = vmul.f32 %v14258_v38, %v14258_v38 }
0x1c12   :  { %v14261_v23 = vrot.slane %v14259_v16, 7 }
0x1c14   :  { %v14263_v43 = vsub.f32 %v14258_v38, %v14261_v23 }
0x1c16   :  { %v14264_v1 = vadd.f32 1e-05, %v14263_v43 }
0x1c18   :  { %28347 = vrsqrt.f32 %v14264_v1 }
0x1c22   :  { %v28348_v57 = vpop.eup %28347 }
0x1c23   :  { %v14273_v28 = vmul.f32 %v28348_v57, %v22348_v62 }
0x1c25   :  { %v14276_v50 = vrot.slane %v14273_v28, 1 }
0x1c27   :  { %v14278_v46 = vmul.f32 %v14276_v50, %v14258_v38  ;;  %v14280_v13 = vmul.f32 %v30185_v19, %v14276_v50  ;;  %v14287_v19 = vld [vmem:[%s28874_s12] sm:$0x1]  ;;  %s31193_s12 = sld [smem:[#allocation11_spill]] }
0x1c29   :  { %v14279_v14 = vsub.f32 %v14274_v11, %v14278_v46  ;;  %v30313_v46 = vld [vmem:[%s28921_s27 + $0x10] sm:$0xff] }
0x1c2b   :  { %v14281_v17 = vadd.f32 %v14280_v13, %v14279_v14  ;;  %v30316_v14 = vld [vmem:[%s28921_s27 + $0x18] sm:$0xff]  ;;  %v11202_v13 = vmul.f32 %v30313_v46, %v30313_v46  ;;  %s31195_s27 = sld [smem:[#allocation13_spill]] }
0x1c2d   :  { %v14282_v2 = vmax.f32 %v14281_v17, 0.0  ;;  %v11203_v17 = vmul.f32 %v30316_v14, %v30316_v14 }
0x1c2f   :  { %v14289_v6 = vsel %vm1785_vm11, %v14282_v2, 0  ;;  %v11204_v2 = vsel %vm202_vm12, %v11202_v13, 0.0 }
0x1c30   :  { %v14360_v59 = vand.u32 4294901760, %v14289_v6  ;;  %11205 = vadd.xlane.f32.xlu1 %v11204_v2 }
0x1c32   :  { %v14361_v8 = vsub.f32 %v14289_v6, %v14360_v59  ;;  %v11207_v6 = vsel %vm202_vm12, %v11203_v17, 0.0 }
0x1c33   :  { %11208 = vadd.xlane.f32.xlu0 %v11207_v6 }
0x1c34   :  { %v14362_v10 = vand.u32 4294901760, %v14361_v8 }
0x1c36   :  { %v14363_v9 = vsub.f32 %v14361_v8, %v14362_v10 }
0x1c38   :  { %v14364_v33 = vand.u32 4294901760, %v14363_v9 }
0x1c3a   :  { %25331 = vmatmul.mubr.f32.vlgmr.msra.gmra.mrb[28].mxu0 %v14364_v33 }
0x1c3b   :  { %27220 = vmatpush3.bf16.msra.mxu0 %v27219_v63  ;;  %25341 = vmatprep.mubr.msk.f32.mxu0 %vm28371_vm2, %v28372_v37 }
0x1c3c   :  { %27221 = vmatprep.subr.bf16.mxu0 %v28370_v34 }
0x1c3f   :  { %27223 = vmatpush3.bf16.msra.mxu0 %v27222_v52 }
0x1c40   :  { %27224 = vmatprep.subr.bf16.mxu0 %v28370_v34 }
0x1c42   :  { %25342 = vmatmul.mubr.f32.vlgmr.msra.gmra.mrb[28].mxu0 %v14360_v59 }
0x1c43   :  { %27226 = vmatpush3.bf16.msra.mxu0 %v27225_v44  ;;  %25352 = vmatprep.mubr.msk.f32.mxu0 %vm28371_vm2, %v28372_v37  ;;  %v15258_v44 = vld [vmem:[%s28910_s20] sm:$0xff] }
0x1c44   :  { %27227 = vmatprep.subr.bf16.mxu0 %v28370_v34 }
0x1c47   :  { %27229 = vmatpush3.bf16.msra.mxu0 %v27228_v39  ;;  %v15259_v39 = vld [vmem:[%s28910_s20 + $0x8] sm:$0xff]  ;;  %s31194_s20 = sld [smem:[#allocation12_spill]] }
0x1c48   :  { %27230 = vmatprep.subr.bf16.mxu0 %v28370_v34 }
0x1c4a   :  { %25353 = vmatmul.mubr.f32.vlgmr.msra.gmra.mrb[28].mxu0 %v14361_v8 }
0x1c4b   :  { %27232 = vmatpush3.bf16.msra.mxu0 %v30240_v26  ;;  %25363 = vmatprep.mubr.msk.f32.mxu0 %vm28371_vm2, %v28372_v37 }
0x1c4c   :  { %27233 = vmatprep.subr.bf16.mxu0 %v28370_v34 }
0x1c4f   :  { %27235 = vmatpush3.bf16.msra.mxu0 %v30243_v12 }
0x1c50   :  { %27236 = vmatprep.subr.bf16.mxu0 %v28370_v34 }
0x1c52   :  { %25364 = vmatmul.mubr.f32.vlgmr.msra.gmra.mrb[28].mxu0 %v14362_v10 }
0x1c53   :  { %27238 = vmatpush3.bf16.msra.mxu0 %v27237_v18  ;;  %25374 = vmatprep.mubr.msk.f32.mxu0 %vm28371_vm2, %v28372_v37  ;;  %v15265_v18 = vand.u32 4294901760, %v15258_v44 }
0x1c54   :  { %27239 = vmatprep.subr.bf16.mxu0 %v28370_v34 }
0x1c55   :  { %v15343_v38 = vsub.f32 %v15258_v44, %v15265_v18 }
0x1c57   :  { %27241 = vmatpush3.bf16.msra.mxu0 %v27240_v40  ;;  %v15268_v40 = vand.u32 4294901760, %v15259_v39  ;;  %v15344_v16 = vand.u32 4294901760, %v15343_v38 }
0x1c58   :  { %27242 = vmatprep.subr.bf16.mxu0 %v28370_v34 }
0x1c59   :  { %v27267_v53 = vpack.c.bf16 %v15268_v40, %v15265_v18  ;;  %v15350_v32 = vsub.f32 %v15259_v39, %v15268_v40  ;;  %v15345_v43 = vsub.f32 %v15343_v38, %v15344_v16 }
0x1c5a   :  { %25375 = vmatmul.mubr.f32.vlgmr.msra.gmra.mrb[28].mxu0 %v14360_v59 }
0x1c5b   :  { %27244 = vmatpush3.bf16.msra.mxu0 %v30240_v26  ;;  %25385 = vmatprep.mubr.msk.f32.mxu0 %vm28371_vm2, %v28372_v37  ;;  %v15351_v23 = vand.u32 4294901760, %v15350_v32  ;;  %v15346_v62 = vand.u32 4294901760, %v15345_v43  ;;  %v27273_v50 = vpack.c.bf16 %v15350_v32, %v15343_v38 }
0x1c5c   :  { %27245 = vmatprep.subr.bf16.mxu0 %v28370_v34 }
0x1c5d   :  { %v15352_v1 = vsub.f32 %v15350_v32, %v15351_v23  ;;  %v27279_v11 = vpack.c.bf16 %v15351_v23, %v15344_v16 }
0x1c5f   :  { %27247 = vmatpush3.bf16.msra.mxu0 %v30243_v12  ;;  %v15353_v57 = vand.u32 4294901760, %v15352_v1 }
0x1c60   :  { %27266 = vmatprep.subr.bf16.mxu0 %v28370_v34 }
0x1c61   :  { %v27270_v28 = vpack.c.bf16 %v15353_v57, %v15346_v62 }
0x1c62   :  { %25386 = vmatmul.mubr.f32.vlgmr.msra.gmra.mrb[28].mxu0 %v14360_v59 }
0x1c63   :  { %25434 = vmatprep.mubr.msk.f32.mxu0 %vm28371_vm2, %v28372_v37  ;;  %27268 = vmatpush3.bf16.msra.mxu0 %v27267_v53 }
0x1c64   :  { %27269 = vmatprep.subr.bf16.mxu0 %v28370_v34 }
0x1d35   :  { %v14772_v51 = vpop.f32.mrb[28].mxu0 }
0x1d36   :  { %v30279_v29 = vadd.f32 %v14772_v51, %v14287_v19  ;;  %v25387_v36 = vpop.f32.mrb[29].mxu0 }
0x1d37   :  { %v22355_v36 = vld [vmem:[%s28938_s4] ss:$0 sm:$0xff]  ;;  %s31196_s4 = sld [smem:[#allocation14_spill]] }
0x1d38   :  { %v14777_v26 = vmul.f32 %v30279_v29, %v30279_v29 }
0x1d3a   :  { %v14780_v41 = vrot.slane %v14777_v26, 7 }
0x1d3c   :  { %v14782_v63 = vsel %vm769_vm7, %v30279_v29, %v14780_v41 }
0x1d3d   :  { %v14784_v12 = vsel %vm748_vm6, %v14782_v63, 0 }
0x1d3e   :  { %v14851_v58 = vand.u32 4294901760, %v14784_v12 }
0x1d40   :  { %v14852_v4 = vsub.f32 %v14784_v12, %v14851_v58  ;;  %v15249_v12 = vld [vmem:[%s28943_s15] sm:$0x1]  ;;  %s31197_s15 = sld [smem:[#allocation15_spill]] }
0x1d42   :  { %v14853_v60 = vand.u32 4294901760, %v14852_v4 }
0x1d44   :  { %v14854_v20 = vsub.f32 %v14852_v4, %v14853_v60 }
0x1d46   :  { %v14855_v52 = vand.u32 4294901760, %v14854_v20 }
0x1d48   :  { %25393 = vmatmul.mubr.f32.vlgmr.msra.gmra.mrb[26].mxu1 %v14855_v52 }
0x1d49   :  { %27253 = vmatpush3.bf16.msra.mxu1 %v28472_v54  ;;  %25399 = vmatprep.mubr.msk.f32.mxu1 %vm28371_vm2, %v28372_v37 }
0x1d4a   :  { %27254 = vmatprep.subr.bf16.mxu1 %v28370_v34 }
0x1d50   :  { %25400 = vmatmul.mubr.f32.vlgmr.msra.gmra.mrb[26].mxu1 %v14851_v58 }
0x1d51   :  { %27256 = vmatpush3.bf16.msra.mxu1 %v28474_v55  ;;  %25406 = vmatprep.mubr.msk.f32.mxu1 %vm28371_vm2, %v28372_v37 }
0x1d52   :  { %27257 = vmatprep.subr.bf16.mxu1 %v28370_v34 }
0x1d58   :  { %25407 = vmatmul.mubr.f32.vlgmr.msra.gmra.mrb[26].mxu1 %v14852_v4 }
0x1d59   :  { %27259 = vmatpush3.bf16.msk.msra.mxu1 %vm28462_vm5, %v28373_v45  ;;  %25413 = vmatprep.mubr.msk.f32.mxu1 %vm28371_vm2, %v28372_v37 }
0x1d5a   :  { %27260 = vmatprep.subr.bf16.mxu1 %v28370_v34 }
0x1d60   :  { %25414 = vmatmul.mubr.f32.vlgmr.msra.gmra.mrb[26].mxu1 %v14853_v60 }
0x1d61   :  { %27262 = vmatpush3.bf16.msra.mxu1 %v28476_v56  ;;  %25420 = vmatprep.mubr.msk.f32.mxu1 %vm28371_vm2, %v28372_v37 }
0x1d62   :  { %27263 = vmatprep.subr.bf16.mxu1 %v28370_v34 }
0x1d68   :  { %25421 = vmatmul.mubr.f32.vlgmr.msra.gmra.mrb[26].mxu1 %v14851_v58 }
0x1d69   :  { %27265 = vmatpush3.bf16.msk.msra.mxu1 %vm28462_vm5, %v28373_v45  ;;  %25427 = vmatprep.mubr.msk.f32.mxu1 %vm28371_vm2, %v28372_v37 }
0x1d70   :  { %25428 = vmatmul.mubr.f32.vlgmr.msra.gmra.mrb[26].mxu1 %v14851_v58 }
0x1e43   :  { %v15229_v59 = vpop.f32.mrb[26].mxu1 }
0x1e44   :  { %v15233_v8 = vmul.f32 0.5, %v15229_v59  ;;  %v25429_v10 = vpop.f32.mrb[27].mxu1 }
0x1e46   :  { %v15234_v9 = vmul.f32 %v15233_v8, %v15233_v8 }
0x1e48   :  { %v15236_v33 = vrot.slane %v15234_v9, 7 }
0x1e4a   :  { %v15238_v19 = vsub.f32 %v15233_v8, %v15236_v33 }
0x1e4c   :  { %v15239_v51 = vadd.f32 1e-05, %v15238_v19 }
0x1e4e   :  { %28349 = vrsqrt.f32 %v15239_v51 }
0x1e58   :  { %v28350_v26 = vpop.eup %28349 }
0x1e59   :  { %v15248_v41 = vmul.f32 %v28350_v26, %v22355_v36 }
0x1e5b   :  { %v15251_v63 = vrot.slane %v15248_v41, 1 }
0x1e5d   :  { %v15253_v58 = vmul.f32 %v15251_v63, %v15233_v8  ;;  %v15255_v60 = vmul.f32 %v30279_v29, %v15251_v63  ;;  %v11206_v29 = vpop.xlane.xlu1 %11205  ;;  %v15723_v8 = vld [vmem:[%s28981_s23] sm:$0x1f]  ;;  %s31198_s23 = sld [smem:[#allocation16_spill]] }
0x1e5e   :  { %28351 = vrsqrt.f32 %v11206_v29  ;;  %vm11212_vm0 = vcmp.eq.f32.partialorder %v11206_v29, inf  ;;  %v11215_v23 = vand.u32 2147483648, %v11206_v29  ;;  %vm11214_vm9 = vcmp.eq.f32.partialorder %v11206_v29, 0.0 }
0x1e5f   :  { %v15254_v4 = vsub.f32 %v15249_v12, %v15253_v58  ;;  %v15738_v33 = vsel %vm4762_vm4, %v15723_v8, 0 }
0x1e60   :  { %v15741_v19 = vand.u32 4294901760, %v15738_v33 }
0x1e61   :  { %v15256_v20 = vadd.f32 %v15255_v60, %v15254_v4 }
0x1e62   :  { %25472 = vmatprep.subr.mxu1 %v15741_v19  ;;  %v15828_v63 = vsub.f32 %v15738_v33, %v15741_v19 }
0x1e63   :  { %v15257_v52 = vmax.f32 %v15256_v20, 0.0  ;;  %25473 = vmatpush3.msra.mxu1 %v15741_v19 }
0x1e64   :  { %v15829_v4 = vand.u32 4294901760, %v15828_v63 }
0x1e65   :  { %v15262_v44 = vsel %vm748_vm6, %v15257_v52, 0 }
0x1e66   :  { %v15331_v39 = vand.u32 4294901760, %v15262_v44 }
0x1e68   :  { %v15332_v18 = vsub.f32 %v15262_v44, %v15331_v39  ;;  %v28352_v16 = vpop.eup %28351 }
0x1e69   :  { %v11211_v1 = vmul.f32 %v28352_v16, %v11206_v29 }
0x1e6a   :  { %v15333_v40 = vand.u32 4294901760, %v15332_v18 }
0x1e6c   :  { %v15334_v38 = vsub.f32 %v15332_v18, %v15333_v40 }
0x1e6e   :  { %v15335_v32 = vand.u32 4294901760, %v15334_v38 }
0x1e70   :  { %25435 = vmatmul.mubr.f32.vlgmr.msra.gmra.mrb[30].mxu0 %v15335_v32 }
0x1e71   :  { %27271 = vmatpush3.bf16.msra.mxu0 %v27270_v28  ;;  %25441 = vmatprep.mubr.msk.f32.mxu0 %vm28371_vm2, %v28372_v37  ;;  %v11213_v28 = vsel %vm11212_vm0, %v11206_v29, %v11211_v1 }
0x1e72   :  { %27272 = vmatprep.subr.bf16.mxu0 %v28370_v34 }
0x1e78   :  { %25442 = vmatmul.mubr.f32.vlgmr.msra.gmra.mrb[30].mxu0 %v15331_v39 }
0x1e79   :  { %27274 = vmatpush3.bf16.msra.mxu0 %v27273_v50  ;;  %25448 = vmatprep.mubr.msk.f32.mxu0 %vm28371_vm2, %v28372_v37  ;;  %v11216_v50 = vsel %vm11214_vm9, %v11215_v23, %v11213_v28 }
0x1e7a   :  { %27275 = vmatprep.subr.bf16.mxu0 %v28370_v34  ;;  %v11224_v17 = vmax.f32 %v11216_v50, 1e-12 }
0x1e80   :  { %25449 = vmatmul.mubr.f32.vlgmr.msra.gmra.mrb[30].mxu0 %v15332_v18 }
0x1e81   :  { %27277 = vmatpush3.bf16.msra.mxu0 %v27267_v53  ;;  %25455 = vmatprep.mubr.msk.f32.mxu0 %vm28371_vm2, %v28372_v37 }
0x1e82   :  { %27278 = vmatprep.subr.bf16.mxu0 %v28370_v34 }
0x1e88   :  { %25456 = vmatmul.mubr.f32.vlgmr.msra.gmra.mrb[30].mxu0 %v15333_v40  ;;  %v15260_v40 = vld [vmem:[%s28990_s2] sm:$0x1]  ;;  %s31199_s2 = sld [smem:[#allocation17_spill]] }
0x1e89   :  { %27280 = vmatpush3.bf16.msra.mxu0 %v27279_v11  ;;  %25462 = vmatprep.mubr.msk.f32.mxu0 %vm28371_vm2, %v28372_v37 }
0x1e8a   :  { %27281 = vmatprep.subr.bf16.mxu0 %v28370_v34 }
0x1e90   :  { %25463 = vmatmul.mubr.f32.vlgmr.msra.gmra.mrb[30].mxu0 %v15331_v39 }
0x1e91   :  { %27283 = vmatpush3.bf16.msra.mxu0 %v27267_v53  ;;  %25469 = vmatprep.mubr.msk.f32.mxu0 %vm28371_vm2, %v28372_v37  ;;  %v11209_v53 = vpop.xlane.xlu0 %11208 }
0x1e92   :  { %27284 = vmatprep.subr.bf16.mxu0 %v28370_v34  ;;  %28353 = vrsqrt.f32 %v11209_v53  ;;  %vm11219_vm13 = vcmp.eq.f32.partialorder %v11209_v53, inf  ;;  %v11222_v62 = vand.u32 2147483648, %v11209_v53  ;;  %vm11221_vm14 = vcmp.eq.f32.partialorder %v11209_v53, 0.0 }
0x1e93   :  { %28355 = vrcp.f32 %v11224_v17 }
0x1e98   :  { %25470 = vmatmul.mubr.f32.vlgmr.msra.gmra.mrb[30].mxu0 %v15331_v39 }
0x1e99   :  { %27286 = vmatpush3.bf16.msk.msra.mxu0 %vm28462_vm5, %v28373_v45  ;;  %25510 = vmatprep.mubr.msk.f32.mxu0 %vm28371_vm2, %v28372_v37 }
0x1e9a   :  { %27287 = vmatprep.subr.bf16.mxu0 %v28370_v34 }
0x1e9c   :  { %v28354_v43 = vpop.eup %28353 }
0x1e9d   :  { %27289 = vmatpush3.bf16.msk.msra.mxu0 %vm28576_vm10, %v28373_v45  ;;  %v11218_v57 = vmul.f32 %v28354_v43, %v11209_v53  ;;  %v28356_v6 = vpop.eup %28355 }
0x1e9e   :  { %27290 = vmatprep.subr.bf16.mxu0 %v28370_v34  ;;  %v11227_v10 = vmul.f32 %v28356_v6, %v30313_v46  ;;  %v15830_v46 = vsub.f32 %v15828_v63, %v15829_v4 }
0x1e9f   :  { %v11220_v11 = vsel %vm11219_vm13, %v11209_v53, %v11218_v57 }
0x1ea0   :  { %v11223_v13 = vsel %vm11221_vm14, %v11222_v62, %v11220_v11  ;;  %v15732_v51 = vsel %vm202_vm12, %v11227_v10, 0  ;;  %v15831_v44 = vand.u32 4294901760, %v15830_v46 }
0x1ea1   :  { %v11225_v2 = vmax.f32 %v11223_v13, 1e-12  ;;  %v15806_v26 = vand.u32 4294901760, %v15732_v51 }
0x1ea2   :  { %25477 = vmatprep.subr.mxu1 %v15831_v44 }
0x1ea3   :  { %28357 = vrcp.f32 %v11225_v2  ;;  %v15807_v12 = vsub.f32 %v15732_v51, %v15806_v26 }
0x1ea5   :  { %v15808_v60 = vand.u32 4294901760, %v15807_v12 }
0x1ea7   :  { %v15809_v52 = vsub.f32 %v15807_v12, %v15808_v60 }
0x1ea9   :  { %v15810_v39 = vand.u32 4294901760, %v15809_v52 }
0x1eab   :  { %25474 = vmatprep.mubr.f32.mxu1 %v15810_v39  ;;  %v22358_v39 = vld [vmem:[%s29025_s7 + $0x1] ss:$0 sm:$0xff] }
0x1ead   :  { %v28358_v59 = vpop.eup %28357 }
0x1eae   :  { %v11229_v9 = vmul.f32 %v28358_v59, %v30316_v14 }
0x1eb0   :  { %v15735_v36 = vsel %vm202_vm12, %v11229_v9, 0 }
0x1eb1   :  { %v15816_v41 = vand.u32 4294901760, %v15735_v36 }
0x1eb3   :  { %v15817_v58 = vsub.f32 %v15735_v36, %v15816_v41  ;;  %v31183_v36 = vmov 1  }
0x1eb5   :  { %v15818_v20 = vand.u32 4294901760, %v15817_v58 }
0x1eb7   :  { %v15819_v14 = vsub.f32 %v15817_v58, %v15818_v20 }
0x1eb9   :  { %v15820_v18 = vand.u32 4294901760, %v15819_v14  ;;  %v22357_v14 = vld [vmem:[%s29025_s7] ss:$0 sm:$0xff] }
0x1ebb   :  { %25475 = vmatmul.mubr.f32.vlgmr.msra.gmra.mrb[28].mxu1 %v15820_v18 }
0x1ebc   :  { %25478 = vmatpush3.msra.mxu1 %v15831_v44  ;;  %25479 = vmatprep.mubr.f32.mxu1 %v15806_v26  ;;  %v22356_v44 = vld [vmem:[%s31184_s25] ss:$0 sm:$0xff] }
0x1ebd   :  { %25482 = vmatprep.subr.mxu1 %v15828_v63 }
0x1ec3   :  { %25480 = vmatmul.mubr.f32.vlgmr.msra.gmra.mrb[28].mxu1 %v15816_v41 }
0x1ec4   :  { %25483 = vmatpush3.msra.mxu1 %v15828_v63  ;;  %25484 = vmatprep.mubr.f32.mxu1 %v15807_v12 }
0x1ec5   :  { %25487 = vmatprep.subr.mxu1 %v15741_v19 }
0x1ecb   :  { %25485 = vmatmul.mubr.f32.vlgmr.msra.gmra.mrb[28].mxu1 %v15817_v58 }
0x1ecc   :  { %25488 = vmatpush3.msra.mxu1 %v15741_v19  ;;  %25489 = vmatprep.mubr.f32.mxu1 %v15808_v60 }
0x1ecd   :  { %25492 = vmatprep.subr.mxu1 %v15829_v4 }
0x1ed3   :  { %25490 = vmatmul.mubr.f32.vlgmr.msra.gmra.mrb[28].mxu1 %v15818_v20 }
0x1ed4   :  { %25493 = vmatpush3.msra.mxu1 %v15829_v4  ;;  %25494 = vmatprep.mubr.f32.mxu1 %v15806_v26 }
0x1ed5   :  { %25497 = vmatprep.subr.mxu1 %v15741_v19 }
0x1edb   :  { %25495 = vmatmul.mubr.f32.vlgmr.msra.gmra.mrb[28].mxu1 %v15816_v41 }
0x1edc   :  { %25498 = vmatpush3.msra.mxu1 %v15741_v19  ;;  %25499 = vmatprep.mubr.f32.mxu1 %v15806_v26 }
0x1ee3   :  { %25500 = vmatmul.mubr.f32.vlgmr.msra.gmra.mrb[28].mxu1 %v15816_v41 }
0x1f6b   :  { %v15719_v38 = vpop.f32.mrb[30].mxu0 }
0x1f6c   :  { %v27823_v32 = vadd.f32 %v15719_v38, %v15260_v40  ;;  %v25471_v29 = vpop.f32.mrb[31].mxu0 }
0x1f6e   :  { %v16232_v53 = vrot.slane %v27823_v32, %v28558_v5 }
0x1f70   :  { %16295 = vrot.lane.b32.xlu0 %v16232_v53, %s31181_s0  ;;  %16263 = vrot.lane.b32.xlu1 %v16232_v53, %s31182_s21  ;;  %v16234_v16 = vmul.f32 %v16232_v53, %v29872_v7  ;;  %v16233_v43 = vmul.f32 %v16232_v53, %v29868_v31  ;;  %v22359_v53 = vld [vmem:[%s29025_s7 + $0x2] ss:$0 sm:$0xff]  ;;  %s31200_s7 = sld [smem:[#allocation18_spill]] }
0x1f72   :  { %v16238_v23 = vsel %vm186_vm1, %v16234_v16, 0.0  ;;  %v16235_v1 = vsel %vm186_vm1, %v16233_v43, 0.0 }
0x1f8f   :  { %16239 = vadd.xlane.f32.xlu0 %v16238_v23 }
0x1f94   :  { %16236 = vadd.xlane.f32.xlu1 %v16235_v1 }
0x1fb6   :  { %v25501_v9 = vpop.f32.mrb[28].mxu1 }
0x1fb7   :  { %v16219_v51 = vpop.f32.mrb[29].mxu1  ;;  %v27824_v16 = vadd.f32 %v25501_v9, %v22356_v44 }
0x1fb8   :  { %v27825_v40 = vadd.f32 %v22356_v44, %v16219_v51 }
0x1fe2   :  { %v16296_v62 = vpop.permute.xlu0 %16295  ;;  %v16264_v57 = vpop.permute.xlu1 %16263 }
0x1fe3   :  { %v16266_v28 = vmul.f32 %v16264_v57, %v29868_v31  ;;  %v16267_v50 = vmul.f32 %v16264_v57, %v29872_v7  ;;  %v16298_v11 = vmul.f32 %v16296_v62, %v29868_v31  ;;  %v16299_v13 = vmul.f32 %v16296_v62, %v29872_v7 }
0x1fe5   :  { %v16271_v17 = vsel %vm186_vm1, %v16267_v50, 0.0  ;;  %v16268_v2 = vsel %vm186_vm1, %v16266_v28, 0.0  ;;  %v16303_v6 = vsel %vm186_vm1, %v16299_v13, 0.0  ;;  %v16300_v59 = vsel %vm186_vm1, %v16298_v11, 0.0 }
0x1fe6   :  { %16272 = vadd.xlane.f32.xlu0 %v16271_v17  ;;  %16269 = vadd.xlane.f32.xlu1 %v16268_v2 }
0x1fea   :  { %16304 = vadd.xlane.f32.xlu0 %v16303_v6  ;;  %16301 = vadd.xlane.f32.xlu1 %v16300_v59 }
0x201c   :  { %v16240_v8 = vpop.xlane.xlu0 %16239 }
0x201d   :  { %v16242_v10 = vadd.f32 %v16240_v8, %v29872_v7 }
0x201f   :  { %16251 = vperm.xlu0 %28313, %v16242_v10  }
0x2021   :  { %v16237_v33 = vpop.xlane.xlu1 %16236 }
0x2022   :  { %v16241_v19 = vadd.f32 %v16237_v33, %v29868_v31 }
0x2023   :  { %28316 = vset.pattern.permute.xlu0 %v28396_v3 }
0x2024   :  { %16246 = vperm.xlu1 %28312, %v16241_v19  }
0x2028   :  { %28314 = vset.pattern.permute.xlu1 %v31183_v36 }
0x2073   :  { %v16270_v26 = vpop.xlane.xlu1 %16269  ;;  %v16273_v63 = vpop.xlane.xlu0 %16272 }
0x2074   :  { %v16274_v41 = vadd.f32 %v16270_v26, %v29868_v31  ;;  %v16275_v12 = vadd.f32 %v16273_v63, %v29872_v7 }
0x2076   :  { %16279 = vperm.xlu1 %28314, %v16274_v41  }
0x2077   :  { %v16302_v58 = vpop.xlane.xlu1 %16301  ;;  %v16305_v60 = vpop.xlane.xlu0 %16304 }
0x2078   :  { %v16306_v4 = vadd.f32 %v16302_v58, %v29868_v31  ;;  %v16307_v20 = vadd.f32 %v16305_v60, %v29872_v7 }
0x207a   :  { %16284 = vperm.xlu1 %28314, %v16275_v12  }
0x207e   :  { %28315 = vset.pattern.permute.xlu1 %v28396_v3 }
0x207f   :  { %16311 = vperm.xlu1 %28315, %v16306_v4  }
0x2083   :  { %16316 = vperm.xlu1 %28315, %v16307_v20  }
0x209e   :  { %v16252_v32 = vpop.permute.xlu0 %16251 }
0x209f   :  { %v16259_v31 = vmul.f32 %v22357_v14, %v16252_v32  ;;  %v16850_v32 = vld [vmem:[%s31185_s29] sm:$0xff] }
0x20a1   :  { %v16261_v7 = vadd.f32 %v27824_v16, %v16259_v31  ;;  %v16868_v31 = vand.u32 4294901760, %v16850_v32 }
0x20a3   :  { %v16247_v46 = vpop.permute.xlu1 %16246 }
0x20a4   :  { %v16258_v18 = vmul.f32 %v22357_v14, %v16247_v46 }
0x20a6   :  { %v16260_v23 = vadd.f32 %v27825_v40, %v16258_v18 }
0x20f5   :  { %v16280_v52 = vpop.permute.xlu1 %16279 }
0x20f6   :  { %v16291_v29 = vmul.f32 %v22358_v39, %v16280_v52 }
0x20f8   :  { %v16293_v3 = vadd.f32 %v16291_v29, %v16260_v23  ;;  %v16851_v29 = vld [vmem:[%s31185_s29 + $0x8] sm:$0xff]  ;;  %v16853_v23 = vld [vmem:[%s31185_s29 + $0x18] sm:$0xff] }
0x20f9   :  { %v16285_v38 = vpop.permute.xlu1 %16284  ;;  %v16871_v16 = vand.u32 4294901760, %v16851_v29 }
0x20fa   :  { %v16292_v1 = vmul.f32 %v22358_v39, %v16285_v38 }
0x20fc   :  { %v16294_v50 = vadd.f32 %v16292_v1, %v16261_v7  ;;  %v30464_v1 = vpack.c.bf16 %v16871_v16, %v16868_v31  ;;  %v16958_v7 = vsub.f32 %v16850_v32, %v16868_v31 }
0x20fe   :  { %v16312_v43 = vpop.permute.xlu1 %16311  ;;  %27321 = vmatprep.subr.bf16.mxu1 %v30464_v1 }
0x20ff   :  { %v16323_v62 = vmul.f32 %v22359_v53, %v16312_v43  ;;  %27323 = vmatpush3.bf16.msra.mxu1 %v30464_v1 }
0x2101   :  { %v30388_v57 = vadd.f32 %v16323_v62, %v16293_v3  ;;  %v16877_v3 = vand.u32 4294901760, %v16853_v23 }
0x2102   :  { %v16317_v28 = vpop.permute.xlu1 %16316 }
0x2103   :  { %v16324_v11 = vmul.f32 %v22359_v53, %v16317_v28  ;;  %v16336_v13 = vmul.f32 %v30388_v57, %v30388_v57  ;;  %v16327_v2 = vsel %vm1785_vm11, %v30388_v57, 0.0  ;;  %v16852_v53 = vld [vmem:[%s31185_s29 + $0x10] sm:$0xff]  ;;  %v16965_v28 = vsub.f32 %v16851_v29, %v16871_v16 }
0x2104   :  { %v16874_v43 = vand.u32 4294901760, %v16852_v53 }
0x2105   :  { %v30392_v17 = vadd.f32 %v16324_v11, %v16294_v50  ;;  %v16338_v10 = vsel %vm1785_vm11, %v16336_v13, 0.0  ;;  %v16959_v50 = vand.u32 4294901760, %v16958_v7  ;;  %v16966_v11 = vand.u32 4294901760, %v16965_v28 }
0x2106   :  { %v30466_v62 = vpack.c.bf16 %v16877_v3, %v16874_v43 }
0x2107   :  { %v16328_v6 = vsel %vm1785_vm11, %v30392_v17, 0.0  ;;  %v16337_v59 = vmul.f32 %v30392_v17, %v30392_v17  ;;  %v16960_v13 = vsub.f32 %v16958_v7, %v16959_v50 }
0x2108   :  { %v16329_v8 = vadd.f32 %v16328_v6, %v16327_v2  ;;  %27325 = vmatprep.subr.bf16.mxu1 %v30466_v62  ;;  %v16967_v2 = vsub.f32 %v16965_v28, %v16966_v11  ;;  %v16972_v6 = vsub.f32 %v16852_v53, %v16874_v43  ;;  %v16828_v53 = vld [vmem:[%s31187_s8] sm:$0x1] }
0x2109   :  { %v16339_v9 = vsel %vm1785_vm11, %v16337_v59, 0.0  ;;  %v16979_v59 = vsub.f32 %v16853_v23, %v16877_v3  ;;  %27327 = vmatpush3.bf16.msra.mxu1 %v30466_v62 }
0x210a   :  { %v16330_v33 = vrot.slane %v16329_v8, 4  ;;  %v16340_v19 = vadd.f32 %v16339_v9, %v16338_v10  ;;  %v16968_v10 = vand.u32 4294901760, %v16967_v2  ;;  %v16973_v9 = vand.u32 4294901760, %v16972_v6 }
0x210c   :  { %v16331_v51 = vadd.f32 %v16330_v33, %v16329_v8  ;;  %v16341_v36 = vrot.slane %v16340_v19, 4  ;;  %v16961_v8 = vand.u32 4294901760, %v16960_v13  ;;  %v16980_v33 = vand.u32 4294901760, %v16979_v59 }
0x210e   :  { %v16332_v26 = vrot.slane %v16331_v51, 2  ;;  %v16342_v41 = vadd.f32 %v16341_v36, %v16340_v19  ;;  %v27328_v19 = vpack.c.bf16 %v16968_v10, %v16961_v8  ;;  %v16981_v36 = vsub.f32 %v16979_v59, %v16980_v33 }
0x2110   :  { %v16333_v63 = vadd.f32 %v16332_v26, %v16331_v51  ;;  %v16343_v12 = vrot.slane %v16342_v41, 2  ;;  %v16974_v51 = vsub.f32 %v16972_v6, %v16973_v9  ;;  %27329 = vmatprep.subr.bf16.mxu1 %v27328_v19 }
0x2112   :  { %v16334_v58 = vrot.slane %v16333_v63, 1  ;;  %v16344_v4 = vadd.f32 %v16343_v12, %v16342_v41  ;;  %v16975_v26 = vand.u32 4294901760, %v16974_v51  ;;  %v16982_v41 = vand.u32 4294901760, %v16981_v36 }
0x2113   :  { %v27336_v12 = vpack.c.bf16 %v16965_v28, %v16958_v7 }
0x2114   :  { %v16345_v60 = vrot.slane %v16344_v4, 1  ;;  %v16335_v20 = vadd.f32 %v16334_v58, %v16333_v63  ;;  %v27332_v63 = vpack.c.bf16 %v16982_v41, %v16975_v26  ;;  %v27340_v58 = vpack.c.bf16 %v16979_v59, %v16972_v6 }
0x2116   :  { %v16346_v46 = vadd.f32 %v16345_v60, %v16344_v4  ;;  %v27352_v4 = vpack.c.bf16 %v16966_v11, %v16959_v50  ;;  %v27356_v60 = vpack.c.bf16 %v16980_v33, %v16973_v9 }
0x2118   :  { %v16347_v52 = vsel %vm769_vm7, %v16335_v20, %v16346_v46 }
0x2119   :  { %v16349_v14 = vsel %vm1785_vm11, %v16347_v52, 0 }
0x211a   :  { %v16416_v44 = vand.u32 4294901760, %v16349_v14 }
0x211c   :  { %v16417_v39 = vsub.f32 %v16349_v14, %v16416_v44 }
0x211e   :  { %v16418_v18 = vand.u32 4294901760, %v16417_v39 }
0x2120   :  { %v16419_v40 = vsub.f32 %v16417_v39, %v16418_v18 }
0x2122   :  { %v16420_v38 = vand.u32 4294901760, %v16419_v40  ;;  %v22372_v40 = vld [vmem:[%s31186_s3] ss:$0 sm:$0xff] }
0x2124   :  { %25511 = vmatmul.mubr.f32.vlgmr.msra.gmra.mrb[32].mxu0 %v16420_v38 }
0x2125   :  { %27292 = vmatpush3.bf16.msra.mxu0 %v28472_v54  ;;  %25521 = vmatprep.mubr.msk.f32.mxu0 %vm28371_vm2, %v28372_v37 }
0x2126   :  { %27293 = vmatprep.subr.bf16.mxu0 %v28370_v34 }
0x2129   :  { %27295 = vmatpush3.bf16.msra.mxu0 %v28586_v47 }
0x212a   :  { %27296 = vmatprep.subr.bf16.mxu0 %v28370_v34 }
0x212c   :  { %25522 = vmatmul.mubr.f32.vlgmr.msra.gmra.mrb[32].mxu0 %v16416_v44 }
0x212d   :  { %27298 = vmatpush3.bf16.msra.mxu0 %v28474_v55  ;;  %25532 = vmatprep.mubr.msk.f32.mxu0 %vm28371_vm2, %v28372_v37 }
0x212e   :  { %27299 = vmatprep.subr.bf16.mxu0 %v28370_v34 }
0x2131   :  { %27301 = vmatpush3.bf16.msra.mxu0 %v28588_v48 }
0x2132   :  { %27302 = vmatprep.subr.bf16.mxu0 %v28370_v34 }
0x2134   :  { %25533 = vmatmul.mubr.f32.vlgmr.msra.gmra.mrb[32].mxu0 %v16417_v39 }
0x2135   :  { %27304 = vmatpush3.bf16.msk.msra.mxu0 %vm28462_vm5, %v28373_v45  ;;  %25543 = vmatprep.mubr.msk.f32.mxu0 %vm28371_vm2, %v28372_v37 }
0x2136   :  { %27305 = vmatprep.subr.bf16.mxu0 %v28370_v34 }
0x2139   :  { %27307 = vmatpush3.bf16.msk.msra.mxu0 %vm28576_vm10, %v28373_v45 }
0x213a   :  { %27308 = vmatprep.subr.bf16.mxu0 %v28370_v34 }
0x213c   :  { %25544 = vmatmul.mubr.f32.vlgmr.msra.gmra.mrb[32].mxu0 %v16418_v18 }
0x213d   :  { %27310 = vmatpush3.bf16.msra.mxu0 %v28476_v56  ;;  %25554 = vmatprep.mubr.msk.f32.mxu0 %vm28371_vm2, %v28372_v37 }
0x213e   :  { %27311 = vmatprep.subr.bf16.mxu0 %v28370_v34 }
0x2141   :  { %27313 = vmatpush3.bf16.msra.mxu0 %v28590_v49 }
0x2142   :  { %27314 = vmatprep.subr.bf16.mxu0 %v28370_v34 }
0x2144   :  { %25555 = vmatmul.mubr.f32.vlgmr.msra.gmra.mrb[32].mxu0 %v16416_v44 }
0x2145   :  { %27316 = vmatpush3.bf16.msk.msra.mxu0 %vm28462_vm5, %v28373_v45  ;;  %25565 = vmatprep.mubr.msk.f32.mxu0 %vm28371_vm2, %v28372_v37 }
0x2146   :  { %27317 = vmatprep.subr.bf16.mxu0 %v28370_v34 }
0x2149   :  { %27319 = vmatpush3.bf16.msk.msra.mxu0 %vm28576_vm10, %v28373_v45 }
0x214a   :  { %27368 = vmatprep.subr.bf16.mxu0 %v28370_v34 }
0x214c   :  { %25566 = vmatmul.mubr.f32.vlgmr.msra.gmra.mrb[32].mxu0 %v16416_v44 }
0x214d   :  { %27370 = vmatpush3.bf16.msk.msra.mxu0 %vm28462_vm5, %v28373_v45  ;;  %25650 = vmatprep.mubr.msk.f32.mxu0 %vm28371_vm2, %v28372_v37 }
0x214e   :  { %27371 = vmatprep.subr.bf16.mxu0 %v28370_v34 }
0x2151   :  { %27373 = vmatpush3.bf16.msk.msra.mxu0 %vm28576_vm10, %v28373_v45 }
0x2152   :  { %27374 = vmatprep.subr.bf16.mxu0 %v28370_v34 }
0x2155   :  { %27376 = vmatpush3.bf16.msk.msra.mxu0 %vm29149_vm15, %v28373_v45 }
0x2156   :  { %27377 = vmatprep.subr.bf16.mxu0 %v28370_v34 }
0x2159   :  { %27379 = vmatpush3.bf16.msk.msra.mxu0 %vm29157_vm3, %v28373_v45 }
0x215a   :  { %27380 = vmatprep.subr.bf16.mxu0 %v28370_v34 }
0x221f   :  { %v16808_v20 = vpop.f32.mrb[32].mxu0 }
0x2220   :  { %v16812_v46 = vmul.f32 0.03125, %v16808_v20  ;;  %v25567_v52 = vpop.f32.mrb[33].mxu0 }
0x2222   :  { %v16813_v14 = vmul.f32 %v16812_v46, %v16812_v46 }
0x2224   :  { %v16815_v44 = vrot.slane %v16813_v14, 7 }
0x2226   :  { %v16817_v39 = vsub.f32 %v16812_v46, %v16815_v44 }
0x2228   :  { %v16818_v18 = vadd.f32 1e-05, %v16817_v39 }
0x222a   :  { %28359 = vrsqrt.f32 %v16818_v18 }
0x2234   :  { %v28360_v38 = vpop.eup %28359 }
0x2235   :  { %v16827_v32 = vmul.f32 %v28360_v38, %v22372_v40 }
0x2237   :  { %v16830_v29 = vrot.slane %v16827_v32, 1  ;;  %v16837_v16 = vrot.slane %v16827_v32, %v28553_v0 }
0x2239   :  { %v16832_v31 = vmul.f32 %v16830_v29, %v16812_v46  ;;  %v16838_v43 = vmul.f32 %v16837_v16, %v30388_v57  ;;  %v16839_v3 = vmul.f32 %v16837_v16, %v30392_v17 }
0x223b   :  { %v16833_v23 = vsub.f32 %v16828_v53, %v16832_v31 }
0x223d   :  { %v16844_v7 = vrot.slane %v16833_v23, %v28558_v5 }
0x223f   :  { %v16846_v28 = vadd.f32 %v16844_v7, %v16838_v43  ;;  %v16847_v50 = vadd.f32 %v16844_v7, %v16839_v3 }
0x2241   :  { %v16848_v11 = vmax.f32 %v16846_v28, 0.0  ;;  %v16849_v13 = vmax.f32 %v16847_v50, 0.0 }
0x2243   :  { %v16862_v2 = vsel %vm1785_vm11, %v16848_v11, 0  ;;  %v16865_v6 = vsel %vm1785_vm11, %v16849_v13, 0 }
0x2244   :  { %v16936_v59 = vand.u32 4294901760, %v16862_v2  ;;  %v16946_v8 = vand.u32 4294901760, %v16865_v6 }
0x2246   :  { %v16937_v10 = vsub.f32 %v16862_v2, %v16936_v59  ;;  %v16947_v9 = vsub.f32 %v16865_v6, %v16946_v8 }
0x2248   :  { %v16938_v33 = vand.u32 4294901760, %v16937_v10  ;;  %v16948_v51 = vand.u32 4294901760, %v16947_v9 }
0x224a   :  { %v16939_v36 = vsub.f32 %v16937_v10, %v16938_v33  ;;  %v16949_v57 = vsub.f32 %v16947_v9, %v16948_v51 }
0x224c   :  { %v16940_v26 = vand.u32 4294901760, %v16939_v36  ;;  %v16950_v17 = vand.u32 4294901760, %v16949_v57 }
0x224e   :  { %25576 = vmatprep.mubr.f32.mxu1 %v16940_v26 }
0x224f   :  { %25577 = vmatmul.mubr.f32.vlgmr.msra.gmra.mrb[30].mxu1 %v16950_v17 }
0x2250   :  { %27331 = vmatpush3.bf16.msra.mxu1 %v27328_v19  ;;  %25587 = vmatprep.mubr.f32.mxu1 %v16936_v59  ;;  %v22373_v19 = vld [vmem:[%s31188_s14] ss:$0 sm:$0xff] }
0x2251   :  { %27333 = vmatprep.subr.bf16.mxu1 %v27332_v63 }
0x2254   :  { %27335 = vmatpush3.bf16.msra.mxu1 %v27332_v63 }
0x2255   :  { %27337 = vmatprep.subr.bf16.mxu1 %v27336_v12 }
0x2257   :  { %25588 = vmatmul.mubr.f32.vlgmr.msra.gmra.mrb[30].mxu1 %v16946_v8 }
0x2258   :  { %27339 = vmatpush3.bf16.msra.mxu1 %v27336_v12  ;;  %25598 = vmatprep.mubr.f32.mxu1 %v16937_v10  ;;  %v17960_v10 = vld [vmem:[%s31189_s19 + $0x28] sm:$0xff] }
0x2259   :  { %27341 = vmatprep.subr.bf16.mxu1 %v27340_v58  ;;  %v17983_v26 = vand.u32 4294901760, %v17960_v10 }
0x225c   :  { %27343 = vmatpush3.bf16.msra.mxu1 %v27340_v58 }
0x225d   :  { %27345 = vmatprep.subr.bf16.mxu1 %v30464_v1 }
0x225f   :  { %25599 = vmatmul.mubr.f32.vlgmr.msra.gmra.mrb[30].mxu1 %v16947_v9  ;;  %v17961_v9 = vld [vmem:[%s31189_s19 + $0x30] sm:$0xff] }
0x2260   :  { %27347 = vmatpush3.bf16.msra.mxu1 %v30464_v1  ;;  %25609 = vmatprep.mubr.f32.mxu1 %v16938_v33  ;;  %v17962_v33 = vld [vmem:[%s31189_s19 + $0x38] sm:$0xff]  ;;  %v17986_v17 = vand.u32 4294901760, %v17961_v9 }
0x2261   :  { %27349 = vmatprep.subr.bf16.mxu1 %v30466_v62 }
0x2264   :  { %27351 = vmatpush3.bf16.msra.mxu1 %v30466_v62 }
0x2265   :  { %27353 = vmatprep.subr.bf16.mxu1 %v27352_v4 }
0x2267   :  { %25610 = vmatmul.mubr.f32.vlgmr.msra.gmra.mrb[30].mxu1 %v16948_v51 }
0x2268   :  { %27355 = vmatpush3.bf16.msra.mxu1 %v27352_v4  ;;  %25620 = vmatprep.mubr.f32.mxu1 %v16936_v59 }
0x2269   :  { %27357 = vmatprep.subr.bf16.mxu1 %v27356_v60 }
0x226c   :  { %27359 = vmatpush3.bf16.msra.mxu1 %v27356_v60 }
0x226d   :  { %27361 = vmatprep.subr.bf16.mxu1 %v30464_v1 }
0x226f   :  { %25621 = vmatmul.mubr.f32.vlgmr.msra.gmra.mrb[30].mxu1 %v16946_v8 }
0x2270   :  { %27363 = vmatpush3.bf16.msra.mxu1 %v30464_v1  ;;  %25631 = vmatprep.mubr.f32.mxu1 %v16936_v59 }
0x2271   :  { %27365 = vmatprep.subr.bf16.mxu1 %v30466_v62 }
0x2274   :  { %27367 = vmatpush3.bf16.msra.mxu1 %v30466_v62 }
0x2275   :  { %27440 = vmatprep.subr.bf16.mxu1 %v28370_v34 }
0x2277   :  { %25632 = vmatmul.mubr.f32.vlgmr.msra.gmra.mrb[30].mxu1 %v16946_v8 }
0x2278   :  { %25764 = vmatprep.mubr.msk.f32.mxu1 %vm28371_vm2, %v28372_v37 }
0x234a   :  { %v25633_v41 = vpop.f32.mrb[30].mxu1 }
0x234b   :  { %v30492_v63 = vadd.f32 %v25633_v41, %v22373_v19  ;;  %v17385_v12 = vpop.f32.mrb[31].mxu1 }
0x234c   :  { %v30494_v58 = vadd.f32 %v22373_v19, %v17385_v12  ;;  %v17989_v19 = vand.u32 4294901760, %v17962_v33 }
0x234d   :  { %v17396_v1 = vsel %vm6437_vm8, %v30492_v63, 0.0  ;;  %v17405_v4 = vmul.f32 %v30492_v63, %v30492_v63 }
0x234e   :  { %v17395_v62 = vsel %vm6437_vm8, %v30494_v58, 0.0  ;;  %v17404_v60 = vmul.f32 %v30494_v58, %v30494_v58 }
0x234f   :  { %v17407_v20 = vsel %vm6437_vm8, %v17405_v4, 0.0  ;;  %v17397_v46 = vadd.f32 %v17396_v1, %v17395_v62  ;;  %v30608_v4 = vsub.f32 %v17960_v10, %v17983_v26  ;;  %v30610_v62 = vsub.f32 %v17961_v9, %v17986_v17 }
0x2350   :  { %v17406_v52 = vsel %vm6437_vm8, %v17404_v60, 0.0  ;;  %v30612_v60 = vsub.f32 %v17962_v33, %v17989_v19 }
0x2351   :  { %v17398_v14 = vrot.slane %v17397_v46, 4  ;;  %v17408_v44 = vadd.f32 %v17407_v20, %v17406_v52 }
0x2352   :  { %v27474_v33 = vpack.c.bf16 %v30612_v60, %v30610_v62 }
0x2353   :  { %v17399_v39 = vadd.f32 %v17398_v14, %v17397_v46  ;;  %v17409_v18 = vrot.slane %v17408_v44, 4  ;;  %v30619_v46 = vpack.c.bf16 %v17989_v19, %v17986_v17 }
0x2355   :  { %v17400_v40 = vrot.slane %v17399_v39, 2  ;;  %v17410_v38 = vadd.f32 %v17409_v18, %v17408_v44 }
0x2357   :  { %v17401_v32 = vadd.f32 %v17400_v40, %v17399_v39  ;;  %v17411_v29 = vrot.slane %v17410_v38, 2 }
0x2359   :  { %v17402_v53 = vrot.slane %v17401_v32, 1  ;;  %v17412_v31 = vadd.f32 %v17411_v29, %v17410_v38 }
0x235b   :  { %v17413_v16 = vrot.slane %v17412_v31, 1  ;;  %v17403_v23 = vadd.f32 %v17402_v53, %v17401_v32 }
0x235d   :  { %v17414_v43 = vadd.f32 %v17413_v16, %v17412_v31 }
0x235f   :  { %v17415_v3 = vsel %vm769_vm7, %v17403_v23, %v17414_v43 }
0x2360   :  { %v17417_v7 = vsel %vm6437_vm8, %v17415_v3, 0  ;;  %v18088_v3 = vand.u32 4294901760, %v30608_v4 }
0x2361   :  { %v17484_v28 = vand.u32 4294901760, %v17417_v7 }
0x2363   :  { %v17485_v50 = vsub.f32 %v17417_v7, %v17484_v28 }
0x2365   :  { %v17486_v11 = vand.u32 4294901760, %v17485_v50 }
0x2367   :  { %v17487_v13 = vsub.f32 %v17485_v50, %v17486_v11 }
0x2369   :  { %v17488_v2 = vand.u32 4294901760, %v17487_v13 }
0x236b   :  { %25651 = vmatmul.mubr.f32.vlgmr.msra.gmra.mrb[34].mxu0 %v17488_v2  ;;  %v18095_v2 = vand.u32 4294901760, %v30610_v62 }
0x236c   :  { %27382 = vmatpush3.bf16.msra.mxu0 %v28472_v54  ;;  %25669 = vmatprep.mubr.msk.f32.mxu0 %vm28371_vm2, %v28372_v37 }
0x236d   :  { %27383 = vmatprep.subr.bf16.mxu0 %v28370_v34 }
0x2370   :  { %27385 = vmatpush3.bf16.msra.mxu0 %v28586_v47 }
0x2371   :  { %27386 = vmatprep.subr.bf16.mxu0 %v28370_v34 }
0x2374   :  { %27388 = vmatpush3.bf16.msra.mxu0 %v29169_v15  ;;  %v17968_v15 = vand.u32 4294901760, %v17955_v27 }
0x2375   :  { %27389 = vmatprep.subr.bf16.mxu0 %v28370_v34 }
0x2376   :  { %v30591_v6 = vsub.f32 %v17955_v27, %v17968_v15  ;;  %v18102_v27 = vand.u32 4294901760, %v30612_v60 }
0x2378   :  { %27391 = vmatpush3.bf16.msra.mxu0 %v29171_v21  ;;  %v17971_v21 = vand.u32 4294901760, %v17956_v35  ;;  %v18053_v52 = vand.u32 4294901760, %v30591_v6  ;;  %v30656_v17 = vpack.c.bf16 %v18102_v27, %v18095_v2 }
0x2379   :  { %27392 = vmatprep.subr.bf16.mxu0 %v28370_v34 }
0x237a   :  { %v30593_v59 = vsub.f32 %v17956_v35, %v17971_v21  ;;  %v18054_v44 = vsub.f32 %v30591_v6, %v18053_v52 }
0x237b   :  { %25670 = vmatmul.mubr.f32.vlgmr.msra.gmra.mrb[34].mxu0 %v17484_v28 }
0x237c   :  { %27394 = vmatpush3.bf16.msra.mxu0 %v28474_v55  ;;  %25688 = vmatprep.mubr.msk.f32.mxu0 %vm28371_vm2, %v28372_v37  ;;  %v18060_v14 = vand.u32 4294901760, %v30593_v59  ;;  %v18055_v18 = vand.u32 4294901760, %v18054_v44 }
0x237d   :  { %27395 = vmatprep.subr.bf16.mxu0 %v28370_v34 }
0x237e   :  { %v18061_v39 = vsub.f32 %v30593_v59, %v18060_v14 }
0x2380   :  { %27397 = vmatpush3.bf16.msra.mxu0 %v28588_v48  ;;  %v18062_v40 = vand.u32 4294901760, %v18061_v39 }
0x2381   :  { %27398 = vmatprep.subr.bf16.mxu0 %v28370_v34 }
0x2382   :  { %v30630_v29 = vpack.c.bf16 %v18062_v40, %v18055_v18 }
0x2384   :  { %27400 = vmatpush3.bf16.msra.mxu0 %v29173_v22  ;;  %v17957_v22 = vld [vmem:[%s31189_s19 + $0x10] sm:$0xff] }
0x2385   :  { %27401 = vmatprep.subr.bf16.mxu0 %v28370_v34  ;;  %v17974_v8 = vand.u32 4294901760, %v17957_v22 }
0x2387   :  { %v30599_v57 = vsub.f32 %v17957_v22, %v17974_v8 }
0x2388   :  { %27403 = vmatpush3.bf16.msra.mxu0 %v29175_v24  ;;  %v17958_v24 = vld [vmem:[%s31189_s19 + $0x18] sm:$0xff] }
0x2389   :  { %27404 = vmatprep.subr.bf16.mxu0 %v28370_v34  ;;  %v17977_v51 = vand.u32 4294901760, %v17958_v24  ;;  %v18067_v38 = vand.u32 4294901760, %v30599_v57 }
0x238b   :  { %25689 = vmatmul.mubr.f32.vlgmr.msra.gmra.mrb[34].mxu0 %v17485_v50  ;;  %v30602_v41 = vpack.c.bf16 %v17977_v51, %v17974_v8  ;;  %v30604_v12 = vsub.f32 %v17958_v24, %v17977_v51  ;;  %v18068_v53 = vsub.f32 %v30599_v57, %v18067_v38  ;;  %v18089_v50 = vsub.f32 %v30608_v4, %v18088_v3 }
0x238c   :  { %27406 = vmatpush3.bf16.msk.msra.mxu0 %vm28462_vm5, %v28373_v45  ;;  %25707 = vmatprep.mubr.msk.f32.mxu0 %vm28371_vm2, %v28372_v37  ;;  %v27465_v8 = vpack.c.bf16 %v30593_v59, %v30591_v6  ;;  %v30650_v51 = vpack.c.bf16 %v18060_v14, %v18053_v52  ;;  %v17924_v52 = vld [vmem:[%s31191_s30] sm:$0x1] }
0x238d   :  { %27407 = vmatprep.subr.bf16.mxu0 %v28370_v34  ;;  %v18074_v32 = vand.u32 4294901760, %v30604_v12  ;;  %v18069_v16 = vand.u32 4294901760, %v18068_v53  ;;  %v18090_v13 = vand.u32 4294901760, %v18089_v50  ;;  %v27468_v10 = vpack.c.bf16 %v30604_v12, %v30599_v57 }
0x238f   :  { %v18075_v31 = vsub.f32 %v30604_v12, %v18074_v32 }
0x2390   :  { %27409 = vmatpush3.bf16.msk.msra.mxu0 %vm28576_vm10, %v28373_v45 }
0x2391   :  { %27410 = vmatprep.subr.bf16.mxu0 %v28370_v34  ;;  %v18076_v23 = vand.u32 4294901760, %v18075_v31 }
0x2393   :  { %v27456_v7 = vpack.c.bf16 %v18076_v23, %v18069_v16 }
0x2394   :  { %27412 = vmatpush3.bf16.msk.msra.mxu0 %vm29149_vm15, %v28373_v45 }
0x2395   :  { %27413 = vmatprep.subr.bf16.mxu0 %v28370_v34 }
0x2398   :  { %27415 = vmatpush3.bf16.msk.msra.mxu0 %vm29157_vm3, %v28373_v45 }
0x2399   :  { %27416 = vmatprep.subr.bf16.mxu0 %v28370_v34 }
0x239b   :  { %25708 = vmatmul.mubr.f32.vlgmr.msra.gmra.mrb[34].mxu0 %v17486_v11 }
0x239c   :  { %27418 = vmatpush3.bf16.msra.mxu0 %v28476_v56  ;;  %25726 = vmatprep.mubr.msk.f32.mxu0 %vm28371_vm2, %v28372_v37 }
0x239d   :  { %27419 = vmatprep.subr.bf16.mxu0 %v28370_v34 }
0x23a0   :  { %27421 = vmatpush3.bf16.msra.mxu0 %v28590_v49 }
0x23a1   :  { %27422 = vmatprep.subr.bf16.mxu0 %v28370_v34 }
0x23a4   :  { %27424 = vmatpush3.bf16.msra.mxu0 %v29177_v61  ;;  %v17959_v61 = vld [vmem:[%s31189_s19 + $0x20] sm:$0xff] }
0x23a5   :  { %27425 = vmatprep.subr.bf16.mxu0 %v28370_v34  ;;  %v17980_v36 = vand.u32 4294901760, %v17959_v61 }
0x23a7   :  { %v30606_v1 = vsub.f32 %v17959_v61, %v17980_v36  ;;  %v30615_v20 = vpack.c.bf16 %v17983_v26, %v17980_v36  ;;  %v30652_v36 = vpack.c.bf16 %v18074_v32, %v18067_v38 }
0x23a8   :  { %27427 = vmatpush3.bf16.msra.mxu0 %v29179_v25  ;;  %v30589_v25 = vpack.c.bf16 %v17971_v21, %v17968_v15  ;;  %v18096_v15 = vsub.f32 %v30610_v62, %v18095_v2  ;;  %v18103_v21 = vsub.f32 %v30612_v60, %v18102_v27 }
0x23a9   :  { %27428 = vmatprep.subr.bf16.mxu0 %v28370_v34  ;;  %v18081_v43 = vand.u32 4294901760, %v30606_v1  ;;  %v27471_v9 = vpack.c.bf16 %v30608_v4, %v30606_v1 }
0x23aa   :  { %27442 = vmatpush3.bf16.msra.mxu1 %v30589_v25  ;;  %v18097_v22 = vand.u32 4294901760, %v18096_v15  ;;  %v18104_v24 = vand.u32 4294901760, %v18103_v21 }
0x23ab   :  { %25727 = vmatmul.mubr.f32.vlgmr.msra.gmra.mrb[34].mxu0 %v17484_v28  ;;  %27443 = vmatprep.subr.bf16.mxu1 %v28370_v34  ;;  %v30654_v26 = vpack.c.bf16 %v18088_v3, %v18081_v43 }
0x23ac   :  { %27430 = vmatpush3.bf16.msk.msra.mxu0 %vm28462_vm5, %v28373_v45  ;;  %25745 = vmatprep.mubr.msk.f32.mxu0 %vm28371_vm2, %v28372_v37  ;;  %v27462_v61 = vpack.c.bf16 %v18104_v24, %v18097_v22 }
0x23ad   :  { %27431 = vmatprep.subr.bf16.mxu0 %v28370_v34 }
0x23ae   :  { %27445 = vmatpush3.bf16.msra.mxu1 %v30602_v41 }
0x23af   :  { %27446 = vmatprep.subr.bf16.mxu1 %v28370_v34 }
0x23b0   :  { %27433 = vmatpush3.bf16.msk.msra.mxu0 %vm28576_vm10, %v28373_v45 }
0x23b1   :  { %27434 = vmatprep.subr.bf16.mxu0 %v28370_v34 }
0x23b2   :  { %27448 = vmatpush3.bf16.msra.mxu1 %v30615_v20 }
0x23b3   :  { %27449 = vmatprep.subr.bf16.mxu1 %v28370_v34 }
0x23b4   :  { %27436 = vmatpush3.bf16.msk.msra.mxu0 %vm29149_vm15, %v28373_v45 }
0x23b5   :  { %27437 = vmatprep.subr.bf16.mxu0 %v28370_v34 }
0x23b6   :  { %27451 = vmatpush3.bf16.msra.mxu1 %v30619_v46 }
0x23b7   :  { %27452 = vmatprep.subr.bf16.mxu1 %v28370_v34 }
0x23b8   :  { %27439 = vmatpush3.bf16.msk.msra.mxu0 %vm29157_vm3, %v28373_v45 }
0x23b9   :  { %27512 = vmatprep.subr.bf16.mxu0 %v28370_v34 }
0x23bb   :  { %25746 = vmatmul.mubr.f32.vlgmr.msra.gmra.mrb[34].mxu0 %v17484_v28  ;;  %v18082_v28 = vsub.f32 %v30606_v1, %v18081_v43  ;;  %v22398_v1 = vld [vmem:[%s31190_s24] ss:$0 sm:$0xff] }
0x23bc   :  { %27514 = vmatpush3.bf16.msk.msra.mxu0 %vm28462_vm5, %v28373_v45  ;;  %25870 = vmatprep.mubr.msk.f32.mxu0 %vm28371_vm2, %v28372_v37 }
0x23bd   :  { %27515 = vmatprep.subr.bf16.mxu0 %v28370_v34  ;;  %v18083_v11 = vand.u32 4294901760, %v18082_v28 }
0x23bf   :  { %v27459_v35 = vpack.c.bf16 %v18090_v13, %v18083_v11 }
0x23c0   :  { %27517 = vmatpush3.bf16.msk.msra.mxu0 %vm28576_vm10, %v28373_v45 }
0x23c1   :  { %27518 = vmatprep.subr.bf16.mxu0 %v28370_v34 }
0x248e   :  { %v17904_v6 = vpop.f32.mrb[34].mxu0 }
0x248f   :  { %v17908_v59 = vmul.f32 0.03125, %v17904_v6  ;;  %v25747_v19 = vpop.f32.mrb[35].mxu0 }
0x2491   :  { %v17909_v44 = vmul.f32 %v17908_v59, %v17908_v59 }
0x2493   :  { %v17911_v57 = vrot.slane %v17909_v44, 7 }
0x2495   :  { %v17913_v12 = vsub.f32 %v17908_v59, %v17911_v57 }
0x2497   :  { %v17914_v39 = vadd.f32 1e-05, %v17913_v12 }
0x2499   :  { %28361 = vrsqrt.f32 %v17914_v39  ;;  %v19002_v39 = vld [vmem:[%s31193_s12 + $0x10] sm:$0xff] }
0x24a3   :  { %v28362_v4 = vpop.eup %28361 }
0x24a4   :  { %v17923_v62 = vmul.f32 %v28362_v4, %v22398_v1  ;;  %v19003_v1 = vld [vmem:[%s31193_s12 + $0x18] sm:$0xff]  ;;  %v19015_v4 = vand.u32 4294901760, %v19002_v39 }
0x24a6   :  { %v17926_v60 = vrot.slane %v17923_v62, 1  ;;  %v17933_v18 = vrot.slane %v17923_v62, %v28553_v0  ;;  %v19018_v62 = vand.u32 4294901760, %v19003_v1 }
0x24a8   :  { %v17928_v14 = vmul.f32 %v17926_v60, %v17908_v59  ;;  %v17934_v38 = vmul.f32 %v30494_v58, %v17933_v18  ;;  %v17935_v32 = vmul.f32 %v30492_v63, %v17933_v18  ;;  %v19103_v18 = vsub.f32 %v19002_v39, %v19015_v4 }
0x24aa   :  { %v17929_v40 = vsub.f32 %v17924_v52, %v17928_v14  ;;  %v30778_v14 = vpack.c.bf16 %v19018_v62, %v19015_v4 }
0x24ac   :  { %v17940_v53 = vrot.slane %v17929_v40, %v28558_v5  ;;  %v19110_v40 = vsub.f32 %v19003_v1, %v19018_v62 }
0x24ae   :  { %v30664_v31 = vadd.f32 %v17940_v53, %v17934_v38  ;;  %v30666_v16 = vadd.f32 %v17940_v53, %v17935_v32 }
0x24b0   :  { %v17944_v23 = vmax.f32 %v30664_v31, 0.0  ;;  %v17945_v43 = vmax.f32 %v30666_v16, 0.0  ;;  %v19499_v16 = vld [vmem:[%s31196_s4 + $0x30] sm:$0xff] }
0x24b2   :  { %v17946_v3 = vsel %vm6437_vm8, %v17944_v23, -inf  ;;  %v17947_v58 = vsel %vm6437_vm8, %v17945_v43, -inf }
0x24b3   :  { %v17948_v28 = vmax.f32 %v17946_v3, %v17947_v58  ;;  %v19104_v58 = vand.u32 4294901760, %v19103_v18 }
0x24b5   :  { %v17949_v63 = vrot.slane %v17948_v28, 4 }
0x24b7   :  { %v17950_v50 = vmax.f32 %v17948_v28, %v17949_v63  ;;  %v19111_v28 = vand.u32 4294901760, %v19110_v40 }
0x24b9   :  { %v17951_v11 = vrot.slane %v17950_v50, 2 }
0x24bb   :  { %v17952_v13 = vmax.f32 %v17950_v50, %v17951_v11  ;;  %v19105_v50 = vsub.f32 %v19103_v18, %v19104_v58  ;;  %v19112_v11 = vsub.f32 %v19110_v40, %v19111_v28 }
0x24bd   :  { %v17953_v2 = vrot.slane %v17952_v13, 1 }
0x24bf   :  { %v17954_v27 = vmax.f32 %v17952_v13, %v17953_v2  ;;  %v19106_v13 = vand.u32 4294901760, %v19105_v50  ;;  %v19113_v2 = vand.u32 4294901760, %v19112_v11  ;;  %v19497_v11 = vld [vmem:[%s31196_s4 + $0x20] sm:$0xff] }
0x24c1   :  { %v17965_v15 = vsel %vm6437_vm8, %v17954_v27, 0  ;;  %v27558_v27 = vpack.c.bf16 %v19113_v2, %v19106_v13  ;;  %v19498_v13 = vld [vmem:[%s31196_s4 + $0x28] sm:$0xff] }
0x24c2   :  { %v18040_v21 = vand.u32 4294901760, %v17965_v15 }
0x24c4   :  { %v18041_v22 = vsub.f32 %v17965_v15, %v18040_v21 }
0x24c6   :  { %v18042_v24 = vand.u32 4294901760, %v18041_v22 }
0x24c8   :  { %v18043_v6 = vsub.f32 %v18041_v22, %v18042_v24 }
0x24ca   :  { %v18044_v59 = vand.u32 4294901760, %v18043_v6 }
0x24cc   :  { %25765 = vmatmul.mubr.f32.vlgmr.msra.gmra.mrb[32].mxu1 %v18044_v59 }
0x24cd   :  { %27454 = vmatpush3.bf16.msra.mxu1 %v30630_v29  ;;  %25783 = vmatprep.mubr.msk.f32.mxu1 %vm28371_vm2, %v28372_v37 }
0x24ce   :  { %27455 = vmatprep.subr.bf16.mxu1 %v28370_v34 }
0x24d1   :  { %27457 = vmatpush3.bf16.msra.mxu1 %v27456_v7 }
0x24d2   :  { %27458 = vmatprep.subr.bf16.mxu1 %v28370_v34 }
0x24d5   :  { %27460 = vmatpush3.bf16.msra.mxu1 %v27459_v35 }
0x24d6   :  { %27461 = vmatprep.subr.bf16.mxu1 %v28370_v34 }
0x24d9   :  { %27463 = vmatpush3.bf16.msra.mxu1 %v27462_v61 }
0x24da   :  { %27464 = vmatprep.subr.bf16.mxu1 %v28370_v34 }
0x24dc   :  { %25784 = vmatmul.mubr.f32.vlgmr.msra.gmra.mrb[32].mxu1 %v18040_v21 }
0x24dd   :  { %27466 = vmatpush3.bf16.msra.mxu1 %v27465_v8  ;;  %25802 = vmatprep.mubr.msk.f32.mxu1 %vm28371_vm2, %v28372_v37 }
0x24de   :  { %27467 = vmatprep.subr.bf16.mxu1 %v28370_v34 }
0x24e1   :  { %27469 = vmatpush3.bf16.msra.mxu1 %v27468_v10 }
0x24e2   :  { %27470 = vmatprep.subr.bf16.mxu1 %v28370_v34 }
0x24e5   :  { %27472 = vmatpush3.bf16.msra.mxu1 %v27471_v9 }
0x24e6   :  { %27473 = vmatprep.subr.bf16.mxu1 %v28370_v34 }
0x24e9   :  { %27475 = vmatpush3.bf16.msra.mxu1 %v27474_v33 }
0x24ea   :  { %27476 = vmatprep.subr.bf16.mxu1 %v28370_v34 }
0x24ec   :  { %25803 = vmatmul.mubr.f32.vlgmr.msra.gmra.mrb[32].mxu1 %v18041_v22 }
0x24ed   :  { %27478 = vmatpush3.bf16.msra.mxu1 %v30589_v25  ;;  %25821 = vmatprep.mubr.msk.f32.mxu1 %vm28371_vm2, %v28372_v37 }
0x24ee   :  { %27479 = vmatprep.subr.bf16.mxu1 %v28370_v34 }
0x24f1   :  { %27481 = vmatpush3.bf16.msra.mxu1 %v30602_v41 }
0x24f2   :  { %27482 = vmatprep.subr.bf16.mxu1 %v28370_v34 }
0x24f5   :  { %27484 = vmatpush3.bf16.msra.mxu1 %v30615_v20 }
0x24f6   :  { %27485 = vmatprep.subr.bf16.mxu1 %v28370_v34 }
0x24f9   :  { %27487 = vmatpush3.bf16.msra.mxu1 %v30619_v46 }
0x24fa   :  { %27488 = vmatprep.subr.bf16.mxu1 %v28370_v34 }
0x24fc   :  { %25822 = vmatmul.mubr.f32.vlgmr.msra.gmra.mrb[32].mxu1 %v18042_v24  ;;  %v27576_v24 = vpack.c.bf16 %v19111_v28, %v19104_v58 }
0x24fd   :  { %27490 = vmatpush3.bf16.msra.mxu1 %v30650_v51  ;;  %25840 = vmatprep.mubr.msk.f32.mxu1 %vm28371_vm2, %v28372_v37 }
0x24fe   :  { %27491 = vmatprep.subr.bf16.mxu1 %v28370_v34 }
0x2501   :  { %27493 = vmatpush3.bf16.msra.mxu1 %v30652_v36  ;;  %v19000_v36 = vld [vmem:[%s31193_s12] sm:$0xff] }
0x2502   :  { %27494 = vmatprep.subr.bf16.mxu1 %v28370_v34 }
0x2505   :  { %27496 = vmatpush3.bf16.msra.mxu1 %v30654_v26  ;;  %v19001_v26 = vld [vmem:[%s31193_s12 + $0x8] sm:$0xff] }
0x2506   :  { %27497 = vmatprep.subr.bf16.mxu1 %v28370_v34  ;;  %v19012_v19 = vand.u32 4294901760, %v19001_v26 }
0x2508   :  { %v19096_v12 = vsub.f32 %v19001_v26, %v19012_v19 }
0x2509   :  { %27499 = vmatpush3.bf16.msra.mxu1 %v30656_v17  ;;  %v19009_v17 = vand.u32 4294901760, %v19000_v36 }
0x250a   :  { %27500 = vmatprep.subr.bf16.mxu1 %v28370_v34  ;;  %v19097_v52 = vand.u32 4294901760, %v19096_v12 }
0x250b   :  { %v30772_v44 = vpack.c.bf16 %v19012_v19, %v19009_v17  ;;  %v19089_v57 = vsub.f32 %v19000_v36, %v19009_v17 }
0x250c   :  { %25841 = vmatmul.mubr.f32.vlgmr.msra.gmra.mrb[32].mxu1 %v18040_v21  ;;  %v19098_v32 = vsub.f32 %v19096_v12, %v19097_v52 }
0x250d   :  { %27502 = vmatpush3.bf16.msra.mxu1 %v30589_v25  ;;  %25859 = vmatprep.mubr.msk.f32.mxu1 %vm28371_vm2, %v28372_v37  ;;  %v17963_v25 = vld [vmem:[%s31192_s5] sm:$0x1]  ;;  %v19090_v60 = vand.u32 4294901760, %v19089_v57  ;;  %v27561_v15 = vpack.c.bf16 %v19096_v12, %v19089_v57 }
0x250e   :  { %27503 = vmatprep.subr.bf16.mxu1 %v28370_v34  ;;  %v19099_v3 = vand.u32 4294901760, %v19098_v32  ;;  %v19496_v32 = vld [vmem:[%s31196_s4 + $0x18] sm:$0xff] }
0x250f   :  { %v19091_v38 = vsub.f32 %v19089_v57, %v19090_v60  ;;  %v27573_v22 = vpack.c.bf16 %v19097_v52, %v19090_v60  ;;  %v19493_v60 = vld [vmem:[%s31196_s4] sm:$0xff]  ;;  %v19494_v52 = vld [vmem:[%s31196_s4 + $0x8] sm:$0xff]  ;;  %v19985_v50 = vand.u32 4294901760, %v19496_v32 }
0x2511   :  { %27505 = vmatpush3.bf16.msra.mxu1 %v30602_v41  ;;  %v19092_v53 = vand.u32 4294901760, %v19091_v38  ;;  %v19495_v38 = vld [vmem:[%s31196_s4 + $0x10] sm:$0xff] }
0x2512   :  { %27506 = vmatprep.subr.bf16.mxu1 %v28370_v34 }
0x2513   :  { %v27555_v63 = vpack.c.bf16 %v19099_v3, %v19092_v53  ;;  %v19973_v53 = vsel %vm6437_vm8, %v17945_v43, 0  ;;  %v19500_v43 = vld [vmem:[%s31196_s4 + $0x38] sm:$0xff] }
0x2514   :  { %v30840_v2 = vand.u32 4294901760, %v19973_v53 }
0x2515   :  { %27508 = vmatpush3.bf16.msra.mxu1 %v30615_v20 }
0x2516   :  { %27509 = vmatprep.subr.bf16.mxu1 %v28370_v34 }
0x2519   :  { %27511 = vmatpush3.bf16.msra.mxu1 %v30619_v46 }
0x251a   :  { %27548 = vmatprep.subr.bf16.mxu1 %v28370_v34 }
0x251c   :  { %25860 = vmatmul.mubr.f32.vlgmr.msra.gmra.mrb[32].mxu1 %v18040_v21  ;;  %v27564_v21 = vpack.c.bf16 %v19110_v40, %v19103_v18  ;;  %v19979_v18 = vand.u32 4294901760, %v19494_v52 }
0x251d   :  { %25936 = vmatprep.mubr.msk.f32.mxu1 %vm28371_vm2, %v28372_v37  ;;  %27550 = vmatpush3.bf16.msra.mxu1 %v30772_v44 }
0x251e   :  { %27551 = vmatprep.subr.bf16.mxu1 %v28370_v34  ;;  %v30830_v58 = vsub.f32 %v19494_v52, %v19979_v18 }
0x2521   :  { %27553 = vmatpush3.bf16.msra.mxu1 %v30778_v14 }
0x2522   :  { %27554 = vmatprep.subr.bf16.mxu1 %v28370_v34 }
0x25ef   :  { %v18500_v29 = vpop.f32.mrb[32].mxu1 }
0x25f0   :  { %v30723_v7 = vadd.f32 %v18500_v29, %v17963_v25  ;;  %v25861_v35 = vpop.f32.mrb[33].mxu1 }
0x25f2   :  { %v18505_v41 = vmul.f32 %v30723_v7, %v30723_v7 }
0x25f4   :  { %v18508_v61 = vrot.slane %v18505_v41, 7 }
0x25f6   :  { %v18510_v20 = vsel %vm769_vm7, %v30723_v7, %v18508_v61 }
0x25f7   :  { %v18512_v46 = vsel %vm1785_vm11, %v18510_v20, 0  ;;  %v22411_v20 = vld [vmem:[%s31194_s20] ss:$0 sm:$0xff] }
0x25f8   :  { %v18579_v8 = vand.u32 4294901760, %v18512_v46 }
0x25fa   :  { %v18580_v10 = vsub.f32 %v18512_v46, %v18579_v8 }
0x25fc   :  { %v18581_v9 = vand.u32 4294901760, %v18580_v10 }
0x25fe   :  { %v18582_v33 = vsub.f32 %v18580_v10, %v18581_v9 }
0x2600   :  { %v18583_v51 = vand.u32 4294901760, %v18582_v33 }
0x2602   :  { %25871 = vmatmul.mubr.f32.vlgmr.msra.gmra.mrb[36].mxu0 %v18583_v51 }
0x2603   :  { %27520 = vmatpush3.bf16.msra.mxu0 %v28472_v54  ;;  %25881 = vmatprep.mubr.msk.f32.mxu0 %vm28371_vm2, %v28372_v37 }
0x2604   :  { %27521 = vmatprep.subr.bf16.mxu0 %v28370_v34 }
0x2607   :  { %27523 = vmatpush3.bf16.msra.mxu0 %v28586_v47 }
0x2608   :  { %27524 = vmatprep.subr.bf16.mxu0 %v28370_v34 }
0x260a   :  { %25882 = vmatmul.mubr.f32.vlgmr.msra.gmra.mrb[36].mxu0 %v18579_v8 }
0x260b   :  { %27526 = vmatpush3.bf16.msra.mxu0 %v28474_v55  ;;  %25892 = vmatprep.mubr.msk.f32.mxu0 %vm28371_vm2, %v28372_v37 }
0x260c   :  { %27527 = vmatprep.subr.bf16.mxu0 %v28370_v34 }
0x260f   :  { %27529 = vmatpush3.bf16.msra.mxu0 %v28588_v48 }
0x2610   :  { %27530 = vmatprep.subr.bf16.mxu0 %v28370_v34 }
0x2612   :  { %25893 = vmatmul.mubr.f32.vlgmr.msra.gmra.mrb[36].mxu0 %v18580_v10 }
0x2613   :  { %27532 = vmatpush3.bf16.msk.msra.mxu0 %vm28462_vm5, %v28373_v45  ;;  %25903 = vmatprep.mubr.msk.f32.mxu0 %vm28371_vm2, %v28372_v37 }
0x2614   :  { %27533 = vmatprep.subr.bf16.mxu0 %v28370_v34 }
0x2617   :  { %27535 = vmatpush3.bf16.msk.msra.mxu0 %vm28576_vm10, %v28373_v45 }
0x2618   :  { %27536 = vmatprep.subr.bf16.mxu0 %v28370_v34 }
0x261a   :  { %25904 = vmatmul.mubr.f32.vlgmr.msra.gmra.mrb[36].mxu0 %v18581_v9  ;;  %v18991_v9 = vld [vmem:[%s31195_s27] sm:$0x1] }
0x261b   :  { %27538 = vmatpush3.bf16.msra.mxu0 %v28476_v56  ;;  %25914 = vmatprep.mubr.msk.f32.mxu0 %vm28371_vm2, %v28372_v37 }
0x261c   :  { %27539 = vmatprep.subr.bf16.mxu0 %v28370_v34 }
0x261f   :  { %27541 = vmatpush3.bf16.msra.mxu0 %v28590_v49 }
0x2620   :  { %27542 = vmatprep.subr.bf16.mxu0 %v28370_v34 }
0x2622   :  { %25915 = vmatmul.mubr.f32.vlgmr.msra.gmra.mrb[36].mxu0 %v18579_v8 }
0x2623   :  { %27544 = vmatpush3.bf16.msk.msra.mxu0 %vm28462_vm5, %v28373_v45  ;;  %25925 = vmatprep.mubr.msk.f32.mxu0 %vm28371_vm2, %v28372_v37 }
0x2624   :  { %27545 = vmatprep.subr.bf16.mxu0 %v28370_v34 }
0x2627   :  { %27547 = vmatpush3.bf16.msk.msra.mxu0 %vm28576_vm10, %v28373_v45 }
0x2628   :  { %27584 = vmatprep.subr.bf16.mxu0 %v28370_v34 }
0x262a   :  { %25926 = vmatmul.mubr.f32.vlgmr.msra.gmra.mrb[36].mxu0 %v18579_v8 }
0x262b   :  { %25998 = vmatprep.mubr.msk.f32.mxu0 %vm28371_vm2, %v28372_v37 }
0x26fd   :  { %v18971_v6 = vpop.f32.mrb[36].mxu0 }
0x26fe   :  { %v18975_v59 = vmul.f32 0.5, %v18971_v6  ;;  %v25927_v25 = vpop.f32.mrb[37].mxu0  ;;  %v19988_v6 = vand.u32 4294901760, %v19497_v11 }
0x2700   :  { %v18976_v29 = vmul.f32 %v18975_v59, %v18975_v59 }
0x2702   :  { %v18978_v35 = vrot.slane %v18976_v29, 7  ;;  %v19997_v29 = vand.u32 4294901760, %v19500_v43 }
0x2704   :  { %v18980_v41 = vsub.f32 %v18975_v59, %v18978_v35  ;;  %v30856_v35 = vsub.f32 %v19973_v53, %v30840_v2 }
0x2706   :  { %v18981_v61 = vadd.f32 1e-05, %v18980_v41 }
0x2708   :  { %28363 = vrsqrt.f32 %v18981_v61 }
0x2712   :  { %v28364_v46 = vpop.eup %28363 }
0x2713   :  { %v18990_v8 = vmul.f32 %v28364_v46, %v22411_v20 }
0x2715   :  { %v18993_v10 = vrot.slane %v18990_v8, 1 }
0x2717   :  { %v18995_v33 = vmul.f32 %v18993_v10, %v18975_v59  ;;  %v18997_v36 = vmul.f32 %v30723_v7, %v18993_v10  ;;  %v19970_v7 = vsel %vm6437_vm8, %v17944_v23, 0  ;;  %v19976_v23 = vand.u32 4294901760, %v19493_v60 }
0x2718   :  { %v30807_v62 = vand.u32 4294901760, %v19970_v7  ;;  %v19991_v59 = vand.u32 4294901760, %v19498_v13  ;;  %v30870_v10 = vsub.f32 %v19497_v11, %v19988_v6 }
0x2719   :  { %v18996_v51 = vsub.f32 %v18991_v9, %v18995_v33  ;;  %v30828_v3 = vsub.f32 %v19493_v60, %v19976_v23  ;;  %v30833_v28 = vpack.c.bf16 %v19979_v18, %v19976_v23 }
0x271a   :  { %v30815_v31 = vsub.f32 %v19970_v7, %v30807_v62  ;;  %v30868_v8 = vpack.c.bf16 %v19991_v59, %v19988_v6  ;;  %v30872_v9 = vsub.f32 %v19498_v13, %v19991_v59 }
0x271b   :  { %v18998_v26 = vadd.f32 %v18997_v36, %v18996_v51  ;;  %v20060_v51 = vand.u32 4294901760, %v30856_v35 }
0x271c   :  { %v20050_v40 = vand.u32 4294901760, %v30815_v31 }
0x271d   :  { %v18999_v17 = vmax.f32 %v18998_v26, 0.0 }
0x271f   :  { %v19006_v19 = vsel %vm1785_vm11, %v18999_v17, 0 }
0x2720   :  { %v30786_v57 = vand.u32 4294901760, %v19006_v19 }
0x2722   :  { %v19078_v12 = vsub.f32 %v19006_v19, %v30786_v57 }
0x2724   :  { %v19079_v39 = vand.u32 4294901760, %v19078_v12 }
0x2726   :  { %v19080_v1 = vsub.f32 %v19078_v12, %v19079_v39 }
0x2728   :  { %v19081_v4 = vand.u32 4294901760, %v19080_v1  ;;  %v30889_v1 = vsub.f32 %v19500_v43, %v19997_v29 }
0x272a   :  { %25937 = vmatmul.mubr.f32.vlgmr.msra.gmra.mrb[34].mxu1 %v19081_v4  ;;  %v20061_v4 = vsub.f32 %v30856_v35, %v20060_v51 }
0x272b   :  { %27556 = vmatpush3.bf16.msra.mxu1 %v27555_v63  ;;  %25947 = vmatprep.mubr.msk.f32.mxu1 %vm28371_vm2, %v28372_v37  ;;  %v19982_v63 = vand.u32 4294901760, %v19495_v38 }
0x272c   :  { %27557 = vmatprep.subr.bf16.mxu1 %v28370_v34  ;;  %v20062_v53 = vand.u32 4294901760, %v20061_v4 }
0x272f   :  { %27559 = vmatpush3.bf16.msra.mxu1 %v27558_v27  ;;  %v20071_v27 = vand.u32 4294901760, %v30828_v3 }
0x2730   :  { %27560 = vmatprep.subr.bf16.mxu1 %v28370_v34 }
0x2731   :  { %v20072_v41 = vsub.f32 %v30828_v3, %v20071_v27 }
0x2732   :  { %25948 = vmatmul.mubr.f32.vlgmr.msra.gmra.mrb[34].mxu1 %v30786_v57 }
0x2733   :  { %27562 = vmatpush3.bf16.msra.mxu1 %v27561_v15  ;;  %25958 = vmatprep.mubr.msk.f32.mxu1 %vm28371_vm2, %v28372_v37  ;;  %v20078_v15 = vand.u32 4294901760, %v30830_v58  ;;  %v20073_v36 = vand.u32 4294901760, %v20072_v41 }
0x2734   :  { %27563 = vmatprep.subr.bf16.mxu1 %v28370_v34 }
0x2735   :  { %v20079_v61 = vsub.f32 %v30830_v58, %v20078_v15 }
0x2737   :  { %27565 = vmatpush3.bf16.msra.mxu1 %v27564_v21  ;;  %v30847_v21 = vsub.f32 %v19495_v38, %v19982_v63  ;;  %v20080_v26 = vand.u32 4294901760, %v20079_v61  ;;  %v27666_v61 = vpack.c.bf16 %v20078_v15, %v20071_v27  ;;  %v19502_v27 = vld [vmem:[%s31197_s15 + $0x8] sm:$0xff] }
0x2738   :  { %27566 = vmatprep.subr.bf16.mxu1 %v28370_v34 }
0x2739   :  { %v20085_v20 = vand.u32 4294901760, %v30847_v21  ;;  %v27618_v7 = vpack.c.bf16 %v20080_v26, %v20073_v36  ;;  %v19004_v36 = vld [vmem:[%s31198_s23] sm:$0x1] }
0x273a   :  { %25959 = vmatmul.mubr.f32.vlgmr.msra.gmra.mrb[34].mxu1 %v19078_v12  ;;  %v20106_v12 = vand.u32 4294901760, %v30872_v9 }
0x273b   :  { %27568 = vmatpush3.bf16.msra.mxu1 %v30772_v44  ;;  %25969 = vmatprep.mubr.msk.f32.mxu1 %vm28371_vm2, %v28372_v37  ;;  %v20086_v17 = vsub.f32 %v30847_v21, %v20085_v20 }
0x273c   :  { %27569 = vmatprep.subr.bf16.mxu1 %v28370_v34  ;;  %v20107_v18 = vsub.f32 %v30872_v9, %v20106_v12 }
0x273d   :  { %v20087_v60 = vand.u32 4294901760, %v20086_v17 }
0x273f   :  { %27571 = vmatpush3.bf16.msra.mxu1 %v30778_v14 }
0x2740   :  { %27572 = vmatprep.subr.bf16.mxu1 %v28370_v34 }
0x2742   :  { %25970 = vmatmul.mubr.f32.vlgmr.msra.gmra.mrb[34].mxu1 %v19079_v39 }
0x2743   :  { %27574 = vmatpush3.bf16.msra.mxu1 %v27573_v22  ;;  %25980 = vmatprep.mubr.msk.f32.mxu1 %vm28371_vm2, %v28372_v37  ;;  %v30849_v22 = vsub.f32 %v19496_v32, %v19985_v50  ;;  %v20120_v32 = vand.u32 4294901760, %v30889_v1 }
0x2744   :  { %27575 = vmatprep.subr.bf16.mxu1 %v28370_v34 }
0x2745   :  { %v20092_v46 = vand.u32 4294901760, %v30849_v22  ;;  %v20121_v13 = vsub.f32 %v30889_v1, %v20120_v32 }
0x2747   :  { %27577 = vmatpush3.bf16.msra.mxu1 %v27576_v24  ;;  %v30852_v24 = vpack.c.bf16 %v19985_v50, %v19982_v63  ;;  %v20093_v19 = vsub.f32 %v30849_v22, %v20092_v46  ;;  %v20122_v6 = vand.u32 4294901760, %v20121_v13 }
0x2748   :  { %27578 = vmatprep.subr.bf16.mxu1 %v28370_v34 }
0x2749   :  { %v20094_v52 = vand.u32 4294901760, %v20093_v19 }
0x274a   :  { %25981 = vmatmul.mubr.f32.vlgmr.msra.gmra.mrb[34].mxu1 %v30786_v57 }
0x274b   :  { %27580 = vmatpush3.bf16.msra.mxu1 %v30772_v44  ;;  %25991 = vmatprep.mubr.msk.f32.mxu1 %vm28371_vm2, %v28372_v37  ;;  %v20051_v44 = vsub.f32 %v30815_v31, %v20050_v40  ;;  %v27622_v63 = vpack.c.bf16 %v20094_v52, %v20087_v60 }
0x274c   :  { %27581 = vmatprep.subr.bf16.mxu1 %v28370_v34 }
0x274d   :  { %v20052_v25 = vand.u32 4294901760, %v20051_v44  ;;  %v20108_v44 = vand.u32 4294901760, %v20107_v18 }
0x274f   :  { %27583 = vmatpush3.bf16.msra.mxu1 %v30778_v14  ;;  %v19994_v14 = vand.u32 4294901760, %v19499_v16 }
0x2750   :  { %27603 = vmatprep.subr.bf16.mxu1 %v30833_v28 }
0x2751   :  { %v30874_v33 = vpack.c.bf16 %v19997_v29, %v19994_v14  ;;  %v30887_v39 = vsub.f32 %v19499_v16, %v19994_v14  ;;  %v27638_v14 = vpack.c.bf16 %v30849_v22, %v30847_v21  ;;  %v27642_v29 = vpack.c.bf16 %v30872_v9, %v30870_v10 }
0x2752   :  { %25992 = vmatmul.mubr.f32.vlgmr.msra.gmra.mrb[34].mxu1 %v30786_v57  ;;  %v20099_v57 = vand.u32 4294901760, %v30870_v10  ;;  %v19510_v21 = vand.u32 4294901760, %v19502_v27 }
0x2753   :  { %27605 = vmatpush3.bf16.msra.mxu1 %v30833_v28  ;;  %26052 = vmatprep.mubr.f32.mxu1 %v20052_v25  ;;  %v20113_v38 = vand.u32 4294901760, %v30887_v39  ;;  %v27634_v25 = vpack.c.bf16 %v30830_v58, %v30828_v3  ;;  %v27646_v41 = vpack.c.bf16 %v30889_v1, %v30887_v39  ;;  %v19501_v58 = vld [vmem:[%s31197_s15] sm:$0xff] }
0x2754   :  { %27607 = vmatprep.subr.bf16.mxu1 %v30852_v24  ;;  %v20100_v23 = vsub.f32 %v30870_v10, %v20099_v57  ;;  %v19507_v15 = vand.u32 4294901760, %v19501_v58 }
0x2755   :  { %v20114_v11 = vsub.f32 %v30887_v39, %v20113_v38  ;;  %v27678_v3 = vpack.c.bf16 %v20120_v32, %v20113_v38  ;;  %v22412_v38 = vld [vmem:[%s31199_s2] ss:$0 sm:$0xff] }
0x2756   :  { %v20101_v50 = vand.u32 4294901760, %v20100_v23  ;;  %v27585_v22 = vpack.c.bf16 %v19510_v21, %v19507_v15 }
0x2757   :  { %27609 = vmatpush3.bf16.msra.mxu1 %v30852_v24  ;;  %v20115_v43 = vand.u32 4294901760, %v20114_v11 }
0x2758   :  { %27611 = vmatprep.subr.bf16.mxu1 %v30868_v8  ;;  %v27626_v16 = vpack.c.bf16 %v20108_v44, %v20101_v50  ;;  %27586 = vmatpush3.bf16.msra.mxu0 %v27585_v22 }
0x2759   :  { %v27630_v59 = vpack.c.bf16 %v20122_v6, %v20115_v43  ;;  %27587 = vmatprep.subr.bf16.mxu0 %v28370_v34 }
0x275b   :  { %27613 = vmatpush3.bf16.msra.mxu1 %v30868_v8 }
0x275c   :  { %27615 = vmatprep.subr.bf16.mxu1 %v30874_v33 }
0x275f   :  { %27617 = vmatpush3.bf16.msra.mxu1 %v30874_v33 }
0x2760   :  { %27619 = vmatprep.subr.bf16.mxu1 %v27618_v7 }
0x2762   :  { %26053 = vmatmul.mubr.f32.vlgmr.msra.gmra.mrb[36].mxu1 %v20062_v53 }
0x2763   :  { %27621 = vmatpush3.bf16.msra.mxu1 %v27618_v7  ;;  %26071 = vmatprep.mubr.f32.mxu1 %v30807_v62 }
0x2764   :  { %27623 = vmatprep.subr.bf16.mxu1 %v27622_v63 }
0x2767   :  { %27625 = vmatpush3.bf16.msra.mxu1 %v27622_v63 }
0x2768   :  { %27627 = vmatprep.subr.bf16.mxu1 %v27626_v16 }
0x276b   :  { %27629 = vmatpush3.bf16.msra.mxu1 %v27626_v16 }
0x276c   :  { %27631 = vmatprep.subr.bf16.mxu1 %v27630_v59 }
0x276f   :  { %27633 = vmatpush3.bf16.msra.mxu1 %v27630_v59 }
0x2770   :  { %27635 = vmatprep.subr.bf16.mxu1 %v27634_v25 }
0x2772   :  { %26072 = vmatmul.mubr.f32.vlgmr.msra.gmra.mrb[36].mxu1 %v30840_v2 }
0x2773   :  { %27637 = vmatpush3.bf16.msra.mxu1 %v27634_v25  ;;  %26090 = vmatprep.mubr.f32.mxu1 %v30815_v31  ;;  %v27670_v31 = vpack.c.bf16 %v20092_v46, %v20085_v20 }
0x2774   :  { %27639 = vmatprep.subr.bf16.mxu1 %v27638_v14 }
0x2777   :  { %27641 = vmatpush3.bf16.msra.mxu1 %v27638_v14 }
0x2778   :  { %27643 = vmatprep.subr.bf16.mxu1 %v27642_v29 }
0x277b   :  { %27645 = vmatpush3.bf16.msra.mxu1 %v27642_v29 }
0x277c   :  { %27647 = vmatprep.subr.bf16.mxu1 %v27646_v41 }
0x277f   :  { %27649 = vmatpush3.bf16.msra.mxu1 %v27646_v41 }
0x2780   :  { %27651 = vmatprep.subr.bf16.mxu1 %v30833_v28 }
0x2782   :  { %26091 = vmatmul.mubr.f32.vlgmr.msra.gmra.mrb[36].mxu1 %v30856_v35  ;;  %v19592_v35 = vsub.f32 %v19502_v27, %v19510_v21 }
0x2783   :  { %27653 = vmatpush3.bf16.msra.mxu1 %v30833_v28  ;;  %26109 = vmatprep.mubr.f32.mxu1 %v20050_v40  ;;  %v27674_v40 = vpack.c.bf16 %v20106_v12, %v20099_v57 }
0x2784   :  { %27655 = vmatprep.subr.bf16.mxu1 %v30852_v24 }
0x2787   :  { %27657 = vmatpush3.bf16.msra.mxu1 %v30852_v24 }
0x2788   :  { %27659 = vmatprep.subr.bf16.mxu1 %v30868_v8 }
0x278b   :  { %27661 = vmatpush3.bf16.msra.mxu1 %v30868_v8 }
0x278c   :  { %27663 = vmatprep.subr.bf16.mxu1 %v30874_v33 }
0x278f   :  { %27665 = vmatpush3.bf16.msra.mxu1 %v30874_v33 }
0x2790   :  { %27667 = vmatprep.subr.bf16.mxu1 %v27666_v61 }
0x2792   :  { %26110 = vmatmul.mubr.f32.vlgmr.msra.gmra.mrb[36].mxu1 %v20060_v51 }
0x2793   :  { %27669 = vmatpush3.bf16.msra.mxu1 %v27666_v61  ;;  %26128 = vmatprep.mubr.f32.mxu1 %v30807_v62 }
0x2794   :  { %27671 = vmatprep.subr.bf16.mxu1 %v27670_v31 }
0x2797   :  { %27673 = vmatpush3.bf16.msra.mxu1 %v27670_v31 }
0x2798   :  { %27675 = vmatprep.subr.bf16.mxu1 %v27674_v40 }
0x279b   :  { %27677 = vmatpush3.bf16.msra.mxu1 %v27674_v40 }
0x279c   :  { %27679 = vmatprep.subr.bf16.mxu1 %v27678_v3 }
0x279f   :  { %27681 = vmatpush3.bf16.msra.mxu1 %v27678_v3 }
0x27a0   :  { %27683 = vmatprep.subr.bf16.mxu1 %v30833_v28 }
0x27a2   :  { %26129 = vmatmul.mubr.f32.vlgmr.msra.gmra.mrb[36].mxu1 %v30840_v2 }
0x27a3   :  { %27685 = vmatpush3.bf16.msra.mxu1 %v30833_v28  ;;  %26147 = vmatprep.mubr.f32.mxu1 %v30807_v62  ;;  %v19585_v28 = vsub.f32 %v19501_v58, %v19507_v15 }
0x27a4   :  { %27687 = vmatprep.subr.bf16.mxu1 %v30852_v24 }
0x27a5   :  { %v19586_v62 = vand.u32 4294901760, %v19585_v28 }
0x27a7   :  { %27689 = vmatpush3.bf16.msra.mxu1 %v30852_v24  ;;  %v19593_v24 = vand.u32 4294901760, %v19592_v35  ;;  %v19587_v20 = vsub.f32 %v19585_v28, %v19586_v62 }
0x27a8   :  { %27691 = vmatprep.subr.bf16.mxu1 %v30868_v8 }
0x27a9   :  { %v19594_v46 = vsub.f32 %v19592_v35, %v19593_v24  ;;  %v27597_v51 = vpack.c.bf16 %v19593_v24, %v19586_v62 }
0x27ab   :  { %27693 = vmatpush3.bf16.msra.mxu1 %v30868_v8  ;;  %v19588_v8 = vand.u32 4294901760, %v19587_v20  ;;  %v19595_v10 = vand.u32 4294901760, %v19594_v46 }
0x27ac   :  { %27695 = vmatprep.subr.bf16.mxu1 %v30874_v33 }
0x27ad   :  { %v27588_v9 = vpack.c.bf16 %v19595_v10, %v19588_v8 }
0x27af   :  { %27697 = vmatpush3.bf16.msra.mxu1 %v30874_v33  ;;  %v27591_v33 = vpack.c.bf16 %v19592_v35, %v19585_v28 }
0x27b0   :  { %27782 = vmatprep.subr.bf16.mxu1 %v28370_v34 }
0x27b2   :  { %26148 = vmatmul.mubr.f32.vlgmr.msra.gmra.mrb[36].mxu1 %v30840_v2 }
0x27b3   :  { %27784 = vmatpush3.bf16.msk.msra.mxu1 %vm28462_vm5, %v28373_v45  ;;  %26286 = vmatprep.mubr.msk.f32.mxu1 %vm28371_vm2, %v28372_v37 }
0x27b4   :  { %27785 = vmatprep.subr.bf16.mxu1 %v28370_v34 }
0x2825   :  { %v19489_v2 = vpop.f32.mrb[34].mxu1 }
0x2826   :  { %v27829_v26 = vadd.f32 %v19489_v2, %v19004_v36  ;;  %v25993_v17 = vpop.f32.mrb[35].mxu1 }
0x2828   :  { %v19504_v19 = vsel %vm748_vm6, %v27829_v26, 0 }
0x2829   :  { %v19573_v57 = vand.u32 4294901760, %v19504_v19 }
0x282b   :  { %v19574_v12 = vsub.f32 %v19504_v19, %v19573_v57 }
0x282d   :  { %v19575_v39 = vand.u32 4294901760, %v19574_v12 }
0x282f   :  { %v19576_v1 = vsub.f32 %v19574_v12, %v19575_v39 }
0x2831   :  { %v19577_v4 = vand.u32 4294901760, %v19576_v1 }
0x2833   :  { %25999 = vmatmul.mubr.f32.vlgmr.msra.gmra.mrb[38].mxu0 %v19577_v4 }
0x2834   :  { %27589 = vmatpush3.bf16.msra.mxu0 %v27588_v9  ;;  %26005 = vmatprep.mubr.msk.f32.mxu0 %vm28371_vm2, %v28372_v37 }
0x2835   :  { %27590 = vmatprep.subr.bf16.mxu0 %v28370_v34 }
0x283b   :  { %26006 = vmatmul.mubr.f32.vlgmr.msra.gmra.mrb[38].mxu0 %v19573_v57 }
0x283c   :  { %27592 = vmatpush3.bf16.msra.mxu0 %v27591_v33  ;;  %26012 = vmatprep.mubr.msk.f32.mxu0 %vm28371_vm2, %v28372_v37  ;;  %v21090_v33 = vld [vmem:[%s31200_s7 + $0x18] sm:$0xff] }
0x283d   :  { %27593 = vmatprep.subr.bf16.mxu0 %v28370_v34  ;;  %v21114_v36 = vand.u32 4294901760, %v21090_v33 }
0x283f   :  { %v21216_v4 = vsub.f32 %v21090_v33, %v21114_v36 }
0x2843   :  { %26013 = vmatmul.mubr.f32.vlgmr.msra.gmra.mrb[38].mxu0 %v19574_v12 }
0x2844   :  { %27595 = vmatpush3.bf16.msra.mxu0 %v27585_v22  ;;  %26019 = vmatprep.mubr.msk.f32.mxu0 %vm28371_vm2, %v28372_v37 }
0x2845   :  { %27596 = vmatprep.subr.bf16.mxu0 %v28370_v34 }
0x284b   :  { %26020 = vmatmul.mubr.f32.vlgmr.msra.gmra.mrb[38].mxu0 %v19575_v39 }
0x284c   :  { %27598 = vmatpush3.bf16.msra.mxu0 %v27597_v51  ;;  %26026 = vmatprep.mubr.msk.f32.mxu0 %vm28371_vm2, %v28372_v37 }
0x284d   :  { %27599 = vmatprep.subr.bf16.mxu0 %v28370_v34 }
0x2853   :  { %26027 = vmatmul.mubr.f32.vlgmr.msra.gmra.mrb[38].mxu0 %v19573_v57 }
0x2854   :  { %27601 = vmatpush3.bf16.msra.mxu0 %v27585_v22  ;;  %26033 = vmatprep.mubr.msk.f32.mxu0 %vm28371_vm2, %v28372_v37 }
0x2855   :  { %27698 = vmatprep.subr.bf16.mxu0 %v28370_v34 }
0x285b   :  { %26034 = vmatmul.mubr.f32.vlgmr.msra.gmra.mrb[38].mxu0 %v19573_v57 }
0x285c   :  { %27700 = vmatpush3.bf16.msk.msra.mxu0 %vm28462_vm5, %v28373_v45  ;;  %26158 = vmatprep.mubr.msk.f32.mxu0 %vm28371_vm2, %v28372_v37 }
0x285d   :  { %27701 = vmatprep.subr.bf16.mxu0 %v28370_v34 }
0x2860   :  { %27703 = vmatpush3.bf16.msk.msra.mxu0 %vm28576_vm10, %v28373_v45 }
0x2861   :  { %27704 = vmatprep.subr.bf16.mxu0 %v28370_v34 }
0x2885   :  { %v26149_v7 = vpop.f32.mrb[36].mxu1 }
0x2886   :  { %v20545_v60 = vpop.f32.mrb[37].mxu1 }
0x292e   :  { %v19961_v52 = vpop.f32.mrb[38].mxu0 }
0x292f   :  { %v19968_v23 = vrot.slane %v19961_v52, %v28558_v5  ;;  %v26035_v18 = vpop.f32.mrb[39].mxu0 }
0x2931   :  { %v27831_v32 = vadd.f32 %v20545_v60, %v19968_v23  ;;  %v27830_v53 = vadd.f32 %v26149_v7, %v19968_v23  ;;  %v21217_v23 = vand.u32 4294901760, %v21216_v4 }
0x2933   :  { %v30994_v63 = vadd.f32 %v27831_v32, %v22412_v38  ;;  %v30996_v50 = vadd.f32 %v27830_v53, %v22412_v38  ;;  %v21218_v32 = vsub.f32 %v21216_v4, %v21217_v23 }
0x2935   :  { %v20564_v44 = vsel %vm1785_vm11, %v30994_v63, 0.0  ;;  %v20565_v11 = vsel %vm1785_vm11, %v30996_v50, 0.0  ;;  %v20573_v13 = vmul.f32 %v30994_v63, %v30994_v63  ;;  %v20574_v16 = vmul.f32 %v30996_v50, %v30996_v50 }
0x2936   :  { %v20566_v43 = vadd.f32 %v20565_v11, %v20564_v44  ;;  %v21219_v44 = vand.u32 4294901760, %v21218_v32 }
0x2937   :  { %v20575_v6 = vsel %vm1785_vm11, %v20573_v13, 0.0  ;;  %v20576_v59 = vsel %vm1785_vm11, %v20574_v16, 0.0 }
0x2938   :  { %v20567_v25 = vrot.slane %v20566_v43, 4  ;;  %v20577_v14 = vadd.f32 %v20576_v59, %v20575_v6 }
0x293a   :  { %v20568_v29 = vadd.f32 %v20567_v25, %v20566_v43  ;;  %v20578_v41 = vrot.slane %v20577_v14, 4 }
0x293c   :  { %v20569_v61 = vrot.slane %v20568_v29, 2  ;;  %v20579_v31 = vadd.f32 %v20578_v41, %v20577_v14 }
0x293e   :  { %v20570_v40 = vadd.f32 %v20569_v61, %v20568_v29  ;;  %v20580_v3 = vrot.slane %v20579_v31, 2 }
0x2940   :  { %v20571_v58 = vrot.slane %v20570_v40, 1  ;;  %v20581_v27 = vadd.f32 %v20580_v3, %v20579_v31 }
0x2942   :  { %v20582_v15 = vrot.slane %v20581_v27, 1  ;;  %v20572_v21 = vadd.f32 %v20571_v58, %v20570_v40  ;;  %v22425_v40 = vld [vmem:[%s29842_s16] ss:$0 sm:$0xff]  ;;  %s31202_s16 = sld [smem:[#allocation20_spill]] }
0x2944   :  { %v20583_v22 = vadd.f32 %v20582_v15, %v20581_v27  ;;  %v21065_v15 = vld [vmem:[%s31201_s22] sm:$0x1] }
0x2946   :  { %v20584_v28 = vsel %vm769_vm7, %v20572_v21, %v20583_v22 }
0x2947   :  { %v20586_v35 = vsel %vm1785_vm11, %v20584_v28, 0 }
0x2948   :  { %v20653_v62 = vand.u32 4294901760, %v20586_v35 }
0x294a   :  { %v20654_v24 = vsub.f32 %v20586_v35, %v20653_v62 }
0x294c   :  { %v20655_v20 = vand.u32 4294901760, %v20654_v24 }
0x294e   :  { %v20656_v46 = vsub.f32 %v20654_v24, %v20655_v20 }
0x2950   :  { %v20657_v8 = vand.u32 4294901760, %v20656_v46 }
0x2952   :  { %26159 = vmatmul.mubr.f32.vlgmr.msra.gmra.mrb[40].mxu0 %v20657_v8 }
0x2953   :  { %27706 = vmatpush3.bf16.msra.mxu0 %v28472_v54  ;;  %26169 = vmatprep.mubr.msk.f32.mxu0 %vm28371_vm2, %v28372_v37 }
0x2954   :  { %27707 = vmatprep.subr.bf16.mxu0 %v28370_v34 }
0x2957   :  { %27709 = vmatpush3.bf16.msra.mxu0 %v28586_v47  ;;  %v21087_v47 = vld [vmem:[%s31200_s7] sm:$0xff] }
0x2958   :  { %27710 = vmatprep.subr.bf16.mxu0 %v28370_v34  ;;  %v21105_v10 = vand.u32 4294901760, %v21087_v47 }
0x295a   :  { %26170 = vmatmul.mubr.f32.vlgmr.msra.gmra.mrb[40].mxu0 %v20653_v62  ;;  %v21195_v17 = vsub.f32 %v21087_v47, %v21105_v10 }
0x295b   :  { %27712 = vmatpush3.bf16.msra.mxu0 %v28474_v55  ;;  %26180 = vmatprep.mubr.msk.f32.mxu0 %vm28371_vm2, %v28372_v37 }
0x295c   :  { %27713 = vmatprep.subr.bf16.mxu0 %v28370_v34  ;;  %v21196_v30 = vand.u32 4294901760, %v21195_v17 }
0x295e   :  { %v21197_v12 = vsub.f32 %v21195_v17, %v21196_v30 }
0x295f   :  { %27715 = vmatpush3.bf16.msra.mxu0 %v28588_v48  ;;  %v21088_v48 = vld [vmem:[%s31200_s7 + $0x8] sm:$0xff] }
0x2960   :  { %27716 = vmatprep.subr.bf16.mxu0 %v28370_v34  ;;  %v21108_v9 = vand.u32 4294901760, %v21088_v48  ;;  %v21198_v7 = vand.u32 4294901760, %v21197_v12 }
0x2962   :  { %26181 = vmatmul.mubr.f32.vlgmr.msra.gmra.mrb[40].mxu0 %v20654_v24  ;;  %v31051_v2 = vpack.c.bf16 %v21108_v9, %v21105_v10  ;;  %v21202_v19 = vsub.f32 %v21088_v48, %v21108_v9 }
0x2963   :  { %27718 = vmatpush3.bf16.msk.msra.mxu0 %vm28462_vm5, %v28373_v45  ;;  %26191 = vmatprep.mubr.msk.f32.mxu0 %vm28371_vm2, %v28372_v37 }
0x2964   :  { %27719 = vmatprep.subr.bf16.mxu0 %v28370_v34  ;;  %v21203_v57 = vand.u32 4294901760, %v21202_v19  ;;  %v27750_v13 = vpack.c.bf16 %v21202_v19, %v21195_v17 }
0x2966   :  { %v21204_v39 = vsub.f32 %v21202_v19, %v21203_v57  ;;  %v27766_v43 = vpack.c.bf16 %v21203_v57, %v21196_v30  ;;  %v22426_v57 = vld [vmem:[%s31202_s16] ss:$0 sm:$0xff] }
0x2967   :  { %27721 = vmatpush3.bf16.msk.msra.mxu0 %vm28576_vm10, %v28373_v45 }
0x2968   :  { %27722 = vmatprep.subr.bf16.mxu0 %v28370_v34  ;;  %v21205_v60 = vand.u32 4294901760, %v21204_v39 }
0x296a   :  { %26192 = vmatmul.mubr.f32.vlgmr.msra.gmra.mrb[40].mxu0 %v20655_v20  ;;  %v27742_v18 = vpack.c.bf16 %v21205_v60, %v21198_v7 }
0x296b   :  { %27724 = vmatpush3.bf16.msra.mxu0 %v28476_v56  ;;  %26202 = vmatprep.mubr.msk.f32.mxu0 %vm28371_vm2, %v28372_v37 }
0x296c   :  { %27725 = vmatprep.subr.bf16.mxu0 %v28370_v34 }
0x296f   :  { %27727 = vmatpush3.bf16.msra.mxu0 %v28590_v49  ;;  %v21089_v49 = vld [vmem:[%s31200_s7 + $0x10] sm:$0xff] }
0x2970   :  { %27728 = vmatprep.subr.bf16.mxu0 %v28370_v34  ;;  %v21111_v51 = vand.u32 4294901760, %v21089_v49 }
0x2972   :  { %26203 = vmatmul.mubr.f32.vlgmr.msra.gmra.mrb[40].mxu0 %v20653_v62  ;;  %v31053_v26 = vpack.c.bf16 %v21114_v36, %v21111_v51  ;;  %v21209_v1 = vsub.f32 %v21089_v49, %v21111_v51 }
0x2973   :  { %27730 = vmatpush3.bf16.msk.msra.mxu0 %vm28462_vm5, %v28373_v45  ;;  %26213 = vmatprep.mubr.msk.f32.mxu0 %vm28371_vm2, %v28372_v37 }
0x2974   :  { %27731 = vmatprep.subr.bf16.mxu0 %v28370_v34  ;;  %v21210_v52 = vand.u32 4294901760, %v21209_v1  ;;  %v27754_v16 = vpack.c.bf16 %v21216_v4, %v21209_v1 }
0x2976   :  { %v21211_v38 = vsub.f32 %v21209_v1, %v21210_v52  ;;  %v27770_v6 = vpack.c.bf16 %v21217_v23, %v21210_v52 }
0x2977   :  { %27733 = vmatpush3.bf16.msk.msra.mxu0 %vm28576_vm10, %v28373_v45 }
0x2978   :  { %27735 = vmatprep.subr.bf16.mxu0 %v31051_v2  ;;  %v21212_v53 = vand.u32 4294901760, %v21211_v38 }
0x297a   :  { %26214 = vmatmul.mubr.f32.vlgmr.msra.gmra.mrb[40].mxu0 %v20653_v62  ;;  %v27746_v11 = vpack.c.bf16 %v21219_v44, %v21212_v53 }
0x297b   :  { %27737 = vmatpush3.bf16.msra.mxu0 %v31051_v2 }
0x297c   :  { %27739 = vmatprep.subr.bf16.mxu0 %v31053_v26 }
0x297f   :  { %27741 = vmatpush3.bf16.msra.mxu0 %v31053_v26 }
0x2980   :  { %27743 = vmatprep.subr.bf16.mxu0 %v27742_v18 }
0x2a4d   :  { %v21045_v59 = vpop.f32.mrb[40].mxu0 }
0x2a4e   :  { %v21049_v25 = vmul.f32 0.03125, %v21045_v59  ;;  %v26215_v14 = vpop.f32.mrb[41].mxu0 }
0x2a50   :  { %v21050_v29 = vmul.f32 %v21049_v25, %v21049_v25 }
0x2a52   :  { %v21052_v41 = vrot.slane %v21050_v29, 7 }
0x2a54   :  { %v21054_v61 = vsub.f32 %v21049_v25, %v21052_v41 }
0x2a56   :  { %v21055_v31 = vadd.f32 1e-05, %v21054_v61 }
0x2a58   :  { %28365 = vrsqrt.f32 %v21055_v31 }
0x2a62   :  { %v28366_v3 = vpop.eup %28365 }
0x2a63   :  { %v21064_v58 = vmul.f32 %v28366_v3, %v22425_v40 }
0x2a65   :  { %v21067_v27 = vrot.slane %v21064_v58, 1  ;;  %v21074_v22 = vrot.slane %v21064_v58, %v28553_v0 }
0x2a67   :  { %v21069_v21 = vmul.f32 %v21067_v27, %v21049_v25  ;;  %v21075_v35 = vmul.f32 %v21074_v22, %v30994_v63  ;;  %v21076_v62 = vmul.f32 %v21074_v22, %v30996_v50 }
0x2a69   :  { %v21070_v28 = vsub.f32 %v21065_v15, %v21069_v21 }
0x2a6b   :  { %v21081_v24 = vrot.slane %v21070_v28, %v28558_v5 }
0x2a6d   :  { %v21083_v20 = vadd.f32 %v21081_v24, %v21075_v35  ;;  %v21084_v46 = vadd.f32 %v21081_v24, %v21076_v62  ;;  %v22119_v24 = vld [vmem:[%s30015_s9] sm:$0x1] }
0x2a6f   :  { %v21085_v8 = vmax.f32 %v21083_v20, 0.0  ;;  %v21086_v47 = vmax.f32 %v21084_v46, 0.0 }
0x2a71   :  { %v21099_v48 = vsel %vm1785_vm11, %v21085_v8, 0  ;;  %v21102_v49 = vsel %vm1785_vm11, %v21086_v47, 0 }
0x2a72   :  { %v21173_v10 = vand.u32 4294901760, %v21099_v48  ;;  %v21183_v9 = vand.u32 4294901760, %v21102_v49 }
0x2a74   :  { %v21174_v33 = vsub.f32 %v21099_v48, %v21173_v10  ;;  %v21184_v51 = vsub.f32 %v21102_v49, %v21183_v9 }
0x2a76   :  { %v21175_v36 = vand.u32 4294901760, %v21174_v33  ;;  %v21185_v17 = vand.u32 4294901760, %v21184_v51 }
0x2a78   :  { %v21176_v19 = vsub.f32 %v21174_v33, %v21175_v36  ;;  %v21186_v63 = vsub.f32 %v21184_v51, %v21185_v17 }
0x2a7a   :  { %v21177_v30 = vand.u32 4294901760, %v21176_v19  ;;  %v21187_v50 = vand.u32 4294901760, %v21186_v63 }
0x2a7c   :  { %26224 = vmatprep.mubr.f32.mxu0 %v21177_v30 }
0x2a7d   :  { %26225 = vmatmul.mubr.f32.vlgmr.msra.gmra.mrb[42].mxu0 %v21187_v50 }
0x2a7e   :  { %27745 = vmatpush3.bf16.msra.mxu0 %v27742_v18  ;;  %26235 = vmatprep.mubr.f32.mxu0 %v21173_v10 }
0x2a7f   :  { %27747 = vmatprep.subr.bf16.mxu0 %v27746_v11 }
0x2a82   :  { %27749 = vmatpush3.bf16.msra.mxu0 %v27746_v11 }
0x2a83   :  { %27751 = vmatprep.subr.bf16.mxu0 %v27750_v13 }
0x2a85   :  { %26236 = vmatmul.mubr.f32.vlgmr.msra.gmra.mrb[42].mxu0 %v21183_v9 }
0x2a86   :  { %27753 = vmatpush3.bf16.msra.mxu0 %v27750_v13  ;;  %26246 = vmatprep.mubr.f32.mxu0 %v21174_v33 }
0x2a87   :  { %27755 = vmatprep.subr.bf16.mxu0 %v27754_v16 }
0x2a8a   :  { %27757 = vmatpush3.bf16.msra.mxu0 %v27754_v16 }
0x2a8b   :  { %27759 = vmatprep.subr.bf16.mxu0 %v31051_v2 }
0x2a8d   :  { %26247 = vmatmul.mubr.f32.vlgmr.msra.gmra.mrb[42].mxu0 %v21184_v51 }
0x2a8e   :  { %27761 = vmatpush3.bf16.msra.mxu0 %v31051_v2  ;;  %26257 = vmatprep.mubr.f32.mxu0 %v21175_v36 }
0x2a8f   :  { %27763 = vmatprep.subr.bf16.mxu0 %v31053_v26 }
0x2a92   :  { %27765 = vmatpush3.bf16.msra.mxu0 %v31053_v26 }
0x2a93   :  { %27767 = vmatprep.subr.bf16.mxu0 %v27766_v43 }
0x2a95   :  { %26258 = vmatmul.mubr.f32.vlgmr.msra.gmra.mrb[42].mxu0 %v21185_v17 }
0x2a96   :  { %27769 = vmatpush3.bf16.msra.mxu0 %v27766_v43  ;;  %26268 = vmatprep.mubr.f32.mxu0 %v21173_v10 }
0x2a97   :  { %27771 = vmatprep.subr.bf16.mxu0 %v27770_v6 }
0x2a9a   :  { %27773 = vmatpush3.bf16.msra.mxu0 %v27770_v6 }
0x2a9b   :  { %27775 = vmatprep.subr.bf16.mxu0 %v31051_v2 }
0x2a9d   :  { %26269 = vmatmul.mubr.f32.vlgmr.msra.gmra.mrb[42].mxu0 %v21183_v9 }
0x2a9e   :  { %27777 = vmatpush3.bf16.msra.mxu0 %v31051_v2  ;;  %26279 = vmatprep.mubr.f32.mxu0 %v21173_v10 }
0x2a9f   :  { %27779 = vmatprep.subr.bf16.mxu0 %v31053_v26 }
0x2aa2   :  { %27781 = vmatpush3.bf16.msra.mxu0 %v31053_v26 }
0x2aa5   :  { %26280 = vmatmul.mubr.f32.vlgmr.msra.gmra.mrb[42].mxu0 %v21183_v9 }
0x2b78   :  { %v26281_v12 = vpop.f32.mrb[42].mxu0 }
0x2b79   :  { %v31076_v39 = vadd.f32 %v26281_v12, %v22426_v57  ;;  %v21622_v1 = vpop.f32.mrb[43].mxu0 }
0x2b7a   :  { %v31078_v4 = vadd.f32 %v22426_v57, %v21622_v1 }
0x2b7b   :  { %v21633_v7 = vsel %vm748_vm6, %v31076_v39, 0.0  ;;  %v21642_v60 = vmul.f32 %v31076_v39, %v31076_v39 }
0x2b7c   :  { %v21632_v2 = vsel %vm748_vm6, %v31078_v4, 0.0  ;;  %v21641_v26 = vmul.f32 %v31078_v4, %v31078_v4 }
0x2b7d   :  { %v21644_v52 = vsel %vm748_vm6, %v21642_v60, 0.0  ;;  %v21634_v23 = vadd.f32 %v21633_v7, %v21632_v2 }
0x2b7e   :  { %v21643_v18 = vsel %vm748_vm6, %v21641_v26, 0.0 }
0x2b7f   :  { %v21635_v38 = vrot.slane %v21634_v23, 4  ;;  %v21645_v32 = vadd.f32 %v21644_v52, %v21643_v18 }
0x2b81   :  { %v21636_v53 = vadd.f32 %v21635_v38, %v21634_v23  ;;  %v21646_v44 = vrot.slane %v21645_v32, 4 }
0x2b83   :  { %v21637_v11 = vrot.slane %v21636_v53, 2  ;;  %v21647_v13 = vadd.f32 %v21646_v44, %v21645_v32 }
0x2b85   :  { %v21638_v16 = vadd.f32 %v21637_v11, %v21636_v53  ;;  %v21648_v43 = vrot.slane %v21647_v13, 2 }
0x2b87   :  { %v21639_v6 = vrot.slane %v21638_v16, 1  ;;  %v21649_v59 = vadd.f32 %v21648_v43, %v21647_v13 }
0x2b89   :  { %v21650_v25 = vrot.slane %v21649_v59, 1  ;;  %v21640_v14 = vadd.f32 %v21639_v6, %v21638_v16 }
0x2b8b   :  { %v21651_v29 = vadd.f32 %v21650_v25, %v21649_v59 }
0x2b8d   :  { %v21652_v41 = vsel %vm769_vm7, %v21640_v14, %v21651_v29 }
0x2b8e   :  { %v21654_v61 = vsel %vm748_vm6, %v21652_v41, 0 }
0x2b8f   :  { %v21721_v31 = vand.u32 4294901760, %v21654_v61 }
0x2b91   :  { %v21722_v40 = vsub.f32 %v21654_v61, %v21721_v31 }
0x2b93   :  { %v21723_v3 = vand.u32 4294901760, %v21722_v40 }
0x2b95   :  { %v21724_v58 = vsub.f32 %v21722_v40, %v21723_v3 }
0x2b97   :  { %v21725_v27 = vand.u32 4294901760, %v21724_v58 }
0x2b99   :  { %26287 = vmatmul.mubr.f32.vlgmr.msra.gmra.mrb[38].mxu1 %v21725_v27 }
0x2b9a   :  { %27787 = vmatpush3.bf16.msra.mxu1 %v28472_v54  ;;  %26293 = vmatprep.mubr.msk.f32.mxu1 %vm28371_vm2, %v28372_v37 }
0x2b9b   :  { %27788 = vmatprep.subr.bf16.mxu1 %v28370_v34 }
0x2ba1   :  { %26294 = vmatmul.mubr.f32.vlgmr.msra.gmra.mrb[38].mxu1 %v21721_v31 }
0x2ba2   :  { %27790 = vmatpush3.bf16.msra.mxu1 %v28474_v55  ;;  %26300 = vmatprep.mubr.msk.f32.mxu1 %vm28371_vm2, %v28372_v37 }
0x2ba3   :  { %27791 = vmatprep.subr.bf16.mxu1 %v28370_v34 }
0x2ba9   :  { %26301 = vmatmul.mubr.f32.vlgmr.msra.gmra.mrb[38].mxu1 %v21722_v40 }
0x2baa   :  { %27793 = vmatpush3.bf16.msk.msra.mxu1 %vm28462_vm5, %v28373_v45  ;;  %26307 = vmatprep.mubr.msk.f32.mxu1 %vm28371_vm2, %v28372_v37 }
0x2bab   :  { %27794 = vmatprep.subr.bf16.mxu1 %v28370_v34 }
0x2bb1   :  { %26308 = vmatmul.mubr.f32.vlgmr.msra.gmra.mrb[38].mxu1 %v21723_v3 }
0x2bb2   :  { %27796 = vmatpush3.bf16.msra.mxu1 %v28476_v56  ;;  %26314 = vmatprep.mubr.msk.f32.mxu1 %vm28371_vm2, %v28372_v37 }
0x2bb3   :  { %27797 = vmatprep.subr.bf16.mxu1 %v28370_v34  ;;  %v22433_v34 = vld [vmem:[%s30010_s1] ss:$0 sm:$0xff] }
0x2bb9   :  { %26315 = vmatmul.mubr.f32.vlgmr.msra.gmra.mrb[38].mxu1 %v21721_v31 }
0x2bba   :  { %27799 = vmatpush3.bf16.msk.msra.mxu1 %vm28462_vm5, %v28373_v45  ;;  %26321 = vmatprep.mubr.msk.f32.mxu1 %vm28371_vm2, %v28372_v37 }
0x2bc1   :  { %26322 = vmatmul.mubr.f32.vlgmr.msra.gmra.mrb[38].mxu1 %v21721_v31 }
0x2c94   :  { %v22099_v54 = vpop.f32.mrb[38].mxu1 }
0x2c95   :  { %v22103_v55 = vmul.f32 0.03125, %v22099_v54  ;;  %v26323_v15 = vpop.f32.mrb[39].mxu1 }
0x2c97   :  { %v22104_v21 = vmul.f32 %v22103_v55, %v22103_v55 }
0x2c99   :  { %v22106_v56 = vrot.slane %v22104_v21, 7 }
0x2c9b   :  { %v22108_v22 = vsub.f32 %v22103_v55, %v22106_v56 }
0x2c9d   :  { %v22109_v28 = vadd.f32 1e-05, %v22108_v22 }
0x2c9f   :  { %28367 = vrsqrt.f32 %v22109_v28 }
0x2ca9   :  { %v28368_v35 = vpop.eup %28367 }
0x2caa   :  { %v22118_v62 = vmul.f32 %v28368_v35, %v22433_v34 }
0x2cac   :  { %v22121_v42 = vrot.slane %v22118_v62, 1  ;;  %v22128_v20 = vrot.slane %v22118_v62, %v28553_v0 }
0x2cae   :  { %v22123_v45 = vmul.f32 %v22121_v42, %v22103_v55  ;;  %v22129_v46 = vmul.f32 %v31078_v4, %v22128_v20  ;;  %v22130_v8 = vmul.f32 %v31076_v39, %v22128_v20 }
0x2cb0   :  { %v22124_v37 = vsub.f32 %v22119_v24, %v22123_v45 }
0x2cb2   :  { %v22135_v47 = vrot.slane %v22124_v37, %v28558_v5 }
0x2cb4   :  { %v22137_v48 = vadd.f32 %v22135_v47, %v22129_v46  ;;  %v22138_v49 = vadd.f32 %v22135_v47, %v22130_v8 }
0x2cb6   :  { %22434 = vst.msk [vmem:[%s30022_s13 + $0x10] sm:$0xff] %vm748_vm6, %v22137_v48  ;;  %22435 = vst.msk [vmem:[%s30022_s13 + $0x18] sm:$0xff] %vm748_vm6, %v22138_v49 }

</bundles_post_ra>
